<compile_context>
chip_gen: v7x
topology: tpu7x:2x2x1
jax: 0.10.0
libtpu: 0.0.40
codegen_flags: <defaults>
</compile_context>

<pallas_src>
import functools

import jax
import jax.numpy as jnp
from jax.experimental import pallas as pl
from jax.experimental.pallas import tpu as pltpu

EPS = 1e-5                        # nn.BatchNorm2d default eps
LANE = 128                        # channel dims padded to a multiple of this
ROW_TILE_BYTES = 2 * 1024 * 1024  # per buffered operand row-tile byte budget
VMEM_LIMIT = 32 * 1024 * 1024     # explicit scoped-VMEM limit (safe on v5e/v6e/v7x)


def _cpad(c):
    # TODO(synk): prefer multiples of 256 for the matmul N dim on v6e/v7x.
    return ((c + LANE - 1) // LANE) * LANE


def _row_tile(R, *channel_widths):
    """Largest row tile within the byte budget that divides R and is a multiple of 8."""
    target = max(8, ROW_TILE_BYTES // (max(channel_widths) * 4))
    if R <= target:
        return R
    target -= target % 8
    for t in range(target, 7, -8):
        if R % t == 0:
            return t
    return R


def _pad_vec(v, n, fill=0.0):
    return jnp.pad(v.astype(jnp.float32), (0, n - v.shape[0]), constant_values=fill)


# ----------------------------------------------------------------------------
# Pallas kernels
# ----------------------------------------------------------------------------
def _matmul_stats_kernel(x_ref, scale_ref, shift_ref, w_ref, b_ref, y_ref, ps_ref,
                         *, apply_in_bn):
    """1x1-conv row tile: optionally apply the previous stage's BN+ReLU on load,
    then y = x @ w + b (MXU, f32 acc) plus per-tile (sum, sumsq) BN partials."""
    if apply_in_bn:
        x = jnp.maximum(
            x_ref[...].astype(jnp.float32) * scale_ref[...] + shift_ref[...], 0.0)
        x = x.astype(w_ref.dtype)
    else:
        x = x_ref[...].astype(w_ref.dtype)
    y = jnp.dot(x, w_ref[...], preferred_element_type=jnp.float32) + b_ref[...]
    y_ref[...] = y.astype(y_ref.dtype)                       # bf16 store on fast path
    ps_ref[0] = jnp.concatenate([jnp.sum(y, axis=0, keepdims=True),
                                 jnp.sum(y * y, axis=0, keepdims=True)], axis=0)


def _conv3x3_stats_kernel(x_ref, scale_ref, shift_ref, w_ref, b_ref, y_ref, ps_ref,
                          *, stride, Ho, Wo):
    """Grouped 3x3 conv on one image: fuse the preceding BN+ReLU on load, build the
    zero-padded image in-register, and do 3 matmuls (kx taps folded into K)."""
    H, W, cin = x_ref.shape[1], x_ref.shape[2], x_ref.shape[3]
    cout = w_ref.shape[-1]
    mxu_dtype = w_ref.dtype

    a = jnp.maximum(
        x_ref[0].astype(jnp.float32) * scale_ref[...] + shift_ref[...], 0.0)
    a = a.astype(mxu_dtype)

    # padding=1 built in VMEM/vregs -- no HBM pad round trip, border stays exactly 0
    # in post-activation space.
    zr = jnp.zeros((1, W, cin), mxu_dtype)
    zc = jnp.zeros((H + 2, 1, cin), mxu_dtype)
    xp = jnp.concatenate([zc, jnp.concatenate([zr, a, zr], axis=0), zc], axis=1)

    acc = jnp.zeros((Ho * Wo, cout), jnp.float32)
    # TODO(synk): stride=2 (blck_in=True) relies on strided in-register slicing and
    # is untested; validate before enabling.
    # TODO(synk): for large H*W*C (v7x 64 MiB VMEM) tile over output rows with a
    # 2-row halo instead of one whole image per grid step.
    for ky in range(3):
        slab = xp[ky:ky + (Ho - 1) * stride + 1:stride]            # (Ho, W+2, cin)
        patch = jnp.concatenate(
            [slab[:, kx:kx + (Wo - 1) * stride + 1:stride, :] for kx in range(3)],
            axis=-1).reshape(Ho * Wo, 3 * cin)                     # kx folded into K
        acc = acc + jnp.dot(patch, w_ref[ky], preferred_element_type=jnp.float32)

    y = acc + b_ref[...]
    y_ref[0] = y.astype(y_ref.dtype)
    ps_ref[0] = jnp.concatenate([jnp.sum(y, axis=0, keepdims=True),
                                 jnp.sum(y * y, axis=0, keepdims=True)], axis=0)


def _finalize_kernel(y_ref, scale_ref, shift_ref, res_ref, *rest, res_bn):
    """Final BN (precomputed scale/shift) + residual (optionally its own BN+ReLU
    for the projected path) + final ReLU."""
    if res_bn:
        rs_ref, rh_ref, o_ref = rest
    else:
        (o_ref,) = rest
    y = y_ref[...].astype(jnp.float32) * scale_ref[...] + shift_ref[...]
    r = res_ref[...].astype(jnp.float32)
    if res_bn:
        r = jnp.maximum(r * rs_ref[...] + rh_ref[...], 0.0)
    o_ref[...] = jnp.maximum(y + r, 0.0).astype(o_ref.dtype)


# ----------------------------------------------------------------------------
# pallas_call wrappers
# ----------------------------------------------------------------------------
def _matmul_stats(x_rc, scale_in, shift_in, w, b, *, apply_in_bn, out_dtype):
    R, Cin = x_rc.shape
    Cout = w.shape[1]
    TR = _row_tile(R, Cin, Cout)
    nR = R // TR
    kernel = functools.partial(_matmul_stats_kernel, apply_in_bn=apply_in_bn)
    y, pstats = pl.pallas_call(
        kernel,
        out_shape=(jax.ShapeDtypeStruct((R, Cout), out_dtype),
                   jax.ShapeDtypeStruct((nR, 2, Cout), jnp.float32)),
        grid=(nR,),
        in_specs=[pl.BlockSpec((TR, Cin), lambda i: (i, 0)),
                  pl.BlockSpec((1, Cin), lambda i: (0, 0)),
                  pl.BlockSpec((1, Cin), lambda i: (0, 0)),
                  # weight/bias index maps are grid-independent -> VMEM resident
                  pl.BlockSpec((Cin, Cout), lambda i: (0, 0)),
                  pl.BlockSpec((1, Cout), lambda i: (0, 0))],
        out_specs=(pl.BlockSpec((TR, Cout), lambda i: (i, 0)),
                   pl.BlockSpec((1, 2, Cout), lambda i: (i, 0, 0))),
        compiler_params=pltpu.CompilerParams(
            # TODO(synk): consider pltpu.CORE_PARALLEL on v7x if "parallel" does not
            # shard the row axis across both TensorCores.
            dimension_semantics=("parallel",), vmem_limit_bytes=VMEM_LIMIT),
    )(x_rc, scale_in, shift_in, w, b)
    return y, jnp.sum(pstats, axis=0)


def _conv3x3_stats(x_nhwc, scale_in, shift_in, w_packed, b, *, stride, Ho, Wo,
                   out_dtype):
    N, H, W, Cin = x_nhwc.shape
    Cout = w_packed.shape[-1]
    kernel = functools.partial(_conv3x3_stats_kernel, stride=stride, Ho=Ho, Wo=Wo)
    y, pstats = pl.pallas_call(
        kernel,
        out_shape=(jax.ShapeDtypeStruct((N, Ho * Wo, Cout), out_dtype),
                   jax.ShapeDtypeStruct((N, 2, Cout), jnp.float32)),
        grid=(N,),
        in_specs=[pl.BlockSpec((1, H, W, Cin), lambda n: (n, 0, 0, 0)),
                  pl.BlockSpec((1, Cin), lambda n: (0, 0)),
                  pl.BlockSpec((1, Cin), lambda n: (0, 0)),
                  pl.BlockSpec((3, 3 * Cin, Cout), lambda n: (0, 0, 0)),
                  pl.BlockSpec((1, Cout), lambda n: (0, 0))],
        out_specs=(pl.BlockSpec((1, Ho * Wo, Cout), lambda n: (n, 0, 0)),
                   pl.BlockSpec((1, 2, Cout), lambda n: (n, 0, 0))),
        compiler_params=pltpu.CompilerParams(
            dimension_semantics=("parallel",), vmem_limit_bytes=VMEM_LIMIT),
    )(x_nhwc, scale_in, shift_in, w_packed, b)
    return y.reshape(N * Ho * Wo, Cout), jnp.sum(pstats, axis=0)


def _finalize(y_rc, scale, shift, res_rc, res_scale=None, res_shift=None):
    R, Cp = y_rc.shape
    TR = _row_tile(R, Cp)
    nR = R // TR
    res_bn = res_scale is not None
    args = [y_rc, scale, shift, res_rc]
    in_specs = [pl.BlockSpec((TR, Cp), lambda i: (i, 0)),
                pl.BlockSpec((1, Cp), lambda i: (0, 0)),
                pl.BlockSpec((1, Cp), lambda i: (0, 0)),
                pl.BlockSpec((TR, Cp), lambda i: (i, 0))]
    if res_bn:
        args += [res_scale, res_shift]
        in_specs += [pl.BlockSpec((1, Cp), lambda i: (0, 0)),
                     pl.BlockSpec((1, Cp), lambda i: (0, 0))]
    kernel = functools.partial(_finalize_kernel, res_bn=res_bn)
    return pl.pallas_call(
        kernel,
        out_shape=jax.ShapeDtypeStruct((R, Cp), jnp.float32),
        grid=(nR,),
        in_specs=in_specs,
        out_specs=pl.BlockSpec((TR, Cp), lambda i: (i, 0)),
        compiler_params=pltpu.CompilerParams(
            dimension_semantics=("parallel",), vmem_limit_bytes=VMEM_LIMIT),
    )(*args)


# ----------------------------------------------------------------------------
# BN scale/shift from reduced single-pass stats (tiny, done in JAX)
# ----------------------------------------------------------------------------
def _bn_scale_shift(stats, gamma_p, beta_p, count):
    mean = stats[0] / count
    var = jnp.maximum(stats[1] / count - mean * mean, 0.0)   # clamp (cancellation)
    scale = gamma_p * jax.lax.rsqrt(var + EPS)
    shift = beta_p - mean * scale
    return scale.reshape(1, -1), shift.reshape(1, -1)


# ----------------------------------------------------------------------------
# Weight re-layout / packing (padded to 128 lanes, pre-cast to MXU dtype)
# ----------------------------------------------------------------------------
def _weight_1x1(w_pt, cin_pad, cout_pad, dtype):
    cout, cin = w_pt.shape[0], w_pt.shape[1]
    w = jnp.zeros((cin_pad, cout_pad), jnp.float32)
    w = w.at[:cin, :cout].set(jnp.transpose(w_pt[:, :, 0, 0]))
    return w.astype(dtype)


def _weight_3x3_packed(w_pt, groups, cin_pad, cout_pad, dtype):
    # Grouped OIHW (Cout, Cin/g, 3, 3) -> (3, 3*Cin_pad, Cout_pad): per-ky weight
    # with the kx taps folded into the K dim, block-diagonal across groups.
    # TODO(synk): block-diagonal packing wastes ~groups x MXU work / VMEM for large
    # cardinality (C=32); switch to per-group matmuls or a groups grid axis there.
    cout, cin_g, kh, kw = w_pt.shape
    cout_g = cout // groups
    packed = jnp.zeros((kh, kw * cin_pad, cout_pad), jnp.float32)
    for g in range(groups):
        blk = jnp.transpose(w_pt[g * cout_g:(g + 1) * cout_g],
                            (2, 3, 1, 0))                  # (kh, kw, cin_g, cout_g)
        for kx in range(kw):
            packed = packed.at[:, kx * cin_pad + g * cin_g:kx * cin_pad + (g + 1) * cin_g,
                               g * cout_g:(g + 1) * cout_g].set(blk[:, kx])
    return packed.astype(dtype)


# ----------------------------------------------------------------------------
# NextBlock forward
# ----------------------------------------------------------------------------
def next_block(x_nchw, params, *, C, blck_in=False, project=False,
               mxu_dtype=jnp.float32):
    stride = 2 if blck_in else 1
    store_dtype = jnp.bfloat16 if mxu_dtype == jnp.bfloat16 else jnp.float32
    N, Cin, H, W = x_nchw.shape
    w1, b1, g1, bt1 = params['conv_1x1']
    w2, b2, g2, bt2 = params['conv_3x3']
    w3, b3, g3, bt3 = params['conv_1x1_2']
    out_1, out_2, out_3 = w1.shape[0], w2.shape[0], w3.shape[0]
    CPi, CP1, CP2, CP3 = _cpad(Cin), _cpad(out_1), _cpad(out_2), _cpad(out_3)
    Ho = (H + 2 - 3) // stride + 1
    Wo = (W + 2 - 3) // stride + 1

    # One NCHW->NHWC transpose at entry; channels padded once to a lane multiple.
    x_nhwc = jnp.transpose(x_nchw, (0, 2, 3, 1))
    x_rc = jnp.pad(x_nhwc.reshape(N * H * W, Cin),
                   ((0, 0), (0, CPi - Cin))).astype(store_dtype)

    ones_i = jnp.ones((1, CPi), jnp.float32)
    zeros_i = jnp.zeros((1, CPi), jnp.float32)

    # ---- conv_1x1: matmul + stats (its BN+ReLU is fused into the 3x3 stage) ----
    W1 = _weight_1x1(w1, CPi, CP1, mxu_dtype)
    y1, st1 = _matmul_stats(x_rc, ones_i, zeros_i, W1, _pad_vec(b1, CP1).reshape(1, CP1),
                            apply_in_bn=False, out_dtype=store_dtype)
    sc1, sh1 = _bn_scale_shift(st1, _pad_vec(g1, CP1), _pad_vec(bt1, CP1), N * H * W)

    # ---- conv_3x3 (grouped): fused BN1+ReLU on load, kx folded into K ----
    W2 = _weight_3x3_packed(w2, C, CP1, CP2, mxu_dtype)
    y2, st2 = _conv3x3_stats(y1.reshape(N, H, W, CP1), sc1, sh1, W2,
                             _pad_vec(b2, CP2).reshape(1, CP2),
                             stride=stride, Ho=Ho, Wo=Wo, out_dtype=store_dtype)
    sc2, sh2 = _bn_scale_shift(st2, _pad_vec(g2, CP2), _pad_vec(bt2, CP2), N * Ho * Wo)

    # ---- conv_1x1_2: fused BN2+ReLU on load; its BN goes to the finalize pass ----
    W3 = _weight_1x1(w3, CP2, CP3, mxu_dtype)
    y3, st3 = _matmul_stats(y2, sc2, sh2, W3, _pad_vec(b3, CP3).reshape(1, CP3),
                            apply_in_bn=True, out_dtype=store_dtype)
    sc3, sh3 = _bn_scale_shift(st3, _pad_vec(g3, CP3), _pad_vec(bt3, CP3), N * Ho * Wo)

    # ---- residual ----
    if project:
        wp, bp, gp, btp = params['dim_project']
        if stride == 1:
            xr = x_rc
        else:
            # 1x1 conv with stride s == 1x1 conv on the subsampled grid.
            xs = x_nhwc[:, ::stride, ::stride, :]
            xr = jnp.pad(xs.reshape(-1, Cin),
                         ((0, 0), (0, CPi - Cin))).astype(store_dtype)
        Wp = _weight_1x1(wp, CPi, CP3, mxu_dtype)
        res_raw, stp = _matmul_stats(xr, ones_i, zeros_i, Wp,
                                     _pad_vec(bp, CP3).reshape(1, CP3),
                                     apply_in_bn=False, out_dtype=store_dtype)
        scp, shp = _bn_scale_shift(stp, _pad_vec(gp, CP3), _pad_vec(btp, CP3),
                                   xr.shape[0])
        out_rc = _finalize(y3, sc3, sh3, res_raw, scp, shp)
    else:
        # nn.Identity residual: valid only for stride == 1 and out_3 == in_channels.
        out_rc = _finalize(y3, sc3, sh3, x_rc)

    return jnp.transpose(out_rc.reshape(N, Ho, Wo, CP3)[..., :out_3], (0, 3, 1, 2))


# ----------------------------------------------------------------------------
# Deterministic parameter init (PyTorch-like shapes; BN weight=1, bias=0)
# ----------------------------------------------------------------------------
def init_basic_conv2d(key, in_ch, out_ch, ksize, groups=1):
    k_w, k_b = jax.random.split(key)
    fan_in = (in_ch // groups) * ksize * ksize
    bound = 1.0 / float(fan_in) ** 0.5
    w = jax.random.uniform(k_w, (out_ch, in_ch // groups, ksize, ksize),
                           jnp.float32, -bound, bound)
    b = jax.random.uniform(k_b, (out_ch,), jnp.float32, -bound, bound)
    return (w, b, jnp.ones((out_ch,), jnp.float32), jnp.zeros((out_ch,), jnp.float32))


# ----------------------------------------------------------------------------
# Pure-JAX reference (lax.conv) used to validate the Pallas path
# ----------------------------------------------------------------------------
# TODO(synk): BatchNorm running_mean/running_var buffers are not updated (only the
# training-mode forward output is modeled, matching the module's forward()).
def _conv_bn_ref(x, params, *, stride, padding, groups, relu):
    w, b, gamma, beta = params
    y = jax.lax.conv_general_dilated(
        x, w, window_strides=(stride, stride),
        padding=[(padding, padding), (padding, padding)],
        dimension_numbers=('NCHW', 'OIHW', 'NCHW'), feature_group_count=groups)
    y = y + b[None, :, None, None]
    mean = y.mean(axis=(0, 2, 3), keepdims=True)
    var = ((y - mean) ** 2).mean(axis=(0, 2, 3), keepdims=True)
    y = (y - mean) / jnp.sqrt(var + EPS)
    y = y * gamma[None, :, None, None] + beta[None, :, None, None]
    return jnp.maximum(y, 0.0) if relu else y


def next_block_ref(x, params, *, C, blck_in=False, project=False):
    stride = 2 if blck_in else 1
    x_res = (_conv_bn_ref(x, params['dim_project'], stride=stride, padding=0,
                          groups=1, relu=True) if project else x)
    y = _conv_bn_ref(x, params['conv_1x1'], stride=1, padding=0, groups=1, relu=True)
    y = _conv_bn_ref(y, params['conv_3x3'], stride=stride, padding=1, groups=C, relu=True)
    y = _conv_bn_ref(y, params['conv_1x1_2'], stride=1, padding=0, groups=1, relu=False)
    return jnp.maximum(x_res + y, 0.0)


if __name__ == "__main__":
    # NextBlock(in_channels=4, out_1=8, out_2=8, out_3=4, C=4, blck_in=False)
    N, in_ch, H, W = 4, 4, 16, 16
    out_1, out_2, out_3, C = 8, 8, 4, 4

    key = jax.random.PRNGKey(0)
    k_x, k1, k2, k3, k4 = jax.random.split(key, 5)
    x = jax.random.normal(k_x, (N, in_ch, H, W), jnp.float32)
    params = {
        'conv_1x1':    init_basic_conv2d(k1, in_ch, out_1, 1),
        'conv_3x3':    init_basic_conv2d(k2, out_1, out_2, 3, groups=C),
        'conv_1x1_2':  init_basic_conv2d(k3, out_2, out_3, 1),
        'dim_project': init_basic_conv2d(k4, in_ch, out_3, 1),
    }

    # 1) f32 MXU/storage, identity residual — tight check vs lax.conv reference.
    fwd_f32 = jax.jit(functools.partial(next_block, C=C, blck_in=False,
                                        project=False, mxu_dtype=jnp.float32))
    out = jax.block_until_ready(fwd_f32(x, params))
    assert out.shape == (N, out_3, H, W), out.shape
    ref = next_block_ref(x, params, C=C, blck_in=False, project=False)
    err = float(jnp.max(jnp.abs(out - ref)))
    if err > 2e-3:
        raise AssertionError(f"f32 identity-residual mismatch: max abs err={err}")

    # 2) f32, projected residual (dim_project path, BN+ReLU fused into finalize).
    fwd_proj = jax.jit(functools.partial(next_block, C=C, blck_in=False,
                                         project=True, mxu_dtype=jnp.float32))
    out_p = jax.block_until_ready(fwd_proj(x, params))
    ref_p = next_block_ref(x, params, C=C, blck_in=False, project=True)
    err_p = float(jnp.max(jnp.abs(out_p - ref_p)))
    if err_p > 2e-3:
        raise AssertionError(f"f32 projected-residual mismatch: max abs err={err_p}")

    # 3) bf16 MXU operands + bf16 intermediate storage (f32 accum/stats/BN math).
    fwd_bf16 = jax.jit(functools.partial(next_block, C=C, blck_in=False,
                                         project=False, mxu_dtype=jnp.bfloat16))
    out_b = jax.block_until_ready(fwd_bf16(x, params))
    err_b = float(jnp.max(jnp.abs(out_b - ref)))
    if (not bool(jnp.isfinite(out_b).all())) or err_b > 2e-1:
        raise AssertionError(f"bf16 path mismatch: max abs err={err_b}")

    print("KERNEL_OK")
</pallas_src>

<mosaic_0001>
module attributes {stable_mosaic.version = 11 : i64} {
  func.func @_matmul_stats_kernel(%arg0: i32, %arg1: memref<1024x128xf32, #tpu.memory_space<vmem>>, %arg2: memref<1x128xf32, #tpu.memory_space<vmem>>, %arg3: memref<1x128xf32, #tpu.memory_space<vmem>>, %arg4: memref<128x128xf32, #tpu.memory_space<vmem>>, %arg5: memref<1x128xf32, #tpu.memory_space<vmem>>, %arg6: memref<1024x128xf32, #tpu.memory_space<vmem>>, %arg7: memref<1x2x128xf32, #tpu.memory_space<vmem>>) attributes {dimension_semantics = [#tpu.dimension_semantics<parallel>], iteration_bounds = array<i64: 1>, scalar_prefetch = 0 : i64, scratch_operands = 0 : i64, tpu.core_type = #tpu.core_type<tc>, window_params = [{transform_indices = @transform_0, window_bounds = array<i64: 1024, 128>}, {pipeline_mode = #tpu.pipeline_mode<synchronous>, transform_indices = @transform_1, window_bounds = array<i64: 1, 128>}, {pipeline_mode = #tpu.pipeline_mode<synchronous>, transform_indices = @transform_2, window_bounds = array<i64: 1, 128>}, {pipeline_mode = #tpu.pipeline_mode<synchronous>, transform_indices = @transform_3, window_bounds = array<i64: 128, 128>}, {pipeline_mode = #tpu.pipeline_mode<synchronous>, transform_indices = @transform_4, window_bounds = array<i64: 1, 128>}, {transform_indices = @transform_5, window_bounds = array<i64: 1024, 128>}, {transform_indices = @transform_6, window_bounds = array<i64: 1, 2, 128>}]} {
    %c0 = arith.constant 0 : index
    %c0_0 = arith.constant 0 : index
    %0 = vector.load %arg1[%c0, %c0_0] : memref<1024x128xf32, #tpu.memory_space<vmem>>, vector<1024x128xf32>
    %c0_1 = arith.constant 0 : index
    %c0_2 = arith.constant 0 : index
    %1 = vector.load %arg4[%c0_1, %c0_2] : memref<128x128xf32, #tpu.memory_space<vmem>>, vector<128x128xf32>
    %cst = arith.constant dense<0.000000e+00> : vector<1024x128xf32>
    %2 = tpu.matmul %0, %1, %cst {dimension_numbers = #tpu.dot_dimension_numbers<[1], [0], [0], [1], [0, 0, 1, 1], [], []>} : vector<1024x128xf32>, vector<128x128xf32>, vector<1024x128xf32> -> vector<1024x128xf32>
    %c0_3 = arith.constant 0 : index
    %c0_4 = arith.constant 0 : index
    %3 = vector.load %arg5[%c0_3, %c0_4] : memref<1x128xf32, #tpu.memory_space<vmem>>, vector<1x128xf32>
    %4 = vector.broadcast %3 : vector<1x128xf32> to vector<1024x128xf32>
    %5 = arith.addf %2, %4 : vector<1024x128xf32>
    %c0_5 = arith.constant 0 : index
    %c0_6 = arith.constant 0 : index
    %6 = vector.load %arg6[%c0_5, %c0_6] : memref<1024x128xf32, #tpu.memory_space<vmem>>, vector<1024x128xf32>
    tpu.vector_store %arg6[%c0_5, %c0_6], %5 {strides = array<i32>} : memref<1024x128xf32, #tpu.memory_space<vmem>>, vector<1024x128xf32>,
    %cst_7 = arith.constant dense<0.000000e+00> : vector<128xf32>
    %7 = vector.multi_reduction <add>, %5, %cst_7 [0] : vector<1024x128xf32> to vector<128xf32>
    %8 = vector.shape_cast %7 : vector<128xf32> to vector<1x128xf32>
    %9 = arith.mulf %5, %5 : vector<1024x128xf32>
    %cst_8 = arith.constant dense<0.000000e+00> : vector<128xf32>
    %10 = vector.multi_reduction <add>, %9, %cst_8 [0] : vector<1024x128xf32> to vector<128xf32>
    %11 = vector.shape_cast %10 : vector<128xf32> to vector<1x128xf32>
    %12 = tpu.concatenate %8, %11 in 0 : vector<1x128xf32>, vector<1x128xf32> -> vector<2x128xf32>
    %c0_9 = arith.constant 0 : index
    %c0_10 = arith.constant 0 : index
    %c0_11 = arith.constant 0 : index
    %13 = vector.load %arg7[%c0_9, %c0_10, %c0_11] : memref<1x2x128xf32, #tpu.memory_space<vmem>>, vector<1x2x128xf32>
    %14 = vector.shape_cast %13 : vector<1x2x128xf32> to vector<2x128xf32>
    %15 = vector.shape_cast %12 : vector<2x128xf32> to vector<1x2x128xf32>
    tpu.vector_store %arg7[%c0_9, %c0_10, %c0_11], %15 {strides = array<i32>} : memref<1x2x128xf32, #tpu.memory_space<vmem>>, vector<1x2x128xf32>,
    return
  }
  func.func @transform_0(%arg0: i32) -> (i32, i32) {
    %c0_i32 = arith.constant 0 : i32
    %c0_i32_0 = arith.constant 0 : i32
    return %arg0, %c0_i32 : i32, i32
  }
  func.func @transform_1(%arg0: i32) -> (i32, i32) {
    %c0_i32 = arith.constant 0 : i32
    %c0_i32_0 = arith.constant 0 : i32
    %c0_i32_1 = arith.constant 0 : i32
    return %c0_i32, %c0_i32_0 : i32, i32
  }
  func.func @transform_2(%arg0: i32) -> (i32, i32) {
    %c0_i32 = arith.constant 0 : i32
    %c0_i32_0 = arith.constant 0 : i32
    %c0_i32_1 = arith.constant 0 : i32
    return %c0_i32, %c0_i32_0 : i32, i32
  }
  func.func @transform_3(%arg0: i32) -> (i32, i32) {
    %c0_i32 = arith.constant 0 : i32
    %c0_i32_0 = arith.constant 0 : i32
    %c0_i32_1 = arith.constant 0 : i32
    return %c0_i32, %c0_i32_0 : i32, i32
  }
  func.func @transform_4(%arg0: i32) -> (i32, i32) {
    %c0_i32 = arith.constant 0 : i32
    %c0_i32_0 = arith.constant 0 : i32
    %c0_i32_1 = arith.constant 0 : i32
    return %c0_i32, %c0_i32_0 : i32, i32
  }
  func.func @transform_5(%arg0: i32) -> (i32, i32) {
    %c0_i32 = arith.constant 0 : i32
    %c0_i32_0 = arith.constant 0 : i32
    return %arg0, %c0_i32 : i32, i32
  }
  func.func @transform_6(%arg0: i32) -> (i32, i32, i32) {
    %c0_i32 = arith.constant 0 : i32
    %c0_i32_0 = arith.constant 0 : i32
    %c0_i32_1 = arith.constant 0 : i32
    return %arg0, %c0_i32, %c0_i32_0 : i32, i32, i32
  }
}

module attributes {stable_mosaic.version = 11 : i64} {
  func.func @_conv3x3_stats_kernel(%arg0: i32, %arg1: memref<1x16x16x128xf32, #tpu.memory_space<vmem>>, %arg2: memref<1x128xf32, #tpu.memory_space<vmem>>, %arg3: memref<1x128xf32, #tpu.memory_space<vmem>>, %arg4: memref<3x384x128xf32, #tpu.memory_space<vmem>>, %arg5: memref<1x128xf32, #tpu.memory_space<vmem>>, %arg6: memref<1x256x128xf32, #tpu.memory_space<vmem>>, %arg7: memref<1x2x128xf32, #tpu.memory_space<vmem>>) attributes {dimension_semantics = [#tpu.dimension_semantics<parallel>], iteration_bounds = array<i64: 4>, scalar_prefetch = 0 : i64, scratch_operands = 0 : i64, tpu.core_type = #tpu.core_type<tc>, window_params = [{transform_indices = @transform_0, window_bounds = array<i64: 1, 16, 16, 128>}, {pipeline_mode = #tpu.pipeline_mode<synchronous>, transform_indices = @transform_1, window_bounds = array<i64: 1, 128>}, {pipeline_mode = #tpu.pipeline_mode<synchronous>, transform_indices = @transform_2, window_bounds = array<i64: 1, 128>}, {pipeline_mode = #tpu.pipeline_mode<synchronous>, transform_indices = @transform_3, window_bounds = array<i64: 3, 384, 128>}, {pipeline_mode = #tpu.pipeline_mode<synchronous>, transform_indices = @transform_4, window_bounds = array<i64: 1, 128>}, {transform_indices = @transform_5, window_bounds = array<i64: 1, 256, 128>}, {transform_indices = @transform_6, window_bounds = array<i64: 1, 2, 128>}]} {
    %c0 = arith.constant 0 : index
    %c0_0 = arith.constant 0 : index
    %c0_1 = arith.constant 0 : index
    %c0_2 = arith.constant 0 : index
    %0 = vector.load %arg1[%c0, %c0_0, %c0_1, %c0_2] : memref<1x16x16x128xf32, #tpu.memory_space<vmem>>, vector<1x16x16x128xf32>
    %1 = vector.shape_cast %0 : vector<1x16x16x128xf32> to vector<16x16x128xf32>
    %c0_3 = arith.constant 0 : index
    %c0_4 = arith.constant 0 : index
    %2 = vector.load %arg2[%c0_3, %c0_4] : memref<1x128xf32, #tpu.memory_space<vmem>>, vector<1x128xf32>
    %3 = vector.shape_cast %2 : vector<1x128xf32> to vector<1x1x128xf32>
    %4 = vector.broadcast %3 : vector<1x1x128xf32> to vector<16x16x128xf32>
    %5 = arith.mulf %1, %4 : vector<16x16x128xf32>
    %c0_5 = arith.constant 0 : index
    %c0_6 = arith.constant 0 : index
    %6 = vector.load %arg3[%c0_5, %c0_6] : memref<1x128xf32, #tpu.memory_space<vmem>>, vector<1x128xf32>
    %7 = vector.shape_cast %6 : vector<1x128xf32> to vector<1x1x128xf32>
    %8 = vector.broadcast %7 : vector<1x1x128xf32> to vector<16x16x128xf32>
    %9 = arith.addf %5, %8 : vector<16x16x128xf32>
    %cst = arith.constant 0.000000e+00 : f32
    %10 = vector.broadcast %cst : f32 to vector<16x16x128xf32>
    %11 = arith.maximumf %9, %10 : vector<16x16x128xf32>
    %cst_7 = arith.constant 0.000000e+00 : f32
    %12 = vector.broadcast %cst_7 : f32 to vector<1x16x128xf32>
    %cst_8 = arith.constant 0.000000e+00 : f32
    %13 = vector.broadcast %cst_8 : f32 to vector<18x1x128xf32>
    %14 = tpu.concatenate %12, %11, %12 in 0 : vector<1x16x128xf32>, vector<16x16x128xf32>, vector<1x16x128xf32> -> vector<18x16x128xf32>
    %15 = tpu.concatenate %13, %14, %13 in 1 : vector<18x1x128xf32>, vector<18x16x128xf32>, vector<18x1x128xf32> -> vector<18x18x128xf32>
    %cst_9 = arith.constant 0.000000e+00 : f32
    %16 = vector.broadcast %cst_9 : f32 to vector<256x128xf32>
    %17 = vector.extract_strided_slice %15 {offsets = [0, 0, 0], sizes = [16, 18, 128], strides = [1, 1, 1]} : vector<18x18x128xf32> to vector<16x18x128xf32>
    %18 = vector.extract_strided_slice %17 {offsets = [0, 0, 0], sizes = [16, 16, 128], strides = [1, 1, 1]} : vector<16x18x128xf32> to vector<16x16x128xf32>
    %19 = vector.extract_strided_slice %17 {offsets = [0, 1, 0], sizes = [16, 16, 128], strides = [1, 1, 1]} : vector<16x18x128xf32> to vector<16x16x128xf32>
    %20 = vector.extract_strided_slice %17 {offsets = [0, 2, 0], sizes = [16, 16, 128], strides = [1, 1, 1]} : vector<16x18x128xf32> to vector<16x16x128xf32>
    %21 = tpu.concatenate %18, %19, %20 in 2 : vector<16x16x128xf32>, vector<16x16x128xf32>, vector<16x16x128xf32> -> vector<16x16x384xf32>
    %22 = vector.shape_cast %21 : vector<16x16x384xf32> to vector<256x384xf32>
    %c0_10 = arith.constant 0 : index
    %c0_11 = arith.constant 0 : index
    %c0_12 = arith.constant 0 : index
    %23 = vector.load %arg4[%c0_10, %c0_11, %c0_12] : memref<3x384x128xf32, #tpu.memory_space<vmem>>, vector<1x384x128xf32>
    %24 = vector.shape_cast %23 : vector<1x384x128xf32> to vector<384x128xf32>
    %cst_13 = arith.constant dense<0.000000e+00> : vector<256x128xf32>
    %25 = tpu.matmul %22, %24, %cst_13 {dimension_numbers = #tpu.dot_dimension_numbers<[1], [0], [0], [1], [0, 0, 1, 1], [], []>} : vector<256x384xf32>, vector<384x128xf32>, vector<256x128xf32> -> vector<256x128xf32>
    %26 = arith.addf %16, %25 : vector<256x128xf32>
    %27 = vector.extract_strided_slice %15 {offsets = [1, 0, 0], sizes = [16, 18, 128], strides = [1, 1, 1]} : vector<18x18x128xf32> to vector<16x18x128xf32>
    %28 = vector.extract_strided_slice %27 {offsets = [0, 0, 0], sizes = [16, 16, 128], strides = [1, 1, 1]} : vector<16x18x128xf32> to vector<16x16x128xf32>
    %29 = vector.extract_strided_slice %27 {offsets = [0, 1, 0], sizes = [16, 16, 128], strides = [1, 1, 1]} : vector<16x18x128xf32> to vector<16x16x128xf32>
    %30 = vector.extract_strided_slice %27 {offsets = [0, 2, 0], sizes = [16, 16, 128], strides = [1, 1, 1]} : vector<16x18x128xf32> to vector<16x16x128xf32>
    %31 = tpu.concatenate %28, %29, %30 in 2 : vector<16x16x128xf32>, vector<16x16x128xf32>, vector<16x16x128xf32> -> vector<16x16x384xf32>
    %32 = vector.shape_cast %31 : vector<16x16x384xf32> to vector<256x384xf32>
    %c1 = arith.constant 1 : index
    %c0_14 = arith.constant 0 : index
    %c0_15 = arith.constant 0 : index
    %33 = vector.load %arg4[%c1, %c0_14, %c0_15] : memref<3x384x128xf32, #tpu.memory_space<vmem>>, vector<1x384x128xf32>
    %34 = vector.shape_cast %33 : vector<1x384x128xf32> to vector<384x128xf32>
    %cst_16 = arith.constant dense<0.000000e+00> : vector<256x128xf32>
    %35 = tpu.matmul %32, %34, %cst_16 {dimension_numbers = #tpu.dot_dimension_numbers<[1], [0], [0], [1], [0, 0, 1, 1], [], []>} : vector<256x384xf32>, vector<384x128xf32>, vector<256x128xf32> -> vector<256x128xf32>
    %36 = arith.addf %26, %35 : vector<256x128xf32>
    %37 = vector.extract_strided_slice %15 {offsets = [2, 0, 0], sizes = [16, 18, 128], strides = [1, 1, 1]} : vector<18x18x128xf32> to vector<16x18x128xf32>
    %38 = vector.extract_strided_slice %37 {offsets = [0, 0, 0], sizes = [16, 16, 128], strides = [1, 1, 1]} : vector<16x18x128xf32> to vector<16x16x128xf32>
    %39 = vector.extract_strided_slice %37 {offsets = [0, 1, 0], sizes = [16, 16, 128], strides = [1, 1, 1]} : vector<16x18x128xf32> to vector<16x16x128xf32>
    %40 = vector.extract_strided_slice %37 {offsets = [0, 2, 0], sizes = [16, 16, 128], strides = [1, 1, 1]} : vector<16x18x128xf32> to vector<16x16x128xf32>
    %41 = tpu.concatenate %38, %39, %40 in 2 : vector<16x16x128xf32>, vector<16x16x128xf32>, vector<16x16x128xf32> -> vector<16x16x384xf32>
    %42 = vector.shape_cast %41 : vector<16x16x384xf32> to vector<256x384xf32>
    %c2 = arith.constant 2 : index
    %c0_17 = arith.constant 0 : index
    %c0_18 = arith.constant 0 : index
    %43 = vector.load %arg4[%c2, %c0_17, %c0_18] : memref<3x384x128xf32, #tpu.memory_space<vmem>>, vector<1x384x128xf32>
    %44 = vector.shape_cast %43 : vector<1x384x128xf32> to vector<384x128xf32>
    %cst_19 = arith.constant dense<0.000000e+00> : vector<256x128xf32>
    %45 = tpu.matmul %42, %44, %cst_19 {dimension_numbers = #tpu.dot_dimension_numbers<[1], [0], [0], [1], [0, 0, 1, 1], [], []>} : vector<256x384xf32>, vector<384x128xf32>, vector<256x128xf32> -> vector<256x128xf32>
    %46 = arith.addf %36, %45 : vector<256x128xf32>
    %c0_20 = arith.constant 0 : index
    %c0_21 = arith.constant 0 : index
    %47 = vector.load %arg5[%c0_20, %c0_21] : memref<1x128xf32, #tpu.memory_space<vmem>>, vector<1x128xf32>
    %48 = vector.broadcast %47 : vector<1x128xf32> to vector<256x128xf32>
    %49 = arith.addf %46, %48 : vector<256x128xf32>
    %c0_22 = arith.constant 0 : index
    %c0_23 = arith.constant 0 : index
    %c0_24 = arith.constant 0 : index
    %50 = vector.load %arg6[%c0_22, %c0_23, %c0_24] : memref<1x256x128xf32, #tpu.memory_space<vmem>>, vector<1x256x128xf32>
    %51 = vector.shape_cast %50 : vector<1x256x128xf32> to vector<256x128xf32>
    %52 = vector.shape_cast %49 : vector<256x128xf32> to vector<1x256x128xf32>
    tpu.vector_store %arg6[%c0_22, %c0_23, %c0_24], %52 {strides = array<i32>} : memref<1x256x128xf32, #tpu.memory_space<vmem>>, vector<1x256x128xf32>,
    %cst_25 = arith.constant dense<0.000000e+00> : vector<128xf32>
    %53 = vector.multi_reduction <add>, %49, %cst_25 [0] : vector<256x128xf32> to vector<128xf32>
    %54 = vector.shape_cast %53 : vector<128xf32> to vector<1x128xf32>
    %55 = arith.mulf %49, %49 : vector<256x128xf32>
    %cst_26 = arith.constant dense<0.000000e+00> : vector<128xf32>
    %56 = vector.multi_reduction <add>, %55, %cst_26 [0] : vector<256x128xf32> to vector<128xf32>
    %57 = vector.shape_cast %56 : vector<128xf32> to vector<1x128xf32>
    %58 = tpu.concatenate %54, %57 in 0 : vector<1x128xf32>, vector<1x128xf32> -> vector<2x128xf32>
    %c0_27 = arith.constant 0 : index
    %c0_28 = arith.constant 0 : index
    %c0_29 = arith.constant 0 : index
    %59 = vector.load %arg7[%c0_27, %c0_28, %c0_29] : memref<1x2x128xf32, #tpu.memory_space<vmem>>, vector<1x2x128xf32>
    %60 = vector.shape_cast %59 : vector<1x2x128xf32> to vector<2x128xf32>
    %61 = vector.shape_cast %58 : vector<2x128xf32> to vector<1x2x128xf32>
    tpu.vector_store %arg7[%c0_27, %c0_28, %c0_29], %61 {strides = array<i32>} : memref<1x2x128xf32, #tpu.memory_space<vmem>>, vector<1x2x128xf32>,
    return
  }
  func.func @transform_0(%arg0: i32) -> (i32, i32, i32, i32) {
    %c0_i32 = arith.constant 0 : i32
    %c0_i32_0 = arith.constant 0 : i32
    %c0_i32_1 = arith.constant 0 : i32
    %c0_i32_2 = arith.constant 0 : i32
    return %arg0, %c0_i32, %c0_i32_0, %c0_i32_1 : i32, i32, i32, i32
  }
  func.func @transform_1(%arg0: i32) -> (i32, i32) {
    %c0_i32 = arith.constant 0 : i32
    %c0_i32_0 = arith.constant 0 : i32
    %c0_i32_1 = arith.constant 0 : i32
    return %c0_i32, %c0_i32_0 : i32, i32
  }
  func.func @transform_2(%arg0: i32) -> (i32, i32) {
    %c0_i32 = arith.constant 0 : i32
    %c0_i32_0 = arith.constant 0 : i32
    %c0_i32_1 = arith.constant 0 : i32
    return %c0_i32, %c0_i32_0 : i32, i32
  }
  func.func @transform_3(%arg0: i32) -> (i32, i32, i32) {
    %c0_i32 = arith.constant 0 : i32
    %c0_i32_0 = arith.constant 0 : i32
    %c0_i32_1 = arith.constant 0 : i32
    %c0_i32_2 = arith.constant 0 : i32
    return %c0_i32, %c0_i32_0, %c0_i32_1 : i32, i32, i32
  }
  func.func @transform_4(%arg0: i32) -> (i32, i32) {
    %c0_i32 = arith.constant 0 : i32
    %c0_i32_0 = arith.constant 0 : i32
    %c0_i32_1 = arith.constant 0 : i32
    return %c0_i32, %c0_i32_0 : i32, i32
  }
  func.func @transform_5(%arg0: i32) -> (i32, i32, i32) {
    %c0_i32 = arith.constant 0 : i32
    %c0_i32_0 = arith.constant 0 : i32
    %c0_i32_1 = arith.constant 0 : i32
    return %arg0, %c0_i32, %c0_i32_0 : i32, i32, i32
  }
  func.func @transform_6(%arg0: i32) -> (i32, i32, i32) {
    %c0_i32 = arith.constant 0 : i32
    %c0_i32_0 = arith.constant 0 : i32
    %c0_i32_1 = arith.constant 0 : i32
    return %arg0, %c0_i32, %c0_i32_0 : i32, i32, i32
  }
}

module attributes {stable_mosaic.version = 11 : i64} {
  func.func @_matmul_stats_kernel(%arg0: i32, %arg1: memref<1024x128xf32, #tpu.memory_space<vmem>>, %arg2: memref<1x128xf32, #tpu.memory_space<vmem>>, %arg3: memref<1x128xf32, #tpu.memory_space<vmem>>, %arg4: memref<128x128xf32, #tpu.memory_space<vmem>>, %arg5: memref<1x128xf32, #tpu.memory_space<vmem>>, %arg6: memref<1024x128xf32, #tpu.memory_space<vmem>>, %arg7: memref<1x2x128xf32, #tpu.memory_space<vmem>>) attributes {dimension_semantics = [#tpu.dimension_semantics<parallel>], iteration_bounds = array<i64: 1>, scalar_prefetch = 0 : i64, scratch_operands = 0 : i64, tpu.core_type = #tpu.core_type<tc>, window_params = [{transform_indices = @transform_0, window_bounds = array<i64: 1024, 128>}, {pipeline_mode = #tpu.pipeline_mode<synchronous>, transform_indices = @transform_1, window_bounds = array<i64: 1, 128>}, {pipeline_mode = #tpu.pipeline_mode<synchronous>, transform_indices = @transform_2, window_bounds = array<i64: 1, 128>}, {pipeline_mode = #tpu.pipeline_mode<synchronous>, transform_indices = @transform_3, window_bounds = array<i64: 128, 128>}, {pipeline_mode = #tpu.pipeline_mode<synchronous>, transform_indices = @transform_4, window_bounds = array<i64: 1, 128>}, {transform_indices = @transform_5, window_bounds = array<i64: 1024, 128>}, {transform_indices = @transform_6, window_bounds = array<i64: 1, 2, 128>}]} {
    %c0 = arith.constant 0 : index
    %c0_0 = arith.constant 0 : index
    %0 = vector.load %arg1[%c0, %c0_0] : memref<1024x128xf32, #tpu.memory_space<vmem>>, vector<1024x128xf32>
    %c0_1 = arith.constant 0 : index
    %c0_2 = arith.constant 0 : index
    %1 = vector.load %arg2[%c0_1, %c0_2] : memref<1x128xf32, #tpu.memory_space<vmem>>, vector<1x128xf32>
    %2 = vector.broadcast %1 : vector<1x128xf32> to vector<1024x128xf32>
    %3 = arith.mulf %0, %2 : vector<1024x128xf32>
    %c0_3 = arith.constant 0 : index
    %c0_4 = arith.constant 0 : index
    %4 = vector.load %arg3[%c0_3, %c0_4] : memref<1x128xf32, #tpu.memory_space<vmem>>, vector<1x128xf32>
    %5 = vector.broadcast %4 : vector<1x128xf32> to vector<1024x128xf32>
    %6 = arith.addf %3, %5 : vector<1024x128xf32>
    %cst = arith.constant 0.000000e+00 : f32
    %7 = vector.broadcast %cst : f32 to vector<1024x128xf32>
    %8 = arith.maximumf %6, %7 : vector<1024x128xf32>
    %c0_5 = arith.constant 0 : index
    %c0_6 = arith.constant 0 : index
    %9 = vector.load %arg4[%c0_5, %c0_6] : memref<128x128xf32, #tpu.memory_space<vmem>>, vector<128x128xf32>
    %cst_7 = arith.constant dense<0.000000e+00> : vector<1024x128xf32>
    %10 = tpu.matmul %8, %9, %cst_7 {dimension_numbers = #tpu.dot_dimension_numbers<[1], [0], [0], [1], [0, 0, 1, 1], [], []>} : vector<1024x128xf32>, vector<128x128xf32>, vector<1024x128xf32> -> vector<1024x128xf32>
    %c0_8 = arith.constant 0 : index
    %c0_9 = arith.constant 0 : index
    %11 = vector.load %arg5[%c0_8, %c0_9] : memref<1x128xf32, #tpu.memory_space<vmem>>, vector<1x128xf32>
    %12 = vector.broadcast %11 : vector<1x128xf32> to vector<1024x128xf32>
    %13 = arith.addf %10, %12 : vector<1024x128xf32>
    %c0_10 = arith.constant 0 : index
    %c0_11 = arith.constant 0 : index
    %14 = vector.load %arg6[%c0_10, %c0_11] : memref<1024x128xf32, #tpu.memory_space<vmem>>, vector<1024x128xf32>
    tpu.vector_store %arg6[%c0_10, %c0_11], %13 {strides = array<i32>} : memref<1024x128xf32, #tpu.memory_space<vmem>>, vector<1024x128xf32>,
    %cst_12 = arith.constant dense<0.000000e+00> : vector<128xf32>
    %15 = vector.multi_reduction <add>, %13, %cst_12 [0] : vector<1024x128xf32> to vector<128xf32>
    %16 = vector.shape_cast %15 : vector<128xf32> to vector<1x128xf32>
    %17 = arith.mulf %13, %13 : vector<1024x128xf32>
    %cst_13 = arith.constant dense<0.000000e+00> : vector<128xf32>
    %18 = vector.multi_reduction <add>, %17, %cst_13 [0] : vector<1024x128xf32> to vector<128xf32>
    %19 = vector.shape_cast %18 : vector<128xf32> to vector<1x128xf32>
    %20 = tpu.concatenate %16, %19 in 0 : vector<1x128xf32>, vector<1x128xf32> -> vector<2x128xf32>
    %c0_14 = arith.constant 0 : index
    %c0_15 = arith.constant 0 : index
    %c0_16 = arith.constant 0 : index
    %21 = vector.load %arg7[%c0_14, %c0_15, %c0_16] : memref<1x2x128xf32, #tpu.memory_space<vmem>>, vector<1x2x128xf32>
    %22 = vector.shape_cast %21 : vector<1x2x128xf32> to vector<2x128xf32>
    %23 = vector.shape_cast %20 : vector<2x128xf32> to vector<1x2x128xf32>
    tpu.vector_store %arg7[%c0_14, %c0_15, %c0_16], %23 {strides = array<i32>} : memref<1x2x128xf32, #tpu.memory_space<vmem>>, vector<1x2x128xf32>,
    return
  }
  func.func @transform_0(%arg0: i32) -> (i32, i32) {
    %c0_i32 = arith.constant 0 : i32
    %c0_i32_0 = arith.constant 0 : i32
    return %arg0, %c0_i32 : i32, i32
  }
  func.func @transform_1(%arg0: i32) -> (i32, i32) {
    %c0_i32 = arith.constant 0 : i32
    %c0_i32_0 = arith.constant 0 : i32
    %c0_i32_1 = arith.constant 0 : i32
    return %c0_i32, %c0_i32_0 : i32, i32
  }
  func.func @transform_2(%arg0: i32) -> (i32, i32) {
    %c0_i32 = arith.constant 0 : i32
    %c0_i32_0 = arith.constant 0 : i32
    %c0_i32_1 = arith.constant 0 : i32
    return %c0_i32, %c0_i32_0 : i32, i32
  }
  func.func @transform_3(%arg0: i32) -> (i32, i32) {
    %c0_i32 = arith.constant 0 : i32
    %c0_i32_0 = arith.constant 0 : i32
    %c0_i32_1 = arith.constant 0 : i32
    return %c0_i32, %c0_i32_0 : i32, i32
  }
  func.func @transform_4(%arg0: i32) -> (i32, i32) {
    %c0_i32 = arith.constant 0 : i32
    %c0_i32_0 = arith.constant 0 : i32
    %c0_i32_1 = arith.constant 0 : i32
    return %c0_i32, %c0_i32_0 : i32, i32
  }
  func.func @transform_5(%arg0: i32) -> (i32, i32) {
    %c0_i32 = arith.constant 0 : i32
    %c0_i32_0 = arith.constant 0 : i32
    return %arg0, %c0_i32 : i32, i32
  }
  func.func @transform_6(%arg0: i32) -> (i32, i32, i32) {
    %c0_i32 = arith.constant 0 : i32
    %c0_i32_0 = arith.constant 0 : i32
    %c0_i32_1 = arith.constant 0 : i32
    return %arg0, %c0_i32, %c0_i32_0 : i32, i32, i32
  }
}

module attributes {stable_mosaic.version = 11 : i64} {
  func.func @_finalize_kernel(%arg0: i32, %arg1: memref<1024x128xf32, #tpu.memory_space<vmem>>, %arg2: memref<1x128xf32, #tpu.memory_space<vmem>>, %arg3: memref<1x128xf32, #tpu.memory_space<vmem>>, %arg4: memref<1024x128xf32, #tpu.memory_space<vmem>>, %arg5: memref<1024x128xf32, #tpu.memory_space<vmem>>) attributes {dimension_semantics = [#tpu.dimension_semantics<parallel>], iteration_bounds = array<i64: 1>, scalar_prefetch = 0 : i64, scratch_operands = 0 : i64, tpu.core_type = #tpu.core_type<tc>, window_params = [{transform_indices = @transform_0, window_bounds = array<i64: 1024, 128>}, {pipeline_mode = #tpu.pipeline_mode<synchronous>, transform_indices = @transform_1, window_bounds = array<i64: 1, 128>}, {pipeline_mode = #tpu.pipeline_mode<synchronous>, transform_indices = @transform_2, window_bounds = array<i64: 1, 128>}, {transform_indices = @transform_3, window_bounds = array<i64: 1024, 128>}, {transform_indices = @transform_4, window_bounds = array<i64: 1024, 128>}]} {
    %c0 = arith.constant 0 : index
    %c0_0 = arith.constant 0 : index
    %0 = vector.load %arg1[%c0, %c0_0] : memref<1024x128xf32, #tpu.memory_space<vmem>>, vector<1024x128xf32>
    %c0_1 = arith.constant 0 : index
    %c0_2 = arith.constant 0 : index
    %1 = vector.load %arg2[%c0_1, %c0_2] : memref<1x128xf32, #tpu.memory_space<vmem>>, vector<1x128xf32>
    %2 = vector.broadcast %1 : vector<1x128xf32> to vector<1024x128xf32>
    %3 = arith.mulf %0, %2 : vector<1024x128xf32>
    %c0_3 = arith.constant 0 : index
    %c0_4 = arith.constant 0 : index
    %4 = vector.load %arg3[%c0_3, %c0_4] : memref<1x128xf32, #tpu.memory_space<vmem>>, vector<1x128xf32>
    %5 = vector.broadcast %4 : vector<1x128xf32> to vector<1024x128xf32>
    %6 = arith.addf %3, %5 : vector<1024x128xf32>
    %c0_5 = arith.constant 0 : index
    %c0_6 = arith.constant 0 : index
    %7 = vector.load %arg4[%c0_5, %c0_6] : memref<1024x128xf32, #tpu.memory_space<vmem>>, vector<1024x128xf32>
    %8 = arith.addf %6, %7 : vector<1024x128xf32>
    %cst = arith.constant 0.000000e+00 : f32
    %9 = vector.broadcast %cst : f32 to vector<1024x128xf32>
    %10 = arith.maximumf %8, %9 : vector<1024x128xf32>
    %c0_7 = arith.constant 0 : index
    %c0_8 = arith.constant 0 : index
    %11 = vector.load %arg5[%c0_7, %c0_8] : memref<1024x128xf32, #tpu.memory_space<vmem>>, vector<1024x128xf32>
    tpu.vector_store %arg5[%c0_7, %c0_8], %10 {strides = array<i32>} : memref<1024x128xf32, #tpu.memory_space<vmem>>, vector<1024x128xf32>,
    return
  }
  func.func @transform_0(%arg0: i32) -> (i32, i32) {
    %c0_i32 = arith.constant 0 : i32
    %c0_i32_0 = arith.constant 0 : i32
    return %arg0, %c0_i32 : i32, i32
  }
  func.func @transform_1(%arg0: i32) -> (i32, i32) {
    %c0_i32 = arith.constant 0 : i32
    %c0_i32_0 = arith.constant 0 : i32
    %c0_i32_1 = arith.constant 0 : i32
    return %c0_i32, %c0_i32_0 : i32, i32
  }
  func.func @transform_2(%arg0: i32) -> (i32, i32) {
    %c0_i32 = arith.constant 0 : i32
    %c0_i32_0 = arith.constant 0 : i32
    %c0_i32_1 = arith.constant 0 : i32
    return %c0_i32, %c0_i32_0 : i32, i32
  }
  func.func @transform_3(%arg0: i32) -> (i32, i32) {
    %c0_i32 = arith.constant 0 : i32
    %c0_i32_0 = arith.constant 0 : i32
    return %arg0, %c0_i32 : i32, i32
  }
  func.func @transform_4(%arg0: i32) -> (i32, i32) {
    %c0_i32 = arith.constant 0 : i32
    %c0_i32_0 = arith.constant 0 : i32
    return %arg0, %c0_i32 : i32, i32
  }
}

</mosaic_0001>

<bundles_post_ra>
// kernel: next_block.4
= control target key start
LH: loop header
LB: loop body
LE: loop exit
PB: predicated region body
PF: predicated region fallthrough
CT: control target
= control target key end

     0   :  { %vm1400_vm0 = vcmask 1040384   ;;  %s3174_s1 = inlined_call_operand.vmem [shape: f32[1,128], index: 1, kind: input, shape index: {}]   ;;  %s3175_s2 = inlined_call_operand.vmem [shape: f32[1,128], index: 2, kind: input, shape index: {}]   ;;  %s3176_s3 = inlined_call_operand.vmem [shape: f32[128,128], index: 3, kind: input, shape index: {}]   ;;  %s3177_s0 = inlined_call_operand.vmem [shape: f32[1024,128], index: 0, kind: input, shape index: {}]   ;;  %s3178_s4 = inlined_call_operand.vmem [shape: f32[1,128], index: 4, kind: input, shape index: {}]   ;;  %s3179_s5 = inlined_call_operand.vmem [shape: f32[1024,128], index: 5, kind: output, shape index: {0}]   ;;  %s3180_s6 = inlined_call_operand.vmem [shape: f32[1,2,128], index: 6, kind: output, shape index: {1}]  }
   0x1   :  { %v150_v0 = vld [vmem:[%s3176_s3] sm:$0xff]  ;;  %v151_v1 = vld [vmem:[%s3176_s3 + $0x8] sm:$0xff]  ;;  %v152_v2 = vld [vmem:[%s3176_s3 + $0x10] sm:$0xff] }
   0x2   :  { %v1780_v3 = vpack.c.bf16 %v151_v1, %v150_v0  ;;  %v153_v4 = vld [vmem:[%s3176_s3 + $0x18] sm:$0xff]  ;;  %v154_v6 = vld [vmem:[%s3176_s3 + $0x20] sm:$0xff]  ;;  %v155_v7 = vld [vmem:[%s3176_s3 + $0x28] sm:$0xff] }
   0x3   :  { %v1784_v5 = vpack.c.bf16 %v153_v4, %v152_v2  ;;  %v1788_v8 = vpack.c.bf16 %v155_v7, %v154_v6  ;;  %v22_v9 = vld [vmem:[%s3177_s0] sm:$0xff]  ;;  %v156_v10 = vld [vmem:[%s3176_s3 + $0x30] sm:$0xff]  ;;  %v157_v11 = vld [vmem:[%s3176_s3 + $0x38] sm:$0xff] }
   0x4   :  { %1781 = vmatprep.subr.bf16.mxu0 %v1780_v3  ;;  %1812 = vmatprep.subr.bf16.mxu1 %v1780_v3  ;;  %v1792_v12 = vpack.c.bf16 %v157_v11, %v156_v10  ;;  %v158_v13 = vld [vmem:[%s3176_s3 + $0x40] sm:$0xff]  ;;  %v159_v14 = vld [vmem:[%s3176_s3 + $0x48] sm:$0xff]  ;;  %v160_v16 = vld [vmem:[%s3176_s3 + $0x50] sm:$0xff] }
   0x5   :  { %1783 = vmatpush3.bf16.msra.mxu0 %v1780_v3  ;;  %1820 = vmatpush3.bf16.msra.mxu1 %v1780_v3  ;;  %v1796_v15 = vpack.c.bf16 %v159_v14, %v158_v13  ;;  %v161_v17 = vld [vmem:[%s3176_s3 + $0x58] sm:$0xff]  ;;  %v162_v19 = vld [vmem:[%s3176_s3 + $0x60] sm:$0xff]  ;;  %v163_v20 = vld [vmem:[%s3176_s3 + $0x68] sm:$0xff] }
   0x6   :  { %1785 = vmatprep.subr.bf16.mxu0 %v1784_v5  ;;  %1813 = vmatprep.subr.bf16.mxu1 %v1784_v5  ;;  %v1800_v18 = vpack.c.bf16 %v161_v17, %v160_v16  ;;  %v1804_v21 = vpack.c.bf16 %v163_v20, %v162_v19  ;;  %v164_v22 = vld [vmem:[%s3176_s3 + $0x70] sm:$0xff]  ;;  %v165_v23 = vld [vmem:[%s3176_s3 + $0x78] sm:$0xff]  ;;  %v86_v25 = vld [vmem:[%s3177_s0 + $0x200] sm:$0xff] }
   0x7   :  { %1588 = vmatprep.mubr.f32.mxu0 %v22_v9  ;;  %v1808_v24 = vpack.c.bf16 %v165_v23, %v164_v22  ;;  %v23_v26 = vld [vmem:[%s3177_s0 + $0x8] sm:$0xff]  ;;  %v24_v28 = vld [vmem:[%s3177_s0 + $0x10] sm:$0xff]  ;;  %1684 = vmatprep.mubr.f32.mxu1 %v86_v25  ;;  %v25_v30 = vld [vmem:[%s3177_s0 + $0x18] sm:$0xff] }
   0x8   :  { %v87_v27 = vld [vmem:[%s3177_s0 + $0x208] sm:$0xff]  ;;  %v88_v29 = vld [vmem:[%s3177_s0 + $0x210] sm:$0xff]  ;;  %v89_v31 = vld [vmem:[%s3177_s0 + $0x218] sm:$0xff] }
   0x9   :  { %1787 = vmatpush3.bf16.msra.mxu0 %v1784_v5  ;;  %1821 = vmatpush3.bf16.msra.mxu1 %v1784_v5  ;;  %v26_v32 = vld [vmem:[%s3177_s0 + $0x20] sm:$0xff]  ;;  %v27_v34 = vld [vmem:[%s3177_s0 + $0x28] sm:$0xff]  ;;  %v28_v36 = vld [vmem:[%s3177_s0 + $0x30] sm:$0xff] }
   0xa   :  { %1789 = vmatprep.subr.bf16.mxu0 %v1788_v8  ;;  %1814 = vmatprep.subr.bf16.mxu1 %v1788_v8  ;;  %v90_v33 = vld [vmem:[%s3177_s0 + $0x220] sm:$0xff]  ;;  %v91_v35 = vld [vmem:[%s3177_s0 + $0x228] sm:$0xff]  ;;  %v92_v37 = vld [vmem:[%s3177_s0 + $0x230] sm:$0xff] }
   0xb   :  { %v29_v38 = vld [vmem:[%s3177_s0 + $0x38] sm:$0xff]  ;;  %v30_v40 = vld [vmem:[%s3177_s0 + $0x40] sm:$0xff]  ;;  %v31_v42 = vld [vmem:[%s3177_s0 + $0x48] sm:$0xff] }
   0xc   :  { %v93_v39 = vld [vmem:[%s3177_s0 + $0x238] sm:$0xff]  ;;  %v94_v41 = vld [vmem:[%s3177_s0 + $0x240] sm:$0xff]  ;;  %v95_v43 = vld [vmem:[%s3177_s0 + $0x248] sm:$0xff] }
   0xd   :  { %1791 = vmatpush3.bf16.msra.mxu0 %v1788_v8  ;;  %1822 = vmatpush3.bf16.msra.mxu1 %v1788_v8  ;;  %v32_v44 = vld [vmem:[%s3177_s0 + $0x50] sm:$0xff]  ;;  %v33_v46 = vld [vmem:[%s3177_s0 + $0x58] sm:$0xff]  ;;  %v34_v48 = vld [vmem:[%s3177_s0 + $0x60] sm:$0xff] }
   0xe   :  { %1793 = vmatprep.subr.bf16.mxu0 %v1792_v12  ;;  %1815 = vmatprep.subr.bf16.mxu1 %v1792_v12  ;;  %v96_v45 = vld [vmem:[%s3177_s0 + $0x250] sm:$0xff]  ;;  %v97_v47 = vld [vmem:[%s3177_s0 + $0x258] sm:$0xff]  ;;  %v98_v49 = vld [vmem:[%s3177_s0 + $0x260] sm:$0xff] }
   0xf   :  { %v35_v50 = vld [vmem:[%s3177_s0 + $0x68] sm:$0xff]  ;;  %v36_v52 = vld [vmem:[%s3177_s0 + $0x70] sm:$0xff]  ;;  %v37_v54 = vld [vmem:[%s3177_s0 + $0x78] sm:$0xff] }
  0x10   :  { %v99_v51 = vld [vmem:[%s3177_s0 + $0x268] sm:$0xff]  ;;  %v100_v53 = vld [vmem:[%s3177_s0 + $0x270] sm:$0xff]  ;;  %v101_v55 = vld [vmem:[%s3177_s0 + $0x278] sm:$0xff] }
  0x11   :  { %1795 = vmatpush3.bf16.msra.mxu0 %v1792_v12  ;;  %1823 = vmatpush3.bf16.msra.mxu1 %v1792_v12  ;;  %v38_v56 = vld [vmem:[%s3177_s0 + $0x80] sm:$0xff]  ;;  %v39_v58 = vld [vmem:[%s3177_s0 + $0x88] sm:$0xff]  ;;  %v40_v60 = vld [vmem:[%s3177_s0 + $0x90] sm:$0xff] }
  0x12   :  { %1797 = vmatprep.subr.bf16.mxu0 %v1796_v15  ;;  %1816 = vmatprep.subr.bf16.mxu1 %v1796_v15  ;;  %v102_v57 = vld [vmem:[%s3177_s0 + $0x280] sm:$0xff]  ;;  %v103_v59 = vld [vmem:[%s3177_s0 + $0x288] sm:$0xff]  ;;  %v104_v61 = vld [vmem:[%s3177_s0 + $0x290] sm:$0xff] }
  0x13   :  { %v41_v62 = vld [vmem:[%s3177_s0 + $0x98] sm:$0xff]  ;;  %v42_v0 = vld [vmem:[%s3177_s0 + $0xa0] sm:$0xff]  ;;  %v43_v2 = vld [vmem:[%s3177_s0 + $0xa8] sm:$0xff] }
  0x14   :  { %v105_v63 = vld [vmem:[%s3177_s0 + $0x298] sm:$0xff]  ;;  %v106_v1 = vld [vmem:[%s3177_s0 + $0x2a0] sm:$0xff]  ;;  %v107_v3 = vld [vmem:[%s3177_s0 + $0x2a8] sm:$0xff] }
  0x15   :  { %1799 = vmatpush3.bf16.msra.mxu0 %v1796_v15  ;;  %1824 = vmatpush3.bf16.msra.mxu1 %v1796_v15  ;;  %v44_v4 = vld [vmem:[%s3177_s0 + $0xb0] sm:$0xff]  ;;  %v45_v6 = vld [vmem:[%s3177_s0 + $0xb8] sm:$0xff]  ;;  %v46_v8 = vld [vmem:[%s3177_s0 + $0xc0] sm:$0xff] }
  0x16   :  { %1801 = vmatprep.subr.bf16.mxu0 %v1800_v18  ;;  %1817 = vmatprep.subr.bf16.mxu1 %v1800_v18  ;;  %v108_v5 = vld [vmem:[%s3177_s0 + $0x2b0] sm:$0xff]  ;;  %v109_v7 = vld [vmem:[%s3177_s0 + $0x2b8] sm:$0xff]  ;;  %v110_v9 = vld [vmem:[%s3177_s0 + $0x2c0] sm:$0xff] }
  0x17   :  { %v47_v10 = vld [vmem:[%s3177_s0 + $0xc8] sm:$0xff]  ;;  %v48_v12 = vld [vmem:[%s3177_s0 + $0xd0] sm:$0xff]  ;;  %v49_v14 = vld [vmem:[%s3177_s0 + $0xd8] sm:$0xff] }
  0x18   :  { %v111_v11 = vld [vmem:[%s3177_s0 + $0x2c8] sm:$0xff]  ;;  %v112_v13 = vld [vmem:[%s3177_s0 + $0x2d0] sm:$0xff]  ;;  %v113_v15 = vld [vmem:[%s3177_s0 + $0x2d8] sm:$0xff] }
  0x19   :  { %1803 = vmatpush3.bf16.msra.mxu0 %v1800_v18  ;;  %1825 = vmatpush3.bf16.msra.mxu1 %v1800_v18  ;;  %v50_v16 = vld [vmem:[%s3177_s0 + $0xe0] sm:$0xff]  ;;  %v51_v18 = vld [vmem:[%s3177_s0 + $0xe8] sm:$0xff]  ;;  %v52_v20 = vld [vmem:[%s3177_s0 + $0xf0] sm:$0xff] }
  0x1a   :  { %1805 = vmatprep.subr.bf16.mxu0 %v1804_v21  ;;  %1818 = vmatprep.subr.bf16.mxu1 %v1804_v21  ;;  %v114_v17 = vld [vmem:[%s3177_s0 + $0x2e0] sm:$0xff]  ;;  %v115_v19 = vld [vmem:[%s3177_s0 + $0x2e8] sm:$0xff]  ;;  %v53_v22 = vld [vmem:[%s3177_s0 + $0xf8] sm:$0xff] }
  0x1b   :  { %v117_v23 = vld [vmem:[%s3177_s0 + $0x2f8] sm:$0xff]  ;;  %v118_v25 = vld [vmem:[%s3177_s0 + $0x300] sm:$0xff] }
  0x1d   :  { %1807 = vmatpush3.bf16.msra.mxu0 %v1804_v21  ;;  %1826 = vmatpush3.bf16.msra.mxu1 %v1804_v21  ;;  %v116_v21 = vld [vmem:[%s3177_s0 + $0x2f0] sm:$0xff] }
  0x1e   :  { %1809 = vmatprep.subr.bf16.mxu0 %v1808_v24  ;;  %1819 = vmatprep.subr.bf16.mxu1 %v1808_v24 }
  0x21   :  { %1811 = vmatpush3.bf16.msra.mxu0 %v1808_v24  ;;  %1827 = vmatpush3.bf16.msra.mxu1 %v1808_v24  ;;  %v54_v24 = vld [vmem:[%s3177_s0 + $0x100] sm:$0xff] }
  0x24   :  { %1589 = vmatmul.mubr.f32.vlgmr.msra.gmra.mrb[0].mxu0 %v23_v26  ;;  %1685 = vmatmul.mubr.f32.vlgmr.msra.gmra.mrb[0].mxu1 %v87_v27  ;;  %v55_v26 = vld [vmem:[%s3177_s0 + $0x108] sm:$0xff] }
  0x25   :  { %1591 = vmatprep.mubr.f32.mxu0 %v24_v28  ;;  %1687 = vmatprep.mubr.f32.mxu1 %v88_v29  ;;  %v119_v27 = vld [vmem:[%s3177_s0 + $0x308] sm:$0xff]  ;;  %v56_v28 = vld [vmem:[%s3177_s0 + $0x110] sm:$0xff] }
  0x26   :  { %v120_v29 = vld [vmem:[%s3177_s0 + $0x310] sm:$0xff] }
  0x28   :  { %1592 = vmatmul.mubr.f32.gmra.mrb[2].mxu0 %v25_v30  ;;  %1688 = vmatmul.mubr.f32.gmra.mrb[2].mxu1 %v89_v31  ;;  %v57_v30 = vld [vmem:[%s3177_s0 + $0x118] sm:$0xff] }
  0x29   :  { %1594 = vmatprep.mubr.f32.mxu0 %v26_v32  ;;  %1690 = vmatprep.mubr.f32.mxu1 %v90_v33  ;;  %v121_v31 = vld [vmem:[%s3177_s0 + $0x318] sm:$0xff]  ;;  %v58_v32 = vld [vmem:[%s3177_s0 + $0x120] sm:$0xff] }
  0x2a   :  { %v122_v33 = vld [vmem:[%s3177_s0 + $0x320] sm:$0xff] }
  0x2c   :  { %1595 = vmatmul.mubr.f32.gmra.mrb[4].mxu0 %v27_v34  ;;  %1691 = vmatmul.mubr.f32.gmra.mrb[4].mxu1 %v91_v35  ;;  %v59_v34 = vld [vmem:[%s3177_s0 + $0x128] sm:$0xff] }
  0x2d   :  { %1597 = vmatprep.mubr.f32.mxu0 %v28_v36  ;;  %1693 = vmatprep.mubr.f32.mxu1 %v92_v37  ;;  %v123_v35 = vld [vmem:[%s3177_s0 + $0x328] sm:$0xff]  ;;  %v60_v36 = vld [vmem:[%s3177_s0 + $0x130] sm:$0xff] }
  0x2e   :  { %v124_v37 = vld [vmem:[%s3177_s0 + $0x330] sm:$0xff] }
  0x30   :  { %1598 = vmatmul.mubr.f32.gmra.mrb[6].mxu0 %v29_v38  ;;  %1694 = vmatmul.mubr.f32.gmra.mrb[6].mxu1 %v93_v39  ;;  %v61_v38 = vld [vmem:[%s3177_s0 + $0x138] sm:$0xff] }
  0x31   :  { %1600 = vmatprep.mubr.f32.mxu0 %v30_v40  ;;  %1696 = vmatprep.mubr.f32.mxu1 %v94_v41  ;;  %v125_v39 = vld [vmem:[%s3177_s0 + $0x338] sm:$0xff]  ;;  %v62_v40 = vld [vmem:[%s3177_s0 + $0x140] sm:$0xff] }
  0x32   :  { %v126_v41 = vld [vmem:[%s3177_s0 + $0x340] sm:$0xff] }
  0x34   :  { %1601 = vmatmul.mubr.f32.gmra.mrb[8].mxu0 %v31_v42  ;;  %1697 = vmatmul.mubr.f32.gmra.mrb[8].mxu1 %v95_v43  ;;  %v63_v42 = vld [vmem:[%s3177_s0 + $0x148] sm:$0xff] }
  0x35   :  { %1603 = vmatprep.mubr.f32.mxu0 %v32_v44  ;;  %1699 = vmatprep.mubr.f32.mxu1 %v96_v45  ;;  %v127_v43 = vld [vmem:[%s3177_s0 + $0x348] sm:$0xff]  ;;  %v64_v44 = vld [vmem:[%s3177_s0 + $0x150] sm:$0xff] }
  0x36   :  { %v128_v45 = vld [vmem:[%s3177_s0 + $0x350] sm:$0xff] }
  0x38   :  { %1604 = vmatmul.mubr.f32.gmra.mrb[10].mxu0 %v33_v46  ;;  %1700 = vmatmul.mubr.f32.gmra.mrb[10].mxu1 %v97_v47  ;;  %v65_v46 = vld [vmem:[%s3177_s0 + $0x158] sm:$0xff]  ;;  %v66_v47 = vld [vmem:[%s3177_s0 + $0x160] sm:$0xff] }
  0x39   :  { %1606 = vmatprep.mubr.f32.mxu0 %v34_v48  ;;  %1702 = vmatprep.mubr.f32.mxu1 %v98_v49  ;;  %v129_v48 = vld [vmem:[%s3177_s0 + $0x358] sm:$0xff]  ;;  %v67_v49 = vld [vmem:[%s3177_s0 + $0x168] sm:$0xff] }
  0x3c   :  { %1607 = vmatmul.mubr.f32.gmra.mrb[12].mxu0 %v35_v50  ;;  %1703 = vmatmul.mubr.f32.gmra.mrb[12].mxu1 %v99_v51  ;;  %v130_v50 = vld [vmem:[%s3177_s0 + $0x360] sm:$0xff]  ;;  %v68_v51 = vld [vmem:[%s3177_s0 + $0x170] sm:$0xff] }
  0x3d   :  { %1609 = vmatprep.mubr.f32.mxu0 %v36_v52  ;;  %1705 = vmatprep.mubr.f32.mxu1 %v100_v53  ;;  %v131_v52 = vld [vmem:[%s3177_s0 + $0x368] sm:$0xff]  ;;  %v69_v53 = vld [vmem:[%s3177_s0 + $0x178] sm:$0xff] }
  0x40   :  { %1610 = vmatmul.mubr.f32.gmra.mrb[14].mxu0 %v37_v54  ;;  %1706 = vmatmul.mubr.f32.gmra.mrb[14].mxu1 %v101_v55  ;;  %v132_v54 = vld [vmem:[%s3177_s0 + $0x370] sm:$0xff]  ;;  %v70_v55 = vld [vmem:[%s3177_s0 + $0x180] sm:$0xff] }
  0x41   :  { %1612 = vmatprep.mubr.f32.mxu0 %v38_v56  ;;  %1708 = vmatprep.mubr.f32.mxu1 %v102_v57  ;;  %v133_v56 = vld [vmem:[%s3177_s0 + $0x378] sm:$0xff]  ;;  %v71_v57 = vld [vmem:[%s3177_s0 + $0x188] sm:$0xff] }
  0x44   :  { %1613 = vmatmul.mubr.f32.gmra.mrb[16].mxu0 %v39_v58  ;;  %1709 = vmatmul.mubr.f32.gmra.mrb[16].mxu1 %v103_v59  ;;  %v134_v58 = vld [vmem:[%s3177_s0 + $0x380] sm:$0xff]  ;;  %v72_v59 = vld [vmem:[%s3177_s0 + $0x190] sm:$0xff] }
  0x45   :  { %1615 = vmatprep.mubr.f32.mxu0 %v40_v60  ;;  %1711 = vmatprep.mubr.f32.mxu1 %v104_v61  ;;  %v135_v60 = vld [vmem:[%s3177_s0 + $0x388] sm:$0xff]  ;;  %v73_v61 = vld [vmem:[%s3177_s0 + $0x198] sm:$0xff] }
  0x48   :  { %1616 = vmatmul.mubr.f32.gmra.mrb[18].mxu0 %v41_v62  ;;  %1712 = vmatmul.mubr.f32.gmra.mrb[18].mxu1 %v105_v63  ;;  %v136_v62 = vld [vmem:[%s3177_s0 + $0x390] sm:$0xff]  ;;  %v74_v63 = vld [vmem:[%s3177_s0 + $0x1a0] sm:$0xff] }
  0x49   :  { %1618 = vmatprep.mubr.f32.mxu0 %v42_v0  ;;  %1714 = vmatprep.mubr.f32.mxu1 %v106_v1  ;;  %v137_v0 = vld [vmem:[%s3177_s0 + $0x398] sm:$0xff]  ;;  %v75_v1 = vld [vmem:[%s3177_s0 + $0x1a8] sm:$0xff] }
  0x4c   :  { %1619 = vmatmul.mubr.f32.gmra.mrb[20].mxu0 %v43_v2  ;;  %1715 = vmatmul.mubr.f32.gmra.mrb[20].mxu1 %v107_v3  ;;  %v138_v2 = vld [vmem:[%s3177_s0 + $0x3a0] sm:$0xff]  ;;  %v76_v3 = vld [vmem:[%s3177_s0 + $0x1b0] sm:$0xff] }
  0x4d   :  { %1621 = vmatprep.mubr.f32.mxu0 %v44_v4  ;;  %1717 = vmatprep.mubr.f32.mxu1 %v108_v5  ;;  %v139_v4 = vld [vmem:[%s3177_s0 + $0x3a8] sm:$0xff]  ;;  %v77_v5 = vld [vmem:[%s3177_s0 + $0x1b8] sm:$0xff] }
  0x50   :  { %1622 = vmatmul.mubr.f32.gmra.mrb[22].mxu0 %v45_v6  ;;  %1718 = vmatmul.mubr.f32.gmra.mrb[22].mxu1 %v109_v7  ;;  %v140_v6 = vld [vmem:[%s3177_s0 + $0x3b0] sm:$0xff]  ;;  %v78_v7 = vld [vmem:[%s3177_s0 + $0x1c0] sm:$0xff] }
  0x51   :  { %1624 = vmatprep.mubr.f32.mxu0 %v46_v8  ;;  %1720 = vmatprep.mubr.f32.mxu1 %v110_v9  ;;  %v141_v8 = vld [vmem:[%s3177_s0 + $0x3b8] sm:$0xff]  ;;  %v79_v9 = vld [vmem:[%s3177_s0 + $0x1c8] sm:$0xff] }
  0x54   :  { %1625 = vmatmul.mubr.f32.gmra.mrb[24].mxu0 %v47_v10  ;;  %1721 = vmatmul.mubr.f32.gmra.mrb[24].mxu1 %v111_v11  ;;  %v142_v10 = vld [vmem:[%s3177_s0 + $0x3c0] sm:$0xff]  ;;  %v80_v11 = vld [vmem:[%s3177_s0 + $0x1d0] sm:$0xff] }
  0x55   :  { %1627 = vmatprep.mubr.f32.mxu0 %v48_v12  ;;  %1723 = vmatprep.mubr.f32.mxu1 %v112_v13  ;;  %v143_v12 = vld [vmem:[%s3177_s0 + $0x3c8] sm:$0xff]  ;;  %v81_v13 = vld [vmem:[%s3177_s0 + $0x1d8] sm:$0xff] }
  0x58   :  { %1628 = vmatmul.mubr.f32.gmra.mrb[26].mxu0 %v49_v14  ;;  %1724 = vmatmul.mubr.f32.gmra.mrb[26].mxu1 %v113_v15  ;;  %v144_v14 = vld [vmem:[%s3177_s0 + $0x3d0] sm:$0xff]  ;;  %v82_v15 = vld [vmem:[%s3177_s0 + $0x1e0] sm:$0xff] }
  0x59   :  { %1630 = vmatprep.mubr.f32.mxu0 %v50_v16  ;;  %1726 = vmatprep.mubr.f32.mxu1 %v114_v17  ;;  %v145_v16 = vld [vmem:[%s3177_s0 + $0x3d8] sm:$0xff]  ;;  %v83_v17 = vld [vmem:[%s3177_s0 + $0x1e8] sm:$0xff] }
  0x5c   :  { %1631 = vmatmul.mubr.f32.gmra.mrb[28].mxu0 %v51_v18  ;;  %1727 = vmatmul.mubr.f32.gmra.mrb[28].mxu1 %v115_v19  ;;  %v146_v18 = vld [vmem:[%s3177_s0 + $0x3e0] sm:$0xff]  ;;  %v84_v19 = vld [vmem:[%s3177_s0 + $0x1f0] sm:$0xff] }
  0x5d   :  { %1633 = vmatprep.mubr.f32.mxu0 %v52_v20  ;;  %1729 = vmatprep.mubr.f32.mxu1 %v116_v21  ;;  %v147_v20 = vld [vmem:[%s3177_s0 + $0x3e8] sm:$0xff]  ;;  %v85_v21 = vld [vmem:[%s3177_s0 + $0x1f8] sm:$0xff] }
  0x60   :  { %1634 = vmatmul.mubr.f32.gmra.mrb[30].mxu0 %v53_v22  ;;  %1730 = vmatmul.mubr.f32.gmra.mrb[30].mxu1 %v117_v23  ;;  %v148_v22 = vld [vmem:[%s3177_s0 + $0x3f0] sm:$0xff]  ;;  %v149_v23 = vld [vmem:[%s3177_s0 + $0x3f8] sm:$0xff] }
  0x61   :  { %1636 = vmatprep.mubr.f32.mxu0 %v54_v24  ;;  %1732 = vmatprep.mubr.f32.mxu1 %v118_v25  ;;  %v2310_v24 = vld [vmem:[%s3178_s4] ss:$0 sm:$0xff] }
  0x64   :  { %1637 = vmatmul.mubr.f32.gmra.mrb[32].mxu0 %v55_v26  ;;  %1733 = vmatmul.mubr.f32.gmra.mrb[32].mxu1 %v119_v27 }
  0x65   :  { %1639 = vmatprep.mubr.f32.mxu0 %v56_v28  ;;  %1735 = vmatprep.mubr.f32.mxu1 %v120_v29 }
  0x68   :  { %1640 = vmatmul.mubr.f32.gmra.mrb[34].mxu0 %v57_v30  ;;  %1736 = vmatmul.mubr.f32.gmra.mrb[34].mxu1 %v121_v31 }
  0x69   :  { %1642 = vmatprep.mubr.f32.mxu0 %v58_v32  ;;  %1738 = vmatprep.mubr.f32.mxu1 %v122_v33 }
  0x6c   :  { %1643 = vmatmul.mubr.f32.gmra.mrb[36].mxu0 %v59_v34  ;;  %1739 = vmatmul.mubr.f32.gmra.mrb[36].mxu1 %v123_v35 }
  0x6d   :  { %1645 = vmatprep.mubr.f32.mxu0 %v60_v36  ;;  %1741 = vmatprep.mubr.f32.mxu1 %v124_v37 }
  0x70   :  { %1646 = vmatmul.mubr.f32.gmra.mrb[38].mxu0 %v61_v38  ;;  %1742 = vmatmul.mubr.f32.gmra.mrb[38].mxu1 %v125_v39 }
  0x71   :  { %1648 = vmatprep.mubr.f32.mxu0 %v62_v40  ;;  %1744 = vmatprep.mubr.f32.mxu1 %v126_v41 }
  0x74   :  { %1649 = vmatmul.mubr.f32.gmra.mrb[40].mxu0 %v63_v42  ;;  %1745 = vmatmul.mubr.f32.gmra.mrb[40].mxu1 %v127_v43 }
  0x75   :  { %1651 = vmatprep.mubr.f32.mxu0 %v64_v44  ;;  %1747 = vmatprep.mubr.f32.mxu1 %v128_v45 }
  0x78   :  { %1652 = vmatmul.mubr.f32.gmra.mrb[42].mxu0 %v65_v46  ;;  %1748 = vmatmul.mubr.f32.gmra.mrb[42].mxu1 %v129_v48 }
  0x79   :  { %1654 = vmatprep.mubr.f32.mxu0 %v66_v47  ;;  %1750 = vmatprep.mubr.f32.mxu1 %v130_v50 }
  0x7c   :  { %1655 = vmatmul.mubr.f32.gmra.mrb[44].mxu0 %v67_v49  ;;  %1751 = vmatmul.mubr.f32.gmra.mrb[44].mxu1 %v131_v52 }
  0x7d   :  { %1657 = vmatprep.mubr.f32.mxu0 %v68_v51  ;;  %1753 = vmatprep.mubr.f32.mxu1 %v132_v54 }
  0x80   :  { %1658 = vmatmul.mubr.f32.gmra.mrb[46].mxu0 %v69_v53  ;;  %1754 = vmatmul.mubr.f32.gmra.mrb[46].mxu1 %v133_v56 }
  0x81   :  { %1660 = vmatprep.mubr.f32.mxu0 %v70_v55  ;;  %1756 = vmatprep.mubr.f32.mxu1 %v134_v58 }
  0x84   :  { %1661 = vmatmul.mubr.f32.gmra.mrb[48].mxu0 %v71_v57  ;;  %1757 = vmatmul.mubr.f32.gmra.mrb[48].mxu1 %v135_v60 }
  0x85   :  { %1663 = vmatprep.mubr.f32.mxu0 %v72_v59  ;;  %1759 = vmatprep.mubr.f32.mxu1 %v136_v62 }
  0x88   :  { %1664 = vmatmul.mubr.f32.gmra.mrb[50].mxu0 %v73_v61  ;;  %1760 = vmatmul.mubr.f32.gmra.mrb[50].mxu1 %v137_v0 }
  0x89   :  { %1666 = vmatprep.mubr.f32.mxu0 %v74_v63  ;;  %1762 = vmatprep.mubr.f32.mxu1 %v138_v2 }
  0x8c   :  { %1667 = vmatmul.mubr.f32.gmra.mrb[52].mxu0 %v75_v1  ;;  %1763 = vmatmul.mubr.f32.gmra.mrb[52].mxu1 %v139_v4 }
  0x8d   :  { %1669 = vmatprep.mubr.f32.mxu0 %v76_v3  ;;  %1765 = vmatprep.mubr.f32.mxu1 %v140_v6 }
  0x90   :  { %1670 = vmatmul.mubr.f32.gmra.mrb[54].mxu0 %v77_v5  ;;  %1766 = vmatmul.mubr.f32.gmra.mrb[54].mxu1 %v141_v8 }
  0x91   :  { %1672 = vmatprep.mubr.f32.mxu0 %v78_v7  ;;  %1768 = vmatprep.mubr.f32.mxu1 %v142_v10 }
  0x94   :  { %1673 = vmatmul.mubr.f32.gmra.mrb[56].mxu0 %v79_v9  ;;  %1769 = vmatmul.mubr.f32.gmra.mrb[56].mxu1 %v143_v12 }
  0x95   :  { %1675 = vmatprep.mubr.f32.mxu0 %v80_v11  ;;  %1771 = vmatprep.mubr.f32.mxu1 %v144_v14 }
  0x98   :  { %1676 = vmatmul.mubr.f32.gmra.mrb[58].mxu0 %v81_v13  ;;  %1772 = vmatmul.mubr.f32.gmra.mrb[58].mxu1 %v145_v16 }
  0x99   :  { %1678 = vmatprep.mubr.f32.mxu0 %v82_v15  ;;  %1774 = vmatprep.mubr.f32.mxu1 %v146_v18 }
  0x9c   :  { %1679 = vmatmul.mubr.f32.gmra.mrb[60].mxu0 %v83_v17  ;;  %1775 = vmatmul.mubr.f32.gmra.mrb[60].mxu1 %v147_v20 }
  0x9d   :  { %1681 = vmatprep.mubr.f32.mxu0 %v84_v19  ;;  %1777 = vmatprep.mubr.f32.mxu1 %v148_v22 }
  0xa0   :  { %1682 = vmatmul.mubr.f32.gmra.mrb[62].mxu0 %v85_v21  ;;  %1778 = vmatmul.mubr.f32.gmra.mrb[62].mxu1 %v149_v23 }
  0xf7   :  { %v1590_v25 = vpop.f32.mrb[0].mxu0  ;;  %v1686_v26 = vpop.f32.mrb[0].mxu1 }
  0xf8   :  { %v245_v27 = vadd.f32 %v1590_v25, %v2310_v24  ;;  %v239_v28 = vpop.f32.mrb[1].mxu0  ;;  %v565_v29 = vadd.f32 %v1686_v26, %v2310_v24  ;;  %v559_v30 = vpop.f32.mrb[1].mxu1 }
  0xf9   :  { %v240_v31 = vadd.f32 %v2310_v24, %v239_v28  ;;  %v560_v32 = vadd.f32 %v2310_v24, %v559_v30 }
  0xfa   :  { %879 = vst [vmem:[%s3179_s5 + $0x8] sm:$0xff] %v245_v27  ;;  %v1140_v33 = vmul.f32 %v245_v27, %v245_v27  ;;  %943 = vst [vmem:[%s3179_s5 + $0x208] sm:$0xff] %v565_v29 }
  0xfb   :  { %878 = vst [vmem:[%s3179_s5] sm:$0xff] %v240_v31  ;;  %v1006_v34 = vadd.f32 %v245_v27, %v240_v31  ;;  %v1139_v35 = vmul.f32 %v240_v31, %v240_v31  ;;  %v1593_v36 = vpop.f32.mrb[2].mxu0  ;;  %942 = vst [vmem:[%s3179_s5 + $0x200] sm:$0xff] %v560_v32  ;;  %v1689_v37 = vpop.f32.mrb[2].mxu1 }
  0xfc   :  { %v255_v38 = vadd.f32 %v1593_v36, %v2310_v24  ;;  %v249_v39 = vpop.f32.mrb[3].mxu0  ;;  %v575_v40 = vadd.f32 %v1689_v37, %v2310_v24  ;;  %v569_v41 = vpop.f32.mrb[3].mxu1 }
  0xfd   :  { %v1267_v42 = vadd.f32 %v1140_v33, %v1139_v35  ;;  %v250_v43 = vadd.f32 %v2310_v24, %v249_v39  ;;  %v570_v44 = vadd.f32 %v2310_v24, %v569_v41 }
  0xfe   :  { %881 = vst [vmem:[%s3179_s5 + $0x18] sm:$0xff] %v255_v38  ;;  %945 = vst [vmem:[%s3179_s5 + $0x218] sm:$0xff] %v575_v40  ;;  %v1142_v49 = vmul.f32 %v255_v38, %v255_v38 }
  0xff   :  { %880 = vst [vmem:[%s3179_s5 + $0x10] sm:$0xff] %v250_v43  ;;  %v1007_v45 = vadd.f32 %v1006_v34, %v250_v43  ;;  %v1141_v46 = vmul.f32 %v250_v43, %v250_v43  ;;  %v1596_v47 = vpop.f32.mrb[4].mxu0  ;;  %944 = vst [vmem:[%s3179_s5 + $0x210] sm:$0xff] %v570_v44  ;;  %v1692_v48 = vpop.f32.mrb[4].mxu1 }
 0x100   :  { %v265_v50 = vadd.f32 %v1596_v47, %v2310_v24  ;;  %v259_v51 = vpop.f32.mrb[5].mxu0  ;;  %v585_v52 = vadd.f32 %v1692_v48, %v2310_v24  ;;  %v579_v53 = vpop.f32.mrb[5].mxu1 }
 0x101   :  { %v1008_v54 = vadd.f32 %v1007_v45, %v255_v38  ;;  %v1268_v55 = vadd.f32 %v1267_v42, %v1141_v46  ;;  %v260_v56 = vadd.f32 %v2310_v24, %v259_v51  ;;  %v580_v57 = vadd.f32 %v2310_v24, %v579_v53 }
 0x102   :  { %883 = vst [vmem:[%s3179_s5 + $0x28] sm:$0xff] %v265_v50  ;;  %947 = vst [vmem:[%s3179_s5 + $0x228] sm:$0xff] %v585_v52  ;;  %v1144_v63 = vmul.f32 %v265_v50, %v265_v50 }
 0x103   :  { %v1269_v58 = vadd.f32 %v1268_v55, %v1142_v49  ;;  %882 = vst [vmem:[%s3179_s5 + $0x20] sm:$0xff] %v260_v56  ;;  %v1009_v59 = vadd.f32 %v1008_v54, %v260_v56  ;;  %v1143_v60 = vmul.f32 %v260_v56, %v260_v56  ;;  %v1599_v61 = vpop.f32.mrb[6].mxu0  ;;  %946 = vst [vmem:[%s3179_s5 + $0x220] sm:$0xff] %v580_v57  ;;  %v1695_v62 = vpop.f32.mrb[6].mxu1 }
 0x104   :  { %v275_v0 = vadd.f32 %v1599_v61, %v2310_v24  ;;  %v269_v1 = vpop.f32.mrb[7].mxu0  ;;  %v595_v2 = vadd.f32 %v1695_v62, %v2310_v24  ;;  %v589_v3 = vpop.f32.mrb[7].mxu1 }
 0x105   :  { %v1010_v4 = vadd.f32 %v1009_v59, %v265_v50  ;;  %v1270_v5 = vadd.f32 %v1269_v58, %v1143_v60  ;;  %v270_v6 = vadd.f32 %v2310_v24, %v269_v1  ;;  %v590_v7 = vadd.f32 %v2310_v24, %v589_v3 }
 0x106   :  { %885 = vst [vmem:[%s3179_s5 + $0x38] sm:$0xff] %v275_v0  ;;  %949 = vst [vmem:[%s3179_s5 + $0x238] sm:$0xff] %v595_v2  ;;  %v1146_v13 = vmul.f32 %v275_v0, %v275_v0 }
 0x107   :  { %v1271_v8 = vadd.f32 %v1270_v5, %v1144_v63  ;;  %884 = vst [vmem:[%s3179_s5 + $0x30] sm:$0xff] %v270_v6  ;;  %v1011_v9 = vadd.f32 %v1010_v4, %v270_v6  ;;  %v1145_v10 = vmul.f32 %v270_v6, %v270_v6  ;;  %v1602_v11 = vpop.f32.mrb[8].mxu0  ;;  %948 = vst [vmem:[%s3179_s5 + $0x230] sm:$0xff] %v590_v7  ;;  %v1698_v12 = vpop.f32.mrb[8].mxu1 }
 0x108   :  { %v285_v14 = vadd.f32 %v1602_v11, %v2310_v24  ;;  %v279_v15 = vpop.f32.mrb[9].mxu0  ;;  %v605_v16 = vadd.f32 %v1698_v12, %v2310_v24  ;;  %v599_v17 = vpop.f32.mrb[9].mxu1 }
 0x109   :  { %v1012_v18 = vadd.f32 %v1011_v9, %v275_v0  ;;  %v1272_v19 = vadd.f32 %v1271_v8, %v1145_v10  ;;  %v280_v20 = vadd.f32 %v2310_v24, %v279_v15  ;;  %v600_v21 = vadd.f32 %v2310_v24, %v599_v17 }
 0x10a   :  { %887 = vst [vmem:[%s3179_s5 + $0x48] sm:$0xff] %v285_v14  ;;  %951 = vst [vmem:[%s3179_s5 + $0x248] sm:$0xff] %v605_v16  ;;  %v1148_v28 = vmul.f32 %v285_v14, %v285_v14 }
 0x10b   :  { %v1273_v22 = vadd.f32 %v1272_v19, %v1146_v13  ;;  %886 = vst [vmem:[%s3179_s5 + $0x40] sm:$0xff] %v280_v20  ;;  %v1013_v23 = vadd.f32 %v1012_v18, %v280_v20  ;;  %v1147_v25 = vmul.f32 %v280_v20, %v280_v20  ;;  %v1605_v26 = vpop.f32.mrb[10].mxu0  ;;  %950 = vst [vmem:[%s3179_s5 + $0x240] sm:$0xff] %v600_v21  ;;  %v1701_v27 = vpop.f32.mrb[10].mxu1 }
 0x10c   :  { %v295_v29 = vadd.f32 %v1605_v26, %v2310_v24  ;;  %v289_v30 = vpop.f32.mrb[11].mxu0  ;;  %v2394_v31 = vadd.f32 %v1701_v27, %v2310_v24  ;;  %v609_v32 = vpop.f32.mrb[11].mxu1 }
 0x10d   :  { %v1014_v33 = vadd.f32 %v1013_v23, %v285_v14  ;;  %v1274_v34 = vadd.f32 %v1273_v22, %v1147_v25  ;;  %v290_v35 = vadd.f32 %v2310_v24, %v289_v30  ;;  %v2398_v36 = vadd.f32 %v2310_v24, %v609_v32 }
 0x10e   :  { %889 = vst [vmem:[%s3179_s5 + $0x58] sm:$0xff] %v295_v29  ;;  %953 = vst [vmem:[%s3179_s5 + $0x258] sm:$0xff] %v2394_v31  ;;  %v1150_v42 = vmul.f32 %v295_v29, %v295_v29 }
 0x10f   :  { %v1275_v37 = vadd.f32 %v1274_v34, %v1148_v28  ;;  %888 = vst [vmem:[%s3179_s5 + $0x50] sm:$0xff] %v290_v35  ;;  %v1015_v38 = vadd.f32 %v1014_v33, %v290_v35  ;;  %v1149_v39 = vmul.f32 %v290_v35, %v290_v35  ;;  %v1608_v40 = vpop.f32.mrb[12].mxu0  ;;  %952 = vst [vmem:[%s3179_s5 + $0x250] sm:$0xff] %v2398_v36  ;;  %v1704_v41 = vpop.f32.mrb[12].mxu1 }
 0x110   :  { %v305_v43 = vadd.f32 %v1608_v40, %v2310_v24  ;;  %v299_v44 = vpop.f32.mrb[13].mxu0  ;;  %v2416_v45 = vadd.f32 %v1704_v41, %v2310_v24  ;;  %v619_v46 = vpop.f32.mrb[13].mxu1 }
 0x111   :  { %v1016_v47 = vadd.f32 %v1015_v38, %v295_v29  ;;  %v1276_v48 = vadd.f32 %v1275_v37, %v1149_v39  ;;  %v300_v49 = vadd.f32 %v2310_v24, %v299_v44  ;;  %v2420_v50 = vadd.f32 %v2310_v24, %v619_v46 }
 0x112   :  { %891 = vst [vmem:[%s3179_s5 + $0x68] sm:$0xff] %v305_v43  ;;  %955 = vst [vmem:[%s3179_s5 + $0x268] sm:$0xff] %v2416_v45  ;;  %v1152_v56 = vmul.f32 %v305_v43, %v305_v43 }
 0x113   :  { %v1277_v51 = vadd.f32 %v1276_v48, %v1150_v42  ;;  %890 = vst [vmem:[%s3179_s5 + $0x60] sm:$0xff] %v300_v49  ;;  %v1017_v52 = vadd.f32 %v1016_v47, %v300_v49  ;;  %v1151_v53 = vmul.f32 %v300_v49, %v300_v49  ;;  %v1611_v54 = vpop.f32.mrb[14].mxu0  ;;  %954 = vst [vmem:[%s3179_s5 + $0x260] sm:$0xff] %v2420_v50  ;;  %v1707_v55 = vpop.f32.mrb[14].mxu1 }
 0x114   :  { %v315_v57 = vadd.f32 %v1611_v54, %v2310_v24  ;;  %v309_v58 = vpop.f32.mrb[15].mxu0  ;;  %v2438_v59 = vadd.f32 %v1707_v55, %v2310_v24  ;;  %v629_v60 = vpop.f32.mrb[15].mxu1 }
 0x115   :  { %v1018_v61 = vadd.f32 %v1017_v52, %v305_v43  ;;  %v1278_v62 = vadd.f32 %v1277_v51, %v1151_v53  ;;  %v310_v63 = vadd.f32 %v2310_v24, %v309_v58  ;;  %v2442_v0 = vadd.f32 %v2310_v24, %v629_v60 }
 0x116   :  { %893 = vst [vmem:[%s3179_s5 + $0x78] sm:$0xff] %v315_v57  ;;  %957 = vst [vmem:[%s3179_s5 + $0x278] sm:$0xff] %v2438_v59  ;;  %v1154_v6 = vmul.f32 %v315_v57, %v315_v57 }
 0x117   :  { %v1279_v1 = vadd.f32 %v1278_v62, %v1152_v56  ;;  %892 = vst [vmem:[%s3179_s5 + $0x70] sm:$0xff] %v310_v63  ;;  %v1019_v2 = vadd.f32 %v1018_v61, %v310_v63  ;;  %v1153_v3 = vmul.f32 %v310_v63, %v310_v63  ;;  %v1614_v4 = vpop.f32.mrb[16].mxu0  ;;  %956 = vst [vmem:[%s3179_s5 + $0x270] sm:$0xff] %v2442_v0  ;;  %v1710_v5 = vpop.f32.mrb[16].mxu1 }
 0x118   :  { %v325_v7 = vadd.f32 %v1614_v4, %v2310_v24  ;;  %v319_v8 = vpop.f32.mrb[17].mxu0  ;;  %v2460_v9 = vadd.f32 %v1710_v5, %v2310_v24  ;;  %v639_v10 = vpop.f32.mrb[17].mxu1 }
 0x119   :  { %v1020_v11 = vadd.f32 %v1019_v2, %v315_v57  ;;  %v1280_v12 = vadd.f32 %v1279_v1, %v1153_v3  ;;  %v320_v13 = vadd.f32 %v2310_v24, %v319_v8  ;;  %v2464_v14 = vadd.f32 %v2310_v24, %v639_v10 }
 0x11a   :  { %895 = vst [vmem:[%s3179_s5 + $0x88] sm:$0xff] %v325_v7  ;;  %959 = vst [vmem:[%s3179_s5 + $0x288] sm:$0xff] %v2460_v9  ;;  %v1156_v20 = vmul.f32 %v325_v7, %v325_v7 }
 0x11b   :  { %v1281_v15 = vadd.f32 %v1280_v12, %v1154_v6  ;;  %894 = vst [vmem:[%s3179_s5 + $0x80] sm:$0xff] %v320_v13  ;;  %v1021_v16 = vadd.f32 %v1020_v11, %v320_v13  ;;  %v1155_v17 = vmul.f32 %v320_v13, %v320_v13  ;;  %v1617_v18 = vpop.f32.mrb[18].mxu0  ;;  %958 = vst [vmem:[%s3179_s5 + $0x280] sm:$0xff] %v2464_v14  ;;  %v1713_v19 = vpop.f32.mrb[18].mxu1 }
 0x11c   :  { %v335_v21 = vadd.f32 %v1617_v18, %v2310_v24  ;;  %v329_v22 = vpop.f32.mrb[19].mxu0  ;;  %v2482_v23 = vadd.f32 %v1713_v19, %v2310_v24  ;;  %v649_v25 = vpop.f32.mrb[19].mxu1 }
 0x11d   :  { %v1022_v26 = vadd.f32 %v1021_v16, %v325_v7  ;;  %v1282_v27 = vadd.f32 %v1281_v15, %v1155_v17  ;;  %v330_v28 = vadd.f32 %v2310_v24, %v329_v22  ;;  %v2486_v29 = vadd.f32 %v2310_v24, %v649_v25 }
 0x11e   :  { %897 = vst [vmem:[%s3179_s5 + $0x98] sm:$0xff] %v335_v21  ;;  %961 = vst [vmem:[%s3179_s5 + $0x298] sm:$0xff] %v2482_v23  ;;  %v1158_v37 = vmul.f32 %v335_v21, %v335_v21 }
 0x11f   :  { %v1283_v30 = vadd.f32 %v1282_v27, %v1156_v20  ;;  %896 = vst [vmem:[%s3179_s5 + $0x90] sm:$0xff] %v330_v28  ;;  %v1023_v32 = vadd.f32 %v1022_v26, %v330_v28  ;;  %v1157_v33 = vmul.f32 %v330_v28, %v330_v28  ;;  %v1620_v34 = vpop.f32.mrb[20].mxu0  ;;  %960 = vst [vmem:[%s3179_s5 + $0x290] sm:$0xff] %v2486_v29  ;;  %v1716_v35 = vpop.f32.mrb[20].mxu1 }
 0x120   :  { %v345_v38 = vadd.f32 %v1620_v34, %v2310_v24  ;;  %v339_v39 = vpop.f32.mrb[21].mxu0  ;;  %v2504_v40 = vadd.f32 %v1716_v35, %v2310_v24  ;;  %v659_v41 = vpop.f32.mrb[21].mxu1 }
 0x121   :  { %v1024_v42 = vadd.f32 %v1023_v32, %v335_v21  ;;  %v1284_v43 = vadd.f32 %v1283_v30, %v1157_v33  ;;  %v340_v44 = vadd.f32 %v2310_v24, %v339_v39  ;;  %v2508_v46 = vadd.f32 %v2310_v24, %v659_v41 }
 0x122   :  { %899 = vst [vmem:[%s3179_s5 + $0xa8] sm:$0xff] %v345_v38  ;;  %963 = vst [vmem:[%s3179_s5 + $0x2a8] sm:$0xff] %v2504_v40  ;;  %v1160_v53 = vmul.f32 %v345_v38, %v345_v38 }
 0x123   :  { %v1285_v47 = vadd.f32 %v1284_v43, %v1158_v37  ;;  %898 = vst [vmem:[%s3179_s5 + $0xa0] sm:$0xff] %v340_v44  ;;  %v1025_v48 = vadd.f32 %v1024_v42, %v340_v44  ;;  %v1159_v49 = vmul.f32 %v340_v44, %v340_v44  ;;  %v1623_v51 = vpop.f32.mrb[22].mxu0  ;;  %962 = vst [vmem:[%s3179_s5 + $0x2a0] sm:$0xff] %v2508_v46  ;;  %v1719_v52 = vpop.f32.mrb[22].mxu1 }
 0x124   :  { %v355_v54 = vadd.f32 %v1623_v51, %v2310_v24  ;;  %v349_v55 = vpop.f32.mrb[23].mxu0  ;;  %v2526_v56 = vadd.f32 %v1719_v52, %v2310_v24  ;;  %v669_v57 = vpop.f32.mrb[23].mxu1 }
 0x125   :  { %v1026_v58 = vadd.f32 %v1025_v48, %v345_v38  ;;  %v1286_v60 = vadd.f32 %v1285_v47, %v1159_v49  ;;  %v350_v61 = vadd.f32 %v2310_v24, %v349_v55  ;;  %v2530_v62 = vadd.f32 %v2310_v24, %v669_v57 }
 0x126   :  { %901 = vst [vmem:[%s3179_s5 + $0xb8] sm:$0xff] %v355_v54  ;;  %965 = vst [vmem:[%s3179_s5 + $0x2b8] sm:$0xff] %v2526_v56  ;;  %v1162_v5 = vmul.f32 %v355_v54, %v355_v54 }
 0x127   :  { %v1287_v63 = vadd.f32 %v1286_v60, %v1160_v53  ;;  %900 = vst [vmem:[%s3179_s5 + $0xb0] sm:$0xff] %v350_v61  ;;  %v1027_v1 = vadd.f32 %v1026_v58, %v350_v61  ;;  %v1161_v2 = vmul.f32 %v350_v61, %v350_v61  ;;  %v1626_v3 = vpop.f32.mrb[24].mxu0  ;;  %964 = vst [vmem:[%s3179_s5 + $0x2b0] sm:$0xff] %v2530_v62  ;;  %v1722_v4 = vpop.f32.mrb[24].mxu1 }
 0x128   :  { %v365_v6 = vadd.f32 %v1626_v3, %v2310_v24  ;;  %v359_v7 = vpop.f32.mrb[25].mxu0  ;;  %v2548_v8 = vadd.f32 %v1722_v4, %v2310_v24  ;;  %v679_v10 = vpop.f32.mrb[25].mxu1 }
 0x129   :  { %v1028_v11 = vadd.f32 %v1027_v1, %v355_v54  ;;  %v1288_v12 = vadd.f32 %v1287_v63, %v1161_v2  ;;  %v360_v13 = vadd.f32 %v2310_v24, %v359_v7  ;;  %v2552_v15 = vadd.f32 %v2310_v24, %v679_v10 }
 0x12a   :  { %903 = vst [vmem:[%s3179_s5 + $0xc8] sm:$0xff] %v365_v6  ;;  %967 = vst [vmem:[%s3179_s5 + $0x2c8] sm:$0xff] %v2548_v8  ;;  %v1164_v21 = vmul.f32 %v365_v6, %v365_v6 }
 0x12b   :  { %v1289_v16 = vadd.f32 %v1288_v12, %v1162_v5  ;;  %902 = vst [vmem:[%s3179_s5 + $0xc0] sm:$0xff] %v360_v13  ;;  %v1029_v17 = vadd.f32 %v1028_v11, %v360_v13  ;;  %v1163_v18 = vmul.f32 %v360_v13, %v360_v13  ;;  %v1629_v19 = vpop.f32.mrb[26].mxu0  ;;  %966 = vst [vmem:[%s3179_s5 + $0x2c0] sm:$0xff] %v2552_v15  ;;  %v1725_v20 = vpop.f32.mrb[26].mxu1 }
 0x12c   :  { %v375_v22 = vadd.f32 %v1629_v19, %v2310_v24  ;;  %v369_v25 = vpop.f32.mrb[27].mxu0  ;;  %v2570_v26 = vadd.f32 %v1725_v20, %v2310_v24  ;;  %v689_v27 = vpop.f32.mrb[27].mxu1 }
 0x12d   :  { %v1030_v28 = vadd.f32 %v1029_v17, %v365_v6  ;;  %v1290_v30 = vadd.f32 %v1289_v16, %v1163_v18  ;;  %v370_v32 = vadd.f32 %v2310_v24, %v369_v25  ;;  %v2574_v33 = vadd.f32 %v2310_v24, %v689_v27 }
 0x12e   :  { %905 = vst [vmem:[%s3179_s5 + $0xd8] sm:$0xff] %v375_v22  ;;  %969 = vst [vmem:[%s3179_s5 + $0x2d8] sm:$0xff] %v2570_v26  ;;  %v1166_v41 = vmul.f32 %v375_v22, %v375_v22 }
 0x12f   :  { %v1291_v34 = vadd.f32 %v1290_v30, %v1164_v21  ;;  %904 = vst [vmem:[%s3179_s5 + $0xd0] sm:$0xff] %v370_v32  ;;  %v1031_v35 = vadd.f32 %v1030_v28, %v370_v32  ;;  %v1165_v37 = vmul.f32 %v370_v32, %v370_v32  ;;  %v1632_v38 = vpop.f32.mrb[28].mxu0  ;;  %968 = vst [vmem:[%s3179_s5 + $0x2d0] sm:$0xff] %v2574_v33  ;;  %v1728_v39 = vpop.f32.mrb[28].mxu1 }
 0x130   :  { %v385_v42 = vadd.f32 %v1632_v38, %v2310_v24  ;;  %v379_v43 = vpop.f32.mrb[29].mxu0  ;;  %v2592_v44 = vadd.f32 %v1728_v39, %v2310_v24  ;;  %v699_v47 = vpop.f32.mrb[29].mxu1 }
 0x131   :  { %v1032_v48 = vadd.f32 %v1031_v35, %v375_v22  ;;  %v1292_v49 = vadd.f32 %v1291_v34, %v1165_v37  ;;  %v380_v51 = vadd.f32 %v2310_v24, %v379_v43  ;;  %v2596_v52 = vadd.f32 %v2310_v24, %v699_v47 }
 0x132   :  { %907 = vst [vmem:[%s3179_s5 + $0xe8] sm:$0xff] %v385_v42  ;;  %971 = vst [vmem:[%s3179_s5 + $0x2e8] sm:$0xff] %v2592_v44  ;;  %v1168_v60 = vmul.f32 %v385_v42, %v385_v42 }
 0x133   :  { %v1293_v53 = vadd.f32 %v1292_v49, %v1166_v41  ;;  %906 = vst [vmem:[%s3179_s5 + $0xe0] sm:$0xff] %v380_v51  ;;  %v1033_v54 = vadd.f32 %v1032_v48, %v380_v51  ;;  %v1167_v55 = vmul.f32 %v380_v51, %v380_v51  ;;  %v1635_v57 = vpop.f32.mrb[30].mxu0  ;;  %970 = vst [vmem:[%s3179_s5 + $0x2e0] sm:$0xff] %v2596_v52  ;;  %v1731_v58 = vpop.f32.mrb[30].mxu1 }
 0x134   :  { %v395_v61 = vadd.f32 %v1635_v57, %v2310_v24  ;;  %v389_v63 = vpop.f32.mrb[31].mxu0  ;;  %v2614_v1 = vadd.f32 %v1731_v58, %v2310_v24  ;;  %v709_v2 = vpop.f32.mrb[31].mxu1 }
 0x135   :  { %v1034_v3 = vadd.f32 %v1033_v54, %v385_v42  ;;  %v1294_v4 = vadd.f32 %v1293_v53, %v1167_v55  ;;  %v390_v5 = vadd.f32 %v2310_v24, %v389_v63  ;;  %v2618_v6 = vadd.f32 %v2310_v24, %v709_v2 }
 0x136   :  { %909 = vst [vmem:[%s3179_s5 + $0xf8] sm:$0xff] %v395_v61  ;;  %973 = vst [vmem:[%s3179_s5 + $0x2f8] sm:$0xff] %v2614_v1  ;;  %v1170_v16 = vmul.f32 %v395_v61, %v395_v61 }
 0x137   :  { %v1295_v7 = vadd.f32 %v1294_v4, %v1168_v60  ;;  %908 = vst [vmem:[%s3179_s5 + $0xf0] sm:$0xff] %v390_v5  ;;  %v1035_v10 = vadd.f32 %v1034_v3, %v390_v5  ;;  %v1169_v11 = vmul.f32 %v390_v5, %v390_v5  ;;  %v1638_v12 = vpop.f32.mrb[32].mxu0  ;;  %972 = vst [vmem:[%s3179_s5 + $0x2f0] sm:$0xff] %v2618_v6  ;;  %v1734_v13 = vpop.f32.mrb[32].mxu1 }
 0x138   :  { %v405_v17 = vadd.f32 %v1638_v12, %v2310_v24  ;;  %v399_v18 = vpop.f32.mrb[33].mxu0  ;;  %v2636_v19 = vadd.f32 %v1734_v13, %v2310_v24  ;;  %v719_v20 = vpop.f32.mrb[33].mxu1 }
 0x139   :  { %v1036_v21 = vadd.f32 %v1035_v10, %v395_v61  ;;  %v1296_v22 = vadd.f32 %v1295_v7, %v1169_v11  ;;  %v400_v25 = vadd.f32 %v2310_v24, %v399_v18  ;;  %v2640_v27 = vadd.f32 %v2310_v24, %v719_v20 }
 0x13a   :  { %911 = vst [vmem:[%s3179_s5 + $0x108] sm:$0xff] %v405_v17  ;;  %975 = vst [vmem:[%s3179_s5 + $0x308] sm:$0xff] %v2636_v19  ;;  %v1172_v37 = vmul.f32 %v405_v17, %v405_v17 }
 0x13b   :  { %v1297_v28 = vadd.f32 %v1296_v22, %v1170_v16  ;;  %910 = vst [vmem:[%s3179_s5 + $0x100] sm:$0xff] %v400_v25  ;;  %v1037_v30 = vadd.f32 %v1036_v21, %v400_v25  ;;  %v1171_v32 = vmul.f32 %v400_v25, %v400_v25  ;;  %v1641_v34 = vpop.f32.mrb[34].mxu0  ;;  %974 = vst [vmem:[%s3179_s5 + $0x300] sm:$0xff] %v2640_v27  ;;  %v1737_v35 = vpop.f32.mrb[34].mxu1 }
 0x13c   :  { %v415_v38 = vadd.f32 %v1641_v34, %v2310_v24  ;;  %v409_v39 = vpop.f32.mrb[35].mxu0  ;;  %v2658_v41 = vadd.f32 %v1737_v35, %v2310_v24  ;;  %v729_v42 = vpop.f32.mrb[35].mxu1 }
 0x13d   :  { %v1038_v43 = vadd.f32 %v1037_v30, %v405_v17  ;;  %v1298_v47 = vadd.f32 %v1297_v28, %v1171_v32  ;;  %v410_v48 = vadd.f32 %v2310_v24, %v409_v39  ;;  %v2662_v49 = vadd.f32 %v2310_v24, %v729_v42 }
 0x13e   :  { %913 = vst [vmem:[%s3179_s5 + $0x118] sm:$0xff] %v415_v38  ;;  %977 = vst [vmem:[%s3179_s5 + $0x318] sm:$0xff] %v2658_v41  ;;  %v1174_v58 = vmul.f32 %v415_v38, %v415_v38 }
 0x13f   :  { %v1299_v51 = vadd.f32 %v1298_v47, %v1172_v37  ;;  %912 = vst [vmem:[%s3179_s5 + $0x110] sm:$0xff] %v410_v48  ;;  %v1039_v53 = vadd.f32 %v1038_v43, %v410_v48  ;;  %v1173_v54 = vmul.f32 %v410_v48, %v410_v48  ;;  %v1644_v55 = vpop.f32.mrb[36].mxu0  ;;  %976 = vst [vmem:[%s3179_s5 + $0x310] sm:$0xff] %v2662_v49  ;;  %v1740_v57 = vpop.f32.mrb[36].mxu1 }
 0x140   :  { %v425_v60 = vadd.f32 %v1644_v55, %v2310_v24  ;;  %v419_v61 = vpop.f32.mrb[37].mxu0  ;;  %v2680_v63 = vadd.f32 %v1740_v57, %v2310_v24  ;;  %v739_v2 = vpop.f32.mrb[37].mxu1 }
 0x141   :  { %v1040_v3 = vadd.f32 %v1039_v53, %v415_v38  ;;  %v1300_v4 = vadd.f32 %v1299_v51, %v1173_v54  ;;  %v420_v5 = vadd.f32 %v2310_v24, %v419_v61  ;;  %v2684_v7 = vadd.f32 %v2310_v24, %v739_v2 }
 0x142   :  { %915 = vst [vmem:[%s3179_s5 + $0x128] sm:$0xff] %v425_v60  ;;  %979 = vst [vmem:[%s3179_s5 + $0x328] sm:$0xff] %v2680_v63  ;;  %v1176_v17 = vmul.f32 %v425_v60, %v425_v60 }
 0x143   :  { %v1301_v10 = vadd.f32 %v1300_v4, %v1174_v58  ;;  %914 = vst [vmem:[%s3179_s5 + $0x120] sm:$0xff] %v420_v5  ;;  %v1041_v11 = vadd.f32 %v1040_v3, %v420_v5  ;;  %v1175_v12 = vmul.f32 %v420_v5, %v420_v5  ;;  %v1647_v13 = vpop.f32.mrb[38].mxu0  ;;  %978 = vst [vmem:[%s3179_s5 + $0x320] sm:$0xff] %v2684_v7  ;;  %v1743_v16 = vpop.f32.mrb[38].mxu1 }
 0x144   :  { %v435_v18 = vadd.f32 %v1647_v13, %v2310_v24  ;;  %v429_v20 = vpop.f32.mrb[39].mxu0  ;;  %v2702_v21 = vadd.f32 %v1743_v16, %v2310_v24  ;;  %v749_v22 = vpop.f32.mrb[39].mxu1 }
 0x145   :  { %v1042_v25 = vadd.f32 %v1041_v11, %v425_v60  ;;  %v1302_v28 = vadd.f32 %v1301_v10, %v1175_v12  ;;  %v430_v30 = vadd.f32 %v2310_v24, %v429_v20  ;;  %v2706_v32 = vadd.f32 %v2310_v24, %v749_v22 }
 0x146   :  { %917 = vst [vmem:[%s3179_s5 + $0x138] sm:$0xff] %v435_v18  ;;  %981 = vst [vmem:[%s3179_s5 + $0x338] sm:$0xff] %v2702_v21  ;;  %v1178_v42 = vmul.f32 %v435_v18, %v435_v18 }
 0x147   :  { %v1303_v34 = vadd.f32 %v1302_v28, %v1176_v17  ;;  %916 = vst [vmem:[%s3179_s5 + $0x130] sm:$0xff] %v430_v30  ;;  %v1043_v35 = vadd.f32 %v1042_v25, %v430_v30  ;;  %v1177_v37 = vmul.f32 %v430_v30, %v430_v30  ;;  %v1650_v38 = vpop.f32.mrb[40].mxu0  ;;  %980 = vst [vmem:[%s3179_s5 + $0x330] sm:$0xff] %v2706_v32  ;;  %v1746_v39 = vpop.f32.mrb[40].mxu1 }
 0x148   :  { %v445_v43 = vadd.f32 %v1650_v38, %v2310_v24  ;;  %v439_v47 = vpop.f32.mrb[41].mxu0  ;;  %v2724_v48 = vadd.f32 %v1746_v39, %v2310_v24  ;;  %v759_v51 = vpop.f32.mrb[41].mxu1 }
 0x149   :  { %v1044_v53 = vadd.f32 %v1043_v35, %v435_v18  ;;  %v1304_v54 = vadd.f32 %v1303_v34, %v1177_v37  ;;  %v440_v55 = vadd.f32 %v2310_v24, %v439_v47  ;;  %v2728_v57 = vadd.f32 %v2310_v24, %v759_v51 }
 0x14a   :  { %919 = vst [vmem:[%s3179_s5 + $0x148] sm:$0xff] %v445_v43  ;;  %983 = vst [vmem:[%s3179_s5 + $0x348] sm:$0xff] %v2724_v48  ;;  %v1180_v4 = vmul.f32 %v445_v43, %v445_v43 }
 0x14b   :  { %v1305_v58 = vadd.f32 %v1304_v54, %v1178_v42  ;;  %918 = vst [vmem:[%s3179_s5 + $0x140] sm:$0xff] %v440_v55  ;;  %v1045_v60 = vadd.f32 %v1044_v53, %v440_v55  ;;  %v1179_v61 = vmul.f32 %v440_v55, %v440_v55  ;;  %v1653_v2 = vpop.f32.mrb[42].mxu0  ;;  %982 = vst [vmem:[%s3179_s5 + $0x340] sm:$0xff] %v2728_v57  ;;  %v1749_v3 = vpop.f32.mrb[42].mxu1 }
 0x14c   :  { %v455_v5 = vadd.f32 %v1653_v2, %v2310_v24  ;;  %v449_v10 = vpop.f32.mrb[43].mxu0  ;;  %v2746_v11 = vadd.f32 %v1749_v3, %v2310_v24  ;;  %v769_v12 = vpop.f32.mrb[43].mxu1 }
 0x14d   :  { %v1046_v13 = vadd.f32 %v1045_v60, %v445_v43  ;;  %v1306_v16 = vadd.f32 %v1305_v58, %v1179_v61  ;;  %v450_v17 = vadd.f32 %v2310_v24, %v449_v10  ;;  %v2750_v18 = vadd.f32 %v2310_v24, %v769_v12 }
 0x14e   :  { %921 = vst [vmem:[%s3179_s5 + $0x158] sm:$0xff] %v455_v5  ;;  %985 = vst [vmem:[%s3179_s5 + $0x358] sm:$0xff] %v2746_v11  ;;  %v1182_v34 = vmul.f32 %v455_v5, %v455_v5 }
 0x14f   :  { %v1307_v20 = vadd.f32 %v1306_v16, %v1180_v4  ;;  %920 = vst [vmem:[%s3179_s5 + $0x150] sm:$0xff] %v450_v17  ;;  %v1047_v22 = vadd.f32 %v1046_v13, %v450_v17  ;;  %v1181_v25 = vmul.f32 %v450_v17, %v450_v17  ;;  %v1656_v28 = vpop.f32.mrb[44].mxu0  ;;  %984 = vst [vmem:[%s3179_s5 + $0x350] sm:$0xff] %v2750_v18  ;;  %v1752_v30 = vpop.f32.mrb[44].mxu1 }
 0x150   :  { %v465_v35 = vadd.f32 %v1656_v28, %v2310_v24  ;;  %v459_v37 = vpop.f32.mrb[45].mxu0  ;;  %v2768_v38 = vadd.f32 %v1752_v30, %v2310_v24  ;;  %v779_v39 = vpop.f32.mrb[45].mxu1 }
 0x151   :  { %v1048_v42 = vadd.f32 %v1047_v22, %v455_v5  ;;  %v1308_v43 = vadd.f32 %v1307_v20, %v1181_v25  ;;  %v460_v47 = vadd.f32 %v2310_v24, %v459_v37  ;;  %v2772_v51 = vadd.f32 %v2310_v24, %v779_v39 }
 0x152   :  { %923 = vst [vmem:[%s3179_s5 + $0x168] sm:$0xff] %v465_v35  ;;  %987 = vst [vmem:[%s3179_s5 + $0x368] sm:$0xff] %v2768_v38  ;;  %v1184_v61 = vmul.f32 %v465_v35, %v465_v35 }
 0x153   :  { %v1309_v53 = vadd.f32 %v1308_v43, %v1182_v34  ;;  %922 = vst [vmem:[%s3179_s5 + $0x160] sm:$0xff] %v460_v47  ;;  %v1049_v54 = vadd.f32 %v1048_v42, %v460_v47  ;;  %v1183_v55 = vmul.f32 %v460_v47, %v460_v47  ;;  %v1659_v58 = vpop.f32.mrb[46].mxu0  ;;  %986 = vst [vmem:[%s3179_s5 + $0x360] sm:$0xff] %v2772_v51  ;;  %v1755_v60 = vpop.f32.mrb[46].mxu1 }
 0x154   :  { %v475_v2 = vadd.f32 %v1659_v58, %v2310_v24  ;;  %v469_v3 = vpop.f32.mrb[47].mxu0  ;;  %v2790_v4 = vadd.f32 %v1755_v60, %v2310_v24  ;;  %v789_v5 = vpop.f32.mrb[47].mxu1 }
 0x155   :  { %v1050_v10 = vadd.f32 %v1049_v54, %v465_v35  ;;  %v1310_v12 = vadd.f32 %v1309_v53, %v1183_v55  ;;  %v470_v13 = vadd.f32 %v2310_v24, %v469_v3  ;;  %v2794_v16 = vadd.f32 %v2310_v24, %v789_v5 }
 0x156   :  { %925 = vst [vmem:[%s3179_s5 + $0x178] sm:$0xff] %v475_v2  ;;  %989 = vst [vmem:[%s3179_s5 + $0x378] sm:$0xff] %v2790_v4  ;;  %v1186_v30 = vmul.f32 %v475_v2, %v475_v2 }
 0x157   :  { %v1311_v17 = vadd.f32 %v1310_v12, %v1184_v61  ;;  %924 = vst [vmem:[%s3179_s5 + $0x170] sm:$0xff] %v470_v13  ;;  %v1051_v20 = vadd.f32 %v1050_v10, %v470_v13  ;;  %v1185_v22 = vmul.f32 %v470_v13, %v470_v13  ;;  %v1662_v25 = vpop.f32.mrb[48].mxu0  ;;  %988 = vst [vmem:[%s3179_s5 + $0x370] sm:$0xff] %v2794_v16  ;;  %v1758_v28 = vpop.f32.mrb[48].mxu1 }
 0x158   :  { %v485_v34 = vadd.f32 %v1662_v25, %v2310_v24  ;;  %v479_v35 = vpop.f32.mrb[49].mxu0  ;;  %v2812_v37 = vadd.f32 %v1758_v28, %v2310_v24  ;;  %v799_v39 = vpop.f32.mrb[49].mxu1 }
 0x159   :  { %v1052_v42 = vadd.f32 %v1051_v20, %v475_v2  ;;  %v1312_v43 = vadd.f32 %v1311_v17, %v1185_v22  ;;  %v480_v47 = vadd.f32 %v2310_v24, %v479_v35  ;;  %v2816_v53 = vadd.f32 %v2310_v24, %v799_v39 }
 0x15a   :  { %927 = vst [vmem:[%s3179_s5 + $0x188] sm:$0xff] %v485_v34  ;;  %991 = vst [vmem:[%s3179_s5 + $0x388] sm:$0xff] %v2812_v37  ;;  %v1188_v2 = vmul.f32 %v485_v34, %v485_v34 }
 0x15b   :  { %v1313_v54 = vadd.f32 %v1312_v43, %v1186_v30  ;;  %926 = vst [vmem:[%s3179_s5 + $0x180] sm:$0xff] %v480_v47  ;;  %v1053_v55 = vadd.f32 %v1052_v42, %v480_v47  ;;  %v1187_v58 = vmul.f32 %v480_v47, %v480_v47  ;;  %v1665_v60 = vpop.f32.mrb[50].mxu0  ;;  %990 = vst [vmem:[%s3179_s5 + $0x380] sm:$0xff] %v2816_v53  ;;  %v1761_v61 = vpop.f32.mrb[50].mxu1 }
 0x15c   :  { %v495_v3 = vadd.f32 %v1665_v60, %v2310_v24  ;;  %v489_v5 = vpop.f32.mrb[51].mxu0  ;;  %v2834_v10 = vadd.f32 %v1761_v61, %v2310_v24  ;;  %v809_v12 = vpop.f32.mrb[51].mxu1 }
 0x15d   :  { %v1054_v13 = vadd.f32 %v1053_v55, %v485_v34  ;;  %v1314_v17 = vadd.f32 %v1313_v54, %v1187_v58  ;;  %v490_v20 = vadd.f32 %v2310_v24, %v489_v5  ;;  %v2838_v22 = vadd.f32 %v2310_v24, %v809_v12 }
 0x15e   :  { %929 = vst [vmem:[%s3179_s5 + $0x198] sm:$0xff] %v495_v3  ;;  %993 = vst [vmem:[%s3179_s5 + $0x398] sm:$0xff] %v2834_v10  ;;  %v1190_v39 = vmul.f32 %v495_v3, %v495_v3 }
 0x15f   :  { %v1315_v25 = vadd.f32 %v1314_v17, %v1188_v2  ;;  %928 = vst [vmem:[%s3179_s5 + $0x190] sm:$0xff] %v490_v20  ;;  %v1055_v28 = vadd.f32 %v1054_v13, %v490_v20  ;;  %v1189_v30 = vmul.f32 %v490_v20, %v490_v20  ;;  %v1668_v34 = vpop.f32.mrb[52].mxu0  ;;  %992 = vst [vmem:[%s3179_s5 + $0x390] sm:$0xff] %v2838_v22  ;;  %v1764_v35 = vpop.f32.mrb[52].mxu1 }
 0x160   :  { %v505_v42 = vadd.f32 %v1668_v34, %v2310_v24  ;;  %v499_v43 = vpop.f32.mrb[53].mxu0  ;;  %v2856_v47 = vadd.f32 %v1764_v35, %v2310_v24  ;;  %v819_v54 = vpop.f32.mrb[53].mxu1 }
 0x161   :  { %v1056_v55 = vadd.f32 %v1055_v28, %v495_v3  ;;  %v1316_v58 = vadd.f32 %v1315_v25, %v1189_v30  ;;  %v500_v60 = vadd.f32 %v2310_v24, %v499_v43  ;;  %v2860_v61 = vadd.f32 %v2310_v24, %v819_v54 }
 0x162   :  { %931 = vst [vmem:[%s3179_s5 + $0x1a8] sm:$0xff] %v505_v42  ;;  %995 = vst [vmem:[%s3179_s5 + $0x3a8] sm:$0xff] %v2856_v47  ;;  %v1192_v17 = vmul.f32 %v505_v42, %v505_v42 }
 0x163   :  { %v1317_v2 = vadd.f32 %v1316_v58, %v1190_v39  ;;  %930 = vst [vmem:[%s3179_s5 + $0x1a0] sm:$0xff] %v500_v60  ;;  %v1057_v3 = vadd.f32 %v1056_v55, %v500_v60  ;;  %v1191_v5 = vmul.f32 %v500_v60, %v500_v60  ;;  %v1671_v12 = vpop.f32.mrb[54].mxu0  ;;  %994 = vst [vmem:[%s3179_s5 + $0x3a0] sm:$0xff] %v2860_v61  ;;  %v1767_v13 = vpop.f32.mrb[54].mxu1 }
 0x164   :  { %v515_v20 = vadd.f32 %v1671_v12, %v2310_v24  ;;  %v509_v25 = vpop.f32.mrb[55].mxu0  ;;  %v2878_v28 = vadd.f32 %v1767_v13, %v2310_v24  ;;  %v829_v30 = vpop.f32.mrb[55].mxu1 }
 0x165   :  { %v1058_v34 = vadd.f32 %v1057_v3, %v505_v42  ;;  %v1318_v35 = vadd.f32 %v1317_v2, %v1191_v5  ;;  %v510_v39 = vadd.f32 %v2310_v24, %v509_v25  ;;  %v2882_v43 = vadd.f32 %v2310_v24, %v829_v30 }
 0x166   :  { %3193 = vst [vmem:[#allocation2_spill] sm:$0xff] %v2878_v28  ;;  %933 = vst [vmem:[%s3179_s5 + $0x1b8] sm:$0xff] %v515_v20  ;;  %v1194_v2 = vmul.f32 %v515_v20, %v515_v20 }
 0x167   :  { %997 = vst [vmem:[%s3179_s5 + $0x3b8] sm:$0xff] %v2878_v28  ;;  %v1319_v54 = vadd.f32 %v1318_v35, %v1192_v17  ;;  %932 = vst [vmem:[%s3179_s5 + $0x1b0] sm:$0xff] %v510_v39  ;;  %v1059_v42 = vadd.f32 %v1058_v34, %v510_v39  ;;  %v1193_v55 = vmul.f32 %v510_v39, %v510_v39  ;;  %v1674_v58 = vpop.f32.mrb[56].mxu0  ;;  %v1770_v60 = vpop.f32.mrb[56].mxu1 }
 0x168   :  { %996 = vst [vmem:[%s3179_s5 + $0x3b0] sm:$0xff] %v2882_v43  ;;  %v525_v3 = vadd.f32 %v1674_v58, %v2310_v24  ;;  %v519_v5 = vpop.f32.mrb[57].mxu0  ;;  %v2900_v12 = vadd.f32 %v1770_v60, %v2310_v24  ;;  %v839_v13 = vpop.f32.mrb[57].mxu1 }
 0x169   :  { %v1060_v17 = vadd.f32 %v1059_v42, %v515_v20  ;;  %v1320_v25 = vadd.f32 %v1319_v54, %v1193_v55  ;;  %v520_v30 = vadd.f32 %v2310_v24, %v519_v5  ;;  %v2904_v34 = vadd.f32 %v2310_v24, %v839_v13  ;;  %v1828_v55 = vld [vmem:[%s3178_s4] ss:$0 sm:$0xff] }
 0x16a   :  { %3194 = vst [vmem:[#allocation3_spill] sm:$0xff] %v2900_v12  ;;  %935 = vst [vmem:[%s3179_s5 + $0x1c8] sm:$0xff] %v525_v3  ;;  %v1196_v42 = vmul.f32 %v525_v3, %v525_v3 }
 0x16b   :  { %3195 = vst [vmem:[#allocation4_spill] sm:$0xff] %v2904_v34  ;;  %999 = vst [vmem:[%s3179_s5 + $0x3c8] sm:$0xff] %v2900_v12  ;;  %v1321_v35 = vadd.f32 %v1320_v25, %v1194_v2  ;;  %v1061_v20 = vadd.f32 %v1060_v17, %v520_v30  ;;  %v1195_v39 = vmul.f32 %v520_v30, %v520_v30  ;;  %v1677_v54 = vpop.f32.mrb[58].mxu0  ;;  %v1773_v24 = vpop.f32.mrb[58].mxu1 }
 0x16c   :  { %934 = vst [vmem:[%s3179_s5 + $0x1c0] sm:$0xff] %v520_v30  ;;  %998 = vst [vmem:[%s3179_s5 + $0x3c0] sm:$0xff] %v2904_v34  ;;  %v535_v58 = vadd.f32 %v1828_v55, %v1677_v54  ;;  %v529_v60 = vpop.f32.mrb[59].mxu0  ;;  %v2923_v2 = vadd.f32 %v1828_v55, %v1773_v24  ;;  %v849_v5 = vpop.f32.mrb[59].mxu1 }
 0x16d   :  { %v1062_v13 = vadd.f32 %v1061_v20, %v525_v3  ;;  %v1322_v17 = vadd.f32 %v1321_v35, %v1195_v39  ;;  %v530_v25 = vadd.f32 %v1828_v55, %v529_v60  ;;  %v2925_v30 = vadd.f32 %v1828_v55, %v849_v5 }
 0x16e   :  { %3196 = vst [vmem:[#allocation5_spill] sm:$0xff] %v2923_v2  ;;  %937 = vst [vmem:[%s3179_s5 + $0x1d8] sm:$0xff] %v535_v58  ;;  %v1198_v39 = vmul.f32 %v535_v58, %v535_v58 }
 0x16f   :  { %3197 = vst [vmem:[#allocation6_spill] sm:$0xff] %v2925_v30  ;;  %1001 = vst [vmem:[%s3179_s5 + $0x3d8] sm:$0xff] %v2923_v2  ;;  %v1323_v12 = vadd.f32 %v1322_v17, %v1196_v42  ;;  %v1063_v54 = vadd.f32 %v1062_v13, %v530_v25  ;;  %v1197_v3 = vmul.f32 %v530_v25, %v530_v25  ;;  %v1680_v35 = vpop.f32.mrb[60].mxu0  ;;  %v1776_v20 = vpop.f32.mrb[60].mxu1 }
 0x170   :  { %936 = vst [vmem:[%s3179_s5 + $0x1d0] sm:$0xff] %v530_v25  ;;  %1000 = vst [vmem:[%s3179_s5 + $0x3d0] sm:$0xff] %v2925_v30  ;;  %v545_v24 = vadd.f32 %v1828_v55, %v1680_v35  ;;  %v539_v60 = vpop.f32.mrb[61].mxu0  ;;  %v2941_v5 = vadd.f32 %v1828_v55, %v1776_v20  ;;  %v859_v2 = vpop.f32.mrb[61].mxu1 }
 0x171   :  { %v1064_v42 = vadd.f32 %v1063_v54, %v535_v58  ;;  %v1324_v17 = vadd.f32 %v1323_v12, %v1197_v3  ;;  %v540_v34 = vadd.f32 %v1828_v55, %v539_v60  ;;  %v2943_v28 = vadd.f32 %v1828_v55, %v859_v2 }
 0x172   :  { %3198 = vst [vmem:[#allocation7_spill] sm:$0xff] %v2941_v5  ;;  %939 = vst [vmem:[%s3179_s5 + $0x1e8] sm:$0xff] %v545_v24  ;;  %v1200_v54 = vmul.f32 %v545_v24, %v545_v24 }
 0x173   :  { %1003 = vst [vmem:[%s3179_s5 + $0x3e8] sm:$0xff] %v2941_v5  ;;  %v1325_v13 = vadd.f32 %v1324_v17, %v1198_v39  ;;  %938 = vst [vmem:[%s3179_s5 + $0x1e0] sm:$0xff] %v540_v34  ;;  %v1065_v25 = vadd.f32 %v1064_v42, %v540_v34  ;;  %v1199_v58 = vmul.f32 %v540_v34, %v540_v34  ;;  %v1683_v12 = vpop.f32.mrb[62].mxu0  ;;  %v1779_v2 = vpop.f32.mrb[62].mxu1 }
 0x174   :  { %1002 = vst [vmem:[%s3179_s5 + $0x3e0] sm:$0xff] %v2943_v28  ;;  %v555_v3 = vadd.f32 %v1828_v55, %v1683_v12  ;;  %v549_v35 = vpop.f32.mrb[63].mxu0  ;;  %v2959_v20 = vadd.f32 %v1828_v55, %v1779_v2  ;;  %v869_v60 = vpop.f32.mrb[63].mxu1 }
 0x175   :  { %v1066_v39 = vadd.f32 %v1065_v25, %v545_v24  ;;  %v1326_v17 = vadd.f32 %v1325_v13, %v1199_v58  ;;  %v550_v5 = vadd.f32 %v1828_v55, %v549_v35  ;;  %v2961_v30 = vadd.f32 %v1828_v55, %v869_v60  ;;  %v1829_v58 = vld [vmem:[%s3179_s5 + $0x200] sm:$0xff]  ;;  %v1830_v35 = vld [vmem:[%s3179_s5 + $0x208] sm:$0xff] }
 0x176   :  { %941 = vst [vmem:[%s3179_s5 + $0x1f8] sm:$0xff] %v555_v3  ;;  %1005 = vst [vmem:[%s3179_s5 + $0x3f8] sm:$0xff] %v2959_v20  ;;  %v1202_v55 = vmul.f32 %v555_v3, %v555_v3  ;;  %v1203_v12 = vmul.f32 %v1829_v58, %v1829_v58 }
 0x177   :  { %v1327_v34 = vadd.f32 %v1326_v17, %v1200_v54  ;;  %940 = vst [vmem:[%s3179_s5 + $0x1f0] sm:$0xff] %v550_v5  ;;  %v1067_v42 = vadd.f32 %v1066_v39, %v550_v5  ;;  %v1201_v24 = vmul.f32 %v550_v5, %v550_v5  ;;  %1004 = vst [vmem:[%s3179_s5 + $0x3f0] sm:$0xff] %v2961_v30  ;;  %v1831_v17 = vld [vmem:[%s3179_s5 + $0x210] sm:$0xff] }
 0x178   :  { %v1204_v5 = vmul.f32 %v1830_v35, %v1830_v35 }
 0x179   :  { %v1068_v13 = vadd.f32 %v1067_v42, %v555_v3  ;;  %v1328_v25 = vadd.f32 %v1327_v34, %v1201_v24  ;;  %v1205_v3 = vmul.f32 %v1831_v17, %v1831_v17  ;;  %v1832_v24 = vld [vmem:[%s3179_s5 + $0x218] sm:$0xff] }
 0x17b   :  { %v1329_v2 = vadd.f32 %v1328_v25, %v1202_v55  ;;  %v1069_v54 = vadd.f32 %v1829_v58, %v1068_v13  ;;  %v1206_v55 = vmul.f32 %v1832_v24, %v1832_v24  ;;  %v1833_v58 = vld [vmem:[%s3179_s5 + $0x220] sm:$0xff] }
 0x17d   :  { %v1070_v60 = vadd.f32 %v1830_v35, %v1069_v54  ;;  %v1330_v39 = vadd.f32 %v1329_v2, %v1203_v12  ;;  %v1207_v54 = vmul.f32 %v1833_v58, %v1833_v58  ;;  %v1834_v35 = vld [vmem:[%s3179_s5 + $0x228] sm:$0xff] }
 0x17f   :  { %v1331_v34 = vadd.f32 %v1330_v39, %v1204_v5  ;;  %v1071_v42 = vadd.f32 %v1831_v17, %v1070_v60  ;;  %v1208_v5 = vmul.f32 %v1834_v35, %v1834_v35  ;;  %v1835_v17 = vld [vmem:[%s3179_s5 + $0x230] sm:$0xff] }
 0x181   :  { %v1332_v13 = vadd.f32 %v1331_v34, %v1205_v3  ;;  %v1072_v25 = vadd.f32 %v1832_v24, %v1071_v42  ;;  %v1209_v3 = vmul.f32 %v1835_v17, %v1835_v17  ;;  %v1836_v24 = vld [vmem:[%s3179_s5 + $0x238] sm:$0xff] }
 0x183   :  { %v1073_v12 = vadd.f32 %v1833_v58, %v1072_v25  ;;  %v1333_v2 = vadd.f32 %v1332_v13, %v1206_v55  ;;  %v1210_v25 = vmul.f32 %v1836_v24, %v1836_v24  ;;  %v1837_v58 = vld [vmem:[%s3179_s5 + $0x240] sm:$0xff] }
 0x185   :  { %v1334_v60 = vadd.f32 %v1333_v2, %v1207_v54  ;;  %v1074_v39 = vadd.f32 %v1834_v35, %v1073_v12  ;;  %v1211_v54 = vmul.f32 %v1837_v58, %v1837_v58  ;;  %v1838_v35 = vld [vmem:[%s3179_s5 + $0x248] sm:$0xff] }
 0x187   :  { %v1075_v34 = vadd.f32 %v1835_v17, %v1074_v39  ;;  %v1335_v42 = vadd.f32 %v1334_v60, %v1208_v5  ;;  %v1212_v39 = vmul.f32 %v1838_v35, %v1838_v35  ;;  %v1213_v17 = vmul.f32 %v2398_v36, %v2398_v36 }
 0x189   :  { %v1336_v55 = vadd.f32 %v1335_v42, %v1209_v3  ;;  %v1076_v13 = vadd.f32 %v1836_v24, %v1075_v34  ;;  %v1214_v42 = vmul.f32 %v2394_v31, %v2394_v31  ;;  %v1217_v31 = vmul.f32 %v2442_v0, %v2442_v0 }
 0x18b   :  { %v1077_v12 = vadd.f32 %v1837_v58, %v1076_v13  ;;  %v1337_v2 = vadd.f32 %v1336_v55, %v1210_v25  ;;  %v1839_v25 = vld [vmem:[%s3179_s5 + $0x258] sm:$0xff]  ;;  %v1215_v13 = vmul.f32 %v2420_v50, %v2420_v50 }
 0x18d   :  { %v1338_v5 = vadd.f32 %v1337_v2, %v1211_v54  ;;  %v1078_v60 = vadd.f32 %v1838_v35, %v1077_v12  ;;  %v1216_v12 = vmul.f32 %v2416_v45, %v2416_v45 }
 0x18f   :  { %v1079_v3 = vadd.f32 %v1078_v60, %v2398_v36  ;;  %v1339_v34 = vadd.f32 %v1338_v5, %v1212_v39  ;;  %v1218_v5 = vmul.f32 %v2438_v59, %v2438_v59 }
 0x191   :  { %v1340_v24 = vadd.f32 %v1339_v34, %v1213_v17  ;;  %v1080_v55 = vadd.f32 %v1839_v25, %v1079_v3 }
 0x193   :  { %v1081_v58 = vadd.f32 %v1080_v55, %v2420_v50  ;;  %v1341_v54 = vadd.f32 %v1340_v24, %v1214_v42  ;;  %v1219_v50 = vmul.f32 %v2464_v14, %v2464_v14 }
 0x195   :  { %v1342_v36 = vadd.f32 %v1341_v54, %v1215_v13  ;;  %v1082_v2 = vadd.f32 %v1081_v58, %v2416_v45  ;;  %v1220_v45 = vmul.f32 %v2460_v9, %v2460_v9 }
 0x197   :  { %v1083_v35 = vadd.f32 %v1082_v2, %v2442_v0  ;;  %v1343_v39 = vadd.f32 %v1342_v36, %v1216_v12  ;;  %v1221_v0 = vmul.f32 %v2486_v29, %v2486_v29 }
 0x199   :  { %v1344_v60 = vadd.f32 %v1343_v39, %v1217_v31  ;;  %v1084_v17 = vadd.f32 %v1083_v35, %v2438_v59  ;;  %v1222_v59 = vmul.f32 %v2482_v23, %v2482_v23 }
 0x19b   :  { %v1085_v3 = vadd.f32 %v1084_v17, %v2464_v14  ;;  %v1345_v34 = vadd.f32 %v1344_v60, %v1218_v5  ;;  %v1223_v14 = vmul.f32 %v2508_v46, %v2508_v46 }
 0x19d   :  { %v1346_v42 = vadd.f32 %v1345_v34, %v1219_v50  ;;  %v1086_v24 = vadd.f32 %v1085_v3, %v2460_v9  ;;  %v1224_v9 = vmul.f32 %v2504_v40, %v2504_v40 }
 0x19f   :  { %v1087_v25 = vadd.f32 %v1086_v24, %v2486_v29  ;;  %v1347_v55 = vadd.f32 %v1346_v42, %v1220_v45  ;;  %v1225_v29 = vmul.f32 %v2530_v62, %v2530_v62 }
 0x1a1   :  { %v1348_v13 = vadd.f32 %v1347_v55, %v1221_v0  ;;  %v1088_v58 = vadd.f32 %v1087_v25, %v2482_v23  ;;  %v1226_v23 = vmul.f32 %v2526_v56, %v2526_v56 }
 0x1a3   :  { %v1089_v54 = vadd.f32 %v1088_v58, %v2508_v46  ;;  %v1349_v12 = vadd.f32 %v1348_v13, %v1222_v59  ;;  %v1227_v46 = vmul.f32 %v2552_v15, %v2552_v15 }
 0x1a5   :  { %v1350_v36 = vadd.f32 %v1349_v12, %v1223_v14  ;;  %v1090_v2 = vadd.f32 %v1089_v54, %v2504_v40  ;;  %v1228_v40 = vmul.f32 %v2548_v8, %v2548_v8 }
 0x1a7   :  { %v1091_v31 = vadd.f32 %v1090_v2, %v2530_v62  ;;  %v1351_v35 = vadd.f32 %v1350_v36, %v1224_v9  ;;  %v1229_v62 = vmul.f32 %v2574_v33, %v2574_v33 }
 0x1a9   :  { %v1352_v39 = vadd.f32 %v1351_v35, %v1225_v29  ;;  %v1092_v5 = vadd.f32 %v1091_v31, %v2526_v56  ;;  %v1230_v56 = vmul.f32 %v2570_v26, %v2570_v26 }
 0x1ab   :  { %v1093_v60 = vadd.f32 %v1092_v5, %v2552_v15  ;;  %v1353_v17 = vadd.f32 %v1352_v39, %v1226_v23  ;;  %v1231_v15 = vmul.f32 %v2596_v52, %v2596_v52 }
 0x1ad   :  { %v1354_v50 = vadd.f32 %v1353_v17, %v1227_v46  ;;  %v1094_v3 = vadd.f32 %v1093_v60, %v2548_v8  ;;  %v1232_v8 = vmul.f32 %v2592_v44, %v2592_v44 }
 0x1af   :  { %v1095_v34 = vadd.f32 %v1094_v3, %v2574_v33  ;;  %v1355_v45 = vadd.f32 %v1354_v50, %v1228_v40  ;;  %v1233_v33 = vmul.f32 %v2618_v6, %v2618_v6 }
 0x1b1   :  { %v1356_v42 = vadd.f32 %v1355_v45, %v1229_v62  ;;  %v1096_v24 = vadd.f32 %v1095_v34, %v2570_v26  ;;  %v1234_v26 = vmul.f32 %v2614_v1, %v2614_v1 }
 0x1b3   :  { %v1097_v0 = vadd.f32 %v1096_v24, %v2596_v52  ;;  %v1357_v25 = vadd.f32 %v1356_v42, %v1230_v56  ;;  %v1235_v52 = vmul.f32 %v2640_v27, %v2640_v27 }
 0x1b5   :  { %v1358_v55 = vadd.f32 %v1357_v25, %v1231_v15  ;;  %v1098_v59 = vadd.f32 %v1097_v0, %v2592_v44  ;;  %v1236_v44 = vmul.f32 %v2636_v19, %v2636_v19 }
 0x1b7   :  { %v1099_v13 = vadd.f32 %v1098_v59, %v2618_v6  ;;  %v1359_v58 = vadd.f32 %v1358_v55, %v1232_v8  ;;  %v1237_v6 = vmul.f32 %v2662_v49, %v2662_v49 }
 0x1b9   :  { %v1360_v14 = vadd.f32 %v1359_v58, %v1233_v33  ;;  %v1100_v54 = vadd.f32 %v1099_v13, %v2614_v1  ;;  %v1238_v1 = vmul.f32 %v2658_v41, %v2658_v41 }
 0x1bb   :  { %v1101_v12 = vadd.f32 %v1100_v54, %v2640_v27  ;;  %v1361_v9 = vadd.f32 %v1360_v14, %v1234_v26  ;;  %v1239_v27 = vmul.f32 %v2684_v7, %v2684_v7 }
 0x1bd   :  { %v1362_v36 = vadd.f32 %v1361_v9, %v1235_v52  ;;  %v1102_v2 = vadd.f32 %v1101_v12, %v2636_v19  ;;  %v1240_v19 = vmul.f32 %v2680_v63, %v2680_v63 }
 0x1bf   :  { %v1103_v29 = vadd.f32 %v1102_v2, %v2662_v49  ;;  %v1363_v31 = vadd.f32 %v1362_v36, %v1236_v44  ;;  %v1241_v49 = vmul.f32 %v2706_v32, %v2706_v32 }
 0x1c1   :  { %v1364_v35 = vadd.f32 %v1363_v31, %v1237_v6  ;;  %v1104_v23 = vadd.f32 %v1103_v29, %v2658_v41  ;;  %v1242_v41 = vmul.f32 %v2702_v21, %v2702_v21 }
 0x1c3   :  { %v1105_v39 = vadd.f32 %v1104_v23, %v2684_v7  ;;  %v1365_v5 = vadd.f32 %v1364_v35, %v1238_v1  ;;  %v1243_v7 = vmul.f32 %v2728_v57, %v2728_v57 }
 0x1c5   :  { %v1366_v46 = vadd.f32 %v1365_v5, %v1239_v27  ;;  %v1106_v60 = vadd.f32 %v1105_v39, %v2680_v63  ;;  %v1244_v63 = vmul.f32 %v2724_v48, %v2724_v48  ;;  %v3199_v27 = vld [vmem:[#allocation2_spill] sm:$0xff] }
 0x1c7   :  { %v1107_v17 = vadd.f32 %v1106_v60, %v2706_v32  ;;  %v1367_v40 = vadd.f32 %v1366_v46, %v1240_v19  ;;  %v1245_v32 = vmul.f32 %v2750_v18, %v2750_v18 }
 0x1c9   :  { %v1368_v50 = vadd.f32 %v1367_v40, %v1241_v49  ;;  %v1108_v3 = vadd.f32 %v1107_v17, %v2702_v21  ;;  %v1246_v21 = vmul.f32 %v2746_v11, %v2746_v11  ;;  %v3201_v49 = vld [vmem:[#allocation3_spill] sm:$0xff] }
 0x1cb   :  { %v1109_v62 = vadd.f32 %v1108_v3, %v2728_v57  ;;  %v1369_v34 = vadd.f32 %v1368_v50, %v1242_v41  ;;  %v1247_v57 = vmul.f32 %v2772_v51, %v2772_v51 }
 0x1cd   :  { %v1370_v45 = vadd.f32 %v1369_v34, %v1243_v7  ;;  %v1110_v56 = vadd.f32 %v1109_v62, %v2724_v48  ;;  %v1248_v48 = vmul.f32 %v2768_v38, %v2768_v38  ;;  %v3203_v7 = vld [vmem:[#allocation5_spill] sm:$0xff] }
 0x1ce   :  { %v1262_v62 = vmul.f32 %v3203_v7, %v3203_v7 }
 0x1cf   :  { %v1111_v42 = vadd.f32 %v1110_v56, %v2750_v18  ;;  %v1371_v24 = vadd.f32 %v1370_v45, %v1244_v63  ;;  %v1249_v18 = vmul.f32 %v2794_v16, %v2794_v16  ;;  %v1263_v45 = vmul.f32 %v2943_v28, %v2943_v28 }
 0x1d1   :  { %v1372_v15 = vadd.f32 %v1371_v24, %v1245_v32  ;;  %v1112_v0 = vadd.f32 %v1111_v42, %v2746_v11  ;;  %v1250_v11 = vmul.f32 %v2790_v4, %v2790_v4  ;;  %v3204_v42 = vld [vmem:[#allocation7_spill] sm:$0xff] }
 0x1d2   :  { %v1264_v24 = vmul.f32 %v3204_v42, %v3204_v42 }
 0x1d3   :  { %v1113_v25 = vadd.f32 %v1112_v0, %v2772_v51  ;;  %v1373_v8 = vadd.f32 %v1372_v15, %v1246_v21  ;;  %v1251_v51 = vmul.f32 %v2816_v53, %v2816_v53  ;;  %v1265_v0 = vmul.f32 %v2961_v30, %v2961_v30 }
 0x1d5   :  { %v1374_v55 = vadd.f32 %v1373_v8, %v1247_v57  ;;  %v1114_v59 = vadd.f32 %v1113_v25, %v2768_v38  ;;  %v1252_v38 = vmul.f32 %v2812_v37, %v2812_v37  ;;  %v1266_v8 = vmul.f32 %v2959_v20, %v2959_v20 }
 0x1d7   :  { %v1115_v33 = vadd.f32 %v1114_v59, %v2794_v16  ;;  %v1375_v13 = vadd.f32 %v1374_v55, %v1248_v48  ;;  %v1253_v16 = vmul.f32 %v2838_v22, %v2838_v22 }
 0x1d9   :  { %v1376_v58 = vadd.f32 %v1375_v13, %v1249_v18  ;;  %v1116_v26 = vadd.f32 %v1115_v33, %v2790_v4  ;;  %v1254_v4 = vmul.f32 %v2834_v10, %v2834_v10 }
 0x1db   :  { %v1117_v14 = vadd.f32 %v1116_v26, %v2816_v53  ;;  %v1377_v54 = vadd.f32 %v1376_v58, %v1250_v11  ;;  %v1255_v53 = vmul.f32 %v2860_v61, %v2860_v61 }
 0x1dd   :  { %v1378_v52 = vadd.f32 %v1377_v54, %v1251_v51  ;;  %v1118_v12 = vadd.f32 %v1117_v14, %v2812_v37  ;;  %v1256_v37 = vmul.f32 %v2856_v47, %v2856_v47 }
 0x1df   :  { %v1119_v9 = vadd.f32 %v1118_v12, %v2838_v22  ;;  %v1379_v44 = vadd.f32 %v1378_v52, %v1252_v38  ;;  %v1257_v22 = vmul.f32 %v2882_v43, %v2882_v43 }
 0x1e1   :  { %v1380_v36 = vadd.f32 %v1379_v44, %v1253_v16  ;;  %v1120_v2 = vadd.f32 %v1119_v9, %v2834_v10  ;;  %v1258_v10 = vmul.f32 %v3199_v27, %v3199_v27 }
 0x1e3   :  { %v1121_v6 = vadd.f32 %v1120_v2, %v2860_v61  ;;  %v1381_v29 = vadd.f32 %v1380_v36, %v1254_v4  ;;  %v3200_v61 = vld [vmem:[#allocation4_spill] sm:$0xff] }
 0x1e4   :  { %v1259_v19 = vmul.f32 %v3200_v61, %v3200_v61 }
 0x1e5   :  { %v1382_v31 = vadd.f32 %v1381_v29, %v1255_v53  ;;  %v1122_v1 = vadd.f32 %v1121_v6, %v2856_v47  ;;  %v1260_v47 = vmul.f32 %v3201_v49, %v3201_v49 }
 0x1e7   :  { %v1123_v35 = vadd.f32 %v1122_v1, %v2882_v43  ;;  %v1383_v23 = vadd.f32 %v1382_v31, %v1256_v37  ;;  %v3202_v43 = vld [vmem:[#allocation6_spill] sm:$0xff] }
 0x1e8   :  { %v1261_v41 = vmul.f32 %v3202_v43, %v3202_v43 }
 0x1e9   :  { %v1384_v39 = vadd.f32 %v1383_v23, %v1257_v22  ;;  %v1124_v5 = vadd.f32 %v1123_v35, %v3199_v27 }
 0x1eb   :  { %v1125_v46 = vadd.f32 %v1124_v5, %v3200_v61  ;;  %v1385_v60 = vadd.f32 %v1384_v39, %v1258_v10 }
 0x1ed   :  { %v1386_v17 = vadd.f32 %v1385_v60, %v1259_v19  ;;  %v1126_v40 = vadd.f32 %v1125_v46, %v3201_v49 }
 0x1ef   :  { %v1127_v50 = vadd.f32 %v1126_v40, %v3202_v43  ;;  %v1387_v3 = vadd.f32 %v1386_v17, %v1260_v47 }
 0x1f1   :  { %v1388_v34 = vadd.f32 %v1387_v3, %v1261_v41  ;;  %v1128_v63 = vadd.f32 %v1127_v50, %v3203_v7 }
 0x1f3   :  { %v1129_v56 = vadd.f32 %v1128_v63, %v2943_v28  ;;  %v1389_v32 = vadd.f32 %v1388_v34, %v1262_v62 }
 0x1f5   :  { %v1390_v21 = vadd.f32 %v1389_v32, %v1263_v45  ;;  %v1130_v15 = vadd.f32 %v1129_v56, %v3204_v42 }
 0x1f7   :  { %v1131_v57 = vadd.f32 %v1130_v15, %v2961_v30  ;;  %v1391_v25 = vadd.f32 %v1390_v21, %v1264_v24 }
 0x1f9   :  { %v1132_v48 = vadd.f32 %v1131_v57, %v2959_v20  ;;  %v1392_v55 = vadd.f32 %v1391_v25, %v1265_v0 }
 0x1fb   :  { %v1133_v28 = vrot.slane %v1132_v48, 4  ;;  %v1393_v59 = vadd.f32 %v1392_v55, %v1266_v8 }
 0x1fd   :  { %v1134_v18 = vadd.f32 %v1133_v28, %v1132_v48  ;;  %v1394_v33 = vrot.slane %v1393_v59, 4 }
 0x1ff   :  { %v1135_v13 = vrot.slane %v1134_v18, 2  ;;  %v1395_v11 = vadd.f32 %v1394_v33, %v1393_v59 }
 0x201   :  { %v1136_v58 = vadd.f32 %v1135_v13, %v1134_v18  ;;  %v1396_v26 = vrot.slane %v1395_v11, 2 }
 0x203   :  { %v1137_v51 = vrot.slane %v1136_v58, 1  ;;  %v1397_v14 = vadd.f32 %v1396_v26, %v1395_v11 }
 0x205   :  { %v1398_v54 = vrot.slane %v1397_v14, 1  ;;  %v1138_v30 = vadd.f32 %v1137_v51, %v1136_v58 }
 0x207   :  { %v1399_v38 = vadd.f32 %v1398_v54, %v1397_v14 }
 0x209   :  { %v1401_v52 = vsel %vm1400_vm0, %v1138_v30, %v1399_v38 }
 0x20a   :  { %1402 = vst [vmem:[%s3180_s6] sm:$0x3] %v1401_v52 }

// kernel: next_block.5
= control target key start
LH: loop header
LB: loop body
LE: loop exit
PB: predicated region body
PF: predicated region fallthrough
CT: control target
= control target key end

     0   :  { %s3528_s21 = smov 0   ;;  %s5680_s0 = inlined_call_operand.vmem [shape: f32[4,16,16,128], index: 0, kind: input, shape index: {}]   ;;  %s5681_s1 = inlined_call_operand.vmem [shape: f32[1,128], index: 1, kind: input, shape index: {}]   ;;  %s5682_s2 = inlined_call_operand.vmem [shape: f32[1,128], index: 2, kind: input, shape index: {}]   ;;  %s5683_s3 = inlined_call_operand.vmem [shape: f32[3,384,128], index: 3, kind: input, shape index: {}]   ;;  %s5684_s4 = inlined_call_operand.vmem [shape: f32[1,128], index: 4, kind: input, shape index: {}]   ;;  %s5685_s5 = inlined_call_operand.vmem [shape: f32[4,256,128], index: 5, kind: output, shape index: {0}]   ;;  %s5686_s6 = inlined_call_operand.vmem [shape: f32[4,2,128], index: 6, kind: output, shape index: {1}]  }
   0x1 LB: > { %s2640_s22 = sadd.s32 4294967295, %s3489_s21   ;;  %p2644_p0 = scmp.ge.s32.totalorder %s3489_s21, 1  ;;  %s3489_s21 = sphi %s3528_s21, %s17_s21  }
   0x2   : > { %p215_p1 = scmp.lt.s32.totalorder %s3489_s21, 5 }
   0x4   : > { %p216_p2 = pnand %p2644_p0, %p215_p1 }
   0x6   : > { %219 = sbr.rel (%p216_p2) target bundleno = 603 (0x25b), region = 40 }
   0xd   : > { %v2652_v0 = vld [vmem:[%s5683_s3 + $0x180] sm:$0xff]  ;;  %v2653_v1 = vld [vmem:[%s5683_s3 + $0x188] sm:$0xff]  ;;  %p249_p3 = scmp.lt.s32.totalorder %s2640_s22, 3  ;;  %v5687_v3 = vmov 0.0|0.0   ;;  %v2654_v6 = vld [vmem:[%s5683_s3 + $0x190] sm:$0xff]  ;;  %vm438_vm0 = vcmask 1040384  }
   0xe   : > { %v2684_v2 = vld [vmem:[%s5683_s3 + $0x280] sm:$0xff]  ;;  %3233 = vmatprep.subr.bf16.mxu0 %v5687_v3  ;;  %v3234_v4 = vpack.c.bf16 %v2653_v1, %v2652_v0  ;;  %v2685_v5 = vld [vmem:[%s5683_s3 + $0x288] sm:$0xff]  ;;  %v2655_v7 = vld [vmem:[%s5683_s3 + $0x198] sm:$0xff]  ;;  %vm718_vm1 = vcmask 1045504   ;;  %vm605_vm2 = vcmask 1046528  }
   0xf   : > { %v3281_v8 = vpack.c.bf16 %v2685_v5, %v2684_v2  ;;  %v2686_v9 = vld [vmem:[%s5683_s3 + $0x290] sm:$0xff]  ;;  %v2687_v10 = vld [vmem:[%s5683_s3 + $0x298] sm:$0xff]  ;;  %s5987_s22 = smov (!%p249_p3, %s2640_s22), 3  ;;  %v3237_v11 = vpack.c.bf16 %v2655_v7, %v2654_v6  ;;  %v2688_v13 = vld [vmem:[%s5683_s3 + $0x2a0] sm:$0xff] }
  0x10   : > { %3235 = vmatpush1.bf16.msra.mxu0 %v3234_v4  ;;  %v3285_v12 = vpack.c.bf16 %v2687_v10, %v2686_v9  ;;  %v2689_v14 = vld [vmem:[%s5683_s3 + $0x2a8] sm:$0xff]  ;;  %v2656_v15 = vld [vmem:[%s5683_s3 + $0x1a0] sm:$0xff]  ;;  %s2847_s25 = sshll.u32 %s5987_s22, 8  ;;  %v2658_v18 = vld [vmem:[%s5683_s3 + $0x1b0] sm:$0xff] }
  0x11   : > { %3282 = vmatprep.subr.bf16.mxu1 %v3281_v8  ;;  %3236 = vmatprep.subr.bf16.mxu0 %v5687_v3  ;;  %v2657_v16 = vld [vmem:[%s5683_s3 + $0x1a8] sm:$0xff]  ;;  %v3289_v17 = vpack.c.bf16 %v2689_v14, %v2688_v13  ;;  %v2659_v20 = vld [vmem:[%s5683_s3 + $0x1b8] sm:$0xff]  ;;  %v2690_v21 = vld [vmem:[%s5683_s3 + $0x2b0] sm:$0xff]  ;;  %s3594_s12 = scalar_lea.vmem %s5680_s0, %s2847_s25  ;;  %s5562_s9 = scalar_lea.vmem %s5685_s5, %s2847_s25 }
  0x12   : > { %3284 = vmatpush3.bf16.msra.mxu1 %v3281_v8  ;;  %v3240_v19 = vpack.c.bf16 %v2657_v16, %v2656_v15  ;;  %v2691_v22 = vld [vmem:[%s5683_s3 + $0x2b8] sm:$0xff]  ;;  %v3600_v23 = vld [vmem:[%s5683_s3 + $0x1c0] sm:$0xff]  ;;  %v3605_v24 = vld [vmem:[%s5683_s3 + $0x1c8] sm:$0xff]  ;;  %v3243_v35 = vpack.c.bf16 %v2659_v20, %v2658_v18  ;;  %s2649_s25 = sshll.u32 %s5987_s22, 1 }
  0x13   : > { %3286 = vmatprep.subr.bf16.mxu1 %v3285_v12  ;;  %v2692_v25 = vld [vmem:[%s5683_s3 + $0x2c0] sm:$0xff]  ;;  %v2693_v26 = vld [vmem:[%s5683_s3 + $0x2c8] sm:$0xff]  ;;  %v3616_v27 = vld [vmem:[%s5683_s3 + $0x1d0] sm:$0xff]  ;;  %v3293_v29 = vpack.c.bf16 %v2691_v22, %v2690_v21  ;;  %v3246_v44 = vpack.c.bf16 %v3605_v24, %v3600_v23  ;;  %s262_s13 = scalar_lea.vmem %s5686_s6, %s2649_s25 }
  0x14   : > { %3238 = vmatpush1.bf16.msra.mxu0 %v3237_v11  ;;  %v3621_v28 = vld [vmem:[%s5683_s3 + $0x1d8] sm:$0xff]  ;;  %v2694_v30 = vld [vmem:[%s5683_s3 + $0x2d0] sm:$0xff]  ;;  %v3632_v32 = vld [vmem:[%s5683_s3 + $0x1e0] sm:$0xff]  ;;  %v3297_v45 = vpack.c.bf16 %v2693_v26, %v2692_v25 }
  0x15   : > { %3239 = vmatprep.subr.bf16.mxu0 %v5687_v3  ;;  %v2695_v31 = vld [vmem:[%s5683_s3 + $0x2d8] sm:$0xff]  ;;  %v3637_v33 = vld [vmem:[%s5683_s3 + $0x1e8] sm:$0xff]  ;;  %v263_v34 = vld [vmem:[%s3594_s12] sm:$0xff]  ;;  %v3249_v49 = vpack.c.bf16 %v3621_v28, %v3616_v27 }
  0x16   : > { %3288 = vmatpush3.bf16.msra.mxu1 %v3285_v12  ;;  %v264_v36 = vld [vmem:[%s3594_s12 + $0x8] sm:$0xff]  ;;  %v3644_v37 = vld [vmem:[%s5681_s1] ss:$0 sm:$0xff]  ;;  %v3661_v41 = vld [vmem:[%s5683_s3 + $0x1f0] sm:$0xff]  ;;  %v3690_v56 = vpack.c.bf16 %v2695_v31, %v2694_v30  ;;  %v3252_v57 = vpack.c.bf16 %v3637_v33, %v3632_v32 }
  0x17   : > { %3290 = vmatprep.subr.bf16.mxu1 %v3289_v17  ;;  %v3649_v38 = vld [vmem:[%s5682_s2] ss:$0 sm:$0xff]  ;;  %v2697_v40 = vld [vmem:[%s5683_s3 + $0x2e8] sm:$0xff]  ;;  %v302_v42 = vmul.f32 %v3644_v37, %v263_v34  ;;  %v303_v43 = vmul.f32 %v3644_v37, %v264_v36  ;;  %v3670_v46 = vld [vmem:[%s5683_s3 + $0x1f8] sm:$0xff] }
  0x18   : > { %3241 = vmatpush1.bf16.msra.mxu0 %v3240_v19  ;;  %v2696_v39 = vld [vmem:[%s5683_s3 + $0x2e0] sm:$0xff]  ;;  %v265_v47 = vld [vmem:[%s3594_s12 + $0x10] sm:$0xff]  ;;  %v266_v48 = vld [vmem:[%s3594_s12 + $0x18] sm:$0xff]  ;;  %v3255_v63 = vpack.c.bf16 %v3670_v46, %v3661_v41 }
  0x19   : > { %3242 = vmatprep.subr.bf16.mxu0 %v5687_v3  ;;  %v2698_v50 = vld [vmem:[%s5683_s3 + $0x2f0] sm:$0xff]  ;;  %v2699_v51 = vld [vmem:[%s5683_s3 + $0x2f8] sm:$0xff]  ;;  %v341_v52 = vadd.f32 %v3649_v38, %v302_v42  ;;  %v342_v53 = vadd.f32 %v3649_v38, %v303_v43  ;;  %v3687_v54 = vld [vmem:[%s5683_s3 + $0x200] sm:$0xff]  ;;  %v304_v55 = vmul.f32 %v3644_v37, %v265_v47  ;;  %v3694_v58 = vpack.c.bf16 %v2697_v40, %v2696_v39 }
  0x1a   : > { %3292 = vmatpush3.bf16.msra.mxu1 %v3289_v17  ;;  %v3699_v59 = vld [vmem:[%s5683_s3 + $0x208] sm:$0xff]  ;;  %v305_v60 = vmul.f32 %v3644_v37, %v266_v48  ;;  %v267_v61 = vld [vmem:[%s3594_s12 + $0x20] sm:$0xff]  ;;  %v3718_v6 = vpack.c.bf16 %v2699_v51, %v2698_v50  ;;  %v269_v14 = vld [vmem:[%s3594_s12 + $0x30] sm:$0xff] }
  0x1b   : > { %3294 = vmatprep.subr.bf16.mxu1 %v3293_v29  ;;  %v268_v62 = vld [vmem:[%s3594_s12 + $0x28] sm:$0xff]  ;;  %v373_v0 = vmax.f32 %v341_v52, 0.0  ;;  %v374_v1 = vmax.f32 %v342_v53, 0.0  ;;  %v3710_v2 = vld [vmem:[%s5683_s3] sm:$0xff]  ;;  %v343_v5 = vadd.f32 %v3649_v38, %v304_v55  ;;  %v306_v8 = vmul.f32 %v3644_v37, %v267_v61  ;;  %v270_v19 = vld [vmem:[%s3594_s12 + $0x38] sm:$0xff] }
  0x1c   : > { %3244 = vmatpush1.bf16.msra.mxu0 %v3243_v35  ;;  %v3715_v4 = vld [vmem:[%s5683_s3 + $0x8] sm:$0xff]  ;;  %v344_v7 = vadd.f32 %v3649_v38, %v305_v60  ;;  %v307_v9 = vmul.f32 %v3644_v37, %v268_v62  ;;  %v3258_v12 = vpack.c.bf16 %v3699_v59, %v3687_v54  ;;  %v3750_v24 = vld [vmem:[%s5683_s3 + $0x210] sm:$0xff]  ;;  %v3755_v25 = vld [vmem:[%s5683_s3 + $0x218] sm:$0xff]  ;;  %v308_v31 = vmul.f32 %v3644_v37, %v269_v14 }
  0x1d   : > { %3245 = vmatprep.subr.bf16.mxu0 %v5687_v3  ;;  %v3723_v10 = vrot.slane %v373_v0, 7  ;;  %v442_v11 = vrot.slane %v374_v1, 7  ;;  %v375_v13 = vmax.f32 %v343_v5, 0.0  ;;  %v3314_v15 = vpack.c.bf16 %v3715_v4, %v3710_v2  ;;  %v3767_v30 = vld [vmem:[%s5683_s3 + $0x18] sm:$0xff]  ;;  %v3803_v51 = vld [vmem:[%s5683_s3 + $0x228] sm:$0xff]  ;;  %v3808_v52 = vld [vmem:[%s5683_s3 + $0x20] sm:$0xff] }
  0x1e   : > { %3296 = vmatpush3.bf16.msra.mxu1 %v3293_v29  ;;  %v376_v16 = vmax.f32 %v344_v7, 0.0  ;;  %v345_v17 = vadd.f32 %v3649_v38, %v306_v8  ;;  %v346_v18 = vadd.f32 %v3649_v38, %v307_v9  ;;  %v3762_v29 = vld [vmem:[%s5683_s3 + $0x10] sm:$0xff]  ;;  %v309_v39 = vmul.f32 %v3644_v37, %v270_v19  ;;  %v3813_v53 = vld [vmem:[%s5683_s3 + $0x28] sm:$0xff]  ;;  %v271_v0 = vld [vmem:[%s3594_s12 + $0x40] sm:$0xff] }
  0x1f   : > { %3298 = vmatprep.subr.bf16.mxu1 %v3297_v45  ;;  %v3736_v20 = vsel %vm438_vm0, %v3723_v10, %v442_v11  ;;  %v3740_v21 = vsel %vm438_vm0, 0.0, %v3723_v10  ;;  %v3743_v22 = vsel %vm438_vm0, %v442_v11, 0.0  ;;  %v3745_v23 = vrot.slane %v375_v13, 7  ;;  %v3837_v8 = vld [vmem:[%s5683_s3 + $0x230] sm:$0xff]  ;;  %v3842_v9 = vld [vmem:[%s5683_s3 + $0x238] sm:$0xff]  ;;  %v272_v11 = vld [vmem:[%s3594_s12 + $0x48] sm:$0xff] }
  0x20   : > { %3247 = vmatpush1.bf16.msra.mxu0 %v3246_v44  ;;  %v724_v26 = vrot.slane %v3740_v21, 2  ;;  %v725_v27 = vrot.slane %v3736_v20, 2  ;;  %v445_v28 = vrot.slane %v376_v16, 7  ;;  %v377_v35 = vmax.f32 %v345_v17, 0.0  ;;  %v3866_v19 = vld [vmem:[%s5683_s3 + $0x38] sm:$0xff]  ;;  %vm4304_vm3 = vmneg %vm438_vm0 }
  0x21   : > { %3248 = vmatprep.subr.bf16.mxu0 %v5687_v3  ;;  %v3773_v34 = vsel %vm438_vm0, 0.0, %v3745_v23  ;;  %v378_v36 = vmax.f32 %v346_v18, 0.0  ;;  %v727_v42 = vrot.slane %v3743_v22, 2  ;;  %v3261_v44 = vpack.c.bf16 %v3755_v25, %v3750_v24  ;;  %v3859_v18 = vld [vmem:[%s5683_s3 + $0x30] sm:$0xff] }
  0x22   : > { %3300 = vmatpush3.bf16.msra.mxu1 %v3297_v45  ;;  %v3777_v40 = vsel %vm718_vm1, %v724_v26, %v725_v27  ;;  %v3782_v43 = vsel %vm438_vm0, %v3745_v23, %v445_v28  ;;  %v3789_v45 = vld [vmem:[%s5683_s3 + $0x220] sm:$0xff]  ;;  %v3794_v47 = vsel %vm438_vm0, %v445_v28, 0.0  ;;  %v729_v55 = vrot.slane %v3773_v34, 2  ;;  %v274_v28 = vld [vmem:[%s3594_s12 + $0x58] sm:$0xff] }
  0x23   : > { %3302 = vmatprep.subr.bf16.mxu1 %v3690_v56  ;;  %5812 = vst [vmem:[#allocation2_spill] sm:$0xff] %v3777_v40  ;;  %3025 = vmatprep.mubr.f32.mxu1 %v3777_v40  ;;  %v448_v50 = vrot.slane %v378_v36, 7  ;;  %v730_v60 = vrot.slane %v3782_v43, 2  ;;  %v347_v61 = vadd.f32 %v3649_v38, %v308_v31  ;;  %v348_v62 = vadd.f32 %v3649_v38, %v309_v39 }
  0x24   : > { %3250 = vmatpush1.bf16.msra.mxu0 %v3249_v49  ;;  %v3798_v49 = vrot.slane %v377_v35, 7  ;;  %v732_v1 = vrot.slane %v3794_v47, 2  ;;  %v3849_v13 = vsel %vm718_vm1, %v725_v27, %v727_v42  ;;  %v310_v26 = vmul.f32 %v3644_v37, %v271_v0  ;;  %v273_v27 = vld [vmem:[%s3594_s12 + $0x50] sm:$0xff]  ;;  %v3882_v42 = vld [vmem:[%s5683_s3 + $0x240] sm:$0xff] }
  0x25   : > { %3251 = vmatprep.subr.bf16.mxu0 %v5687_v3  ;;  %v3832_v7 = vsel %vm438_vm0, %v448_v50, 0.0  ;;  %5813 = vst [vmem:[#allocation3_spill] sm:$0xff] %v3849_v13  ;;  %v379_v33 = vmax.f32 %v347_v61, 0.0  ;;  %v3873_v31 = vsel %vm718_vm1, %v729_v55, %v730_v60  ;;  %v311_v39 = vmul.f32 %v3644_v37, %v272_v11  ;;  %v3899_v0 = vld [vmem:[%s5683_s3 + $0x40] sm:$0xff] }
  0x26   : > { %3304 = vmatpush3.bf16.msra.mxu1 %v3690_v56  ;;  %v3825_v5 = vsel %vm438_vm0, %v3798_v49, %v448_v50  ;;  %v3829_v56 = vsel %vm438_vm0, 0.0, %v3798_v49  ;;  %5814 = vst [vmem:[#allocation4_spill] sm:$0xff] %v3873_v31  ;;  %v737_v35 = vrot.slane %v3832_v7, 2  ;;  %v3886_v50 = vsel %vm718_vm1, %v730_v60, %v732_v1  ;;  %v3904_v60 = vld [vmem:[%s5683_s3 + $0x48] sm:$0xff] }
  0x27   : > { %3306 = vmatprep.subr.bf16.mxu1 %v3694_v58  ;;  %v734_v14 = vrot.slane %v3829_v56, 2  ;;  %v735_v32 = vrot.slane %v3825_v5, 2  ;;  %5815 = vst [vmem:[#allocation5_spill] sm:$0xff] %v3886_v50  ;;  %v349_v61 = vadd.f32 %v3649_v38, %v310_v26  ;;  %v350_v11 = vadd.f32 %v3649_v38, %v311_v39  ;;  %v276_v1 = vld [vmem:[%s3594_s12 + $0x68] sm:$0xff]  ;;  %v3967_v39 = vld [vmem:[%s5683_s3 + $0x58] sm:$0xff] }
  0x28   : > { %3253 = vmatpush1.bf16.msra.mxu0 %v3252_v57  ;;  %v380_v57 = vmax.f32 %v348_v62, 0.0  ;;  %v3894_v62 = vld [vmem:[%s5683_s3 + $0x248] sm:$0xff] }
  0x29   : > { %3254 = vmatprep.subr.bf16.mxu0 %v5687_v3  ;;  %v3916_v26 = vsel %vm718_vm1, %v734_v14, %v735_v32  ;;  %v381_v46 = vmax.f32 %v349_v61, 0.0 }
  0x2a   : > { %3308 = vmatpush3.bf16.msra.mxu1 %v3694_v58  ;;  %v3888_v58 = vrot.slane %v379_v33, 7  ;;  %v451_v55 = vrot.slane %v380_v57, 7  ;;  %v312_v33 = vmul.f32 %v3644_v37, %v273_v27  ;;  %v313_v57 = vmul.f32 %v3644_v37, %v274_v28  ;;  %5817 = vst [vmem:[#allocation7_spill] sm:$0xff] %v3916_v26 }
  0x2b   : > { %3310 = vmatprep.subr.bf16.mxu1 %v3718_v6  ;;  %v3929_v27 = vsel %vm718_vm1, %v735_v32, %v737_v35  ;;  %v382_v28 = vmax.f32 %v350_v11, 0.0  ;;  %v3940_v61 = vrot.slane %v381_v46, 7  ;;  %v3947_v35 = vld [vmem:[%s5683_s3 + $0x250] sm:$0xff]  ;;  %v3952_v11 = vld [vmem:[%s5683_s3 + $0x258] sm:$0xff] }
  0x2c   : > { %5816 = vst [vmem:[#allocation6_spill] sm:$0xff] %v3888_v58  ;;  %3256 = vmatpush1.bf16.msra.mxu0 %v3255_v63  ;;  %v3920_v36 = vsel %vm438_vm0, %v3888_v58, %v451_v55  ;;  %v3924_v41 = vsel %vm438_vm0, 0.0, %v3888_v58  ;;  %v275_v63 = vld [vmem:[%s3594_s12 + $0x60] sm:$0xff]  ;;  %5818 = vst [vmem:[#allocation8_spill] sm:$0xff] %v3929_v27  ;;  %v3938_v17 = vsel %vm438_vm0, %v451_v55, 0.0  ;;  %v352_v32 = vadd.f32 %v3649_v38, %v313_v57  ;;  %v3962_v57 = vld [vmem:[%s5683_s3 + $0x50] sm:$0xff] }
  0x2d   : > { %3257 = vmatprep.subr.bf16.mxu0 %v5687_v3  ;;  %5819 = vst [vmem:[#allocation9_spill] sm:$0xff] %v3940_v61  ;;  %v739_v55 = vrot.slane %v3924_v41, 2  ;;  %v454_v46 = vrot.slane %v382_v28, 7  ;;  %v314_v14 = vmul.f32 %v3644_v37, %v275_v63  ;;  %v3974_v54 = vsel %vm438_vm0, 0.0, %v3940_v61 }
  0x2e   : > { %3312 = vmatpush3.bf16.msra.mxu1 %v3718_v6  ;;  %v351_v6 = vadd.f32 %v3649_v38, %v312_v33  ;;  %v740_v33 = vrot.slane %v3920_v36, 2  ;;  %v315_v28 = vmul.f32 %v3644_v37, %v276_v1  ;;  %v742_v2 = vrot.slane %v3938_v17, 2 }
  0x2f   : > { %3313 = vmatprep.subr.bf16.mxu1 %v5687_v3  ;;  %v3983_v63 = vsel %vm438_vm0, %v3940_v61, %v454_v46  ;;  %v3986_v16 = vsel %vm438_vm0, %v454_v46, 0.0  ;;  %v353_v1 = vadd.f32 %v3649_v38, %v314_v14  ;;  %v744_v46 = vrot.slane %v3974_v54, 2 }
  0x30   : > { %3259 = vmatpush1.bf16.msra.mxu0 %v3258_v12  ;;  %v383_v59 = vmax.f32 %v351_v6, 0.0  ;;  %v384_v12 = vmax.f32 %v352_v32, 0.0  ;;  %5820 = vst [vmem:[#allocation10_spill] sm:$0xff] %v3986_v16  ;;  %v745_v6 = vrot.slane %v3983_v63, 2  ;;  %v354_v14 = vadd.f32 %v3649_v38, %v315_v28 }
  0x31   : > { %3026 = vmatmul.mubr.f32.vlgmr.msra.gmra.mrb[0].mxu1 %v3849_v13  ;;  %3260 = vmatprep.subr.bf16.mxu0 %v5687_v3  ;;  %v385_v48 = vmax.f32 %v353_v1, 0.0  ;;  %v5822_v32 = vmov 0.0|0.0   ;;  %v4013_v24 = vsel %vm718_vm1, %v739_v55, %v740_v33  ;;  %v747_v25 = vrot.slane %v3986_v16, 2  ;;  %v4027_v1 = vld [vmem:[%s5683_s3 + $0x268] sm:$0xff]  ;;  %v4032_v55 = vld [vmem:[%s5683_s3 + $0x60] sm:$0xff] }
  0x32   : > { %3315 = vmatpush1.bf16.msra.mxu1 %v3314_v15  ;;  %3028 = vmatprep.mubr.f32.mxu1 %v3873_v31  ;;  %v3993_v4 = vrot.slane %v383_v59, 7  ;;  %v457_v15 = vrot.slane %v384_v12, 7  ;;  %v4006_v59 = vld [vmem:[%s5683_s3 + $0x260] sm:$0xff]  ;;  %v277_v12 = vld [vmem:[%s3594_s12 + $0x70] sm:$0xff]  ;;  %5823 = vst [vmem:[#allocation12_spill] sm:$0xff] %v4013_v24  ;;  %v5825_v31 = vpack.c.bf16 %v3767_v30, %v3762_v29  ;;  %v386_v61 = vmax.f32 %v354_v14, 0.0 }
  0x33   : > { %3316 = vmatprep.subr.bf16.mxu1 %v5687_v3  ;;  %v278_v3 = vld [vmem:[%s3594_s12 + $0x78] sm:$0xff]  ;;  %v4050_v16 = vsel %vm718_vm1, %v740_v33, %v742_v2  ;;  %v4052_v58 = vrot.slane %v385_v48, 7  ;;  %v316_v29 = vmul.f32 %v3644_v37, %v277_v12  ;;  %v279_v48 = vld [vmem:[%s3594_s12 + $0x80] sm:$0xff]  ;;  %v280_v33 = vld [vmem:[%s3594_s12 + $0x88] sm:$0xff] }
  0x34   : > { %5821 = vst [vmem:[#allocation11_spill] sm:$0xff] %v3993_v4  ;;  %3262 = vmatpush1.bf16.msra.mxu0 %v3261_v44  ;;  %v4018_v44 = vsel %vm438_vm0, %v3993_v4, %v457_v15  ;;  %v4022_v28 = vsel %vm438_vm0, 0.0, %v3993_v4  ;;  %v4046_v4 = vsel %vm438_vm0, %v457_v15, 0.0  ;;  %5827 = vst [vmem:[#allocation15_spill] sm:$0xff] %v4050_v16  ;;  %v317_v30 = vmul.f32 %v3644_v37, %v278_v3  ;;  %v4069_v3 = vld [vmem:[%s5683_s3 + $0x270] sm:$0xff] }
  0x35   : > { %3029 = vmatmul.mubr.f32.gmra.mrb[2].mxu1 %v3886_v50  ;;  %3263 = vmatprep.subr.bf16.mxu0 %v5822_v32  ;;  %5824 = vst [vmem:[#allocation13_spill] sm:$0xff] %v4018_v44  ;;  %v4037_v50 = vld [vmem:[%s5683_s3 + $0x68] sm:$0xff]  ;;  %v749_v13 = vrot.slane %v4022_v28, 2  ;;  %v750_v40 = vrot.slane %v4018_v44, 2  ;;  %5826 = vst [vmem:[#allocation14_spill] sm:$0xff] %v4046_v4  ;;  %v4060_v15 = vsel %vm718_vm1, %v744_v46, %v745_v6  ;;  %v460_v14 = vrot.slane %v386_v61, 7 }
  0x36   : > { %3318 = vmatpush1.bf16.msra.mxu1 %v5825_v31  ;;  %3031 = vmatprep.mubr.f32.mxu1 %v3916_v26  ;;  %5828 = vst [vmem:[#allocation16_spill] sm:$0xff] %v4052_v58  ;;  %v5829_v31 = vpack.c.bf16 %v3803_v51, %v3789_v45  ;;  %5830 = vst [vmem:[#allocation17_spill] sm:$0xff] %v4060_v15  ;;  %v4074_v45 = vld [vmem:[%s5683_s3 + $0x278] sm:$0xff]  ;;  %v4079_v51 = vld [vmem:[%s5683_s3 + $0x70] sm:$0xff]  ;;  %v4084_v61 = vsel %vm718_vm1, %v745_v6, %v747_v25  ;;  %v752_v2 = vrot.slane %v4046_v4, 2 }
  0x37   : > { %3319 = vmatprep.subr.bf16.mxu1 %v5822_v32  ;;  %5831 = vst [vmem:[#allocation18_spill] sm:$0xff] %v4084_v61  ;;  %v355_v46 = vadd.f32 %v3649_v38, %v316_v29  ;;  %v356_v12 = vadd.f32 %v3649_v38, %v317_v30  ;;  %v4101_v6 = vsel %vm718_vm1, %v749_v13, %v750_v40  ;;  %v4109_v29 = vsel %vm438_vm0, 0.0, %v4052_v58 }
  0x38   : > { %3265 = vmatpush1.bf16.msra.mxu0 %v5829_v31  ;;  %v4092_v31 = vld [vmem:[%s5683_s3 + $0x78] sm:$0xff]  ;;  %5833 = vst [vmem:[#allocation19_spill] sm:$0xff] %v4101_v6  ;;  %v4105_v25 = vsel %vm438_vm0, %v4052_v58, %v460_v14  ;;  %v611_v30 = vrot.slane %v3740_v21, 1  ;;  %v612_v58 = vrot.slane %v3736_v20, 1  ;;  %v318_v21 = vmul.f32 %v3644_v37, %v279_v48 }
  0x39   : > { %3032 = vmatmul.mubr.f32.gmra.mrb[4].mxu1 %v3929_v27  ;;  %3266 = vmatprep.subr.bf16.mxu0 %v5822_v32  ;;  %v5832_v27 = vpack.c.bf16 %v3813_v53, %v3808_v52  ;;  %5834 = vst [vmem:[#allocation20_spill] sm:$0xff] %v4105_v25  ;;  %v4114_v52 = vsel %vm438_vm0, %v460_v14, 0.0  ;;  %v387_v53 = vmax.f32 %v355_v46, 0.0  ;;  %v319_v4 = vmul.f32 %v3644_v37, %v280_v33  ;;  %v281_v14 = vld [vmem:[%s3594_s12 + $0x90] sm:$0xff]  ;;  %v4141_v33 = vld [vmem:[%s5683_s3 + $0x88] sm:$0xff] }
  0x3a   : > { %3034 = vmatprep.mubr.f32.mxu1 %v4013_v24  ;;  %v5835_v24 = vpack.c.bf16 %v3842_v9, %v3837_v8  ;;  %v754_v46 = vrot.slane %v4109_v29, 2  ;;  %v755_v8 = vrot.slane %v4105_v25, 2  ;;  %v5836_v48 = vpack.c.bf16 %v3866_v19, %v3859_v18 }
  0x3b   : > { %3321 = vmatpush1.bf16.msra.mxu1 %v5832_v27  ;;  %v388_v27 = vmax.f32 %v356_v12, 0.0  ;;  %v4131_v9 = vrot.slane %v387_v53, 7  ;;  %v4136_v12 = vld [vmem:[%s5683_s3 + $0x80] sm:$0xff]  ;;  %v757_v53 = vrot.slane %v4114_v52, 2  ;;  %v357_v26 = vadd.f32 %v3649_v38, %v318_v21 }
  0x3c   : > { %3322 = vmatprep.subr.bf16.mxu1 %v5822_v32  ;;  %3268 = vmatpush1.bf16.msra.mxu0 %v5835_v24  ;;  %v358_v13 = vadd.f32 %v3649_v38, %v319_v4  ;;  %v4156_v25 = vsel %vm718_vm1, %v750_v40, %v752_v2  ;;  %v320_v4 = vmul.f32 %v3644_v37, %v281_v14 }
  0x3d   : > { %3035 = vmatmul.mubr.f32.gmra.mrb[6].mxu1 %v4050_v16  ;;  %3269 = vmatprep.subr.bf16.mxu0 %v5822_v32  ;;  %v463_v24 = vrot.slane %v388_v27, 7  ;;  %v4149_v27 = vsel %vm605_vm2, %v611_v30, %v612_v58  ;;  %v282_v16 = vld [vmem:[%s3594_s12 + $0x98] sm:$0xff]  ;;  %5837 = vst [vmem:[#allocation21_spill] sm:$0xff] %v4156_v25  ;;  %v4164_v19 = vsel %vm438_vm0, 0.0, %v4131_v9  ;;  %v5838_v30 = vpack.c.bf16 %v3894_v62, %v3882_v42 }
  0x3e   : > { %3037 = vmatprep.mubr.f32.mxu1 %v4060_v15  ;;  %1008 = vmatprep.mubr.f32.mxu0 %v4149_v27  ;;  %v389_v2 = vmax.f32 %v357_v26, 0.0  ;;  %v4180_v15 = vsel %vm718_vm1, %v754_v46, %v755_v8  ;;  %v390_v14 = vmax.f32 %v358_v13, 0.0  ;;  %v321_v42 = vmul.f32 %v3644_v37, %v282_v16 }
  0x3f   : > { %3324 = vmatpush1.bf16.msra.mxu1 %v5836_v48  ;;  %v4160_v18 = vsel %vm438_vm0, %v4131_v9, %v463_v24  ;;  %v4172_v40 = vsel %vm438_vm0, %v463_v24, 0.0  ;;  %v614_v48 = vrot.slane %v3743_v22, 1  ;;  %5839 = vst [vmem:[#allocation22_spill] sm:$0xff] %v4180_v15  ;;  %v359_v62 = vadd.f32 %v3649_v38, %v320_v4  ;;  %v283_v24 = vld [vmem:[%s3594_s12 + $0xa0] sm:$0xff] }
  0x40   : > { %3325 = vmatprep.subr.bf16.mxu1 %v5822_v32  ;;  %3271 = vmatpush1.bf16.msra.mxu0 %v5838_v30  ;;  %v284_v30 = vld [vmem:[%s3594_s12 + $0xa8] sm:$0xff]  ;;  %v5840_v26 = vpack.c.bf16 %v3904_v60, %v3899_v0  ;;  %v4191_v22 = vsel %vm718_vm1, %v755_v8, %v757_v53  ;;  %v759_v21 = vrot.slane %v4164_v19, 2  ;;  %v760_v46 = vrot.slane %v4160_v18, 2 }
  0x41   : > { %3038 = vmatmul.mubr.f32.gmra.mrb[8].mxu1 %v4084_v61  ;;  %3272 = vmatprep.subr.bf16.mxu0 %v5822_v32  ;;  %5841 = vst [vmem:[#allocation23_spill] sm:$0xff] %v4191_v22  ;;  %v4195_v13 = vrot.slane %v389_v2, 7  ;;  %v762_v16 = vrot.slane %v4172_v40, 2  ;;  %v466_v4 = vrot.slane %v390_v14, 7  ;;  %v360_v61 = vadd.f32 %v3649_v38, %v321_v42 }
  0x42   : > { %3040 = vmatprep.mubr.f32.mxu1 %v4101_v6  ;;  %v391_v0 = vmax.f32 %v359_v62, 0.0  ;;  %v5843_v60 = vpack.c.bf16 %v3952_v11, %v3947_v35  ;;  %v4208_v53 = vsel %vm605_vm2, %v612_v58, %v614_v48  ;;  %v322_v2 = vmul.f32 %v3644_v37, %v283_v24  ;;  %v4224_v58 = vld [vmem:[%s5683_s3 + $0x90] sm:$0xff]  ;;  %v4229_v48 = vld [vmem:[%s5683_s3 + $0x98] sm:$0xff] }
  0x43   : > { %3327 = vmatpush1.bf16.msra.mxu1 %v5840_v26  ;;  %5842 = vst [vmem:[#allocation24_spill] sm:$0xff] %v4195_v13  ;;  %v4205_v8 = vsel %vm438_vm0, 0.0, %v4195_v13  ;;  %v323_v26 = vmul.f32 %v3644_v37, %v284_v30  ;;  %v4216_v14 = vsel %vm438_vm0, %v4195_v13, %v466_v4  ;;  %v4219_v35 = vsel %vm438_vm0, %v466_v4, 0.0 }
  0x44   : > { %3328 = vmatprep.subr.bf16.mxu1 %v5822_v32  ;;  %3274 = vmatpush1.bf16.msra.mxu0 %v5843_v60  ;;  %5844 = vst [vmem:[#allocation25_spill] sm:$0xff] %v4216_v14  ;;  %v392_v11 = vmax.f32 %v360_v61, 0.0  ;;  %v616_v42 = vrot.slane %v3773_v34, 1  ;;  %v5845_v62 = vpack.c.bf16 %v3967_v39, %v3962_v57  ;;  %v764_v61 = vrot.slane %v4205_v8, 2 }
  0x45   : > { %3041 = vmatmul.mubr.f32.gmra.mrb[10].mxu1 %v4156_v25  ;;  %3275 = vmatprep.subr.bf16.mxu0 %v5822_v32  ;;  %v765_v24 = vrot.slane %v4216_v14, 2  ;;  %v4238_v30 = vrot.slane %v391_v0, 7  ;;  %v617_v4 = vrot.slane %v3782_v43, 1  ;;  %v4243_v34 = vsel %vm718_vm1, %v759_v21, %v760_v46 }
  0x46   : > { %3043 = vmatprep.mubr.f32.mxu1 %v4180_v15  ;;  %5847 = vst [vmem:[#allocation27_spill] sm:$0xff] %v4243_v34  ;;  %v469_v60 = vrot.slane %v392_v11, 7  ;;  %v361_v39 = vadd.f32 %v3649_v38, %v322_v2  ;;  %v362_v57 = vadd.f32 %v3649_v38, %v323_v26  ;;  %v4251_v15 = vsel %vm718_vm1, %v760_v46, %v762_v16  ;;  %v285_v11 = vld [vmem:[%s3594_s12 + $0xb0] sm:$0xff]  ;;  %v286_v2 = vld [vmem:[%s3594_s12 + $0xb8] sm:$0xff]  ;;  %v4274_v16 = vld [vmem:[%s5683_s3 + $0xa0] sm:$0xff] }
  0x47   : > { %3330 = vmatpush1.bf16.msra.mxu1 %v5845_v62  ;;  %5846 = vst [vmem:[#allocation26_spill] sm:$0xff] %v4238_v30  ;;  %v5848_v62 = vpack.c.bf16 %v4027_v1, %v4006_v59  ;;  %5849 = vst [vmem:[#allocation28_spill] sm:$0xff] %v4251_v15  ;;  %v767_v0 = vrot.slane %v4219_v35, 2  ;;  %v4256_v25 = vsel %vm438_vm0, 0.0, %v4238_v30  ;;  %v4279_v26 = vld [vmem:[%s5683_s3 + $0xa8] sm:$0xff]  ;;  %v5850_v21 = vpack.c.bf16 %v4037_v50, %v4032_v55 }
  0x48   : > { %3331 = vmatprep.subr.bf16.mxu1 %v5822_v32  ;;  %v4266_v59 = vsel %vm438_vm0, %v4238_v30, %v469_v60  ;;  %v4269_v1 = vsel %vm438_vm0, %v469_v60, 0.0  ;;  %v393_v46 = vmax.f32 %v361_v39, 0.0  ;;  %v4287_v60 = vsel %vm718_vm1, %v764_v61, %v765_v24 }
  0x49   : > { %3277 = vmatpush1.bf16.msra.mxu0 %v5848_v62  ;;  %3044 = vmatmul.mubr.f32.gmra.mrb[12].mxu1 %v4191_v22  ;;  %v619_v62 = vrot.slane %v3794_v47, 1  ;;  %5851 = vst [vmem:[#allocation29_spill] sm:$0xff] %v4287_v60  ;;  %v769_v39 = vrot.slane %v4256_v25, 2  ;;  %v4291_v22 = vsel %vm605_vm2, %v616_v42, %v617_v4  ;;  %v394_v6 = vmax.f32 %v362_v57, 0.0 }
  0x4a   : > { %3278 = vmatprep.subr.bf16.mxu0 %v5822_v32  ;;  %3046 = vmatprep.mubr.f32.mxu1 %v4243_v34  ;;  %v770_v30 = vrot.slane %v4266_v59, 2  ;;  %v4295_v47 = vrot.slane %v393_v46, 7  ;;  %v324_v50 = vmul.f32 %v3644_v37, %v285_v11  ;;  %v325_v55 = vmul.f32 %v3644_v37, %v286_v2  ;;  %v289_v11 = vld [vmem:[%s3594_s12 + $0xd0] sm:$0xff] }
  0x4b   : > { %3333 = vmatpush1.bf16.msra.mxu1 %v5850_v21  ;;  %v287_v21 = vld [vmem:[%s3594_s12 + $0xc0] sm:$0xff]  ;;  %v5853_v61 = vpack.c.bf16 %v4074_v45, %v4069_v3  ;;  %v4309_v57 = vsel %vm718_vm1, %v765_v24, %v767_v0  ;;  %v772_v46 = vrot.slane %v4269_v1, 2  ;;  %v472_v34 = vrot.slane %v394_v6, 7  ;;  %v288_v0 = vld [vmem:[%s3594_s12 + $0xc8] sm:$0xff] }
  0x4c   : > { %3334 = vmatprep.subr.bf16.mxu1 %v5822_v32  ;;  %5852 = vst [vmem:[#allocation30_spill] sm:$0xff] %v4295_v47  ;;  %5856 = vst [vmem:[#allocation31_spill] sm:$0xff] %v4309_v57  ;;  %v4317_v3 = vsel %vm438_vm0, 0.0, %v4295_v47  ;;  %v4320_v45 = vsel %vm605_vm2, %v617_v4, %v619_v62  ;;  %v363_v2 = vadd.f32 %v3649_v38, %v324_v50 }
  0x4d   : > { %3280 = vmatpush1.bf16.msra.mxu0 %v5853_v61  ;;  %3047 = vmatmul.mubr.f32.gmra.mrb[14].mxu1 %v4251_v15  ;;  %v364_v24 = vadd.f32 %v3649_v38, %v325_v55  ;;  %v5857_v6 = vpack.c.bf16 %v4092_v31, %v4079_v51  ;;  %v4331_v61 = vsel %vm438_vm0, %v4295_v47, %v472_v34  ;;  %v774_v4 = vrot.slane %v4317_v3, 2  ;;  %v290_v47 = vld [vmem:[%s3594_s12 + $0xd8] sm:$0xff] }
  0x4e   : > { %3049 = vmatprep.mubr.f32.mxu1 %v4287_v60  ;;  %5858 = vst [vmem:[#allocation32_spill] sm:$0xff] %v4331_v61  ;;  %v4335_v62 = vsel %vm438_vm0, %v472_v34, 0.0  ;;  %v326_v50 = vmul.f32 %v3644_v37, %v287_v21  ;;  %v4343_v51 = vsel %vm718_vm1, %v769_v39, %v770_v30  ;;  %v775_v31 = vrot.slane %v4331_v61, 2 }
  0x4f   : > { %3336 = vmatpush1.bf16.msra.mxu1 %v5857_v6  ;;  %5859 = vst [vmem:[#allocation33_spill] sm:$0xff] %v4343_v51  ;;  %v395_v55 = vmax.f32 %v363_v2, 0.0  ;;  %v396_v6 = vmax.f32 %v364_v24, 0.0  ;;  %v4349_v34 = vsel %vm718_vm1, %v770_v30, %v772_v46  ;;  %v621_v21 = vrot.slane %v3829_v56, 1  ;;  %v4362_v24 = vld [vmem:[%s5683_s3 + $0xb0] sm:$0xff]  ;;  %v4367_v56 = vld [vmem:[%s5683_s3 + $0xb8] sm:$0xff] }
  0x50   : > { %2701 = vmatmul.mubr.msk.f32.vlgmr.msra.gmra.mrb[0].mxu0 %vm4304_vm3, %v3723_v10  ;;  %3337 = vmatprep.subr.bf16.mxu1 %v5822_v32  ;;  %5860 = vst [vmem:[#allocation34_spill] sm:$0xff] %v4349_v34  ;;  %v327_v60 = vmul.f32 %v3644_v37, %v288_v0  ;;  %v365_v15 = vadd.f32 %v3649_v38, %v326_v50  ;;  %v777_v39 = vrot.slane %v4335_v62, 2  ;;  %v622_v30 = vrot.slane %v3825_v5, 1 }
  0x51   : > { %1013 = vmatprep.mubr.f32.mxu0 %v4208_v53  ;;  %3050 = vmatmul.mubr.f32.gmra.mrb[16].mxu1 %v4309_v57  ;;  %v4357_v61 = vrot.slane %v395_v55, 7  ;;  %v475_v2 = vrot.slane %v396_v6, 7  ;;  %v5862_v46 = vpack.c.bf16 %v4141_v33, %v4136_v12  ;;  %v4375_v0 = vsel %vm718_vm1, %v774_v4, %v775_v31 }
  0x52   : > { %3052 = vmatprep.mubr.f32.mxu1 %v4343_v51  ;;  %5863 = vst [vmem:[#allocation36_spill] sm:$0xff] %v4375_v0  ;;  %v366_v50 = vadd.f32 %v3649_v38, %v327_v60  ;;  %v397_v55 = vmax.f32 %v365_v15, 0.0  ;;  %v328_v6 = vmul.f32 %v3644_v37, %v289_v11  ;;  %v329_v60 = vmul.f32 %v3644_v37, %v290_v47  ;;  %v4407_v47 = vld [vmem:[%s5683_s3 + $0xc0] sm:$0xff] }
  0x53   : > { %5861 = vst [vmem:[#allocation35_spill] sm:$0xff] %v4357_v61  ;;  %3339 = vmatpush1.bf16.msra.mxu1 %v5862_v46  ;;  %v4383_v57 = vsel %vm438_vm0, %v4357_v61, %v475_v2  ;;  %v4387_v12 = vsel %vm438_vm0, 0.0, %v4357_v61  ;;  %v4390_v33 = vsel %vm438_vm0, %v475_v2, 0.0  ;;  %v3347_v4 = vpack.c.bf16 %v4367_v56, %v4362_v24  ;;  %v4412_v2 = vld [vmem:[%s5683_s3 + $0xc8] sm:$0xff] }
  0x54   : > { %1014 = vmatmul.mubr.f32.gmra.mrb[2].mxu0 %v3736_v20  ;;  %3340 = vmatprep.subr.bf16.mxu1 %v5822_v32  ;;  %5864 = vst [vmem:[#allocation37_spill] sm:$0xff] %v4383_v57  ;;  %v779_v15 = vrot.slane %v4387_v12, 2  ;;  %v780_v11 = vrot.slane %v4383_v57, 2  ;;  %v398_v46 = vmax.f32 %v366_v50, 0.0  ;;  %v4400_v51 = vsel %vm605_vm2, %v621_v21, %v622_v30 }
  0x55   : > { %1018 = vmatprep.mubr.f32.mxu0 %v4291_v22  ;;  %3053 = vmatmul.mubr.f32.gmra.mrb[18].mxu1 %v4349_v34  ;;  %v4402_v61 = vrot.slane %v397_v55, 7  ;;  %v367_v24 = vadd.f32 %v3649_v38, %v328_v6  ;;  %v368_v56 = vadd.f32 %v3649_v38, %v329_v60  ;;  %v5866_v21 = vpack.c.bf16 %v4229_v48, %v4224_v58  ;;  %v292_v60 = vld [vmem:[%s3594_s12 + $0xe8] sm:$0xff] }
  0x56   : > { %3055 = vmatprep.mubr.f32.mxu1 %v4375_v0  ;;  %v4421_v50 = vsel %vm718_vm1, %v775_v31, %v777_v39  ;;  %v782_v55 = vrot.slane %v4390_v33, 2  ;;  %v478_v34 = vrot.slane %v398_v46, 7  ;;  %v624_v57 = vrot.slane %v3832_v7, 1  ;;  %v291_v39 = vld [vmem:[%s3594_s12 + $0xe0] sm:$0xff] }
  0x57   : > { %5865 = vst [vmem:[#allocation38_spill] sm:$0xff] %v4402_v61  ;;  %3342 = vmatpush1.bf16.msra.mxu1 %v5866_v21  ;;  %5867 = vst [vmem:[#allocation39_spill] sm:$0xff] %v4421_v50  ;;  %v4430_v6 = vsel %vm718_vm1, %v779_v15, %v780_v11  ;;  %v4434_v58 = vsel %vm438_vm0, 0.0, %v4402_v61  ;;  %v399_v48 = vmax.f32 %v367_v24, 0.0  ;;  %v400_v31 = vmax.f32 %v368_v56, 0.0 }
  0x58   : > { %2703 = vmatmul.mubr.msk.f32.gmra.mrb[4].mxu0 %vm4304_vm3, %v3745_v23  ;;  %3343 = vmatprep.subr.bf16.mxu1 %v5822_v32  ;;  %5868 = vst [vmem:[#allocation40_spill] sm:$0xff] %v4430_v6  ;;  %5869 = vst [vmem:[#allocation41_spill] sm:$0xff] %v4434_v58  ;;  %v4441_v7 = vsel %vm438_vm0, %v4402_v61, %v478_v34  ;;  %v784_v46 = vrot.slane %v4434_v58, 2  ;;  %v4445_v21 = vsel %vm438_vm0, %v478_v34, 0.0 }
  0x59   : > { %1023 = vmatprep.mubr.f32.mxu0 %v4320_v45  ;;  %5870 = vst [vmem:[#allocation42_spill] sm:$0xff] %v4441_v7  ;;  %5871 = vst [vmem:[#allocation43_spill] sm:$0xff] %v4445_v21  ;;  %v3350_v15 = vpack.c.bf16 %v4412_v2, %v4407_v47  ;;  %3056 = vmatmul.mubr.f32.gmra.mrb[20].mxu1 %v4421_v50  ;;  %v785_v24 = vrot.slane %v4441_v7, 2  ;;  %v787_v56 = vrot.slane %v4445_v21, 2  ;;  %v4452_v0 = vrot.slane %v399_v48, 7 }
  0x5a   : > { %v481_v61 = vrot.slane %v400_v31, 7  ;;  %v5873_v58 = vpack.c.bf16 %v4279_v26, %v4274_v16  ;;  %3058 = vmatprep.mubr.f32.mxu1 %v4430_v6  ;;  %v4459_v34 = vsel %vm718_vm1, %v780_v11, %v782_v55  ;;  %v330_v47 = vmul.f32 %v3644_v37, %v291_v39  ;;  %v294_v55 = vld [vmem:[%s3594_s12 + $0xf8] sm:$0xff] }
  0x5b   : > { %5872 = vst [vmem:[#allocation44_spill] sm:$0xff] %v4452_v0  ;;  %5874 = vst [vmem:[#allocation45_spill] sm:$0xff] %v4459_v34  ;;  %v331_v2 = vmul.f32 %v3644_v37, %v292_v60  ;;  %v3492_v50 = vmov 0.0   ;;  %v4468_v48 = vsel %vm718_vm1, %v784_v46, %v785_v24  ;;  %v4471_v16 = vsel %vm605_vm2, %v622_v30, %v624_v57  ;;  %v863_v30 = vld [vmem:[%s5683_s3 + $0x100] sm:$0xff]  ;;  %v864_v60 = vld [vmem:[%s5683_s3 + $0x108] sm:$0xff] }
  0x5c   : > { %3345 = vmatpush1.bf16.msra.mxu1 %v5873_v58  ;;  %v4463_v21 = vrot.slane %v3492_v50, 7  ;;  %1024 = vmatmul.mubr.f32.gmra.mrb[6].mxu0 %v3782_v43  ;;  %5876 = vst [vmem:[#allocation47_spill] sm:$0xff] %v4468_v48  ;;  %v4475_v26 = vsel %vm438_vm0, %v4452_v0, %v481_v61  ;;  %v4479_v11 = vsel %vm438_vm0, 0.0, %v4452_v0  ;;  %v293_v50 = vld [vmem:[%s3594_s12 + $0xf0] sm:$0xff]  ;;  %v4487_v39 = vsel %vm438_vm0, %v481_v61, 0.0 }
  0x5d   : > { %3346 = vmatprep.subr.bf16.mxu1 %v5822_v32  ;;  %5877 = vst [vmem:[#allocation48_spill] sm:$0xff] %v4475_v26  ;;  %1028 = vmatprep.mubr.f32.mxu0 %v4400_v51  ;;  %v789_v58 = vrot.slane %v4479_v11, 2  ;;  %v790_v31 = vrot.slane %v4475_v26, 2  ;;  %5878 = vst [vmem:[#allocation49_spill] sm:$0xff] %v4487_v39  ;;  %v369_v57 = vadd.f32 %v3649_v38, %v330_v47  ;;  %v626_v6 = vrot.slane %v3924_v41, 1  ;;  %v857_v26 = vld [vmem:[%s5683_s3 + $0xd0] sm:$0xff] }
  0x5e   : > { %5875 = vst [vmem:[#allocation46_spill] sm:$0xff] %v4463_v21  ;;  %3059 = vmatmul.mubr.f32.gmra.mrb[22].mxu1 %v4459_v34  ;;  %v4498_v46 = vsel %vm718_vm1, %v785_v24, %v787_v56  ;;  %v627_v61 = vrot.slane %v3920_v36, 1  ;;  %v370_v0 = vadd.f32 %v3649_v38, %v331_v2  ;;  %v792_v47 = vrot.slane %v4487_v39, 2  ;;  %v858_v24 = vld [vmem:[%s5683_s3 + $0xd8] sm:$0xff] }
  0x5f   : > { %5879 = vst [vmem:[#allocation50_spill] sm:$0xff] %v4498_v46  ;;  %3061 = vmatprep.mubr.f32.mxu1 %v4468_v48  ;;  %v401_v56 = vmax.f32 %v369_v57, 0.0  ;;  %v332_v41 = vmul.f32 %v3644_v37, %v293_v50  ;;  %v333_v34 = vmul.f32 %v3644_v37, %v294_v55  ;;  %v3361_v48 = vpack.c.bf16 %v864_v60, %v863_v30 }
  0x60   : > { %3348 = vmatpush1.bf16.msra.mxu1 %v3347_v4  ;;  %2705 = vmatmul.mubr.msk.f32.gmra.mrb[8].mxu0 %vm4304_vm3, %v3798_v49  ;;  %v4518_v4 = vsel %vm718_vm1, %v789_v58, %v790_v31  ;;  %v402_v2 = vmax.f32 %v370_v0, 0.0  ;;  %v4527_v37 = vsel %vm438_vm0, 0.0, %v4463_v21  ;;  %v3353_v55 = vpack.c.bf16 %v858_v24, %v857_v26 }
  0x61   : > { %3349 = vmatprep.subr.bf16.mxu1 %v5822_v32  ;;  %5880 = vst [vmem:[#allocation51_spill] sm:$0xff] %v4518_v4  ;;  %1033 = vmatprep.mubr.f32.mxu0 %v4471_v16  ;;  %v4521_v39 = vrot.slane %v401_v56, 7  ;;  %v371_v57 = vadd.f32 %v3649_v38, %v332_v41  ;;  %v372_v50 = vadd.f32 %v3649_v38, %v333_v34  ;;  %5882 = vst [vmem:[#allocation53_spill] sm:$0xff] %v4527_v37  ;;  %v859_v34 = vld [vmem:[%s5683_s3 + $0xe0] sm:$0xff] }
  0x62   : > { %3062 = vmatmul.mubr.f32.gmra.mrb[24].mxu1 %v4498_v46  ;;  %v4531_v58 = vsel %vm605_vm2, %v626_v6, %v627_v61  ;;  %v484_v0 = vrot.slane %v402_v2, 7  ;;  %v629_v30 = vrot.slane %v3938_v17, 1  ;;  %3362 = vmatprep.subr.bf16.mxu0 %v3361_v48  ;;  %v4536_v60 = vsel %vm718_vm1, %v790_v31, %v792_v47  ;;  %v860_v6 = vld [vmem:[%s5683_s3 + $0xe8] sm:$0xff]  ;;  %v865_v46 = vld [vmem:[%s5683_s3 + $0x110] sm:$0xff] }
  0x63   : > { %5881 = vst [vmem:[#allocation52_spill] sm:$0xff] %v4521_v39  ;;  %3064 = vmatprep.mubr.f32.mxu1 %v4518_v4  ;;  %5883 = vst [vmem:[#allocation54_spill] sm:$0xff] %v4536_v60  ;;  %v4540_v38 = vsel %vm438_vm0, 0.0, %v4521_v39  ;;  %v403_v17 = vmax.f32 %v371_v57, 0.0  ;;  %v404_v26 = vmax.f32 %v372_v50, 0.0  ;;  %3364 = vmatpush3.bf16.msra.mxu0 %v3361_v48  ;;  %v3356_v50 = vpack.c.bf16 %v860_v6, %v859_v34 }
  0x64   : > { %3351 = vmatpush1.bf16.msra.mxu1 %v3350_v15  ;;  %1034 = vmatmul.mubr.f32.gmra.mrb[10].mxu0 %v3825_v5  ;;  %v4552_v15 = vsel %vm438_vm0, %v4521_v39, %v484_v0  ;;  %v794_v31 = vrot.slane %v4540_v38, 2  ;;  %v4556_v47 = vsel %vm438_vm0, %v484_v0, 0.0  ;;  %v4566_v4 = vsel %vm605_vm2, %v627_v61, %v629_v30  ;;  %v5889_v30 = vld [vmem:[#allocation6_spill] sm:$0xff] }
  0x65   : > { %3352 = vmatprep.subr.bf16.mxu1 %v5822_v32  ;;  %5884 = vst [vmem:[#allocation55_spill] sm:$0xff] %v4552_v15  ;;  %1038 = vmatprep.mubr.f32.mxu0 %v4531_v58  ;;  %v795_v56 = vrot.slane %v4552_v15, 2  ;;  %v797_v41 = vrot.slane %v4556_v47, 2  ;;  %v4562_v2 = vrot.slane %v403_v17, 7  ;;  %v487_v57 = vrot.slane %v404_v26, 7  ;;  %v866_v17 = vld [vmem:[%s5683_s3 + $0x118] sm:$0xff] }
  0x66   : > { %3065 = vmatmul.mubr.f32.gmra.mrb[26].mxu1 %v4536_v60  ;;  %v631_v0 = vrot.slane %v3974_v54, 1  ;;  %v632_v24 = vrot.slane %v3983_v63, 1  ;;  %v3365_v60 = vpack.c.bf16 %v866_v17, %v865_v46 }
  0x67   : > { %5885 = vst [vmem:[#allocation56_spill] sm:$0xff] %v4562_v2  ;;  %v4577_v48 = vsel %vm718_vm1, %v794_v31, %v795_v56  ;;  %v4580_v34 = vsel %vm718_vm1, %v795_v56, %v797_v41  ;;  %v4584_v54 = vsel %vm438_vm0, %v4562_v2, %v487_v57  ;;  %v4588_v61 = vsel %vm438_vm0, 0.0, %v4562_v2  ;;  %v861_v31 = vld [vmem:[%s5683_s3 + $0xf0] sm:$0xff]  ;;  %v862_v56 = vld [vmem:[%s5683_s3 + $0xf8] sm:$0xff] }
  0x68   : > { %3354 = vmatpush1.bf16.msra.mxu1 %v3353_v55  ;;  %5886 = vst [vmem:[#allocation57_spill] sm:$0xff] %v4577_v48  ;;  %5887 = vst [vmem:[#allocation58_spill] sm:$0xff] %v4584_v54  ;;  %2707 = vmatmul.mubr.msk.f32.gmra.mrb[12].mxu0 %vm4304_vm3, %v5889_v30  ;;  %v888_v55 = vrot.slane %v4588_v61, 2  ;;  %v889_v6 = vrot.slane %v4584_v54, 2  ;;  %v4597_v26 = vsel %vm438_vm0, %v487_v57, 0.0  ;;  %v606_v41 = vrot.slane %v4527_v37, 1 }
  0x69   : > { %5888 = vst [vmem:[#allocation59_spill] sm:$0xff] %v4588_v61  ;;  %3067 = vmatprep.mubr.f32.mxu1 %v4577_v48  ;;  %5890 = vst [vmem:[#allocation6_spill] sm:$0xff] %v4597_v26  ;;  %3355 = vmatprep.subr.bf16.mxu1 %v5822_v32  ;;  %v891_v48 = vrot.slane %v4597_v26, 2  ;;  %v4611_v57 = vsel %vm438_vm0, %v4463_v21, 0.0  ;;  %v4618_v39 = vsel %vm605_vm2, %v631_v0, %v632_v24  ;;  %v5892_v37 = vld [vmem:[#allocation10_spill] sm:$0xff]  ;;  %v868_v26 = vld [vmem:[%s5683_s3 + $0x128] sm:$0xff] }
  0x6a   : > { %1043 = vmatprep.mubr.f32.mxu0 %v4566_v4  ;;  %3068 = vmatmul.mubr.f32.gmra.mrb[28].mxu1 %v4580_v34  ;;  %v4615_v2 = vsel %vm718_vm1, %v888_v55, %v889_v6  ;;  %v634_v54 = vrot.slane %v5892_v37, 1  ;;  %v867_v61 = vld [vmem:[%s5683_s3 + $0x120] sm:$0xff]  ;;  %v3359_v17 = vpack.c.bf16 %v862_v56, %v861_v31  ;;  %v5894_v37 = vrot.slane %v4463_v21, 1 }
  0x6b   : > { %5891 = vst [vmem:[#allocation60_spill] sm:$0xff] %v4615_v2  ;;  %3070 = vmatprep.mubr.f32.mxu1 %v4615_v2  ;;  %v4629_v46 = vsel %vm718_vm1, %v889_v6, %v891_v48  ;;  %v2764_v55 = vld [vmem:[%s5683_s3 + $0x300] sm:$0xff]  ;;  %v609_v48 = vrot.slane %v4611_v57, 1  ;;  %3366 = vmatprep.subr.bf16.mxu0 %v3365_v60  ;;  %v3369_v6 = vpack.c.bf16 %v868_v26, %v867_v61  ;;  %v636_v56 = vrot.slane %v4022_v28, 1  ;;  %v870_v2 = vld [vmem:[%s5683_s3 + $0x138] sm:$0xff] }
  0x6c   : > { %3357 = vmatpush1.bf16.msra.mxu1 %v3356_v50  ;;  %5893 = vst [vmem:[#allocation10_spill] sm:$0xff] %v4629_v46  ;;  %1044 = vmatmul.mubr.f32.gmra.mrb[14].mxu0 %v3920_v36  ;;  %v4636_v0 = vsel %vm605_vm2, %v606_v41, %v5894_v37  ;;  %v2765_v50 = vld [vmem:[%s5683_s3 + $0x308] sm:$0xff]  ;;  %v4648_v31 = vsel %vm605_vm2, %v632_v24, %v634_v54  ;;  %v637_v41 = vrot.slane %v4018_v44, 1  ;;  %v869_v37 = vld [vmem:[%s5683_s3 + $0x130] sm:$0xff]  ;;  %v5896_v26 = vld [vmem:[#allocation9_spill] sm:$0xff]  ;;  %v5897_v28 = vrot.slane %v4463_v21, 1 }
  0x6d   : > { %3358 = vmatprep.subr.bf16.mxu1 %v5822_v32  ;;  %5895 = vst [vmem:[#allocation61_spill] sm:$0xff] %v4636_v0  ;;  %1048 = vmatprep.mubr.f32.mxu0 %v4618_v39  ;;  %v3394_v61 = vpack.c.bf16 %v2765_v50, %v2764_v55  ;;  %v2766_v24 = vld [vmem:[%s5683_s3 + $0x310] sm:$0xff]  ;;  %v2767_v54 = vld [vmem:[%s5683_s3 + $0x318] sm:$0xff]  ;;  %v5899_v50 = vld [vmem:[#allocation14_spill] sm:$0xff] }
  0x6e   : > { %3071 = vmatmul.mubr.f32.gmra.mrb[30].mxu1 %v4629_v46  ;;  %3368 = vmatpush3.bf16.msra.mxu0 %v3365_v60  ;;  %v4666_v60 = vsel %vm605_vm2, %v5897_v28, %v609_v48  ;;  %v4679_v55 = vsel %vm605_vm2, %v636_v56, %v637_v41  ;;  %v639_v48 = vrot.slane %v5899_v50, 1  ;;  %v871_v28 = vld [vmem:[%s5683_s3 + $0x140] sm:$0xff]  ;;  %v2769_v56 = vld [vmem:[%s5683_s3 + $0x328] sm:$0xff]  ;;  %v874_v46 = vld [vmem:[%s5683_s3 + $0x158] sm:$0xff] }
  0x6f   : > { %1458 = vmatprep.mubr.f32.mxu1 %v4636_v0  ;;  %5898 = vst [vmem:[#allocation9_spill] sm:$0xff] %v4666_v60  ;;  %3370 = vmatprep.subr.bf16.mxu0 %v3369_v6  ;;  %v872_v0 = vld [vmem:[%s5683_s3 + $0x148] sm:$0xff] }
  0x70   : > { %3360 = vmatpush1.bf16.msra.mxu1 %v3359_v17  ;;  %2709 = vmatmul.mubr.msk.f32.gmra.mrb[16].mxu0 %vm4304_vm3, %v5896_v26  ;;  %v3373_v17 = vpack.c.bf16 %v870_v2, %v869_v37  ;;  %v3397_v2 = vpack.c.bf16 %v2767_v54, %v2766_v24  ;;  %v3377_v37 = vpack.c.bf16 %v872_v0, %v871_v28  ;;  %v641_v24 = vrot.slane %v4109_v29, 1  ;;  %v5900_v54 = vld [vmem:[#allocation20_spill] sm:$0xff]  ;;  %v5901_v28 = vld [vmem:[#allocation11_spill] sm:$0xff] }
  0x71   : > { %3393 = vmatprep.subr.bf16.mxu1 %v5822_v32  ;;  %1053 = vmatprep.mubr.f32.mxu0 %v4648_v31  ;;  %v642_v50 = vrot.slane %v5900_v54, 1  ;;  %v2770_v29 = vld [vmem:[%s5683_s3 + $0x330] sm:$0xff] }
  0x72   : > { %3372 = vmatpush3.bf16.msra.mxu0 %v3369_v6  ;;  %v2768_v6 = vld [vmem:[%s5683_s3 + $0x320] sm:$0xff] }
  0x73   : > { %2733 = vmatmul.mubr.msk.f32.vlgmr.msra.gmra.mrb[32].mxu1 %vm4304_vm3, %v4463_v21  ;;  %3374 = vmatprep.subr.bf16.mxu0 %v3373_v17  ;;  %v3400_v0 = vpack.c.bf16 %v2769_v56, %v2768_v6  ;;  %v876_v6 = vld [vmem:[%s5683_s3 + $0x168] sm:$0xff]  ;;  %v646_v56 = vrot.slane %v4164_v19, 1  ;;  %v2774_v19 = vld [vmem:[%s5683_s3 + $0x350] sm:$0xff] }
  0x74   : > { %3395 = vmatpush1.bf16.msra.mxu1 %v3394_v61  ;;  %1463 = vmatprep.mubr.f32.mxu1 %v4666_v60  ;;  %v4700_v61 = vsel %vm605_vm2, %v637_v41, %v639_v48  ;;  %v873_v60 = vld [vmem:[%s5683_s3 + $0x150] sm:$0xff]  ;;  %v2771_v41 = vld [vmem:[%s5683_s3 + $0x338] sm:$0xff]  ;;  %v644_v48 = vrot.slane %v4114_v52, 1  ;;  %v2773_v52 = vld [vmem:[%s5683_s3 + $0x348] sm:$0xff] }
  0x75   : > { %1054 = vmatmul.mubr.f32.gmra.mrb[18].mxu0 %v3983_v63  ;;  %3396 = vmatprep.subr.bf16.mxu1 %v5822_v32 }
  0x76   : > { %1058 = vmatprep.mubr.f32.mxu0 %v4679_v55  ;;  %3376 = vmatpush3.bf16.msra.mxu0 %v3373_v17  ;;  %v4726_v17 = vsel %vm605_vm2, %v641_v24, %v642_v50  ;;  %v877_v24 = vld [vmem:[%s5683_s3 + $0x170] sm:$0xff] }
  0x77   : > { %1464 = vmatmul.mubr.f32.gmra.mrb[34].mxu1 %v4463_v21  ;;  %3378 = vmatprep.subr.bf16.mxu0 %v3377_v37  ;;  %5902 = vst [vmem:[#allocation14_spill] sm:$0xff] %v4726_v17 }
  0x78   : > { %1468 = vmatprep.mubr.f32.mxu1 %v4149_v27  ;;  %3398 = vmatpush1.bf16.msra.mxu1 %v3397_v2  ;;  %v3381_v27 = vpack.c.bf16 %v874_v46, %v873_v60  ;;  %v875_v2 = vld [vmem:[%s5683_s3 + $0x160] sm:$0xff]  ;;  %v3403_v46 = vpack.c.bf16 %v2771_v41, %v2770_v29  ;;  %v5903_v29 = vld [vmem:[#allocation16_spill] sm:$0xff] }
  0x79   : > { %2711 = vmatmul.mubr.msk.f32.gmra.mrb[20].mxu0 %vm4304_vm3, %v5901_v28  ;;  %3399 = vmatprep.subr.bf16.mxu1 %v5822_v32  ;;  %v3385_v60 = vpack.c.bf16 %v876_v6, %v875_v2  ;;  %v2796_v2 = vld [vmem:[%s5683_s3 + $0x400] sm:$0xff]  ;;  %v2797_v6 = vld [vmem:[%s5683_s3 + $0x408] sm:$0xff] }
  0x7a   : > { %1063 = vmatprep.mubr.f32.mxu0 %v4700_v61  ;;  %3380 = vmatpush3.bf16.msra.mxu0 %v3377_v37  ;;  %v647_v37 = vrot.slane %v4160_v18, 1 }
  0x7b   : > { %2735 = vmatmul.mubr.msk.f32.gmra.mrb[36].mxu1 %vm4304_vm3, %v3723_v10  ;;  %v2772_v10 = vld [vmem:[%s5683_s3 + $0x340] sm:$0xff]  ;;  %3382 = vmatprep.subr.bf16.mxu0 %v3381_v27 }
  0x7c   : > { %1473 = vmatprep.mubr.f32.mxu1 %v4208_v53  ;;  %3401 = vmatpush1.bf16.msra.mxu1 %v3400_v0  ;;  %v4747_v53 = vsel %vm605_vm2, %v642_v50, %v644_v48  ;;  %v878_v0 = vld [vmem:[%s5683_s3 + $0x178] sm:$0xff]  ;;  %v649_v48 = vrot.slane %v4172_v40, 1  ;;  %v2776_v40 = vld [vmem:[%s5683_s3 + $0x360] sm:$0xff] }
  0x7d   : > { %1064 = vmatmul.mubr.f32.gmra.mrb[22].mxu0 %v4018_v44  ;;  %3402 = vmatprep.subr.bf16.mxu1 %v5822_v32  ;;  %v2775_v50 = vld [vmem:[%s5683_s3 + $0x358] sm:$0xff]  ;;  %v3389_v41 = vpack.c.bf16 %v878_v0, %v877_v24  ;;  %v652_v24 = vrot.slane %v4216_v14, 1 }
  0x7e   : > { %1068 = vmatprep.mubr.f32.mxu0 %v4726_v17  ;;  %3384 = vmatpush3.bf16.msra.mxu0 %v3381_v27  ;;  %v4773_v27 = vsel %vm605_vm2, %v646_v56, %v647_v37  ;;  %v651_v56 = vrot.slane %v4205_v8, 1  ;;  %v2779_v8 = vld [vmem:[%s5683_s3 + $0x378] sm:$0xff] }
  0x7f   : > { %1474 = vmatmul.mubr.f32.gmra.mrb[38].mxu1 %v3736_v20  ;;  %v3406_v20 = vpack.c.bf16 %v2773_v52, %v2772_v10  ;;  %3386 = vmatprep.subr.bf16.mxu0 %v3385_v60  ;;  %v2777_v10 = vld [vmem:[%s5683_s3 + $0x368] sm:$0xff]  ;;  %v4792_v52 = vpack.c.bf16 %v2797_v6, %v2796_v2  ;;  %v656_v2 = vrot.slane %v4256_v25, 1  ;;  %v657_v6 = vrot.slane %v4266_v59, 1  ;;  %v2783_v25 = vld [vmem:[%s5683_s3 + $0x398] sm:$0xff] }
  0x80   : > { %1478 = vmatprep.mubr.f32.mxu1 %v4291_v22  ;;  %3404 = vmatpush1.bf16.msra.mxu1 %v3403_v46  ;;  %v3409_v46 = vpack.c.bf16 %v2775_v50, %v2774_v19  ;;  %v3412_v0 = vpack.c.bf16 %v2777_v10, %v2776_v40  ;;  %v654_v19 = vrot.slane %v4219_v35, 1  ;;  %v2782_v40 = vld [vmem:[%s5683_s3 + $0x390] sm:$0xff] }
  0x81   : > { %2713 = vmatmul.mubr.msk.f32.gmra.mrb[24].mxu0 %vm4304_vm3, %v5903_v29  ;;  %3405 = vmatprep.subr.bf16.mxu1 %v5822_v32  ;;  %v4852_v10 = vsel %vm605_vm2, %v656_v2, %v657_v6  ;;  %v2786_v2 = vld [vmem:[%s5683_s3 + $0x3b0] sm:$0xff] }
  0x82   : > { %1073 = vmatprep.mubr.f32.mxu0 %v4747_v53  ;;  %3388 = vmatpush3.bf16.msra.mxu0 %v3385_v60  ;;  %v4796_v60 = vsel %vm605_vm2, %v647_v37, %v649_v48  ;;  %v2778_v37 = vld [vmem:[%s5683_s3 + $0x370] sm:$0xff]  ;;  %v2781_v48 = vld [vmem:[%s5683_s3 + $0x388] sm:$0xff]  ;;  %v4832_v35 = vsel %vm605_vm2, %v652_v24, %v654_v19  ;;  %5904 = vst [vmem:[#allocation20_spill] sm:$0xff] %v4852_v10 }
  0x83   : > { %2737 = vmatmul.mubr.msk.f32.gmra.mrb[40].mxu1 %vm4304_vm3, %v3745_v23  ;;  %3390 = vmatprep.subr.bf16.mxu0 %v3389_v41  ;;  %v3415_v50 = vpack.c.bf16 %v2779_v8, %v2778_v37  ;;  %v2785_v37 = vld [vmem:[%s5683_s3 + $0x3a8] sm:$0xff]  ;;  %v661_v8 = vrot.slane %v4317_v3, 1  ;;  %v5905_v19 = vld [vmem:[#allocation32_spill] sm:$0xff]  ;;  %v2787_v3 = vld [vmem:[%s5683_s3 + $0x3b8] sm:$0xff] }
  0x84   : > { %1483 = vmatprep.mubr.f32.mxu1 %v4320_v45  ;;  %3407 = vmatpush1.bf16.msra.mxu1 %v3406_v20  ;;  %v4817_v20 = vsel %vm605_vm2, %v651_v56, %v652_v24  ;;  %v659_v56 = vrot.slane %v4269_v1, 1  ;;  %v3421_v24 = vpack.c.bf16 %v2783_v25, %v2782_v40  ;;  %v3427_v40 = vpack.c.bf16 %v2787_v3, %v2786_v2  ;;  %v2788_v25 = vld [vmem:[%s5683_s3 + $0x3c0] sm:$0xff]  ;;  %v2790_v2 = vld [vmem:[%s5683_s3 + $0x3d0] sm:$0xff] }
  0x85   : > { %1074 = vmatmul.mubr.f32.gmra.mrb[26].mxu0 %v5900_v54  ;;  %3408 = vmatprep.subr.bf16.mxu1 %v5822_v32  ;;  %v669_v3 = vrot.slane %v4390_v33, 1 }
  0x86   : > { %1078 = vmatprep.mubr.f32.mxu0 %v4773_v27  ;;  %3392 = vmatpush3.bf16.msra.mxu0 %v3389_v41  ;;  %v2780_v41 = vld [vmem:[%s5683_s3 + $0x380] sm:$0xff]  ;;  %v4867_v1 = vsel %vm605_vm2, %v657_v6, %v659_v56  ;;  %v2789_v56 = vld [vmem:[%s5683_s3 + $0x3c8] sm:$0xff] }
  0x87   : > { %1484 = vmatmul.mubr.f32.gmra.mrb[42].mxu1 %v3782_v43  ;;  %3442 = vmatprep.subr.bf16.mxu0 %v4792_v52 }
  0x88   : > { %1488 = vmatprep.mubr.f32.mxu1 %v4400_v51  ;;  %3410 = vmatpush1.bf16.msra.mxu1 %v3409_v46  ;;  %v3418_v46 = vpack.c.bf16 %v2781_v48, %v2780_v41  ;;  %v5906_v48 = vld [vmem:[#allocation26_spill] sm:$0xff] }
  0x89   : > { %2715 = vmatmul.mubr.msk.f32.gmra.mrb[28].mxu0 %vm4304_vm3, %v4131_v9  ;;  %3411 = vmatprep.subr.bf16.mxu1 %v5822_v32 }
  0x8a   : > { %1083 = vmatprep.mubr.f32.mxu0 %v4796_v60 }
  0x8b   : > { %2739 = vmatmul.mubr.msk.f32.gmra.mrb[44].mxu1 %vm4304_vm3, %v3798_v49 }
  0x8c   : > { %1493 = vmatprep.mubr.f32.mxu1 %v4471_v16  ;;  %3413 = vmatpush1.bf16.msra.mxu1 %v3412_v0  ;;  %v2784_v0 = vld [vmem:[%s5683_s3 + $0x3a0] sm:$0xff] }
  0x8d   : > { %1084 = vmatmul.mubr.f32.gmra.mrb[30].mxu0 %v4160_v18  ;;  %3414 = vmatprep.subr.bf16.mxu1 %v5822_v32  ;;  %v3424_v41 = vpack.c.bf16 %v2785_v37, %v2784_v0  ;;  %v5907_v0 = vld [vmem:[#allocation37_spill] sm:$0xff] }
  0x8e   : > { %1088 = vmatprep.mubr.f32.mxu0 %v4817_v20  ;;  %v667_v37 = vrot.slane %v5907_v0, 1 }
  0x8f   : > { %1494 = vmatmul.mubr.f32.gmra.mrb[46].mxu1 %v3825_v5 }
  0x90   : > { %1498 = vmatprep.mubr.f32.mxu1 %v4531_v58  ;;  %3416 = vmatpush1.bf16.msra.mxu1 %v3415_v50  ;;  %v662_v50 = vrot.slane %v5905_v19, 1  ;;  %v4937_v33 = vsel %vm605_vm2, %v667_v37, %v669_v3 }
  0x91   : > { %2717 = vmatmul.mubr.msk.f32.gmra.mrb[32].mxu0 %vm4304_vm3, %v4195_v13  ;;  %3417 = vmatprep.subr.bf16.mxu1 %v5822_v32 }
  0x92   : > { %1093 = vmatprep.mubr.f32.mxu0 %v4832_v35  ;;  %v4887_v6 = vsel %vm605_vm2, %v661_v8, %v662_v50  ;;  %v3430_v8 = vpack.c.bf16 %v2789_v56, %v2788_v25  ;;  %v2793_v25 = vld [vmem:[%s5683_s3 + $0x3e8] sm:$0xff]  ;;  %v5909_v56 = vld [vmem:[#allocation41_spill] sm:$0xff] }
  0x93   : > { %2741 = vmatmul.mubr.msk.f32.gmra.mrb[48].mxu1 %vm4304_vm3, %v5889_v30 }
  0x94   : > { %1503 = vmatprep.mubr.f32.mxu1 %v4566_v4  ;;  %3419 = vmatpush1.bf16.msra.mxu1 %v3418_v46  ;;  %v664_v46 = vrot.slane %v4335_v62, 1 }
  0x95   : > { %1094 = vmatmul.mubr.f32.gmra.mrb[34].mxu0 %v4216_v14  ;;  %3420 = vmatprep.subr.bf16.mxu1 %v5822_v32 }
  0x96   : > { %1098 = vmatprep.mubr.f32.mxu0 %v4852_v10  ;;  %v4902_v62 = vsel %vm605_vm2, %v662_v50, %v664_v46 }
  0x97   : > { %1504 = vmatmul.mubr.f32.gmra.mrb[50].mxu1 %v3920_v36 }
  0x98   : > { %1508 = vmatprep.mubr.f32.mxu1 %v4618_v39  ;;  %3422 = vmatpush1.bf16.msra.mxu1 %v3421_v24  ;;  %v666_v24 = vrot.slane %v4387_v12, 1  ;;  %v2791_v12 = vld [vmem:[%s5683_s3 + $0x3d8] sm:$0xff] }
  0x99   : > { %2719 = vmatmul.mubr.msk.f32.gmra.mrb[36].mxu0 %vm4304_vm3, %v5906_v48  ;;  %3423 = vmatprep.subr.bf16.mxu1 %v5822_v32  ;;  %v3433_v46 = vpack.c.bf16 %v2791_v12, %v2790_v2  ;;  %v5910_v12 = vld [vmem:[#allocation35_spill] sm:$0xff] }
  0x9a   : > { %1103 = vmatprep.mubr.f32.mxu0 %v4867_v1  ;;  %v4922_v50 = vsel %vm605_vm2, %v666_v24, %v667_v37  ;;  %v671_v24 = vrot.slane %v5909_v56, 1  ;;  %v2795_v37 = vld [vmem:[%s5683_s3 + $0x3f8] sm:$0xff] }
  0x9b   : > { %2743 = vmatmul.mubr.msk.f32.gmra.mrb[52].mxu1 %vm4304_vm3, %v5896_v26 }
  0x9c   : > { %1513 = vmatprep.mubr.f32.mxu1 %v4648_v31  ;;  %3425 = vmatpush1.bf16.msra.mxu1 %v3424_v41  ;;  %v5908_v41 = vld [vmem:[#allocation30_spill] sm:$0xff] }
  0x9d   : > { %1104 = vmatmul.mubr.f32.gmra.mrb[38].mxu0 %v4266_v59  ;;  %3426 = vmatprep.subr.bf16.mxu1 %v5822_v32 }
  0x9e   : > { %1108 = vmatprep.mubr.f32.mxu0 %v4887_v6 }
  0x9f   : > { %1514 = vmatmul.mubr.f32.gmra.mrb[54].mxu1 %v3983_v63 }
  0xa0   : > { %1518 = vmatprep.mubr.f32.mxu1 %v4679_v55  ;;  %3428 = vmatpush1.bf16.msra.mxu1 %v3427_v40  ;;  %v2792_v40 = vld [vmem:[%s5683_s3 + $0x3e0] sm:$0xff] }
  0xa1   : > { %2721 = vmatmul.mubr.msk.f32.gmra.mrb[40].mxu0 %vm4304_vm3, %v5908_v41  ;;  %3429 = vmatprep.subr.bf16.mxu1 %v5822_v32  ;;  %v3436_v2 = vpack.c.bf16 %v2793_v25, %v2792_v40 }
  0xa2   : > { %1113 = vmatprep.mubr.f32.mxu0 %v4902_v62 }
  0xa3   : > { %2745 = vmatmul.mubr.msk.f32.gmra.mrb[56].mxu1 %vm4304_vm3, %v5901_v28 }
  0xa4   : > { %1523 = vmatprep.mubr.f32.mxu1 %v4700_v61  ;;  %3431 = vmatpush1.bf16.msra.mxu1 %v3430_v8  ;;  %v672_v8 = vrot.slane %v4441_v7, 1 }
  0xa5   : > { %1114 = vmatmul.mubr.f32.gmra.mrb[42].mxu0 %v5905_v19  ;;  %3432 = vmatprep.subr.bf16.mxu1 %v5822_v32 }
  0xa6   : > { %1118 = vmatprep.mubr.f32.mxu0 %v4922_v50  ;;  %v4957_v3 = vsel %vm605_vm2, %v671_v24, %v672_v8  ;;  %v676_v24 = vrot.slane %v4479_v11, 1 }
  0xa7   : > { %1524 = vmatmul.mubr.f32.gmra.mrb[58].mxu1 %v4018_v44  ;;  %v2794_v44 = vld [vmem:[%s5683_s3 + $0x3f0] sm:$0xff] }
  0xa8   : > { %1528 = vmatprep.mubr.f32.mxu1 %v4726_v17  ;;  %3434 = vmatpush1.bf16.msra.mxu1 %v3433_v46  ;;  %v5911_v46 = vld [vmem:[#allocation43_spill] sm:$0xff]  ;;  %v3439_v25 = vpack.c.bf16 %v2795_v37, %v2794_v44  ;;  %v5916_v44 = vld [vmem:[#allocation49_spill] sm:$0xff]  ;;  %v681_v37 = vrot.slane %v4540_v38, 1 }
  0xa9   : > { %2723 = vmatmul.mubr.msk.f32.gmra.mrb[44].mxu0 %vm4304_vm3, %v5910_v12  ;;  %3435 = vmatprep.subr.bf16.mxu1 %v5822_v32  ;;  %v674_v40 = vrot.slane %v5911_v46, 1  ;;  %v679_v11 = vrot.slane %v5916_v44, 1  ;;  %v682_v46 = vrot.slane %v4552_v15, 1 }
  0xaa   : > { %1123 = vmatprep.mubr.f32.mxu0 %v4937_v33 }
  0xab   : > { %2747 = vmatmul.mubr.msk.f32.gmra.mrb[60].mxu1 %vm4304_vm3, %v5903_v29  ;;  %v4966_v56 = vsel %vm605_vm2, %v672_v8, %v674_v40  ;;  %v5913_v29 = vld [vmem:[#allocation48_spill] sm:$0xff] }
  0xac   : > { %1533 = vmatprep.mubr.f32.mxu1 %v4747_v53  ;;  %3437 = vmatpush1.bf16.msra.mxu1 %v3436_v2  ;;  %5912 = vst [vmem:[#allocation11_spill] sm:$0xff] %v4966_v56  ;;  %v677_v17 = vrot.slane %v5913_v29, 1  ;;  %v5914_v2 = vld [vmem:[#allocation38_spill] sm:$0xff]  ;;  %v5918_v40 = vld [vmem:[#allocation44_spill] sm:$0xff] }
  0xad   : > { %1124 = vmatmul.mubr.f32.gmra.mrb[46].mxu0 %v5907_v0  ;;  %3438 = vmatprep.subr.bf16.mxu1 %v5822_v32 }
  0xae   : > { %1128 = vmatprep.mubr.f32.mxu0 %v4957_v3  ;;  %v4979_v32 = vsel %vm605_vm2, %v676_v24, %v677_v17  ;;  %v4987_v8 = vsel %vm605_vm2, %v677_v17, %v679_v11  ;;  %v684_v17 = vrot.slane %v4556_v47, 1  ;;  %v5921_v24 = vld [vmem:[#allocation59_spill] sm:$0xff]  ;;  %v5922_v11 = vld [vmem:[#allocation58_spill] sm:$0xff] }
  0xaf   : > { %1534 = vmatmul.mubr.f32.gmra.mrb[62].mxu1 %v5900_v54  ;;  %5915 = vst [vmem:[#allocation32_spill] sm:$0xff] %v4979_v32  ;;  %5917 = vst [vmem:[#allocation37_spill] sm:$0xff] %v4987_v8  ;;  %v881_v44 = vrot.slane %v5921_v24, 1 }
  0xb0   : > { %1538 = vmatprep.mubr.f32.mxu1 %v4773_v27  ;;  %3440 = vmatpush1.bf16.msra.mxu1 %v3439_v25  ;;  %v5000_v25 = vsel %vm605_vm2, %v681_v37, %v682_v46  ;;  %v5008_v38 = vsel %vm605_vm2, %v682_v46, %v684_v17  ;;  %v5923_v37 = vld [vmem:[#allocation52_spill] sm:$0xff]  ;;  %v5925_v46 = vld [vmem:[#allocation6_spill] sm:$0xff] }
  0xb1   : > { %2725 = vmatmul.mubr.msk.f32.gmra.mrb[48].mxu0 %vm4304_vm3, %v5914_v2  ;;  %5919 = vst [vmem:[#allocation30_spill] sm:$0xff] %v5000_v25  ;;  %5920 = vst [vmem:[#allocation41_spill] sm:$0xff] %v5008_v38  ;;  %v884_v17 = vrot.slane %v5925_v46, 1  ;;  %v722_v46 = vrot.slane %v4611_v57, 2 }
  0xb2   : > { %1133 = vmatprep.mubr.f32.mxu0 %v4966_v56 }
  0xb3   : > { %2749 = vmatmul.mubr.msk.f32.gmra.mrb[64].mxu1 %vm4304_vm3, %v4131_v9 }
  0xb4   : > { %1543 = vmatprep.mubr.f32.mxu1 %v4796_v60 }
  0xb5   : > { %1134 = vmatmul.mubr.f32.gmra.mrb[50].mxu0 %v4441_v7 }
  0xb6   : > { %1138 = vmatprep.mubr.f32.mxu0 %v4979_v32 }
  0xb7   : > { %1544 = vmatmul.mubr.f32.gmra.mrb[66].mxu1 %v4160_v18 }
  0xb8   : > { %1548 = vmatprep.mubr.f32.mxu1 %v4817_v20 }
  0xb9   : > { %2727 = vmatmul.mubr.msk.f32.gmra.mrb[52].mxu0 %vm4304_vm3, %v5918_v40 }
  0xba   : > { %1143 = vmatprep.mubr.f32.mxu0 %v4987_v8 }
  0xbb   : > { %2751 = vmatmul.mubr.msk.f32.gmra.mrb[68].mxu1 %vm4304_vm3, %v4195_v13  ;;  %v882_v13 = vrot.slane %v5922_v11, 1 }
  0xbc   : > { %1553 = vmatprep.mubr.f32.mxu1 %v4832_v35 }
  0xbd   : > { %1144 = vmatmul.mubr.f32.gmra.mrb[54].mxu0 %v5913_v29  ;;  %v5021_v47 = vsel %vm605_vm2, %v881_v44, %v882_v13  ;;  %v5029_v24 = vsel %vm605_vm2, %v882_v13, %v884_v17  ;;  %v5928_v44 = vld [vmem:[#allocation56_spill] sm:$0xff]  ;;  %v2799_v17 = vld [vmem:[%s5683_s3 + $0x418] sm:$0xff] }
  0xbe   : > { %1148 = vmatprep.mubr.f32.mxu0 %v5000_v25  ;;  %5924 = vst [vmem:[#allocation35_spill] sm:$0xff] %v5021_v47  ;;  %5926 = vst [vmem:[#allocation43_spill] sm:$0xff] %v5029_v24 }
  0xbf   : > { %1554 = vmatmul.mubr.f32.gmra.mrb[70].mxu1 %v4216_v14 }
  0xc0   : > { %1558 = vmatprep.mubr.f32.mxu1 %v4852_v10  ;;  %v5927_v10 = vld [vmem:[#allocation53_spill] sm:$0xff] }
  0xc1   : > { %2729 = vmatmul.mubr.msk.f32.gmra.mrb[56].mxu0 %vm4304_vm3, %v5923_v37  ;;  %v719_v14 = vrot.slane %v5927_v10, 2  ;;  %v2798_v10 = vld [vmem:[%s5683_s3 + $0x410] sm:$0xff] }
  0xc2   : > { %1153 = vmatprep.mubr.f32.mxu0 %v5008_v38 }
  0xc3   : > { %2753 = vmatmul.mubr.msk.f32.gmra.mrb[72].mxu1 %vm4304_vm3, %v5906_v48  ;;  %v720_v48 = vrot.slane %v4463_v21, 2  ;;  %v2800_v21 = vld [vmem:[%s5683_s3 + $0x420] sm:$0xff] }
  0xc4   : > { %1563 = vmatprep.mubr.f32.mxu1 %v4867_v1 }
  0xc5   : > { %1154 = vmatmul.mubr.f32.gmra.mrb[58].mxu0 %v4552_v15  ;;  %v5043_v13 = vsel %vm718_vm1, %v719_v14, %v720_v48  ;;  %v5055_v57 = vsel %vm718_vm1, %v720_v48, %v722_v46  ;;  %v3445_v14 = vpack.c.bf16 %v2799_v17, %v2798_v10  ;;  %v2802_v46 = vld [vmem:[%s5683_s3 + $0x430] sm:$0xff]  ;;  %v2803_v10 = vld [vmem:[%s5683_s3 + $0x438] sm:$0xff]  ;;  %v5931_v17 = vld [vmem:[#allocation3_spill] sm:$0xff] }
  0xc6   : > { %1158 = vmatprep.mubr.f32.mxu0 %v5021_v47  ;;  %5929 = vst [vmem:[#allocation49_spill] sm:$0xff] %v5055_v57  ;;  %v5935_v47 = vld [vmem:[#allocation8_spill] sm:$0xff] }
  0xc7   : > { %1564 = vmatmul.mubr.f32.gmra.mrb[74].mxu1 %v4266_v59 }
  0xc8   : > { %1568 = vmatprep.mubr.f32.mxu1 %v4887_v6 }
  0xc9   : > { %2731 = vmatmul.mubr.msk.f32.gmra.mrb[60].mxu0 %vm4304_vm3, %v5928_v44  ;;  %v5933_v44 = vld [vmem:[#allocation5_spill] sm:$0xff] }
  0xca   : > { %1163 = vmatprep.mubr.f32.mxu0 %v5029_v24  ;;  %v2801_v24 = vld [vmem:[%s5683_s3 + $0x428] sm:$0xff] }
  0xcb   : > { %2755 = vmatmul.mubr.msk.f32.gmra.mrb[76].mxu1 %vm4304_vm3, %v5908_v41  ;;  %v3449_v48 = vpack.c.bf16 %v2801_v24, %v2800_v21  ;;  %v2804_v21 = vld [vmem:[%s5683_s3 + $0x440] sm:$0xff]  ;;  %v2805_v24 = vld [vmem:[%s5683_s3 + $0x448] sm:$0xff] }
  0xcc   : > { %1573 = vmatprep.mubr.f32.mxu1 %v4902_v62 }
  0xcd   : > { %1164 = vmatmul.mubr.f32.gmra.mrb[62].mxu0 %v5922_v11  ;;  %v5930_v11 = vld [vmem:[#allocation2_spill] sm:$0xff] }
  0xce   : > { %3105 = vmatprep.mubr.f32.mxu0 %v5043_v13 }
  0xcf   : > { %1574 = vmatmul.mubr.f32.gmra.mrb[78].mxu1 %v5905_v19 }
  0xd0   : > { %1578 = vmatprep.mubr.f32.mxu1 %v4922_v50 }
  0xd1   : > { %3106 = vmatmul.mubr.f32.vlgmr.msra.gmra.mrb[64].mxu0 %v5055_v57  ;;  %v5936_v57 = vld [vmem:[#allocation12_spill] sm:$0xff] }
  0xd2   : > { %3108 = vmatprep.mubr.f32.mxu0 %v5930_v11  ;;  %3444 = vmatpush3.bf16.msra.mxu0 %v4792_v52  ;;  %v5932_v11 = vld [vmem:[#allocation4_spill] sm:$0xff]  ;;  %v3453_v52 = vpack.c.bf16 %v2803_v10, %v2802_v46  ;;  %v2807_v10 = vld [vmem:[%s5683_s3 + $0x458] sm:$0xff] }
  0xd3   : > { %2757 = vmatmul.mubr.msk.f32.gmra.mrb[80].mxu1 %vm4304_vm3, %v5910_v12  ;;  %3446 = vmatprep.subr.bf16.mxu0 %v3445_v14  ;;  %v2806_v46 = vld [vmem:[%s5683_s3 + $0x450] sm:$0xff] }
  0xd4   : > { %1583 = vmatprep.mubr.f32.mxu1 %v4937_v33 }
  0xd5   : > { %3109 = vmatmul.mubr.f32.gmra.mrb[66].mxu0 %v5931_v17  ;;  %v5934_v17 = vld [vmem:[#allocation7_spill] sm:$0xff] }
  0xd6   : > { %3111 = vmatprep.mubr.f32.mxu0 %v5932_v11  ;;  %3448 = vmatpush3.bf16.msra.mxu0 %v3445_v14  ;;  %v3457_v14 = vpack.c.bf16 %v2805_v24, %v2804_v21  ;;  %v2808_v21 = vld [vmem:[%s5683_s3 + $0x460] sm:$0xff]  ;;  %v2809_v24 = vld [vmem:[%s5683_s3 + $0x468] sm:$0xff] }
  0xd7   : > { %1584 = vmatmul.mubr.f32.gmra.mrb[82].mxu1 %v5907_v0  ;;  %3450 = vmatprep.subr.bf16.mxu0 %v3449_v48 }
  0xd8   : > { %1588 = vmatprep.mubr.f32.mxu1 %v4957_v3 }
  0xd9   : > { %3112 = vmatmul.mubr.f32.gmra.mrb[68].mxu0 %v5933_v44 }
  0xda   : > { %3114 = vmatprep.mubr.f32.mxu0 %v5934_v17  ;;  %3452 = vmatpush3.bf16.msra.mxu0 %v3449_v48  ;;  %v3461_v48 = vpack.c.bf16 %v2807_v10, %v2806_v46  ;;  %v2810_v46 = vld [vmem:[%s5683_s3 + $0x470] sm:$0xff]  ;;  %v2811_v10 = vld [vmem:[%s5683_s3 + $0x478] sm:$0xff] }
  0xdb   : > { %2759 = vmatmul.mubr.msk.f32.gmra.mrb[84].mxu1 %vm4304_vm3, %v5914_v2  ;;  %3454 = vmatprep.subr.bf16.mxu0 %v3453_v52  ;;  %v5938_v2 = vld [vmem:[#allocation17_spill] sm:$0xff] }
  0xdc   : > { %1593 = vmatprep.mubr.f32.mxu1 %v4966_v56  ;;  %v5937_v56 = vld [vmem:[#allocation15_spill] sm:$0xff] }
  0xdd   : > { %3115 = vmatmul.mubr.f32.gmra.mrb[70].mxu0 %v5935_v47 }
  0xde   : > { %3117 = vmatprep.mubr.f32.mxu0 %v5936_v57  ;;  %3456 = vmatpush3.bf16.msra.mxu0 %v3453_v52  ;;  %v3465_v52 = vpack.c.bf16 %v2809_v24, %v2808_v21  ;;  %v5941_v21 = vld [vmem:[#allocation21_spill] sm:$0xff]  ;;  %v5942_v24 = vld [vmem:[#allocation22_spill] sm:$0xff] }
  0xdf   : > { %1594 = vmatmul.mubr.f32.gmra.mrb[86].mxu1 %v4441_v7  ;;  %3458 = vmatprep.subr.bf16.mxu0 %v3457_v14  ;;  %v5940_v7 = vld [vmem:[#allocation19_spill] sm:$0xff] }
  0xe0   : > { %1598 = vmatprep.mubr.f32.mxu1 %v4979_v32  ;;  %v5939_v32 = vld [vmem:[#allocation18_spill] sm:$0xff] }
  0xe1   : > { %3118 = vmatmul.mubr.f32.gmra.mrb[72].mxu0 %v5937_v56 }
  0xe2   : > { %3120 = vmatprep.mubr.f32.mxu0 %v5938_v2  ;;  %3460 = vmatpush3.bf16.msra.mxu0 %v3457_v14  ;;  %v3469_v14 = vpack.c.bf16 %v2811_v10, %v2810_v46  ;;  %v5945_v46 = vld [vmem:[#allocation28_spill] sm:$0xff]  ;;  %v5946_v10 = vld [vmem:[#allocation29_spill] sm:$0xff] }
  0xe3   : > { %2761 = vmatmul.mubr.msk.f32.gmra.mrb[88].mxu1 %vm4304_vm3, %v5918_v40  ;;  %3462 = vmatprep.subr.bf16.mxu0 %v3461_v48 }
  0xe4   : > { %1603 = vmatprep.mubr.f32.mxu1 %v4987_v8  ;;  %v5943_v8 = vld [vmem:[#allocation23_spill] sm:$0xff] }
  0xe5   : > { %3121 = vmatmul.mubr.f32.gmra.mrb[74].mxu0 %v5939_v32 }
  0xe6   : > { %3123 = vmatprep.mubr.f32.mxu0 %v5940_v7  ;;  %3464 = vmatpush3.bf16.msra.mxu0 %v3461_v48  ;;  %v5944_v48 = vld [vmem:[#allocation27_spill] sm:$0xff] }
  0xe7   : > { %1604 = vmatmul.mubr.f32.gmra.mrb[90].mxu1 %v5913_v29  ;;  %3466 = vmatprep.subr.bf16.mxu0 %v3465_v52 }
  0xe8   : > { %1608 = vmatprep.mubr.f32.mxu1 %v5000_v25  ;;  %v5958_v25 = vld [vmem:[#allocation57_spill] sm:$0xff] }
  0xe9   : > { %3124 = vmatmul.mubr.f32.gmra.mrb[76].mxu0 %v5941_v21 }
  0xea   : > { %3126 = vmatprep.mubr.f32.mxu0 %v5942_v24  ;;  %3468 = vmatpush3.bf16.msra.mxu0 %v3465_v52  ;;  %v5947_v52 = vld [vmem:[#allocation31_spill] sm:$0xff] }
  0xeb   : > { %2763 = vmatmul.mubr.msk.f32.gmra.mrb[92].mxu1 %vm4304_vm3, %v5923_v37  ;;  %3470 = vmatprep.subr.bf16.mxu0 %v3469_v14 }
  0xec   : > { %1613 = vmatprep.mubr.f32.mxu1 %v5008_v38  ;;  %v5948_v38 = vld [vmem:[#allocation33_spill] sm:$0xff] }
  0xed   : > { %3127 = vmatmul.mubr.f32.gmra.mrb[78].mxu0 %v5943_v8 }
  0xee   : > { %3129 = vmatprep.mubr.f32.mxu0 %v5944_v48  ;;  %3472 = vmatpush3.bf16.msra.mxu0 %v3469_v14  ;;  %v5949_v14 = vld [vmem:[#allocation34_spill] sm:$0xff] }
  0xef   : > { %1614 = vmatmul.mubr.f32.gmra.mrb[94].mxu1 %v4552_v15  ;;  %v5956_v15 = vld [vmem:[#allocation51_spill] sm:$0xff] }
  0xf0   : > { %1957 = vmatprep.mubr.f32.mxu1 %v4291_v22  ;;  %v5950_v22 = vld [vmem:[#allocation36_spill] sm:$0xff] }
  0xf1   : > { %3130 = vmatmul.mubr.f32.gmra.mrb[80].mxu0 %v5945_v46 }
  0xf2   : > { %3132 = vmatprep.mubr.f32.mxu0 %v5946_v10 }
  0xf3   : > { %2813 = vmatmul.mubr.msk.f32.vlgmr.msra.gmra.mrb[96].mxu1 %vm4304_vm3, %v3745_v23  ;;  %v5951_v23 = vld [vmem:[#allocation39_spill] sm:$0xff] }
  0xf4   : > { %1962 = vmatprep.mubr.f32.mxu1 %v4320_v45  ;;  %v5952_v45 = vld [vmem:[#allocation40_spill] sm:$0xff] }
  0xf5   : > { %3133 = vmatmul.mubr.f32.gmra.mrb[82].mxu0 %v5947_v52 }
  0xf6   : > { %3135 = vmatprep.mubr.f32.mxu0 %v5948_v38 }
  0xf7   : > { %1963 = vmatmul.mubr.f32.gmra.mrb[98].mxu1 %v3782_v43  ;;  %v5953_v43 = vld [vmem:[#allocation45_spill] sm:$0xff] }
  0xf8   : > { %1967 = vmatprep.mubr.f32.mxu1 %v4400_v51  ;;  %v5954_v51 = vld [vmem:[#allocation47_spill] sm:$0xff] }
  0xf9   : > { %3136 = vmatmul.mubr.f32.gmra.mrb[84].mxu0 %v5949_v14 }
  0xfa   : > { %3138 = vmatprep.mubr.f32.mxu0 %v5950_v22 }
  0xfb   : > { %2815 = vmatmul.mubr.msk.f32.gmra.mrb[100].mxu1 %vm4304_vm3, %v3798_v49  ;;  %v5955_v49 = vld [vmem:[#allocation50_spill] sm:$0xff] }
  0xfc   : > { %1972 = vmatprep.mubr.f32.mxu1 %v4471_v16 }
  0xfd   : > { %3139 = vmatmul.mubr.f32.gmra.mrb[86].mxu0 %v5951_v23 }
  0xfe   : > { %3141 = vmatprep.mubr.f32.mxu0 %v5952_v45 }
  0xff   : > { %1973 = vmatmul.mubr.f32.gmra.mrb[102].mxu1 %v3825_v5  ;;  %v5957_v5 = vld [vmem:[#allocation54_spill] sm:$0xff] }
 0x100   : > { %1977 = vmatprep.mubr.f32.mxu1 %v4531_v58 }
 0x101   : > { %3142 = vmatmul.mubr.f32.gmra.mrb[88].mxu0 %v5953_v43 }
 0x102   : > { %3144 = vmatprep.mubr.f32.mxu0 %v5954_v51 }
 0x103   : > { %2817 = vmatmul.mubr.msk.f32.gmra.mrb[104].mxu1 %vm4304_vm3, %v5889_v30 }
 0x104   : > { %1982 = vmatprep.mubr.f32.mxu1 %v4566_v4  ;;  %v3027_v16 = vpop.f32.mrb[0].mxu1 }
 0x105   : > { %3145 = vmatmul.mubr.f32.gmra.mrb[90].mxu0 %v5955_v49  ;;  %v1235_v37 = vpop.f32.mrb[1].mxu1 }
 0x106   : > { %3147 = vmatprep.mubr.f32.mxu0 %v5956_v15 }
 0x107   : > { %1983 = vmatmul.mubr.f32.gmra.mrb[106].mxu1 %v3920_v36 }
 0x108   : > { %1987 = vmatprep.mubr.f32.mxu1 %v4618_v39  ;;  %v5167_v58 = vpop.f32.mrb[2].mxu1 }
 0x109   : > { %3148 = vmatmul.mubr.f32.gmra.mrb[92].mxu0 %v5957_v5  ;;  %v1245_v29 = vpop.f32.mrb[3].mxu1 }
 0x10a   : > { %3150 = vmatprep.mubr.f32.mxu0 %v5958_v25 }
 0x10b   : > { %2819 = vmatmul.mubr.msk.f32.gmra.mrb[108].mxu1 %vm4304_vm3, %v5896_v26  ;;  %v5959_v26 = vld [vmem:[#allocation13_spill] sm:$0xff] }
 0x10c   : > { %1992 = vmatprep.mubr.f32.mxu1 %v4648_v31  ;;  %v5175_v4 = vpop.f32.mrb[4].mxu1 }
 0x10d   : > { %3151 = vmatmul.mubr.f32.gmra.mrb[94].mxu0 %v4580_v34  ;;  %v5178_v36 = vpop.f32.mrb[5].mxu1 }
 0x10e   : > { %3185 = vmatprep.mubr.f32.mxu0 %v5932_v11 }
 0x10f   : > { %1993 = vmatmul.mubr.f32.gmra.mrb[110].mxu1 %v3983_v63 }
 0x110   : > { %1997 = vmatprep.mubr.f32.mxu1 %v4679_v55  ;;  %v5183_v39 = vpop.f32.mrb[6].mxu1  ;;  %v5960_v55 = vld [vmem:[#allocation14_spill] sm:$0xff] }
 0x111   : > { %3186 = vmatmul.mubr.f32.vlgmr.msra.gmra.mrb[96].mxu0 %v5933_v44  ;;  %v5186_v30 = vpop.f32.mrb[7].mxu1 }
 0x112   : > { %3188 = vmatprep.mubr.f32.mxu0 %v5934_v17  ;;  %v5962_v17 = vld [vmem:[#allocation24_spill] sm:$0xff] }
 0x113   : > { %2821 = vmatmul.mubr.msk.f32.gmra.mrb[112].mxu1 %vm4304_vm3, %v5901_v28 }
 0x114   : > { %2002 = vmatprep.mubr.f32.mxu1 %v4700_v61  ;;  %v5193_v31 = vpop.f32.mrb[8].mxu1  ;;  %v5961_v61 = vld [vmem:[#allocation16_spill] sm:$0xff] }
 0x115   : > { %3189 = vmatmul.mubr.f32.gmra.mrb[98].mxu0 %v5935_v47  ;;  %v5196_v63 = vpop.f32.mrb[9].mxu1 }
 0x116   : > { %3191 = vmatprep.mubr.f32.mxu0 %v5936_v57 }
 0x117   : > { %2003 = vmatmul.mubr.f32.gmra.mrb[114].mxu1 %v5959_v26 }
 0x118   : > { %2007 = vmatprep.mubr.f32.mxu1 %v5960_v55  ;;  %v5201_v44 = vpop.f32.mrb[10].mxu1 }
 0x119   : > { %3192 = vmatmul.mubr.f32.gmra.mrb[100].mxu0 %v5937_v56  ;;  %v5204_v28 = vpop.f32.mrb[11].mxu1 }
 0x11a   : > { %3194 = vmatprep.mubr.f32.mxu0 %v5938_v2 }
 0x11b   : > { %2823 = vmatmul.mubr.msk.f32.gmra.mrb[116].mxu1 %vm4304_vm3, %v5961_v61 }
 0x11c   : > { %2012 = vmatprep.mubr.f32.mxu1 %v4747_v53  ;;  %v5211_v47 = vpop.f32.mrb[12].mxu1 }
 0x11d   : > { %3195 = vmatmul.mubr.f32.gmra.mrb[102].mxu0 %v5939_v32  ;;  %v5214_v57 = vpop.f32.mrb[13].mxu1 }
 0x11e   : > { %3197 = vmatprep.mubr.f32.mxu0 %v5940_v7 }
 0x11f   : > { %2013 = vmatmul.mubr.f32.gmra.mrb[118].mxu1 %v5900_v54 }
 0x120   : > { %2017 = vmatprep.mubr.f32.mxu1 %v4773_v27  ;;  %v5219_v56 = vpop.f32.mrb[14].mxu1 }
 0x121   : > { %3198 = vmatmul.mubr.f32.gmra.mrb[104].mxu0 %v5941_v21  ;;  %v5222_v2 = vpop.f32.mrb[15].mxu1 }
 0x122   : > { %3200 = vmatprep.mubr.f32.mxu0 %v5942_v24 }
 0x123   : > { %2825 = vmatmul.mubr.msk.f32.gmra.mrb[120].mxu1 %vm4304_vm3, %v4131_v9  ;;  %v1010_v53 = vpop.f32.mrb[0].mxu0 }
 0x124   : > { %2022 = vmatprep.mubr.f32.mxu1 %v4796_v60  ;;  %v5228_v7 = vadd.f32 %v1235_v37, %v1010_v53  ;;  %v1012_v54 = vpop.f32.mrb[1].mxu0  ;;  %v5231_v27 = vpop.f32.mrb[16].mxu1 }
 0x125   : > { %3201 = vmatmul.mubr.f32.gmra.mrb[106].mxu0 %v5943_v8  ;;  %v5234_v32 = vpop.f32.mrb[17].mxu1 }
 0x126   : > { %3203 = vmatprep.mubr.f32.mxu0 %v5944_v48 }
 0x127   : > { %2023 = vmatmul.mubr.f32.gmra.mrb[122].mxu1 %v4160_v18  ;;  %v1015_v11 = vpop.f32.mrb[2].mxu0 }
 0x128   : > { %2027 = vmatprep.mubr.f32.mxu1 %v4817_v20  ;;  %v5238_v9 = vadd.f32 %v3027_v16, %v1015_v11  ;;  %v1017_v60 = vpop.f32.mrb[3].mxu0  ;;  %v5241_v37 = vpop.f32.mrb[18].mxu1  ;;  %v5964_v16 = vld [vmem:[#allocation20_spill] sm:$0xff] }
 0x129   : > { %3204 = vmatmul.mubr.f32.gmra.mrb[108].mxu0 %v5945_v46  ;;  %v5244_v8 = vpop.f32.mrb[19].mxu1  ;;  %v5963_v46 = vld [vmem:[#allocation25_spill] sm:$0xff] }
 0x12a   : > { %3206 = vmatprep.mubr.f32.mxu0 %v5946_v10 }
 0x12b   : > { %2827 = vmatmul.mubr.msk.f32.gmra.mrb[124].mxu1 %vm4304_vm3, %v5962_v17  ;;  %v1020_v21 = vpop.f32.mrb[4].mxu0 }
 0x12c   : > { %2032 = vmatprep.mubr.f32.mxu1 %v4832_v35  ;;  %v5250_v18 = vadd.f32 %v1245_v29, %v1020_v21  ;;  %v1022_v20 = vpop.f32.mrb[5].mxu0  ;;  %v5253_v24 = vpop.f32.mrb[20].mxu1  ;;  %v5968_v21 = vld [vmem:[#allocation38_spill] sm:$0xff] }
 0x12d   : > { %3207 = vmatmul.mubr.f32.gmra.mrb[110].mxu0 %v5947_v52  ;;  %v5256_v48 = vpop.f32.mrb[21].mxu1  ;;  %v5969_v20 = vld [vmem:[#allocation11_spill] sm:$0xff] }
 0x12e   : > { %3209 = vmatprep.mubr.f32.mxu0 %v5948_v38  ;;  %v5965_v38 = vld [vmem:[#allocation26_spill] sm:$0xff] }
 0x12f   : > { %2033 = vmatmul.mubr.f32.gmra.mrb[126].mxu1 %v5963_v46  ;;  %v1025_v10 = vpop.f32.mrb[6].mxu0  ;;  %v5970_v46 = vld [vmem:[#allocation49_spill] sm:$0xff] }
 0x130   : > { %2037 = vmatprep.mubr.f32.mxu1 %v5964_v16  ;;  %v5261_v26 = vadd.f32 %v5167_v58, %v1025_v10  ;;  %v1027_v29 = vpop.f32.mrb[7].mxu0  ;;  %v5971_v16 = vld [vmem:[#allocation42_spill] sm:$0xff] }
 0x131   : > { %3210 = vmatmul.mubr.f32.gmra.mrb[112].mxu0 %v5949_v14  ;;  %v5264_v35 = vpop.f32.mrb[22].mxu1 }
 0x132   : > { %3212 = vmatprep.mubr.f32.mxu0 %v5950_v22  ;;  %v5267_v52 = vpop.f32.mrb[23].mxu1 }
 0x133   : > { %2829 = vmatmul.mubr.msk.f32.gmra.mrb[128].mxu1 %vm4304_vm3, %v5965_v38  ;;  %v1030_v55 = vpop.f32.mrb[8].mxu0  ;;  %v5972_v38 = vld [vmem:[#allocation32_spill] sm:$0xff] }
 0x134   : > { %2042 = vmatprep.mubr.f32.mxu1 %v4867_v1  ;;  %v5274_v61 = vadd.f32 %v5178_v36, %v1030_v55  ;;  %v1032_v58 = vpop.f32.mrb[9].mxu0 }
 0x135   : > { %3213 = vmatmul.mubr.f32.gmra.mrb[114].mxu0 %v5951_v23  ;;  %v5277_v14 = vpop.f32.mrb[24].mxu1 }
 0x136   : > { %3215 = vmatprep.mubr.f32.mxu0 %v5952_v45  ;;  %v5280_v22 = vpop.f32.mrb[25].mxu1 }
 0x137   : > { %2043 = vmatmul.mubr.f32.gmra.mrb[130].mxu1 %v4266_v59  ;;  %v1035_v53 = vpop.f32.mrb[10].mxu0 }
 0x138   : > { %2047 = vmatprep.mubr.f32.mxu1 %v4887_v6  ;;  %v5285_v54 = vadd.f32 %v5175_v4, %v1035_v53  ;;  %v1037_v1 = vpop.f32.mrb[11].mxu0 }
 0x139   : > { %3216 = vmatmul.mubr.f32.gmra.mrb[116].mxu0 %v5953_v43  ;;  %v5288_v36 = vpop.f32.mrb[26].mxu1 }
 0x13a   : > { %3218 = vmatprep.mubr.f32.mxu0 %v5954_v51  ;;  %v5291_v23 = vpop.f32.mrb[27].mxu1 }
 0x13b   : > { %2831 = vmatmul.mubr.msk.f32.gmra.mrb[132].mxu1 %vm4304_vm3, %v5908_v41  ;;  %v1040_v59 = vpop.f32.mrb[12].mxu0 }
 0x13c   : > { %2052 = vmatprep.mubr.f32.mxu1 %v4902_v62  ;;  %v5298_v6 = vadd.f32 %v5186_v30, %v1040_v59  ;;  %v1042_v45 = vpop.f32.mrb[13].mxu0  ;;  %v5973_v59 = vld [vmem:[#allocation37_spill] sm:$0xff] }
 0x13d   : > { %3219 = vmatmul.mubr.f32.gmra.mrb[118].mxu0 %v5955_v49  ;;  %v5301_v43 = vpop.f32.mrb[28].mxu1 }
 0x13e   : > { %3221 = vmatprep.mubr.f32.mxu0 %v5956_v15  ;;  %v5304_v51 = vpop.f32.mrb[29].mxu1 }
 0x13f   : > { %2053 = vmatmul.mubr.f32.gmra.mrb[134].mxu1 %v5905_v19  ;;  %v1045_v4 = vpop.f32.mrb[14].mxu0 }
 0x140   : > { %2057 = vmatprep.mubr.f32.mxu1 %v4922_v50  ;;  %v5309_v41 = vadd.f32 %v5183_v39, %v1045_v4  ;;  %v1047_v62 = vpop.f32.mrb[15].mxu0  ;;  %v5966_v39 = vld [vmem:[#allocation60_spill] sm:$0xff] }
 0x141   : > { %3222 = vmatmul.mubr.f32.gmra.mrb[120].mxu0 %v5957_v5  ;;  %v5312_v30 = vpop.f32.mrb[30].mxu1 }
 0x142   : > { %3224 = vmatprep.mubr.f32.mxu0 %v5958_v25  ;;  %v5315_v49 = vpop.f32.mrb[31].mxu1 }
 0x143   : > { %2833 = vmatmul.mubr.msk.f32.gmra.mrb[136].mxu1 %vm4304_vm3, %v5910_v12  ;;  %v1050_v15 = vpop.f32.mrb[16].mxu0 }
 0x144   : > { %2062 = vmatprep.mubr.f32.mxu1 %v4937_v33  ;;  %v5322_v19 = vadd.f32 %v5196_v63, %v1050_v15  ;;  %v1052_v50 = vpop.f32.mrb[17].mxu0  ;;  %v5967_v63 = vld [vmem:[#allocation10_spill] sm:$0xff] }
 0x145   : > { %3225 = vmatmul.mubr.f32.gmra.mrb[122].mxu0 %v4580_v34  ;;  %v5974_v50 = vld [vmem:[#allocation48_spill] sm:$0xff] }
 0x146   : > { %v1460_v5 = vpop.f32.mrb[32].mxu1  ;;  %3227 = vmatprep.mubr.f32.mxu0 %v5966_v39 }
 0x147   : > { %v5327_v25 = vadd.f32 %v1460_v5, %v5228_v7  ;;  %v1462_v11 = vpop.f32.mrb[33].mxu1  ;;  %2063 = vmatmul.mubr.f32.gmra.mrb[138].mxu1 %v5907_v0  ;;  %v5975_v5 = vld [vmem:[#allocation30_spill] sm:$0xff] }
 0x148   : > { %v1055_v60 = vpop.f32.mrb[18].mxu0  ;;  %2067 = vmatprep.mubr.f32.mxu1 %v4957_v3 }
 0x149   : > { %v5332_v33 = vadd.f32 %v5193_v31, %v1055_v60  ;;  %v1057_v12 = vpop.f32.mrb[19].mxu0  ;;  %3228 = vmatmul.mubr.f32.gmra.mrb[124].mxu0 %v5967_v63  ;;  %v5977_v63 = vld [vmem:[#allocation41_spill] sm:$0xff] }
 0x14a   : > { %v1465_v17 = vpop.f32.mrb[34].mxu1  ;;  %3230 = vmatprep.mubr.f32.mxu0 %v5043_v13  ;;  %v5976_v12 = vld [vmem:[#allocation52_spill] sm:$0xff] }
 0x14b   : > { %v5337_v34 = vadd.f32 %v1465_v17, %v5238_v9  ;;  %v1467_v7 = vpop.f32.mrb[35].mxu1  ;;  %2835 = vmatmul.mubr.msk.f32.gmra.mrb[140].mxu1 %vm4304_vm3, %v5968_v21 }
 0x14c   : > { %v1060_v0 = vpop.f32.mrb[20].mxu0  ;;  %2072 = vmatprep.mubr.f32.mxu1 %v5969_v20  ;;  %v5978_v20 = vld [vmem:[#allocation55_spill] sm:$0xff] }
 0x14d   : > { %v5344_v3 = vadd.f32 %v5204_v28, %v1060_v0  ;;  %v1062_v31 = vpop.f32.mrb[21].mxu0  ;;  %3231 = vmatmul.mubr.f32.gmra.mrb[126].mxu0 %v5970_v46 }
 0x14e   : > { %v1470_v10 = vpop.f32.mrb[36].mxu1  ;;  %v5979_v31 = vld [vmem:[#allocation35_spill] sm:$0xff] }
 0x14f   : > { %v5348_v13 = vadd.f32 %v1470_v10, %v5250_v18  ;;  %v1472_v9 = vpop.f32.mrb[37].mxu1  ;;  %2073 = vmatmul.mubr.f32.gmra.mrb[142].mxu1 %v5971_v16 }
 0x150   : > { %v1065_v29 = vpop.f32.mrb[22].mxu0  ;;  %2077 = vmatprep.mubr.f32.mxu1 %v5972_v38  ;;  %v5981_v38 = vld [vmem:[#allocation43_spill] sm:$0xff] }
 0x151   : > { %v5353_v55 = vadd.f32 %v5201_v44, %v1065_v29  ;;  %v1067_v58 = vpop.f32.mrb[23].mxu0 }
 0x152   : > { %v1475_v53 = vpop.f32.mrb[38].mxu1 }
 0x153   : > { %v5356_v28 = vadd.f32 %v1475_v53, %v5261_v26  ;;  %v1477_v1 = vpop.f32.mrb[39].mxu1  ;;  %2837 = vmatmul.mubr.msk.f32.gmra.mrb[144].mxu1 %vm4304_vm3, %v5918_v40 }
 0x154   : > { %v1070_v18 = vpop.f32.mrb[24].mxu0  ;;  %2082 = vmatprep.mubr.f32.mxu1 %v5973_v59  ;;  %v5982_v59 = vld [vmem:[#allocation58_spill] sm:$0xff] }
 0x155   : > { %v5363_v45 = vadd.f32 %v5214_v57, %v1070_v18  ;;  %v1072_v4 = vpop.f32.mrb[25].mxu0 }
 0x156   : > { %v1480_v62 = vpop.f32.mrb[40].mxu1  ;;  %v5983_v4 = vld [vmem:[#allocation61_spill] sm:$0xff] }
 0x157   : > { %v5366_v44 = vadd.f32 %v1480_v62, %v5274_v61  ;;  %v1482_v15 = vpop.f32.mrb[41].mxu1  ;;  %2083 = vmatmul.mubr.f32.gmra.mrb[146].mxu1 %v5974_v50 }
 0x158   : > { %v1075_v26 = vpop.f32.mrb[26].mxu0  ;;  %2087 = vmatprep.mubr.f32.mxu1 %v5975_v5 }
 0x159   : > { %v1301_v39 = vadd.f32 %v5211_v47, %v1075_v26  ;;  %v1077_v40 = vpop.f32.mrb[27].mxu0 }
 0x15a   : > { %v1485_v11 = vpop.f32.mrb[42].mxu1  ;;  %v5985_v40 = vld [vmem:[#allocation9_spill] sm:$0xff] }
 0x15b   : > { %v5372_v60 = vadd.f32 %v1485_v11, %v5285_v54  ;;  %v1487_v57 = vpop.f32.mrb[43].mxu1  ;;  %2839 = vmatmul.mubr.msk.f32.gmra.mrb[148].mxu1 %vm4304_vm3, %v5976_v12 }
 0x15c   : > { %v1080_v61 = vpop.f32.mrb[28].mxu0  ;;  %2092 = vmatprep.mubr.f32.mxu1 %v5977_v63 }
 0x15d   : > { %v1306_v17 = vadd.f32 %v5222_v2, %v1080_v61  ;;  %v1082_v7 = vpop.f32.mrb[29].mxu0  ;;  %v5980_v2 = vld [vmem:[#allocation56_spill] sm:$0xff] }
 0x15e   : > { %v1490_v21 = vpop.f32.mrb[44].mxu1 }
 0x15f   : > { %v5380_v0 = vadd.f32 %v1490_v21, %v5298_v6  ;;  %v1492_v47 = vpop.f32.mrb[45].mxu1  ;;  %2093 = vmatmul.mubr.f32.gmra.mrb[150].mxu1 %v5978_v20 }
 0x160   : > { %v1085_v54 = vpop.f32.mrb[30].mxu0  ;;  %2097 = vmatprep.mubr.f32.mxu1 %v5979_v31 }
 0x161   : > { %v1311_v46 = vadd.f32 %v5219_v56, %v1085_v54  ;;  %v1087_v10 = vpop.f32.mrb[31].mxu0 }
 0x162   : > { %v1495_v9 = vpop.f32.mrb[46].mxu1 }
 0x163   : > { %v5386_v16 = vadd.f32 %v1495_v9, %v5309_v41  ;;  %v1497_v29 = vpop.f32.mrb[47].mxu1  ;;  %2841 = vmatmul.mubr.msk.f32.gmra.mrb[152].mxu1 %vm4304_vm3, %v5980_v2 }
 0x164   : > { %v1090_v6 = vpop.f32.mrb[32].mxu0  ;;  %2102 = vmatprep.mubr.f32.mxu1 %v5981_v38 }
 0x165   : > { %v1316_v58 = vadd.f32 %v5234_v32, %v1090_v6  ;;  %v1092_v53 = vpop.f32.mrb[33].mxu0  ;;  %v5984_v32 = vld [vmem:[#allocation46_spill] sm:$0xff] }
 0x166   : > { %v1500_v1 = vpop.f32.mrb[48].mxu1 }
 0x167   : > { %v5394_v18 = vadd.f32 %v1500_v1, %v5322_v19  ;;  %v1502_v56 = vpop.f32.mrb[49].mxu1  ;;  %2103 = vmatmul.mubr.f32.gmra.mrb[154].mxu1 %v5982_v59 }
 0x168   : > { %v1095_v41 = vpop.f32.mrb[34].mxu0  ;;  %2107 = vmatprep.mubr.f32.mxu1 %v5983_v4 }
 0x169   : > { %v1321_v62 = vadd.f32 %v5231_v27, %v1095_v41  ;;  %v1097_v15 = vpop.f32.mrb[35].mxu0 }
 0x16a   : > { %v1505_v50 = vpop.f32.mrb[50].mxu1 }
 0x16b   : > { %v5400_v26 = vadd.f32 %v1505_v50, %v5332_v33  ;;  %v1507_v5 = vpop.f32.mrb[51].mxu1  ;;  %2843 = vmatmul.mubr.msk.f32.gmra.mrb[156].mxu1 %vm4304_vm3, %v5984_v32 }
 0x16c   : > { %v1100_v19 = vpop.f32.mrb[36].mxu0  ;;  %2112 = vmatprep.mubr.f32.mxu1 %v5985_v40 }
 0x16d   : > { %v1326_v11 = vadd.f32 %v5244_v8, %v1100_v19  ;;  %v1102_v57 = vpop.f32.mrb[37].mxu0 }
 0x16e   : > { %v1510_v12 = vpop.f32.mrb[52].mxu1 }
 0x16f   : > { %v5408_v61 = vadd.f32 %v1510_v12, %v5344_v3  ;;  %v1512_v27 = vpop.f32.mrb[53].mxu1  ;;  %2113 = vmatmul.mubr.f32.gmra.mrb[158].mxu1 %v5984_v32 }
 0x170   : > { %v1105_v33 = vpop.f32.mrb[38].mxu0 }
 0x171   : > { %v1331_v63 = vadd.f32 %v5241_v37, %v1105_v33  ;;  %v1107_v7 = vpop.f32.mrb[39].mxu0 }
 0x172   : > { %v1515_v21 = vpop.f32.mrb[54].mxu1 }
 0x173   : > { %v5413_v42 = vadd.f32 %v1515_v21, %v5353_v55  ;;  %v1517_v47 = vpop.f32.mrb[55].mxu1 }
 0x174   : > { %v1110_v20 = vpop.f32.mrb[40].mxu0 }
 0x175   : > { %v1336_v8 = vadd.f32 %v5256_v48, %v1110_v20  ;;  %v1112_v54 = vpop.f32.mrb[41].mxu0 }
 0x176   : > { %v1520_v31 = vpop.f32.mrb[56].mxu1 }
 0x177   : > { %v5417_v3 = vadd.f32 %v1520_v31, %v5363_v45  ;;  %v1522_v10 = vpop.f32.mrb[57].mxu1 }
 0x178   : > { %v1115_v9 = vpop.f32.mrb[42].mxu0 }
 0x179   : > { %v1341_v29 = vadd.f32 %v5253_v24, %v1115_v9  ;;  %v1117_v2 = vpop.f32.mrb[43].mxu0 }
 0x17a   : > { %v1525_v37 = vpop.f32.mrb[58].mxu1 }
 0x17b   : > { %v5420_v6 = vadd.f32 %v1525_v37, %v1301_v39  ;;  %v1527_v38 = vpop.f32.mrb[59].mxu1 }
 0x17c   : > { %v1120_v55 = vpop.f32.mrb[44].mxu0 }
 0x17d   : > { %v1346_v53 = vadd.f32 %v5267_v52, %v1120_v55  ;;  %v1122_v1 = vpop.f32.mrb[45].mxu0 }
 0x17e   : > { %v1530_v56 = vpop.f32.mrb[60].mxu1 }
 0x17f   : > { %v5423_v48 = vadd.f32 %v1530_v56, %v1306_v17  ;;  %v1532_v59 = vpop.f32.mrb[61].mxu1 }
 0x180   : > { %v1125_v41 = vpop.f32.mrb[46].mxu0 }
 0x181   : > { %v1351_v45 = vadd.f32 %v5264_v35, %v1125_v41  ;;  %v1127_v4 = vpop.f32.mrb[47].mxu0 }
 0x182   : > { %v1535_v15 = vpop.f32.mrb[62].mxu1 }
 0x183   : > { %v5426_v50 = vadd.f32 %v1535_v15, %v1311_v46  ;;  %v1537_v24 = vpop.f32.mrb[63].mxu1 }
 0x184   : > { %v1130_v5 = vpop.f32.mrb[48].mxu0 }
 0x185   : > { %v1356_v39 = vadd.f32 %v5280_v22, %v1130_v5  ;;  %v1132_v32 = vpop.f32.mrb[49].mxu0 }
 0x186   : > { %v1540_v19 = vpop.f32.mrb[64].mxu1 }
 0x187   : > { %v5429_v40 = vadd.f32 %v1540_v19, %v1316_v58  ;;  %v1542_v52 = vpop.f32.mrb[65].mxu1 }
 0x188   : > { %v1135_v57 = vpop.f32.mrb[50].mxu0 }
 0x189   : > { %v1361_v17 = vadd.f32 %v5277_v14, %v1135_v57  ;;  %v1137_v12 = vpop.f32.mrb[51].mxu0 }
 0x18a   : > { %v1545_v27 = vpop.f32.mrb[66].mxu1 }
 0x18b   : > { %v5432_v33 = vadd.f32 %v1545_v27, %v1321_v62  ;;  %v1547_v35 = vpop.f32.mrb[67].mxu1 }
 0x18c   : > { %v1140_v7 = vpop.f32.mrb[52].mxu0 }
 0x18d   : > { %v1366_v46 = vadd.f32 %v5291_v23, %v1140_v7  ;;  %v1142_v21 = vpop.f32.mrb[53].mxu0 }
 0x18e   : > { %v1550_v47 = vpop.f32.mrb[68].mxu1 }
 0x18f   : > { %v5435_v20 = vadd.f32 %v1550_v47, %v1326_v11  ;;  %v1552_v22 = vpop.f32.mrb[69].mxu1 }
 0x190   : > { %v1145_v54 = vpop.f32.mrb[54].mxu0 }
 0x191   : > { %v1371_v58 = vadd.f32 %v5288_v36, %v1145_v54  ;;  %v1147_v31 = vpop.f32.mrb[55].mxu0 }
 0x192   : > { %v1555_v10 = vpop.f32.mrb[70].mxu1 }
 0x193   : > { %v5438_v9 = vadd.f32 %v1555_v10, %v1331_v63  ;;  %v1557_v14 = vpop.f32.mrb[71].mxu1 }
 0x194   : > { %v1150_v2 = vpop.f32.mrb[56].mxu0 }
 0x195   : > { %v1376_v62 = vadd.f32 %v5304_v51, %v1150_v2  ;;  %v1152_v37 = vpop.f32.mrb[57].mxu0 }
 0x196   : > { %v1560_v38 = vpop.f32.mrb[72].mxu1 }
 0x197   : > { %v5441_v55 = vadd.f32 %v1560_v38, %v1336_v8  ;;  %v1562_v23 = vpop.f32.mrb[73].mxu1 }
 0x198   : > { %v1155_v1 = vpop.f32.mrb[58].mxu0 }
 0x199   : > { %v1381_v11 = vadd.f32 %v5301_v43, %v1155_v1  ;;  %v1157_v56 = vpop.f32.mrb[59].mxu0 }
 0x19a   : > { %v1565_v59 = vpop.f32.mrb[74].mxu1 }
 0x19b   : > { %v5444_v41 = vadd.f32 %v1565_v59, %v1341_v29  ;;  %v1567_v36 = vpop.f32.mrb[75].mxu1 }
 0x19c   : > { %v1160_v4 = vpop.f32.mrb[60].mxu0 }
 0x19d   : > { %v1386_v63 = vadd.f32 %v5315_v49, %v1160_v4  ;;  %v1162_v15 = vpop.f32.mrb[61].mxu0 }
 0x19e   : > { %v1570_v24 = vpop.f32.mrb[76].mxu1 }
 0x19f   : > { %v5447_v5 = vadd.f32 %v1570_v24, %v1346_v53  ;;  %v1572_v51 = vpop.f32.mrb[77].mxu1 }
 0x1a0   : > { %v1165_v32 = vpop.f32.mrb[62].mxu0 }
 0x1a1   : > { %v1391_v8 = vadd.f32 %v5312_v30, %v1165_v32  ;;  %v1167_v19 = vpop.f32.mrb[63].mxu0 }
 0x1a2   : > { %v1575_v52 = vpop.f32.mrb[78].mxu1 }
 0x1a3   : > { %v5450_v57 = vadd.f32 %v1575_v52, %v1351_v45  ;;  %v1577_v43 = vpop.f32.mrb[79].mxu1 }
 0x1a4   : > { %v3107_v12 = vpop.f32.mrb[64].mxu0 }
 0x1a5   : > { %v5453_v29 = vadd.f32 %v3107_v12, %v5337_v34  ;;  %v1685_v27 = vpop.f32.mrb[65].mxu0 }
 0x1a6   : > { %v1580_v35 = vpop.f32.mrb[80].mxu1  ;;  %v5456_v49 = vadd.f32 %v1685_v27, %v5327_v25 }
 0x1a7   : > { %v5458_v53 = vadd.f32 %v1580_v35, %v1356_v39  ;;  %v1582_v7 = vpop.f32.mrb[81].mxu1 }
 0x1a8   : > { %v3110_v21 = vpop.f32.mrb[66].mxu0 }
 0x1a9   : > { %v5461_v30 = vadd.f32 %v3110_v21, %v5356_v28  ;;  %v1695_v47 = vpop.f32.mrb[67].mxu0 }
 0x1aa   : > { %v1585_v45 = vpop.f32.mrb[82].mxu1  ;;  %v5464_v22 = vadd.f32 %v1695_v47, %v5348_v13 }
 0x1ab   : > { %v5466_v54 = vadd.f32 %v1585_v45, %v1361_v17  ;;  %v1587_v34 = vpop.f32.mrb[83].mxu1 }
 0x1ac   : > { %v3113_v31 = vpop.f32.mrb[68].mxu0 }
 0x1ad   : > { %v5469_v10 = vadd.f32 %v3113_v31, %v5372_v60  ;;  %v1705_v25 = vpop.f32.mrb[69].mxu0 }
 0x1ae   : > { %v1590_v39 = vpop.f32.mrb[84].mxu1  ;;  %v5472_v14 = vadd.f32 %v1705_v25, %v5366_v44 }
 0x1af   : > { %v5474_v2 = vadd.f32 %v1590_v39, %v1366_v46  ;;  %v1592_v28 = vpop.f32.mrb[85].mxu1 }
 0x1b0   : > { %v3116_v37 = vpop.f32.mrb[70].mxu0 }
 0x1b1   : > { %v5477_v38 = vadd.f32 %v3116_v37, %v5386_v16  ;;  %v1715_v13 = vpop.f32.mrb[71].mxu0 }
 0x1b2   : > { %v1595_v17 = vpop.f32.mrb[86].mxu1  ;;  %v5480_v23 = vadd.f32 %v1715_v13, %v5380_v0 }
 0x1b3   : > { %v1596_v1 = vadd.f32 %v1595_v17, %v1371_v58  ;;  %v1597_v60 = vpop.f32.mrb[87].mxu1 }
 0x1b4   : > { %v3119_v56 = vpop.f32.mrb[72].mxu0 }
 0x1b5   : > { %v5483_v59 = vadd.f32 %v3119_v56, %v5400_v26  ;;  %v1725_v44 = vpop.f32.mrb[73].mxu0 }
 0x1b6   : > { %v1600_v36 = vpop.f32.mrb[88].mxu1  ;;  %v5486_v46 = vadd.f32 %v1725_v44, %v5394_v18 }
 0x1b7   : > { %v1601_v4 = vadd.f32 %v1600_v36, %v1376_v62  ;;  %v1602_v15 = vpop.f32.mrb[89].mxu1 }
 0x1b8   : > { %v3122_v16 = vpop.f32.mrb[74].mxu0 }
 0x1b9   : > { %v5489_v24 = vadd.f32 %v3122_v16, %v5413_v42  ;;  %v1735_v51 = vpop.f32.mrb[75].mxu0 }
 0x1ba   : > { %v1605_v0 = vpop.f32.mrb[90].mxu1  ;;  %v5492_v58 = vadd.f32 %v1735_v51, %v5408_v61 }
 0x1bb   : > { %v1606_v32 = vadd.f32 %v1605_v0, %v1381_v11  ;;  %v1607_v19 = vpop.f32.mrb[91].mxu1 }
 0x1bc   : > { %v3125_v26 = vpop.f32.mrb[76].mxu0 }
 0x1bd   : > { %v5495_v52 = vadd.f32 %v3125_v26, %v5420_v6  ;;  %v1745_v43 = vpop.f32.mrb[77].mxu0 }
 0x1be   : > { %v1610_v18 = vpop.f32.mrb[92].mxu1  ;;  %v5498_v62 = vadd.f32 %v1745_v43, %v5417_v3 }
 0x1bf   : > { %v1611_v12 = vadd.f32 %v1610_v18, %v1386_v63  ;;  %v1612_v27 = vpop.f32.mrb[93].mxu1 }
 0x1c0   : > { %v3128_v42 = vpop.f32.mrb[78].mxu0 }
 0x1c1   : > { %v5501_v35 = vadd.f32 %v3128_v42, %v5426_v50  ;;  %v1755_v7 = vpop.f32.mrb[79].mxu0 }
 0x1c2   : > { %v1615_v61 = vpop.f32.mrb[94].mxu1  ;;  %v5504_v11 = vadd.f32 %v1755_v7, %v5423_v48 }
 0x1c3   : > { %v1616_v21 = vadd.f32 %v1615_v61, %v1391_v8  ;;  %v1617_v47 = vpop.f32.mrb[95].mxu1 }
 0x1c4   : > { %v3131_v6 = vpop.f32.mrb[80].mxu0 }
 0x1c5   : > { %v5507_v45 = vadd.f32 %v3131_v6, %v5432_v33  ;;  %v1765_v34 = vpop.f32.mrb[81].mxu0 }
 0x1c6   : > { %v5510_v3 = vadd.f32 %v1765_v34, %v5429_v40  ;;  %v1959_v63 = vpop.f32.mrb[96].mxu1 }
 0x1c7   : > { %v1961_v31 = vpop.f32.mrb[97].mxu1 }
 0x1c8   : > { %v3134_v25 = vpop.f32.mrb[82].mxu0 }
 0x1c9   : > { %v5513_v50 = vadd.f32 %v3134_v25, %v5438_v9  ;;  %v1775_v39 = vpop.f32.mrb[83].mxu0 }
 0x1ca   : > { %v5516_v48 = vadd.f32 %v1775_v39, %v5435_v20  ;;  %v1964_v8 = vpop.f32.mrb[98].mxu1 }
 0x1cb   : > { %v1966_v28 = vpop.f32.mrb[99].mxu1 }
 0x1cc   : > { %v3137_v37 = vpop.f32.mrb[84].mxu0 }
 0x1cd   : > { %v5519_v33 = vadd.f32 %v3137_v37, %v5444_v41  ;;  %v1785_v13 = vpop.f32.mrb[85].mxu0 }
 0x1ce   : > { %v5522_v40 = vadd.f32 %v1785_v13, %v5441_v55  ;;  %v1969_v17 = vpop.f32.mrb[100].mxu1 }
 0x1cf   : > { %v1971_v60 = vpop.f32.mrb[101].mxu1 }
 0x1d0   : > { %v3140_v56 = vpop.f32.mrb[86].mxu0 }
 0x1d1   : > { %v5525_v9 = vadd.f32 %v3140_v56, %v5450_v57  ;;  %v1795_v44 = vpop.f32.mrb[87].mxu0 }
 0x1d2   : > { %v5528_v20 = vadd.f32 %v1795_v44, %v5447_v5  ;;  %v1974_v36 = vpop.f32.mrb[102].mxu1 }
 0x1d3   : > { %v1976_v15 = vpop.f32.mrb[103].mxu1 }
 0x1d4   : > { %v3143_v16 = vpop.f32.mrb[88].mxu0 }
 0x1d5   : > { %v5531_v41 = vadd.f32 %v3143_v16, %v5466_v54  ;;  %v1805_v51 = vpop.f32.mrb[89].mxu0 }
 0x1d6   : > { %v5534_v55 = vadd.f32 %v1805_v51, %v5458_v53  ;;  %v1979_v0 = vpop.f32.mrb[104].mxu1 }
 0x1d7   : > { %v1981_v19 = vpop.f32.mrb[105].mxu1 }
 0x1d8   : > { %v3146_v26 = vpop.f32.mrb[90].mxu0 }
 0x1d9   : > { %v5536_v43 = vadd.f32 %v3146_v26, %v1596_v1  ;;  %v1815_v57 = vpop.f32.mrb[91].mxu0 }
 0x1da   : > { %v5539_v18 = vadd.f32 %v1815_v57, %v5474_v2  ;;  %v1984_v5 = vpop.f32.mrb[106].mxu1 }
 0x1db   : > { %v1986_v27 = vpop.f32.mrb[107].mxu1 }
 0x1dc   : > { %v3149_v42 = vpop.f32.mrb[92].mxu0 }
 0x1dd   : > { %v5541_v7 = vadd.f32 %v3149_v42, %v1606_v32  ;;  %v1825_v54 = vpop.f32.mrb[93].mxu0  ;;  %v5552_v32 = vld [vmem:[%s5684_s4] ss:$0 sm:$0xff] }
 0x1de   : > { %v5543_v61 = vadd.f32 %v1825_v54, %v1601_v4  ;;  %v1989_v47 = vpop.f32.mrb[108].mxu1 }
 0x1df   : > { %v1991_v53 = vpop.f32.mrb[109].mxu1 }
 0x1e0   : > { %v3152_v6 = vpop.f32.mrb[94].mxu0 }
 0x1e1   : > { %v5545_v34 = vadd.f32 %v3152_v6, %v1616_v21  ;;  %v1835_v1 = vpop.f32.mrb[95].mxu0 }
 0x1e2   : > { %v5547_v31 = vadd.f32 %v1835_v1, %v1611_v12  ;;  %v1994_v25 = vpop.f32.mrb[110].mxu1 }
 0x1e3   : > { %v1996_v2 = vpop.f32.mrb[111].mxu1 }
 0x1e4   : > { %v3187_v39 = vpop.f32.mrb[96].mxu0 }
 0x1e5   : > { %v2190_v28 = vadd.f32 %v3187_v39, %v1964_v8  ;;  %v2184_v37 = vpop.f32.mrb[97].mxu0 }
 0x1e6   : > { %v5554_v4 = vpop.f32.mrb[112].mxu1  ;;  %v2185_v13 = vadd.f32 %v2184_v37, %v1959_v63 }
 0x1e7   : > { %v2344_v60 = vadd.f32 %v2190_v28, %v5453_v29  ;;  %v2001_v21 = vpop.f32.mrb[113].mxu1 }
 0x1e8   : > { %v2343_v12 = vadd.f32 %v2185_v13, %v5456_v49  ;;  %v3190_v8 = vpop.f32.mrb[98].mxu0 }
 0x1e9   : > { %v2383_v56 = vadd.f32 %v5552_v32, %v2344_v60  ;;  %v2200_v44 = vadd.f32 %v3190_v8, %v1974_v36  ;;  %v2194_v15 = vpop.f32.mrb[99].mxu0 }
 0x1ea   : > { %v2382_v63 = vadd.f32 %v5552_v32, %v2343_v12  ;;  %v2004_v16 = vpop.f32.mrb[114].mxu1  ;;  %v2195_v29 = vadd.f32 %v2194_v15, %v1969_v17 }
 0x1eb   : > { %2415 = vst [vmem:[%s5562_s9 + $0x8] sm:$0xff] %v2383_v56  ;;  %v2484_v51 = vmul.f32 %v2383_v56, %v2383_v56  ;;  %v2346_v19 = vadd.f32 %v2200_v44, %v5461_v30  ;;  %v2006_v26 = vpop.f32.mrb[115].mxu1 }
 0x1ec   : > { %2414 = vst [vmem:[%s5562_s9] sm:$0xff] %v2382_v63  ;;  %v2446_v57 = vadd.f32 %v2383_v56, %v2382_v63  ;;  %v2483_v27 = vmul.f32 %v2382_v63, %v2382_v63  ;;  %v2345_v49 = vadd.f32 %v2195_v29, %v5464_v22  ;;  %v3193_v42 = vpop.f32.mrb[100].mxu0 }
 0x1ed   : > { %v2385_v36 = vadd.f32 %v5552_v32, %v2346_v19  ;;  %v2210_v54 = vadd.f32 %v3193_v42, %v1984_v5  ;;  %v2204_v53 = vpop.f32.mrb[101].mxu0 }
 0x1ee   : > { %v2515_v6 = vadd.f32 %v2484_v51, %v2483_v27  ;;  %v2384_v17 = vadd.f32 %v5552_v32, %v2345_v49  ;;  %v2009_v1 = vpop.f32.mrb[116].mxu1  ;;  %v2205_v2 = vadd.f32 %v2204_v53, %v1979_v0 }
 0x1ef   : > { %2417 = vst [vmem:[%s5562_s9 + $0x18] sm:$0xff] %v2385_v36  ;;  %v2348_v30 = vadd.f32 %v2210_v54, %v5469_v10  ;;  %v2011_v39 = vpop.f32.mrb[117].mxu1  ;;  %v2486_v60 = vmul.f32 %v2385_v36, %v2385_v36 }
 0x1f0   : > { %2416 = vst [vmem:[%s5562_s9 + $0x10] sm:$0xff] %v2384_v17  ;;  %v2447_v28 = vadd.f32 %v2446_v57, %v2384_v17  ;;  %v2485_v37 = vmul.f32 %v2384_v17, %v2384_v17  ;;  %v2347_v22 = vadd.f32 %v2205_v2, %v5472_v14  ;;  %v3196_v13 = vpop.f32.mrb[102].mxu0 }
 0x1f1   : > { %v2387_v5 = vadd.f32 %v5552_v32, %v2348_v30  ;;  %v2220_v21 = vadd.f32 %v3196_v13, %v1994_v25  ;;  %v2214_v12 = vpop.f32.mrb[103].mxu0 }
 0x1f2   : > { %v2516_v8 = vadd.f32 %v2515_v6, %v2485_v37  ;;  %v2386_v0 = vadd.f32 %v5552_v32, %v2347_v22  ;;  %v2448_v56 = vadd.f32 %v2447_v28, %v2385_v36  ;;  %v2014_v44 = vpop.f32.mrb[118].mxu1  ;;  %v2215_v10 = vadd.f32 %v2214_v12, %v1989_v47 }
 0x1f3   : > { %2419 = vst [vmem:[%s5562_s9 + $0x28] sm:$0xff] %v2387_v5  ;;  %v2350_v15 = vadd.f32 %v2220_v21, %v5477_v38  ;;  %v2016_v63 = vpop.f32.mrb[119].mxu1  ;;  %v2488_v26 = vmul.f32 %v2387_v5, %v2387_v5 }
 0x1f4   : > { %2418 = vst [vmem:[%s5562_s9 + $0x20] sm:$0xff] %v2386_v0  ;;  %v2449_v29 = vadd.f32 %v2448_v56, %v2386_v0  ;;  %v2487_v14 = vmul.f32 %v2386_v0, %v2386_v0  ;;  %v2517_v51 = vadd.f32 %v2516_v8, %v2486_v60  ;;  %v2349_v19 = vadd.f32 %v2215_v10, %v5480_v23  ;;  %v3199_v25 = vpop.f32.mrb[104].mxu0 }
 0x1f5   : > { %v2389_v57 = vadd.f32 %v5552_v32, %v2350_v15  ;;  %v2230_v27 = vadd.f32 %v3199_v25, %v2004_v16  ;;  %v2224_v49 = vpop.f32.mrb[105].mxu0 }
 0x1f6   : > { %v2518_v42 = vadd.f32 %v2517_v51, %v2487_v14  ;;  %v2388_v47 = vadd.f32 %v5552_v32, %v2349_v19  ;;  %v2450_v36 = vadd.f32 %v2449_v29, %v2387_v5  ;;  %v2019_v38 = vpop.f32.mrb[120].mxu1  ;;  %v2225_v54 = vadd.f32 %v2224_v49, %v5554_v4 }
 0x1f7   : > { %2421 = vst [vmem:[%s5562_s9 + $0x38] sm:$0xff] %v2389_v57  ;;  %v2352_v53 = vadd.f32 %v2230_v27, %v5483_v59  ;;  %v2021_v6 = vpop.f32.mrb[121].mxu1  ;;  %v2490_v39 = vmul.f32 %v2389_v57, %v2389_v57 }
 0x1f8   : > { %2420 = vst [vmem:[%s5562_s9 + $0x30] sm:$0xff] %v2388_v47  ;;  %v2451_v23 = vadd.f32 %v2450_v36, %v2388_v47  ;;  %v2489_v17 = vmul.f32 %v2388_v47, %v2388_v47  ;;  %v2519_v2 = vadd.f32 %v2518_v42, %v2488_v26  ;;  %v2351_v16 = vadd.f32 %v2225_v54, %v5486_v46  ;;  %v3202_v30 = vpop.f32.mrb[106].mxu0 }
 0x1f9   : > { %v2391_v28 = vadd.f32 %v5552_v32, %v2352_v53  ;;  %v2240_v37 = vadd.f32 %v3202_v30, %v2014_v44  ;;  %v2234_v22 = vpop.f32.mrb[107].mxu0 }
 0x1fa   : > { %v2520_v13 = vadd.f32 %v2519_v2, %v2489_v17  ;;  %v2390_v4 = vadd.f32 %v5552_v32, %v2351_v16  ;;  %v2452_v60 = vadd.f32 %v2451_v23, %v2389_v57  ;;  %v2024_v59 = vpop.f32.mrb[122].mxu1  ;;  %v2235_v5 = vadd.f32 %v2234_v22, %v2009_v1 }
 0x1fb   : > { %2423 = vst [vmem:[%s5562_s9 + $0x48] sm:$0xff] %v2391_v28  ;;  %v2354_v21 = vadd.f32 %v2240_v37, %v5489_v24  ;;  %v2026_v12 = vpop.f32.mrb[123].mxu1  ;;  %v2492_v10 = vmul.f32 %v2391_v28, %v2391_v28 }
 0x1fc   : > { %2422 = vst [vmem:[%s5562_s9 + $0x40] sm:$0xff] %v2390_v4  ;;  %v2453_v8 = vadd.f32 %v2452_v60, %v2390_v4  ;;  %v2491_v46 = vmul.f32 %v2390_v4, %v2390_v4  ;;  %v2521_v0 = vadd.f32 %v2520_v13, %v2490_v39  ;;  %v2353_v56 = vadd.f32 %v2235_v5, %v5492_v58  ;;  %v3205_v44 = vpop.f32.mrb[108].mxu0 }
 0x1fd   : > { %v2393_v15 = vadd.f32 %v5552_v32, %v2354_v21  ;;  %v2250_v63 = vadd.f32 %v3205_v44, %v2024_v59  ;;  %v2244_v29 = vpop.f32.mrb[109].mxu0 }
 0x1fe   : > { %v2522_v14 = vadd.f32 %v2521_v0, %v2491_v46  ;;  %v2392_v1 = vadd.f32 %v5552_v32, %v2353_v56  ;;  %v2454_v51 = vadd.f32 %v2453_v8, %v2391_v28  ;;  %v2029_v24 = vpop.f32.mrb[124].mxu1  ;;  %v2245_v19 = vadd.f32 %v2244_v29, %v2019_v38 }
 0x1ff   : > { %2425 = vst [vmem:[%s5562_s9 + $0x58] sm:$0xff] %v2393_v15  ;;  %v2356_v25 = vadd.f32 %v2250_v63, %v5495_v52  ;;  %v2031_v26 = vpop.f32.mrb[125].mxu1  ;;  %v2494_v47 = vmul.f32 %v2393_v15, %v2393_v15 }
 0x200   : > { %2424 = vst [vmem:[%s5562_s9 + $0x50] sm:$0xff] %v2392_v1  ;;  %v2455_v57 = vadd.f32 %v2454_v51, %v2392_v1  ;;  %v2493_v58 = vmul.f32 %v2392_v1, %v2392_v1  ;;  %v2523_v27 = vadd.f32 %v2522_v14, %v2492_v10  ;;  %v2355_v49 = vadd.f32 %v2245_v19, %v5498_v62  ;;  %v3208_v42 = vpop.f32.mrb[110].mxu0 }
 0x201   : > { %v2395_v36 = vadd.f32 %v5552_v32, %v2356_v25  ;;  %v2254_v54 = vpop.f32.mrb[111].mxu0 }
 0x202   : > { %v2524_v53 = vadd.f32 %v2523_v27, %v2493_v58  ;;  %v2394_v38 = vadd.f32 %v5552_v32, %v2355_v49  ;;  %v2456_v6 = vadd.f32 %v2455_v57, %v2393_v15  ;;  %v2034_v23 = vpop.f32.mrb[126].mxu1  ;;  %v2255_v52 = vadd.f32 %v2254_v54, %v2029_v24 }
 0x203   : > { %2427 = vst [vmem:[%s5562_s9 + $0x68] sm:$0xff] %v2395_v36  ;;  %v2260_v17 = vadd.f32 %v3208_v42, %v2034_v23  ;;  %v2036_v2 = vpop.f32.mrb[127].mxu1  ;;  %v2496_v13 = vmul.f32 %v2395_v36, %v2395_v36 }
 0x204   : > { %2426 = vst [vmem:[%s5562_s9 + $0x60] sm:$0xff] %v2394_v38  ;;  %v2457_v16 = vadd.f32 %v2456_v6, %v2394_v38  ;;  %v2495_v30 = vmul.f32 %v2394_v38, %v2394_v38  ;;  %v2525_v39 = vadd.f32 %v2524_v53, %v2494_v47  ;;  %v2357_v62 = vadd.f32 %v2255_v52, %v5504_v11  ;;  %v3211_v28 = vpop.f32.mrb[112].mxu0 }
 0x205   : > { %v2358_v37 = vadd.f32 %v2260_v17, %v5501_v35  ;;  %v2264_v22 = vpop.f32.mrb[113].mxu0 }
 0x206   : > { %v2526_v4 = vadd.f32 %v2525_v39, %v2495_v30  ;;  %v2396_v60 = vadd.f32 %v5552_v32, %v2357_v62  ;;  %v2458_v59 = vadd.f32 %v2457_v16, %v2395_v36  ;;  %v2039_v5 = vpop.f32.mrb[128].mxu1 }
 0x207   : > { %v2397_v21 = vadd.f32 %v5552_v32, %v2358_v37  ;;  %v2265_v12 = vadd.f32 %v2264_v22, %v2039_v5  ;;  %v2041_v8 = vpop.f32.mrb[129].mxu1 }
 0x208   : > { %2428 = vst [vmem:[%s5562_s9 + $0x70] sm:$0xff] %v2396_v60  ;;  %v2459_v46 = vadd.f32 %v2458_v59, %v2396_v60  ;;  %v2497_v0 = vmul.f32 %v2396_v60, %v2396_v60  ;;  %v2527_v11 = vadd.f32 %v2526_v4, %v2496_v13  ;;  %v3214_v56 = vpop.f32.mrb[114].mxu0 }
 0x209   : > { %2429 = vst [vmem:[%s5562_s9 + $0x78] sm:$0xff] %v2397_v21  ;;  %v2359_v35 = vadd.f32 %v2265_v12, %v5510_v3  ;;  %v2274_v44 = vpop.f32.mrb[115].mxu0  ;;  %v2498_v10 = vmul.f32 %v2397_v21, %v2397_v21 }
 0x20a   : > { %v2528_v15 = vadd.f32 %v2527_v11, %v2497_v0  ;;  %v2460_v63 = vadd.f32 %v2459_v46, %v2397_v21  ;;  %v2044_v29 = vpop.f32.mrb[130].mxu1 }
 0x20b   : > { %v2398_v14 = vadd.f32 %v5552_v32, %v2359_v35  ;;  %v2270_v1 = vadd.f32 %v3211_v28, %v2044_v29  ;;  %v2046_v51 = vpop.f32.mrb[131].mxu1 }
 0x20c   : > { %v2529_v24 = vadd.f32 %v2528_v15, %v2498_v10  ;;  %v3217_v19 = vpop.f32.mrb[116].mxu0 }
 0x20d   : > { %2430 = vst [vmem:[%s5562_s9 + $0x80] sm:$0xff] %v2398_v14  ;;  %v2461_v25 = vadd.f32 %v2460_v63, %v2398_v14  ;;  %v2499_v26 = vmul.f32 %v2398_v14, %v2398_v14  ;;  %v2360_v57 = vadd.f32 %v2270_v1, %v5507_v45  ;;  %v2284_v58 = vpop.f32.mrb[117].mxu0 }
 0x20e   : > { %v2049_v27 = vpop.f32.mrb[132].mxu1 }
 0x20f   : > { %v2530_v3 = vadd.f32 %v2529_v24, %v2499_v26  ;;  %v2399_v49 = vadd.f32 %v5552_v32, %v2360_v57  ;;  %v2275_v42 = vadd.f32 %v2274_v44, %v2049_v27  ;;  %v2051_v47 = vpop.f32.mrb[133].mxu1 }
 0x210   : > { %v3220_v36 = vpop.f32.mrb[118].mxu0 }
 0x211   : > { %2431 = vst [vmem:[%s5562_s9 + $0x88] sm:$0xff] %v2399_v49  ;;  %v2462_v54 = vadd.f32 %v2461_v25, %v2399_v49  ;;  %v2500_v53 = vmul.f32 %v2399_v49, %v2399_v49  ;;  %v2361_v38 = vadd.f32 %v2275_v42, %v5516_v48  ;;  %v2294_v6 = vpop.f32.mrb[119].mxu0 }
 0x212   : > { %v2054_v23 = vpop.f32.mrb[134].mxu1 }
 0x213   : > { %v2531_v52 = vadd.f32 %v2530_v3, %v2500_v53  ;;  %v2400_v45 = vadd.f32 %v5552_v32, %v2361_v38  ;;  %v2280_v17 = vadd.f32 %v3214_v56, %v2054_v23  ;;  %v2056_v2 = vpop.f32.mrb[135].mxu1 }
 0x214   : > { %v3223_v16 = vpop.f32.mrb[120].mxu0 }
 0x215   : > { %2432 = vst [vmem:[%s5562_s9 + $0x90] sm:$0xff] %v2400_v45  ;;  %v2463_v30 = vadd.f32 %v2462_v54, %v2400_v45  ;;  %v2501_v39 = vmul.f32 %v2400_v45, %v2400_v45  ;;  %v2362_v62 = vadd.f32 %v2280_v17, %v5513_v50  ;;  %v2304_v28 = vpop.f32.mrb[121].mxu0 }
 0x216   : > { %v2059_v37 = vpop.f32.mrb[136].mxu1 }
 0x217   : > { %v2532_v22 = vadd.f32 %v2531_v52, %v2501_v39  ;;  %v2401_v48 = vadd.f32 %v5552_v32, %v2362_v62  ;;  %v2285_v13 = vadd.f32 %v2284_v58, %v2059_v37  ;;  %v2061_v4 = vpop.f32.mrb[137].mxu1 }
 0x218   : > { %v5623_v60 = vpop.f32.mrb[122].mxu0 }
 0x219   : > { %2433 = vst [vmem:[%s5562_s9 + $0x98] sm:$0xff] %v2401_v48  ;;  %v2464_v59 = vadd.f32 %v2463_v30, %v2401_v48  ;;  %v2502_v5 = vmul.f32 %v2401_v48, %v2401_v48  ;;  %v2363_v21 = vadd.f32 %v2285_v13, %v5522_v40  ;;  %v2314_v12 = vpop.f32.mrb[123].mxu0 }
 0x21a   : > { %v2064_v8 = vpop.f32.mrb[138].mxu1 }
 0x21b   : > { %v2533_v46 = vadd.f32 %v2532_v22, %v2502_v5  ;;  %v2402_v50 = vadd.f32 %v5552_v32, %v2363_v21  ;;  %v2290_v0 = vadd.f32 %v3217_v19, %v2064_v8  ;;  %v2066_v11 = vpop.f32.mrb[139].mxu1 }
 0x21c   : > { %v5628_v56 = vpop.f32.mrb[124].mxu0 }
 0x21d   : > { %2434 = vst [vmem:[%s5562_s9 + $0xa0] sm:$0xff] %v2402_v50  ;;  %v2465_v35 = vadd.f32 %v2464_v59, %v2402_v50  ;;  %v2503_v44 = vmul.f32 %v2402_v50, %v2402_v50  ;;  %v2364_v10 = vadd.f32 %v2290_v0, %v5519_v33  ;;  %v2324_v15 = vpop.f32.mrb[125].mxu0 }
 0x21e   : > { %v2069_v63 = vpop.f32.mrb[140].mxu1 }
 0x21f   : > { %v2534_v29 = vadd.f32 %v2533_v46, %v2503_v44  ;;  %v2403_v40 = vadd.f32 %v5552_v32, %v2364_v10  ;;  %v2295_v14 = vadd.f32 %v2294_v6, %v2069_v63  ;;  %v2071_v1 = vpop.f32.mrb[141].mxu1 }
 0x220   : > { %v5633_v51 = vpop.f32.mrb[126].mxu0 }
 0x221   : > { %2435 = vst [vmem:[%s5562_s9 + $0xa8] sm:$0xff] %v2403_v40  ;;  %v2466_v24 = vadd.f32 %v2465_v35, %v2403_v40  ;;  %v2504_v19 = vmul.f32 %v2403_v40, %v2403_v40  ;;  %v2365_v25 = vadd.f32 %v2295_v14, %v5528_v20  ;;  %v5637_v26 = vpop.f32.mrb[127].mxu0 }
 0x222   : > { %v2074_v57 = vpop.f32.mrb[142].mxu1 }
 0x223   : > { %v2535_v33 = vadd.f32 %v2534_v29, %v2504_v19  ;;  %v2404_v58 = vadd.f32 %v5552_v32, %v2365_v25  ;;  %v2300_v27 = vadd.f32 %v3220_v36, %v2074_v57  ;;  %v2076_v3 = vpop.f32.mrb[143].mxu1 }
 0x225   : > { %2436 = vst [vmem:[%s5562_s9 + $0xb0] sm:$0xff] %v2404_v58  ;;  %v2467_v49 = vadd.f32 %v2466_v24, %v2404_v58  ;;  %v2505_v42 = vmul.f32 %v2404_v58, %v2404_v58  ;;  %v2366_v47 = vadd.f32 %v2300_v27, %v5525_v9 }
 0x226   : > { %v2079_v54 = vpop.f32.mrb[144].mxu1 }
 0x227   : > { %v2536_v53 = vadd.f32 %v2535_v33, %v2505_v42  ;;  %v2405_v38 = vadd.f32 %v5552_v32, %v2366_v47  ;;  %v2305_v20 = vadd.f32 %v2304_v28, %v2079_v54  ;;  %v2081_v6 = vpop.f32.mrb[145].mxu1 }
 0x229   : > { %2437 = vst [vmem:[%s5562_s9 + $0xb8] sm:$0xff] %v2405_v38  ;;  %v2468_v23 = vadd.f32 %v2467_v49, %v2405_v38  ;;  %v2506_v52 = vmul.f32 %v2405_v38, %v2405_v38  ;;  %v2367_v45 = vadd.f32 %v2305_v20, %v5534_v55 }
 0x22a   : > { %v2084_v36 = vpop.f32.mrb[146].mxu1 }
 0x22b   : > { %v2537_v17 = vadd.f32 %v2536_v53, %v2506_v52  ;;  %v2406_v2 = vadd.f32 %v5552_v32, %v2367_v45  ;;  %v2310_v30 = vadd.f32 %v3223_v16, %v2084_v36  ;;  %v2086_v39 = vpop.f32.mrb[147].mxu1 }
 0x22d   : > { %2438 = vst [vmem:[%s5562_s9 + $0xc0] sm:$0xff] %v2406_v2  ;;  %v2469_v9 = vadd.f32 %v2468_v23, %v2406_v2  ;;  %v2507_v62 = vmul.f32 %v2406_v2, %v2406_v2  ;;  %v2368_v37 = vadd.f32 %v2310_v30, %v5531_v41 }
 0x22e   : > { %v2089_v28 = vpop.f32.mrb[148].mxu1 }
 0x22f   : > { %v2538_v22 = vadd.f32 %v2537_v17, %v2507_v62  ;;  %v2407_v48 = vadd.f32 %v5552_v32, %v2368_v37  ;;  %v2315_v13 = vadd.f32 %v2314_v12, %v2089_v28  ;;  %v2091_v4 = vpop.f32.mrb[149].mxu1 }
 0x231   : > { %2439 = vst [vmem:[%s5562_s9 + $0xc8] sm:$0xff] %v2407_v48  ;;  %v2470_v55 = vadd.f32 %v2469_v9, %v2407_v48  ;;  %v2508_v59 = vmul.f32 %v2407_v48, %v2407_v48  ;;  %v2369_v5 = vadd.f32 %v2315_v13, %v5539_v18 }
 0x232   : > { %v2094_v16 = vpop.f32.mrb[150].mxu1 }
 0x233   : > { %v2539_v21 = vadd.f32 %v2538_v22, %v2508_v59  ;;  %v2408_v8 = vadd.f32 %v5552_v32, %v2369_v5  ;;  %v2320_v46 = vadd.f32 %v5623_v60, %v2094_v16  ;;  %v2096_v50 = vpop.f32.mrb[151].mxu1 }
 0x235   : > { %2440 = vst [vmem:[%s5562_s9 + $0xd0] sm:$0xff] %v2408_v8  ;;  %v2471_v41 = vadd.f32 %v2470_v55, %v2408_v8  ;;  %v2509_v0 = vmul.f32 %v2408_v8, %v2408_v8  ;;  %v2370_v12 = vadd.f32 %v2320_v46, %v5536_v43 }
 0x236   : > { %v2099_v11 = vpop.f32.mrb[152].mxu1 }
 0x237   : > { %v2540_v35 = vadd.f32 %v2539_v21, %v2509_v0  ;;  %v2409_v44 = vadd.f32 %v5552_v32, %v2370_v12  ;;  %v2325_v10 = vadd.f32 %v2324_v15, %v2099_v11  ;;  %v2101_v63 = vpop.f32.mrb[153].mxu1 }
 0x239   : > { %2441 = vst [vmem:[%s5562_s9 + $0xd8] sm:$0xff] %v2409_v44  ;;  %v2472_v18 = vadd.f32 %v2471_v41, %v2409_v44  ;;  %v2510_v29 = vmul.f32 %v2409_v44, %v2409_v44  ;;  %v2371_v40 = vadd.f32 %v2325_v10, %v5543_v61 }
 0x23a   : > { %v2104_v60 = vpop.f32.mrb[154].mxu1 }
 0x23b   : > { %v2541_v14 = vadd.f32 %v2540_v35, %v2510_v29  ;;  %v2410_v1 = vadd.f32 %v5552_v32, %v2371_v40  ;;  %v2330_v24 = vadd.f32 %v5628_v56, %v2104_v60  ;;  %v2106_v19 = vpop.f32.mrb[155].mxu1 }
 0x23d   : > { %2442 = vst [vmem:[%s5562_s9 + $0xe0] sm:$0xff] %v2410_v1  ;;  %v2473_v43 = vadd.f32 %v2472_v18, %v2410_v1  ;;  %v2511_v25 = vmul.f32 %v2410_v1, %v2410_v1  ;;  %v2372_v15 = vadd.f32 %v2330_v24, %v5541_v7 }
 0x23e   : > { %v2109_v57 = vpop.f32.mrb[156].mxu1 }
 0x23f   : > { %v2542_v33 = vadd.f32 %v2541_v14, %v2511_v25  ;;  %v2411_v58 = vadd.f32 %v5552_v32, %v2372_v15  ;;  %v2335_v27 = vadd.f32 %v5637_v26, %v2109_v57  ;;  %v2111_v61 = vpop.f32.mrb[157].mxu1 }
 0x241   : > { %2443 = vst [vmem:[%s5562_s9 + $0xe8] sm:$0xff] %v2411_v58  ;;  %v2474_v3 = vadd.f32 %v2473_v43, %v2411_v58  ;;  %v2512_v49 = vmul.f32 %v2411_v58, %v2411_v58  ;;  %v2373_v56 = vadd.f32 %v2335_v27, %v5547_v31 }
 0x242   : > { %v2114_v42 = vpop.f32.mrb[158].mxu1 }
 0x243   : > { %v2543_v47 = vadd.f32 %v2542_v33, %v2512_v49  ;;  %v2412_v54 = vadd.f32 %v5552_v32, %v2373_v56  ;;  %v2340_v53 = vadd.f32 %v5633_v51, %v2114_v42  ;;  %v2116_v7 = vpop.f32.mrb[159].mxu1 }
 0x245   : > { %2444 = vst [vmem:[%s5562_s9 + $0xf0] sm:$0xff] %v2412_v54  ;;  %v2475_v38 = vadd.f32 %v2474_v3, %v2412_v54  ;;  %v2513_v20 = vmul.f32 %v2412_v54, %v2412_v54  ;;  %v2374_v6 = vadd.f32 %v2340_v53, %v5545_v34 }
 0x247   : > { %v2544_v26 = vadd.f32 %v2543_v47, %v2513_v20  ;;  %v2413_v23 = vadd.f32 %v5552_v32, %v2374_v6 }
 0x249   : > { %2445 = vst [vmem:[%s5562_s9 + $0xf8] sm:$0xff] %v2413_v23  ;;  %v2476_v52 = vadd.f32 %v2475_v38, %v2413_v23  ;;  %v2514_v45 = vmul.f32 %v2413_v23, %v2413_v23 }
 0x24b   : > { %v2477_v31 = vrot.slane %v2476_v52, 4  ;;  %v2545_v36 = vadd.f32 %v2544_v26, %v2514_v45 }
 0x24d   : > { %v2478_v17 = vadd.f32 %v2477_v31, %v2476_v52  ;;  %v2546_v2 = vrot.slane %v2545_v36, 4 }
 0x24f   : > { %v2479_v30 = vrot.slane %v2478_v17, 2  ;;  %v2547_v39 = vadd.f32 %v2546_v2, %v2545_v36 }
 0x251   : > { %v2480_v51 = vadd.f32 %v2479_v30, %v2478_v17  ;;  %v2548_v9 = vrot.slane %v2547_v39, 2 }
 0x253   : > { %v2481_v62 = vrot.slane %v2480_v51, 1  ;;  %v2549_v37 = vadd.f32 %v2548_v9, %v2547_v39 }
 0x255   : > { %v2550_v28 = vrot.slane %v2549_v37, 1  ;;  %v2482_v34 = vadd.f32 %v2481_v62, %v2480_v51 }
 0x257   : > { %v2551_v32 = vadd.f32 %v2550_v28, %v2549_v37 }
 0x259   : > { %v2552_v22 = vsel %vm438_vm0, %v2482_v34, %v2551_v32 }
 0x25a   : > { %2553 = vst [vmem:[%s262_s13] sm:$0x3] %v2552_v22 }
 0x25b PF: > { %s17_s21 = sadd.s32 1, %s3489_s21  }
 0x25c   : > { %p14_p4 = scmp.ge.s32.totalorder %s17_s21, 6  }
 0x25e   :  { %16 = sbr.rel (!%p14_p4) target bundleno = 1 (0x1), region = 84 }

// kernel: next_block.6
= control target key start
LH: loop header
LB: loop body
LE: loop exit
PB: predicated region body
PF: predicated region fallthrough
CT: control target
= control target key end

     0   :  { %vm1798_vm0 = vcmask 1040384   ;;  %s3883_s3 = inlined_call_operand.vmem [shape: f32[128,128], index: 3, kind: input, shape index: {}]   ;;  %s3884_s0 = inlined_call_operand.vmem [shape: f32[1024,128], index: 0, kind: input, shape index: {}]   ;;  %s3885_s1 = inlined_call_operand.vmem [shape: f32[1,128], index: 1, kind: input, shape index: {}]   ;;  %s3886_s2 = inlined_call_operand.vmem [shape: f32[1,128], index: 2, kind: input, shape index: {}]   ;;  %s3887_s4 = inlined_call_operand.vmem [shape: f32[1,128], index: 4, kind: input, shape index: {}]   ;;  %s3888_s5 = inlined_call_operand.vmem [shape: f32[1024,128], index: 5, kind: output, shape index: {0}]   ;;  %s3889_s6 = inlined_call_operand.vmem [shape: f32[1,2,128], index: 6, kind: output, shape index: {1}]  }
   0x1   :  { %v548_v0 = vld [vmem:[%s3883_s3] sm:$0xff]  ;;  %v549_v1 = vld [vmem:[%s3883_s3 + $0x8] sm:$0xff]  ;;  %v550_v2 = vld [vmem:[%s3883_s3 + $0x10] sm:$0xff] }
   0x2   :  { %v2180_v3 = vpack.c.bf16 %v549_v1, %v548_v0  ;;  %v551_v4 = vld [vmem:[%s3883_s3 + $0x18] sm:$0xff]  ;;  %v552_v6 = vld [vmem:[%s3883_s3 + $0x20] sm:$0xff]  ;;  %v553_v7 = vld [vmem:[%s3883_s3 + $0x28] sm:$0xff] }
   0x3   :  { %v2184_v5 = vpack.c.bf16 %v551_v4, %v550_v2  ;;  %v2188_v8 = vpack.c.bf16 %v553_v7, %v552_v6  ;;  %v22_v9 = vld [vmem:[%s3884_s0] sm:$0xff]  ;;  %v554_v11 = vld [vmem:[%s3883_s3 + $0x30] sm:$0xff]  ;;  %v555_v12 = vld [vmem:[%s3883_s3 + $0x38] sm:$0xff] }
   0x4   :  { %2181 = vmatprep.subr.bf16.mxu0 %v2180_v3  ;;  %2212 = vmatprep.subr.bf16.mxu1 %v2180_v3  ;;  %v2290_v10 = vld [vmem:[%s3885_s1] ss:$0 sm:$0xff]  ;;  %v2192_v16 = vpack.c.bf16 %v555_v12, %v554_v11  ;;  %v557_v18 = vld [vmem:[%s3883_s3 + $0x48] sm:$0xff]  ;;  %v558_v21 = vld [vmem:[%s3883_s3 + $0x50] sm:$0xff] }
   0x5   :  { %2183 = vmatpush3.bf16.msra.mxu0 %v2180_v3  ;;  %2220 = vmatpush3.bf16.msra.mxu1 %v2180_v3  ;;  %v157_v13 = vmul.f32 %v2290_v10, %v22_v9  ;;  %v2302_v14 = vld [vmem:[%s3886_s2] ss:$0 sm:$0xff]  ;;  %v559_v22 = vld [vmem:[%s3883_s3 + $0x58] sm:$0xff]  ;;  %v561_v25 = vld [vmem:[%s3883_s3 + $0x68] sm:$0xff] }
   0x6   :  { %2185 = vmatprep.subr.bf16.mxu0 %v2184_v5  ;;  %2213 = vmatprep.subr.bf16.mxu1 %v2184_v5  ;;  %v556_v17 = vld [vmem:[%s3883_s3 + $0x40] sm:$0xff]  ;;  %v2200_v23 = vpack.c.bf16 %v559_v22, %v558_v21  ;;  %v23_v26 = vld [vmem:[%s3884_s0 + $0x8] sm:$0xff]  ;;  %v24_v28 = vld [vmem:[%s3884_s0 + $0x10] sm:$0xff] }
   0x7   :  { %v292_v15 = vadd.f32 %v2302_v14, %v157_v13  ;;  %v2196_v20 = vpack.c.bf16 %v557_v18, %v556_v17  ;;  %v560_v24 = vld [vmem:[%s3883_s3 + $0x60] sm:$0xff]  ;;  %v562_v29 = vld [vmem:[%s3883_s3 + $0x70] sm:$0xff]  ;;  %v563_v30 = vld [vmem:[%s3883_s3 + $0x78] sm:$0xff]  ;;  %v158_v31 = vmul.f32 %v2290_v10, %v23_v26  ;;  %v159_v32 = vmul.f32 %v2290_v10, %v24_v28 }
   0x8   :  { %v2204_v27 = vpack.c.bf16 %v561_v25, %v560_v24  ;;  %v25_v33 = vld [vmem:[%s3884_s0 + $0x18] sm:$0xff]  ;;  %v2208_v34 = vpack.c.bf16 %v563_v30, %v562_v29  ;;  %v26_v35 = vld [vmem:[%s3884_s0 + $0x20] sm:$0xff]  ;;  %v27_v40 = vld [vmem:[%s3884_s0 + $0x28] sm:$0xff] }
   0x9   :  { %2187 = vmatpush3.bf16.msra.mxu0 %v2184_v5  ;;  %v420_v19 = vmax.f32 %v292_v15, 0.0  ;;  %2221 = vmatpush3.bf16.msra.mxu1 %v2184_v5  ;;  %v293_v36 = vadd.f32 %v2302_v14, %v158_v31  ;;  %v160_v37 = vmul.f32 %v2290_v10, %v25_v33  ;;  %v294_v38 = vadd.f32 %v2302_v14, %v159_v32  ;;  %v28_v41 = vld [vmem:[%s3884_s0 + $0x30] sm:$0xff]  ;;  %v29_v48 = vld [vmem:[%s3884_s0 + $0x38] sm:$0xff]  ;;  %v30_v49 = vld [vmem:[%s3884_s0 + $0x40] sm:$0xff] }
   0xa   :  { %2189 = vmatprep.subr.bf16.mxu0 %v2188_v8  ;;  %2214 = vmatprep.subr.bf16.mxu1 %v2188_v8  ;;  %v161_v39 = vmul.f32 %v2290_v10, %v26_v35  ;;  %v162_v44 = vmul.f32 %v2290_v10, %v27_v40  ;;  %v163_v47 = vmul.f32 %v2290_v10, %v28_v41  ;;  %v31_v56 = vld [vmem:[%s3884_s0 + $0x48] sm:$0xff]  ;;  %v32_v57 = vld [vmem:[%s3884_s0 + $0x50] sm:$0xff]  ;;  %v33_v0 = vld [vmem:[%s3884_s0 + $0x58] sm:$0xff] }
   0xb   :  { %1988 = vmatprep.mubr.f32.mxu0 %v420_v19  ;;  %v421_v42 = vmax.f32 %v293_v36, 0.0  ;;  %v295_v43 = vadd.f32 %v2302_v14, %v160_v37  ;;  %v422_v45 = vmax.f32 %v294_v38, 0.0  ;;  %v164_v52 = vmul.f32 %v2290_v10, %v29_v48  ;;  %v34_v1 = vld [vmem:[%s3884_s0 + $0x60] sm:$0xff]  ;;  %v35_v5 = vld [vmem:[%s3884_s0 + $0x68] sm:$0xff]  ;;  %v36_v6 = vld [vmem:[%s3884_s0 + $0x70] sm:$0xff] }
   0xc   :  { %v296_v46 = vadd.f32 %v2302_v14, %v161_v39  ;;  %v297_v51 = vadd.f32 %v2302_v14, %v162_v44  ;;  %v298_v54 = vadd.f32 %v2302_v14, %v163_v47  ;;  %v165_v55 = vmul.f32 %v2290_v10, %v30_v49  ;;  %v37_v13 = vld [vmem:[%s3884_s0 + $0x78] sm:$0xff]  ;;  %v39_v24 = vld [vmem:[%s3884_s0 + $0x88] sm:$0xff]  ;;  %v86_v25 = vld [vmem:[%s3884_s0 + $0x200] sm:$0xff] }
   0xd   :  { %2191 = vmatpush3.bf16.msra.mxu0 %v2188_v8  ;;  %2222 = vmatpush3.bf16.msra.mxu1 %v2188_v8  ;;  %v423_v50 = vmax.f32 %v295_v43, 0.0  ;;  %v299_v59 = vadd.f32 %v2302_v14, %v164_v52  ;;  %v166_v60 = vmul.f32 %v2290_v10, %v31_v56  ;;  %v167_v63 = vmul.f32 %v2290_v10, %v32_v57  ;;  %v40_v28 = vld [vmem:[%s3884_s0 + $0x90] sm:$0xff]  ;;  %v87_v29 = vld [vmem:[%s3884_s0 + $0x208] sm:$0xff]  ;;  %v89_v32 = vld [vmem:[%s3884_s0 + $0x218] sm:$0xff] }
   0xe   :  { %2193 = vmatprep.subr.bf16.mxu0 %v2192_v16  ;;  %2215 = vmatprep.subr.bf16.mxu1 %v2192_v16  ;;  %v424_v53 = vmax.f32 %v296_v46, 0.0  ;;  %v425_v58 = vmax.f32 %v297_v51, 0.0  ;;  %v426_v61 = vmax.f32 %v298_v54, 0.0  ;;  %v300_v62 = vadd.f32 %v2302_v14, %v165_v55  ;;  %v88_v30 = vld [vmem:[%s3884_s0 + $0x210] sm:$0xff]  ;;  %v90_v33 = vld [vmem:[%s3884_s0 + $0x220] sm:$0xff]  ;;  %v91_v37 = vld [vmem:[%s3884_s0 + $0x228] sm:$0xff] }
   0xf   :  { %v427_v2 = vmax.f32 %v299_v59, 0.0  ;;  %v301_v3 = vadd.f32 %v2302_v14, %v166_v60  ;;  %v168_v4 = vmul.f32 %v2290_v10, %v33_v0  ;;  %v302_v8 = vadd.f32 %v2302_v14, %v167_v63  ;;  %v41_v44 = vld [vmem:[%s3884_s0 + $0x98] sm:$0xff]  ;;  %v42_v49 = vld [vmem:[%s3884_s0 + $0xa0] sm:$0xff] }
  0x10   :  { %v428_v7 = vmax.f32 %v300_v62, 0.0  ;;  %v169_v9 = vmul.f32 %v2290_v10, %v34_v1  ;;  %v170_v11 = vmul.f32 %v2290_v10, %v35_v5  ;;  %v171_v12 = vmul.f32 %v2290_v10, %v36_v6  ;;  %v93_v57 = vld [vmem:[%s3884_s0 + $0x238] sm:$0xff]  ;;  %v94_v62 = vld [vmem:[%s3884_s0 + $0x240] sm:$0xff] }
  0x11   :  { %2195 = vmatpush3.bf16.msra.mxu0 %v2192_v16  ;;  %2223 = vmatpush3.bf16.msra.mxu1 %v2192_v16  ;;  %v429_v15 = vmax.f32 %v301_v3, 0.0  ;;  %v303_v16 = vadd.f32 %v2302_v14, %v168_v4  ;;  %v430_v17 = vmax.f32 %v302_v8, 0.0  ;;  %v172_v19 = vmul.f32 %v2290_v10, %v37_v13  ;;  %v44_v3 = vld [vmem:[%s3884_s0 + $0xb0] sm:$0xff] }
  0x12   :  { %2197 = vmatprep.subr.bf16.mxu0 %v2196_v20  ;;  %2216 = vmatprep.subr.bf16.mxu1 %v2196_v20  ;;  %v304_v18 = vadd.f32 %v2302_v14, %v169_v9  ;;  %v305_v21 = vadd.f32 %v2302_v14, %v170_v11  ;;  %v306_v22 = vadd.f32 %v2302_v14, %v171_v12  ;;  %v95_v11 = vld [vmem:[%s3884_s0 + $0x248] sm:$0xff] }
  0x13   :  { %v307_v31 = vadd.f32 %v2302_v14, %v172_v19  ;;  %v221_v36 = vmul.f32 %v2290_v10, %v86_v25  ;;  %v174_v38 = vmul.f32 %v2290_v10, %v39_v24  ;;  %v175_v39 = vmul.f32 %v2290_v10, %v40_v28  ;;  %v97_v28 = vld [vmem:[%s3884_s0 + $0x258] sm:$0xff] }
  0x14   :  { %v432_v26 = vmax.f32 %v304_v18, 0.0  ;;  %v434_v35 = vmax.f32 %v306_v22, 0.0  ;;  %v222_v40 = vmul.f32 %v2290_v10, %v87_v29  ;;  %v223_v41 = vmul.f32 %v2290_v10, %v88_v30 }
  0x15   :  { %2199 = vmatpush3.bf16.msra.mxu0 %v2196_v20  ;;  %2224 = vmatpush3.bf16.msra.mxu1 %v2196_v20  ;;  %v38_v20 = vld [vmem:[%s3884_s0 + $0x80] sm:$0xff]  ;;  %v224_v46 = vmul.f32 %v2290_v10, %v89_v32  ;;  %v225_v47 = vmul.f32 %v2290_v10, %v90_v33  ;;  %v435_v48 = vmax.f32 %v307_v31, 0.0  ;;  %v226_v52 = vmul.f32 %v2290_v10, %v91_v37  ;;  %v48_v37 = vld [vmem:[%s3884_s0 + $0xd0] sm:$0xff] }
  0x16   :  { %2201 = vmatprep.subr.bf16.mxu0 %v2200_v23  ;;  %2217 = vmatprep.subr.bf16.mxu1 %v2200_v23  ;;  %v358_v51 = vadd.f32 %v2302_v14, %v223_v41  ;;  %v176_v59 = vmul.f32 %v2290_v10, %v41_v44  ;;  %v310_v0 = vadd.f32 %v2302_v14, %v175_v39  ;;  %v98_v32 = vld [vmem:[%s3884_s0 + $0x260] sm:$0xff]  ;;  %v99_v44 = vld [vmem:[%s3884_s0 + $0x268] sm:$0xff] }
  0x17   :  { %v359_v54 = vadd.f32 %v2302_v14, %v224_v46  ;;  %v360_v55 = vadd.f32 %v2302_v14, %v225_v47  ;;  %v177_v1 = vmul.f32 %v2290_v10, %v42_v49  ;;  %v361_v5 = vadd.f32 %v2302_v14, %v226_v52  ;;  %v49_v52 = vld [vmem:[%s3884_s0 + $0xd8] sm:$0xff] }
  0x18   :  { %v228_v6 = vmul.f32 %v2290_v10, %v93_v57  ;;  %v229_v9 = vmul.f32 %v2290_v10, %v94_v62  ;;  %v311_v13 = vadd.f32 %v2302_v14, %v176_v59  ;;  %v179_v19 = vmul.f32 %v2290_v10, %v44_v3 }
  0x19   :  { %2203 = vmatpush3.bf16.msra.mxu0 %v2200_v23  ;;  %2225 = vmatpush3.bf16.msra.mxu1 %v2200_v23  ;;  %v431_v23 = vmax.f32 %v303_v16, 0.0  ;;  %v487_v4 = vmax.f32 %v359_v54, 0.0  ;;  %v96_v16 = vld [vmem:[%s3884_s0 + $0x250] sm:$0xff]  ;;  %v312_v18 = vadd.f32 %v2302_v14, %v177_v1  ;;  %v489_v22 = vmax.f32 %v361_v5, 0.0 }
  0x1a   :  { %2205 = vmatprep.subr.bf16.mxu0 %v2204_v27  ;;  %2218 = vmatprep.subr.bf16.mxu1 %v2204_v27  ;;  %v230_v24 = vmul.f32 %v2290_v10, %v95_v11  ;;  %v439_v29 = vmax.f32 %v311_v13, 0.0  ;;  %v52_v5 = vld [vmem:[%s3884_s0 + $0xf0] sm:$0xff]  ;;  %v103_v13 = vld [vmem:[%s3884_s0 + $0x288] sm:$0xff] }
  0x1b   :  { %v440_v33 = vmax.f32 %v312_v18, 0.0  ;;  %v104_v18 = vld [vmem:[%s3884_s0 + $0x290] sm:$0xff] }
  0x1c   :  { %v365_v39 = vadd.f32 %v2302_v14, %v230_v24 }
  0x1d   :  { %2207 = vmatpush3.bf16.msra.mxu0 %v2204_v27  ;;  %2226 = vmatpush3.bf16.msra.mxu1 %v2204_v27  ;;  %v173_v27 = vmul.f32 %v2290_v10, %v38_v20  ;;  %v45_v20 = vld [vmem:[%s3884_s0 + $0xb8] sm:$0xff] }
  0x1e   :  { %2209 = vmatprep.subr.bf16.mxu0 %v2208_v34  ;;  %2219 = vmatprep.subr.bf16.mxu1 %v2208_v34  ;;  %v180_v31 = vmul.f32 %v2290_v10, %v45_v20  ;;  %v493_v54 = vmax.f32 %v365_v39, 0.0  ;;  %v56_v39 = vld [vmem:[%s3884_s0 + $0x110] sm:$0xff] }
  0x1f   :  { %v308_v43 = vadd.f32 %v2302_v14, %v173_v27  ;;  %v231_v27 = vmul.f32 %v2290_v10, %v96_v16 }
  0x20   :  { %v315_v46 = vadd.f32 %v2302_v14, %v180_v31 }
  0x21   :  { %2211 = vmatpush3.bf16.msra.mxu0 %v2208_v34  ;;  %2227 = vmatpush3.bf16.msra.mxu1 %v2208_v34  ;;  %v433_v34 = vmax.f32 %v305_v21, 0.0  ;;  %v436_v63 = vmax.f32 %v308_v43, 0.0  ;;  %v46_v21 = vld [vmem:[%s3884_s0 + $0xc0] sm:$0xff]  ;;  %v233_v43 = vmul.f32 %v2290_v10, %v98_v32 }
  0x24   :  { %1989 = vmatmul.mubr.f32.vlgmr.msra.gmra.mrb[0].mxu0 %v421_v42  ;;  %v92_v42 = vld [vmem:[%s3884_s0 + $0x230] sm:$0xff] }
  0x25   :  { %1991 = vmatprep.mubr.f32.mxu0 %v422_v45  ;;  %v356_v45 = vadd.f32 %v2302_v14, %v221_v36  ;;  %v227_v56 = vmul.f32 %v2290_v10, %v92_v42  ;;  %v47_v36 = vld [vmem:[%s3884_s0 + $0xc8] sm:$0xff]  ;;  %v366_v42 = vadd.f32 %v2302_v14, %v231_v27 }
  0x26   :  { %v182_v47 = vmul.f32 %v2290_v10, %v47_v36 }
  0x27   :  { %v362_v8 = vadd.f32 %v2302_v14, %v227_v56  ;;  %v234_v56 = vmul.f32 %v2290_v10, %v99_v44  ;;  %v494_v57 = vmax.f32 %v366_v42, 0.0 }
  0x28   :  { %1992 = vmatmul.mubr.f32.gmra.mrb[2].mxu0 %v423_v50  ;;  %v357_v50 = vadd.f32 %v2302_v14, %v222_v40  ;;  %v232_v40 = vmul.f32 %v2290_v10, %v97_v28  ;;  %v317_v62 = vadd.f32 %v2302_v14, %v182_v47 }
  0x29   :  { %1994 = vmatprep.mubr.f32.mxu0 %v424_v53  ;;  %v484_v53 = vmax.f32 %v356_v45, 0.0  ;;  %v490_v25 = vmax.f32 %v362_v8, 0.0 }
  0x2a   :  { %v485_v60 = vmax.f32 %v357_v50, 0.0 }
  0x2b   :  { %2084 = vmatprep.mubr.f32.mxu1 %v484_v53  ;;  %v50_v53 = vld [vmem:[%s3884_s0 + $0xe0] sm:$0xff] }
  0x2c   :  { %1995 = vmatmul.mubr.f32.gmra.mrb[4].mxu0 %v425_v58  ;;  %v309_v58 = vadd.f32 %v2302_v14, %v174_v38  ;;  %2085 = vmatmul.mubr.f32.vlgmr.msra.gmra.mrb[0].mxu1 %v485_v60  ;;  %v101_v60 = vld [vmem:[%s3884_s0 + $0x278] sm:$0xff]  ;;  %v185_v3 = vmul.f32 %v2290_v10, %v50_v53  ;;  %v191_v53 = vmul.f32 %v2290_v10, %v56_v39 }
  0x2d   :  { %1997 = vmatprep.mubr.f32.mxu0 %v426_v61  ;;  %v486_v61 = vmax.f32 %v358_v51, 0.0  ;;  %v183_v51 = vmul.f32 %v2290_v10, %v48_v37  ;;  %v236_v8 = vmul.f32 %v2290_v10, %v101_v60 }
  0x2e   :  { %v437_v12 = vmax.f32 %v309_v58, 0.0  ;;  %v368_v58 = vadd.f32 %v2302_v14, %v233_v43  ;;  %v320_v20 = vadd.f32 %v2302_v14, %v185_v3 }
  0x2f   :  { %2087 = vmatprep.mubr.f32.mxu1 %v486_v61  ;;  %v443_v61 = vmax.f32 %v315_v46, 0.0  ;;  %v107_v46 = vld [vmem:[%s3884_s0 + $0x2a8] sm:$0xff] }
  0x30   :  { %1998 = vmatmul.mubr.f32.gmra.mrb[6].mxu0 %v427_v2  ;;  %v43_v2 = vld [vmem:[%s3884_s0 + $0xa8] sm:$0xff]  ;;  %2088 = vmatmul.mubr.f32.gmra.mrb[2].mxu1 %v487_v4 }
  0x31   :  { %2000 = vmatprep.mubr.f32.mxu0 %v428_v7  ;;  %v488_v7 = vmax.f32 %v360_v55, 0.0  ;;  %v367_v55 = vadd.f32 %v2302_v14, %v232_v40  ;;  %v51_v4 = vld [vmem:[%s3884_s0 + $0xe8] sm:$0xff] }
  0x33   :  { %2090 = vmatprep.mubr.f32.mxu1 %v488_v7  ;;  %v369_v7 = vadd.f32 %v2302_v14, %v234_v56 }
  0x34   :  { %2001 = vmatmul.mubr.f32.gmra.mrb[8].mxu0 %v429_v15  ;;  %v178_v15 = vmul.f32 %v2290_v10, %v43_v2  ;;  %2091 = vmatmul.mubr.f32.gmra.mrb[4].mxu1 %v489_v22  ;;  %v318_v2 = vadd.f32 %v2302_v14, %v183_v51  ;;  %v53_v22 = vld [vmem:[%s3884_s0 + $0xf8] sm:$0xff] }
  0x35   :  { %2003 = vmatprep.mubr.f32.mxu0 %v430_v17  ;;  %v438_v17 = vmax.f32 %v310_v0, 0.0  ;;  %2093 = vmatprep.mubr.f32.mxu1 %v490_v25  ;;  %v102_v0 = vld [vmem:[%s3884_s0 + $0x280] sm:$0xff]  ;;  %v497_v24 = vmax.f32 %v369_v7, 0.0  ;;  %v371_v25 = vadd.f32 %v2302_v14, %v236_v8  ;;  %v60_v7 = vld [vmem:[%s3884_s0 + $0x130] sm:$0xff] }
  0x36   :  { %v313_v30 = vadd.f32 %v2302_v14, %v178_v15  ;;  %v445_v15 = vmax.f32 %v317_v62, 0.0  ;;  %v109_v62 = vld [vmem:[%s3884_s0 + $0x2b8] sm:$0xff] }
  0x37   :  { %v499_v40 = vmax.f32 %v371_v25, 0.0  ;;  %v62_v25 = vld [vmem:[%s3884_s0 + $0x140] sm:$0xff] }
  0x38   :  { %2004 = vmatmul.mubr.f32.gmra.mrb[10].mxu0 %v431_v23  ;;  %v363_v23 = vadd.f32 %v2302_v14, %v228_v6  ;;  %v441_v45 = vmax.f32 %v313_v30, 0.0  ;;  %v495_v6 = vmax.f32 %v367_v55, 0.0  ;;  %v105_v30 = vld [vmem:[%s3884_s0 + $0x298] sm:$0xff]  ;;  %v58_v55 = vld [vmem:[%s3884_s0 + $0x120] sm:$0xff]  ;;  %v197_v39 = vmul.f32 %v2290_v10, %v62_v25 }
  0x39   :  { %2006 = vmatprep.mubr.f32.mxu0 %v432_v26  ;;  %v364_v26 = vadd.f32 %v2302_v14, %v229_v9  ;;  %v496_v9 = vmax.f32 %v368_v58, 0.0  ;;  %v240_v42 = vmul.f32 %v2290_v10, %v105_v30  ;;  %v242_v58 = vmul.f32 %v2290_v10, %v107_v46 }
  0x3a   :  { %v491_v38 = vmax.f32 %v363_v23, 0.0  ;;  %v54_v23 = vld [vmem:[%s3884_s0 + $0x100] sm:$0xff] }
  0x3b   :  { %v492_v41 = vmax.f32 %v364_v26, 0.0  ;;  %v238_v26 = vmul.f32 %v2290_v10, %v103_v13  ;;  %v189_v37 = vmul.f32 %v2290_v10, %v54_v23  ;;  %v195_v23 = vmul.f32 %v2290_v10, %v60_v7 }
  0x3c   :  { %2007 = vmatmul.mubr.f32.gmra.mrb[12].mxu0 %v433_v34  ;;  %v314_v34 = vadd.f32 %v2302_v14, %v179_v19  ;;  %2094 = vmatmul.mubr.f32.gmra.mrb[6].mxu1 %v491_v38  ;;  %v446_v19 = vmax.f32 %v318_v2, 0.0  ;;  %v55_v38 = vld [vmem:[%s3884_s0 + $0x108] sm:$0xff]  ;;  %v110_v2 = vld [vmem:[%s3884_s0 + $0x2c0] sm:$0xff] }
  0x3d   :  { %2009 = vmatprep.mubr.f32.mxu0 %v434_v35  ;;  %v181_v35 = vmul.f32 %v2290_v10, %v46_v21  ;;  %2096 = vmatprep.mubr.f32.mxu1 %v492_v41  ;;  %v187_v21 = vmul.f32 %v2290_v10, %v52_v5  ;;  %v373_v41 = vadd.f32 %v2302_v14, %v238_v26 }
  0x3e   :  { %v442_v49 = vmax.f32 %v314_v34, 0.0  ;;  %v106_v34 = vld [vmem:[%s3884_s0 + $0x2a0] sm:$0xff]  ;;  %v193_v5 = vmul.f32 %v2290_v10, %v58_v55 }
  0x3f   :  { %v316_v50 = vadd.f32 %v2302_v14, %v181_v35  ;;  %v448_v35 = vmax.f32 %v320_v20, 0.0  ;;  %v322_v36 = vadd.f32 %v2302_v14, %v187_v21  ;;  %v501_v56 = vmax.f32 %v373_v41, 0.0  ;;  %v112_v20 = vld [vmem:[%s3884_s0 + $0x2d0] sm:$0xff] }
  0x40   :  { %2010 = vmatmul.mubr.f32.gmra.mrb[14].mxu0 %v435_v48  ;;  %v100_v48 = vld [vmem:[%s3884_s0 + $0x270] sm:$0xff]  ;;  %2097 = vmatmul.mubr.f32.gmra.mrb[8].mxu1 %v493_v54  ;;  %v57_v54 = vld [vmem:[%s3884_s0 + $0x118] sm:$0xff] }
  0x41   :  { %2012 = vmatprep.mubr.f32.mxu0 %v436_v63  ;;  %v235_v59 = vmul.f32 %v2290_v10, %v100_v48  ;;  %v184_v63 = vmul.f32 %v2290_v10, %v49_v52  ;;  %v444_v1 = vmax.f32 %v316_v50, 0.0  ;;  %2099 = vmatprep.mubr.f32.mxu1 %v494_v57  ;;  %v108_v50 = vld [vmem:[%s3884_s0 + $0x2b0] sm:$0xff]  ;;  %v450_v51 = vmax.f32 %v322_v36, 0.0  ;;  %v114_v36 = vld [vmem:[%s3884_s0 + $0x2e0] sm:$0xff] }
  0x42   :  { %v324_v52 = vadd.f32 %v2302_v14, %v189_v37  ;;  %v375_v57 = vadd.f32 %v2302_v14, %v240_v42  ;;  %v64_v41 = vld [vmem:[%s3884_s0 + $0x150] sm:$0xff] }
  0x43   :  { %v370_v11 = vadd.f32 %v2302_v14, %v235_v59  ;;  %v319_v16 = vadd.f32 %v2302_v14, %v184_v63  ;;  %v199_v55 = vmul.f32 %v2290_v10, %v64_v41 }
  0x44   :  { %2013 = vmatmul.mubr.f32.gmra.mrb[16].mxu0 %v437_v12  ;;  %v237_v12 = vmul.f32 %v2290_v10, %v102_v0  ;;  %2100 = vmatmul.mubr.f32.gmra.mrb[10].mxu1 %v495_v6  ;;  %v452_v3 = vmax.f32 %v324_v52, 0.0  ;;  %v59_v6 = vld [vmem:[%s3884_s0 + $0x128] sm:$0xff]  ;;  %v503_v8 = vmax.f32 %v375_v57, 0.0  ;;  %v116_v52 = vld [vmem:[%s3884_s0 + $0x2f0] sm:$0xff]  ;;  %v66_v57 = vld [vmem:[%s3884_s0 + $0x160] sm:$0xff] }
  0x45   :  { %2015 = vmatprep.mubr.f32.mxu0 %v438_v17  ;;  %v186_v17 = vmul.f32 %v2290_v10, %v51_v4  ;;  %2102 = vmatprep.mubr.f32.mxu1 %v496_v9  ;;  %v498_v27 = vmax.f32 %v370_v11, 0.0  ;;  %v447_v31 = vmax.f32 %v319_v16, 0.0  ;;  %v326_v4 = vadd.f32 %v2302_v14, %v191_v53  ;;  %v111_v16 = vld [vmem:[%s3884_s0 + $0x2c8] sm:$0xff] }
  0x46   :  { %v372_v28 = vadd.f32 %v2302_v14, %v237_v12  ;;  %v377_v9 = vadd.f32 %v2302_v14, %v242_v58  ;;  %v244_v11 = vmul.f32 %v2290_v10, %v109_v62  ;;  %v201_v7 = vmul.f32 %v2290_v10, %v66_v57 }
  0x47   :  { %v321_v32 = vadd.f32 %v2302_v14, %v186_v17  ;;  %v454_v21 = vmax.f32 %v326_v4, 0.0  ;;  %v118_v4 = vld [vmem:[%s3884_s0 + $0x300] sm:$0xff] }
  0x48   :  { %2016 = vmatmul.mubr.f32.gmra.mrb[18].mxu0 %v439_v29  ;;  %v239_v29 = vmul.f32 %v2290_v10, %v104_v18  ;;  %2103 = vmatmul.mubr.f32.gmra.mrb[12].mxu1 %v497_v24  ;;  %v500_v43 = vmax.f32 %v372_v28, 0.0  ;;  %v61_v24 = vld [vmem:[%s3884_s0 + $0x138] sm:$0xff]  ;;  %v505_v26 = vmax.f32 %v377_v9, 0.0  ;;  %v246_v28 = vmul.f32 %v2290_v10, %v111_v16  ;;  %v68_v9 = vld [vmem:[%s3884_s0 + $0x170] sm:$0xff] }
  0x49   :  { %2018 = vmatprep.mubr.f32.mxu0 %v440_v33  ;;  %v188_v33 = vmul.f32 %v2290_v10, %v53_v22  ;;  %2105 = vmatprep.mubr.f32.mxu1 %v498_v27  ;;  %v449_v47 = vmax.f32 %v321_v32, 0.0  ;;  %v328_v22 = vadd.f32 %v2302_v14, %v193_v5  ;;  %v379_v27 = vadd.f32 %v2302_v14, %v244_v11  ;;  %v113_v32 = vld [vmem:[%s3884_s0 + $0x2d8] sm:$0xff] }
  0x4a   :  { %v374_v44 = vadd.f32 %v2302_v14, %v239_v29  ;;  %v203_v25 = vmul.f32 %v2290_v10, %v68_v9 }
  0x4b   :  { %v323_v48 = vadd.f32 %v2302_v14, %v188_v33  ;;  %v456_v37 = vmax.f32 %v328_v22, 0.0  ;;  %v507_v42 = vmax.f32 %v379_v27, 0.0  ;;  %v120_v22 = vld [vmem:[%s3884_s0 + $0x310] sm:$0xff]  ;;  %v70_v27 = vld [vmem:[%s3884_s0 + $0x180] sm:$0xff] }
  0x4c   :  { %2019 = vmatmul.mubr.f32.gmra.mrb[20].mxu0 %v441_v45  ;;  %v241_v45 = vmul.f32 %v2290_v10, %v106_v34  ;;  %2106 = vmatmul.mubr.f32.gmra.mrb[14].mxu1 %v499_v40  ;;  %v502_v59 = vmax.f32 %v374_v44, 0.0  ;;  %v63_v40 = vld [vmem:[%s3884_s0 + $0x148] sm:$0xff]  ;;  %v248_v44 = vmul.f32 %v2290_v10, %v113_v32  ;;  %v205_v41 = vmul.f32 %v2290_v10, %v70_v27 }
  0x4d   :  { %2021 = vmatprep.mubr.f32.mxu0 %v442_v49  ;;  %v190_v49 = vmul.f32 %v2290_v10, %v55_v38  ;;  %2108 = vmatprep.mubr.f32.mxu1 %v500_v43  ;;  %v451_v63 = vmax.f32 %v323_v48, 0.0  ;;  %v330_v38 = vadd.f32 %v2302_v14, %v195_v23  ;;  %v381_v43 = vadd.f32 %v2302_v14, %v246_v28  ;;  %v115_v48 = vld [vmem:[%s3884_s0 + $0x2e8] sm:$0xff] }
  0x4e   :  { %v376_v60 = vadd.f32 %v2302_v14, %v241_v45 }
  0x4f   :  { %v325_v0 = vadd.f32 %v2302_v14, %v190_v49  ;;  %v458_v53 = vmax.f32 %v330_v38, 0.0  ;;  %v509_v58 = vmax.f32 %v381_v43, 0.0  ;;  %v122_v38 = vld [vmem:[%s3884_s0 + $0x320] sm:$0xff]  ;;  %v72_v43 = vld [vmem:[%s3884_s0 + $0x190] sm:$0xff] }
  0x50   :  { %2022 = vmatmul.mubr.f32.gmra.mrb[22].mxu0 %v443_v61  ;;  %v243_v61 = vmul.f32 %v2290_v10, %v108_v50  ;;  %2109 = vmatmul.mubr.f32.gmra.mrb[16].mxu1 %v501_v56  ;;  %v504_v12 = vmax.f32 %v376_v60, 0.0  ;;  %v65_v56 = vld [vmem:[%s3884_s0 + $0x158] sm:$0xff]  ;;  %v250_v60 = vmul.f32 %v2290_v10, %v115_v48  ;;  %v207_v57 = vmul.f32 %v2290_v10, %v72_v43 }
  0x51   :  { %2024 = vmatprep.mubr.f32.mxu0 %v444_v1  ;;  %v192_v1 = vmul.f32 %v2290_v10, %v57_v54  ;;  %2111 = vmatprep.mubr.f32.mxu1 %v502_v59  ;;  %v453_v17 = vmax.f32 %v325_v0, 0.0  ;;  %v332_v54 = vadd.f32 %v2302_v14, %v197_v39  ;;  %v383_v59 = vadd.f32 %v2302_v14, %v248_v44  ;;  %v117_v0 = vld [vmem:[%s3884_s0 + $0x2f8] sm:$0xff] }
  0x52   :  { %v378_v13 = vadd.f32 %v2302_v14, %v243_v61 }
  0x53   :  { %v327_v18 = vadd.f32 %v2302_v14, %v192_v1  ;;  %v460_v5 = vmax.f32 %v332_v54, 0.0  ;;  %v511_v11 = vmax.f32 %v383_v59, 0.0  ;;  %v124_v54 = vld [vmem:[%s3884_s0 + $0x330] sm:$0xff]  ;;  %v74_v59 = vld [vmem:[%s3884_s0 + $0x1a0] sm:$0xff] }
  0x54   :  { %2025 = vmatmul.mubr.f32.gmra.mrb[24].mxu0 %v445_v15  ;;  %v245_v15 = vmul.f32 %v2290_v10, %v110_v2  ;;  %2112 = vmatmul.mubr.f32.gmra.mrb[18].mxu1 %v503_v8  ;;  %v506_v29 = vmax.f32 %v378_v13, 0.0  ;;  %v67_v8 = vld [vmem:[%s3884_s0 + $0x168] sm:$0xff]  ;;  %v252_v13 = vmul.f32 %v2290_v10, %v117_v0  ;;  %v209_v9 = vmul.f32 %v2290_v10, %v74_v59 }
  0x55   :  { %2027 = vmatprep.mubr.f32.mxu0 %v446_v19  ;;  %v194_v19 = vmul.f32 %v2290_v10, %v59_v6  ;;  %2114 = vmatprep.mubr.f32.mxu1 %v504_v12  ;;  %v455_v33 = vmax.f32 %v327_v18, 0.0  ;;  %v334_v6 = vadd.f32 %v2302_v14, %v199_v55  ;;  %v385_v12 = vadd.f32 %v2302_v14, %v250_v60  ;;  %v119_v18 = vld [vmem:[%s3884_s0 + $0x308] sm:$0xff] }
  0x56   :  { %v380_v30 = vadd.f32 %v2302_v14, %v245_v15 }
  0x57   :  { %v329_v34 = vadd.f32 %v2302_v14, %v194_v19  ;;  %v462_v23 = vmax.f32 %v334_v6, 0.0  ;;  %v513_v28 = vmax.f32 %v385_v12, 0.0  ;;  %v126_v6 = vld [vmem:[%s3884_s0 + $0x340] sm:$0xff]  ;;  %v76_v12 = vld [vmem:[%s3884_s0 + $0x1b0] sm:$0xff] }
  0x58   :  { %2028 = vmatmul.mubr.f32.gmra.mrb[26].mxu0 %v447_v31  ;;  %v247_v31 = vmul.f32 %v2290_v10, %v112_v20  ;;  %2115 = vmatmul.mubr.f32.gmra.mrb[20].mxu1 %v505_v26  ;;  %v508_v45 = vmax.f32 %v380_v30, 0.0  ;;  %v69_v26 = vld [vmem:[%s3884_s0 + $0x178] sm:$0xff]  ;;  %v254_v30 = vmul.f32 %v2290_v10, %v119_v18  ;;  %v211_v27 = vmul.f32 %v2290_v10, %v76_v12 }
  0x59   :  { %2030 = vmatprep.mubr.f32.mxu0 %v448_v35  ;;  %v196_v35 = vmul.f32 %v2290_v10, %v61_v24  ;;  %2117 = vmatprep.mubr.f32.mxu1 %v506_v29  ;;  %v457_v49 = vmax.f32 %v329_v34, 0.0  ;;  %v336_v24 = vadd.f32 %v2302_v14, %v201_v7  ;;  %v387_v29 = vadd.f32 %v2302_v14, %v252_v13  ;;  %v121_v34 = vld [vmem:[%s3884_s0 + $0x318] sm:$0xff] }
  0x5a   :  { %v382_v46 = vadd.f32 %v2302_v14, %v247_v31 }
  0x5b   :  { %v331_v50 = vadd.f32 %v2302_v14, %v196_v35  ;;  %v464_v39 = vmax.f32 %v336_v24, 0.0  ;;  %v515_v44 = vmax.f32 %v387_v29, 0.0  ;;  %v128_v24 = vld [vmem:[%s3884_s0 + $0x350] sm:$0xff]  ;;  %v78_v29 = vld [vmem:[%s3884_s0 + $0x1c0] sm:$0xff] }
  0x5c   :  { %2031 = vmatmul.mubr.f32.gmra.mrb[28].mxu0 %v449_v47  ;;  %v249_v47 = vmul.f32 %v2290_v10, %v114_v36  ;;  %2118 = vmatmul.mubr.f32.gmra.mrb[22].mxu1 %v507_v42  ;;  %v510_v61 = vmax.f32 %v382_v46, 0.0  ;;  %v71_v42 = vld [vmem:[%s3884_s0 + $0x188] sm:$0xff]  ;;  %v256_v46 = vmul.f32 %v2290_v10, %v121_v34 }
  0x5d   :  { %2033 = vmatprep.mubr.f32.mxu0 %v450_v51  ;;  %v198_v51 = vmul.f32 %v2290_v10, %v63_v40  ;;  %2120 = vmatprep.mubr.f32.mxu1 %v508_v45  ;;  %v459_v1 = vmax.f32 %v331_v50, 0.0  ;;  %v338_v40 = vadd.f32 %v2302_v14, %v203_v25  ;;  %v389_v45 = vadd.f32 %v2302_v14, %v254_v30  ;;  %v123_v50 = vld [vmem:[%s3884_s0 + $0x328] sm:$0xff] }
  0x5e   :  { %v384_v62 = vadd.f32 %v2302_v14, %v249_v47 }
  0x5f   :  { %v333_v2 = vadd.f32 %v2302_v14, %v198_v51  ;;  %v466_v55 = vmax.f32 %v338_v40, 0.0  ;;  %v517_v60 = vmax.f32 %v389_v45, 0.0  ;;  %v80_v45 = vld [vmem:[%s3884_s0 + $0x1d0] sm:$0xff] }
  0x60   :  { %2034 = vmatmul.mubr.f32.gmra.mrb[30].mxu0 %v451_v63  ;;  %v251_v63 = vmul.f32 %v2290_v10, %v116_v52  ;;  %2121 = vmatmul.mubr.f32.gmra.mrb[24].mxu1 %v509_v58  ;;  %v512_v15 = vmax.f32 %v384_v62, 0.0  ;;  %v73_v58 = vld [vmem:[%s3884_s0 + $0x198] sm:$0xff]  ;;  %v258_v62 = vmul.f32 %v2290_v10, %v123_v50 }
  0x61   :  { %2036 = vmatprep.mubr.f32.mxu0 %v452_v3  ;;  %v200_v3 = vmul.f32 %v2290_v10, %v65_v56  ;;  %2123 = vmatprep.mubr.f32.mxu1 %v510_v61  ;;  %v461_v19 = vmax.f32 %v333_v2, 0.0  ;;  %v340_v56 = vadd.f32 %v2302_v14, %v205_v41  ;;  %v391_v61 = vadd.f32 %v2302_v14, %v256_v46  ;;  %v125_v2 = vld [vmem:[%s3884_s0 + $0x338] sm:$0xff]  ;;  %v130_v41 = vld [vmem:[%s3884_s0 + $0x360] sm:$0xff] }
  0x62   :  { %v386_v16 = vadd.f32 %v2302_v14, %v251_v63 }
  0x63   :  { %v335_v20 = vadd.f32 %v2302_v14, %v200_v3  ;;  %v468_v7 = vmax.f32 %v340_v56, 0.0  ;;  %v519_v13 = vmax.f32 %v391_v61, 0.0  ;;  %v132_v56 = vld [vmem:[%s3884_s0 + $0x370] sm:$0xff]  ;;  %v82_v61 = vld [vmem:[%s3884_s0 + $0x1e0] sm:$0xff] }
  0x64   :  { %2037 = vmatmul.mubr.f32.gmra.mrb[32].mxu0 %v453_v17  ;;  %v253_v17 = vmul.f32 %v2290_v10, %v118_v4  ;;  %2124 = vmatmul.mubr.f32.gmra.mrb[26].mxu1 %v511_v11  ;;  %v514_v31 = vmax.f32 %v386_v16, 0.0  ;;  %v75_v11 = vld [vmem:[%s3884_s0 + $0x1a8] sm:$0xff]  ;;  %v260_v16 = vmul.f32 %v2290_v10, %v125_v2 }
  0x65   :  { %2039 = vmatprep.mubr.f32.mxu0 %v454_v21  ;;  %v202_v21 = vmul.f32 %v2290_v10, %v67_v8  ;;  %2126 = vmatprep.mubr.f32.mxu1 %v512_v15  ;;  %v463_v35 = vmax.f32 %v335_v20, 0.0  ;;  %v342_v8 = vadd.f32 %v2302_v14, %v207_v57  ;;  %v393_v15 = vadd.f32 %v2302_v14, %v258_v62  ;;  %v127_v20 = vld [vmem:[%s3884_s0 + $0x348] sm:$0xff] }
  0x66   :  { %v388_v32 = vadd.f32 %v2302_v14, %v253_v17 }
  0x67   :  { %v337_v36 = vadd.f32 %v2302_v14, %v202_v21  ;;  %v470_v25 = vmax.f32 %v342_v8, 0.0  ;;  %v521_v30 = vmax.f32 %v393_v15, 0.0  ;;  %v134_v8 = vld [vmem:[%s3884_s0 + $0x380] sm:$0xff]  ;;  %v84_v15 = vld [vmem:[%s3884_s0 + $0x1f0] sm:$0xff] }
  0x68   :  { %2040 = vmatmul.mubr.f32.gmra.mrb[34].mxu0 %v455_v33  ;;  %v255_v33 = vmul.f32 %v2290_v10, %v120_v22  ;;  %2127 = vmatmul.mubr.f32.gmra.mrb[28].mxu1 %v513_v28  ;;  %v516_v47 = vmax.f32 %v388_v32, 0.0  ;;  %v77_v28 = vld [vmem:[%s3884_s0 + $0x1b8] sm:$0xff]  ;;  %v262_v32 = vmul.f32 %v2290_v10, %v127_v20 }
  0x69   :  { %2042 = vmatprep.mubr.f32.mxu0 %v456_v37  ;;  %v204_v37 = vmul.f32 %v2290_v10, %v69_v26  ;;  %2129 = vmatprep.mubr.f32.mxu1 %v514_v31  ;;  %v465_v51 = vmax.f32 %v337_v36, 0.0  ;;  %v344_v26 = vadd.f32 %v2302_v14, %v209_v9  ;;  %v395_v31 = vadd.f32 %v2302_v14, %v260_v16  ;;  %v129_v36 = vld [vmem:[%s3884_s0 + $0x358] sm:$0xff] }
  0x6a   :  { %v390_v48 = vadd.f32 %v2302_v14, %v255_v33 }
  0x6b   :  { %v339_v52 = vadd.f32 %v2302_v14, %v204_v37  ;;  %v523_v46 = vmax.f32 %v395_v31, 0.0 }
  0x6c   :  { %2043 = vmatmul.mubr.f32.gmra.mrb[36].mxu0 %v457_v49  ;;  %v257_v49 = vmul.f32 %v2290_v10, %v122_v38  ;;  %2130 = vmatmul.mubr.f32.gmra.mrb[30].mxu1 %v515_v44  ;;  %v518_v63 = vmax.f32 %v390_v48, 0.0  ;;  %v79_v44 = vld [vmem:[%s3884_s0 + $0x1c8] sm:$0xff] }
  0x6d   :  { %2045 = vmatprep.mubr.f32.mxu0 %v458_v53  ;;  %v206_v53 = vmul.f32 %v2290_v10, %v71_v42  ;;  %2132 = vmatprep.mubr.f32.mxu1 %v516_v47  ;;  %v467_v3 = vmax.f32 %v339_v52, 0.0  ;;  %v2832_v42 = vld [vmem:[%s3886_s2] ss:$0 sm:$0xff]  ;;  %v131_v52 = vld [vmem:[%s3884_s0 + $0x368] sm:$0xff] }
  0x6e   :  { %v392_v0 = vadd.f32 %v2302_v14, %v257_v49  ;;  %v397_v47 = vadd.f32 %v2832_v42, %v262_v32 }
  0x6f   :  { %v341_v4 = vadd.f32 %v2302_v14, %v206_v53 }
  0x70   :  { %2046 = vmatmul.mubr.f32.gmra.mrb[38].mxu0 %v459_v1  ;;  %v259_v1 = vmul.f32 %v2290_v10, %v124_v54  ;;  %2133 = vmatmul.mubr.f32.gmra.mrb[32].mxu1 %v517_v60  ;;  %v520_v17 = vmax.f32 %v392_v0, 0.0  ;;  %v81_v60 = vld [vmem:[%s3884_s0 + $0x1d8] sm:$0xff]  ;;  %v525_v62 = vmax.f32 %v397_v47, 0.0 }
  0x71   :  { %2048 = vmatprep.mubr.f32.mxu0 %v460_v5  ;;  %v208_v5 = vmul.f32 %v2290_v10, %v73_v58  ;;  %2135 = vmatprep.mubr.f32.mxu1 %v518_v63  ;;  %v469_v21 = vmax.f32 %v341_v4, 0.0  ;;  %v133_v4 = vld [vmem:[%s3884_s0 + $0x378] sm:$0xff] }
  0x72   :  { %v394_v18 = vadd.f32 %v2302_v14, %v259_v1 }
  0x73   :  { %v343_v22 = vadd.f32 %v2302_v14, %v208_v5 }
  0x74   :  { %2049 = vmatmul.mubr.f32.gmra.mrb[40].mxu0 %v461_v19  ;;  %v261_v19 = vmul.f32 %v2290_v10, %v126_v6  ;;  %2136 = vmatmul.mubr.f32.gmra.mrb[34].mxu1 %v519_v13  ;;  %v522_v33 = vmax.f32 %v394_v18, 0.0  ;;  %v83_v13 = vld [vmem:[%s3884_s0 + $0x1e8] sm:$0xff] }
  0x75   :  { %2051 = vmatprep.mubr.f32.mxu0 %v462_v23  ;;  %v210_v23 = vmul.f32 %v2290_v10, %v75_v11  ;;  %2138 = vmatprep.mubr.f32.mxu1 %v520_v17  ;;  %v471_v37 = vmax.f32 %v343_v22, 0.0  ;;  %v135_v22 = vld [vmem:[%s3884_s0 + $0x388] sm:$0xff] }
  0x76   :  { %v396_v34 = vadd.f32 %v2302_v14, %v261_v19 }
  0x77   :  { %v345_v38 = vadd.f32 %v2302_v14, %v210_v23  ;;  %v346_v14 = vadd.f32 %v2832_v42, %v211_v27 }
  0x78   :  { %2052 = vmatmul.mubr.f32.gmra.mrb[42].mxu0 %v463_v35  ;;  %v263_v35 = vmul.f32 %v2290_v10, %v128_v24  ;;  %v472_v10 = vmax.f32 %v344_v26, 0.0  ;;  %2139 = vmatmul.mubr.f32.gmra.mrb[36].mxu1 %v521_v30  ;;  %v524_v49 = vmax.f32 %v396_v34, 0.0  ;;  %v136_v26 = vld [vmem:[%s3884_s0 + $0x390] sm:$0xff]  ;;  %v85_v30 = vld [vmem:[%s3884_s0 + $0x1f8] sm:$0xff] }
  0x79   :  { %2054 = vmatprep.mubr.f32.mxu0 %v464_v39  ;;  %v2823_v39 = vld [vmem:[%s3885_s1] ss:$0 sm:$0xff]  ;;  %2141 = vmatprep.mubr.f32.mxu1 %v522_v33  ;;  %v473_v53 = vmax.f32 %v345_v38, 0.0  ;;  %v474_v57 = vmax.f32 %v346_v14, 0.0 }
  0x7a   :  { %v212_v40 = vmul.f32 %v2823_v39, %v77_v28  ;;  %v213_v43 = vmul.f32 %v2823_v39, %v78_v29  ;;  %v264_v48 = vmul.f32 %v2823_v39, %v129_v36  ;;  %v398_v50 = vadd.f32 %v2832_v42, %v263_v35 }
  0x7b   :  { %v215_v59 = vmul.f32 %v2823_v39, %v80_v45  ;;  %v266_v0 = vmul.f32 %v2823_v39, %v131_v52  ;;  %v217_v12 = vmul.f32 %v2823_v39, %v82_v61  ;;  %v268_v18 = vmul.f32 %v2823_v39, %v133_v4  ;;  %v141_v61 = vld [vmem:[%s3884_s0 + $0x3b8] sm:$0xff] }
  0x7c   :  { %2055 = vmatmul.mubr.f32.gmra.mrb[44].mxu0 %v465_v51  ;;  %v265_v51 = vmul.f32 %v2823_v39, %v130_v41  ;;  %v347_v54 = vadd.f32 %v2832_v42, %v212_v40  ;;  %v348_v58 = vadd.f32 %v2832_v42, %v213_v43  ;;  %2142 = vmatmul.mubr.f32.gmra.mrb[38].mxu1 %v523_v46  ;;  %v526_v1 = vmax.f32 %v398_v50, 0.0  ;;  %v139_v50 = vld [vmem:[%s3884_s0 + $0x3a8] sm:$0xff] }
  0x7d   :  { %2057 = vmatprep.mubr.f32.mxu0 %v466_v55  ;;  %v214_v55 = vmul.f32 %v2823_v39, %v79_v44  ;;  %v399_v63 = vadd.f32 %v2832_v42, %v264_v48  ;;  %2144 = vmatprep.mubr.f32.mxu1 %v524_v49  ;;  %v350_v11 = vadd.f32 %v2832_v42, %v215_v59 }
  0x7e   :  { %v400_v2 = vadd.f32 %v2832_v42, %v265_v51  ;;  %v475_v5 = vmax.f32 %v347_v54, 0.0  ;;  %v476_v9 = vmax.f32 %v348_v58, 0.0  ;;  %v401_v17 = vadd.f32 %v2832_v42, %v266_v0 }
  0x7f   :  { %v349_v6 = vadd.f32 %v2832_v42, %v214_v55  ;;  %v527_v16 = vmax.f32 %v399_v63, 0.0  ;;  %v478_v27 = vmax.f32 %v350_v11, 0.0  ;;  %v352_v28 = vadd.f32 %v2832_v42, %v217_v12  ;;  %v142_v63 = vld [vmem:[%s3884_s0 + $0x3c0] sm:$0xff] }
  0x80   :  { %2058 = vmatmul.mubr.f32.gmra.mrb[46].mxu0 %v467_v3  ;;  %v267_v3 = vmul.f32 %v2823_v39, %v132_v56  ;;  %2145 = vmatmul.mubr.f32.gmra.mrb[40].mxu1 %v525_v62  ;;  %v528_v19 = vmax.f32 %v400_v2, 0.0  ;;  %v219_v29 = vmul.f32 %v2823_v39, %v84_v15  ;;  %v529_v31 = vmax.f32 %v401_v17, 0.0  ;;  %v146_v17 = vld [vmem:[%s3884_s0 + $0x3e0] sm:$0xff] }
  0x81   :  { %2060 = vmatprep.mubr.f32.mxu0 %v468_v7  ;;  %v216_v7 = vmul.f32 %v2823_v39, %v81_v60  ;;  %2147 = vmatprep.mubr.f32.mxu1 %v526_v1  ;;  %v477_v23 = vmax.f32 %v349_v6, 0.0  ;;  %v403_v32 = vadd.f32 %v2832_v42, %v268_v18  ;;  %v270_v33 = vmul.f32 %v2823_v39, %v135_v22  ;;  %v143_v6 = vld [vmem:[%s3884_s0 + $0x3c8] sm:$0xff] }
  0x82   :  { %v402_v20 = vadd.f32 %v2832_v42, %v267_v3  ;;  %v271_v36 = vmul.f32 %v2823_v39, %v136_v26  ;;  %v220_v41 = vmul.f32 %v2823_v39, %v85_v30  ;;  %v480_v14 = vmax.f32 %v352_v28, 0.0 }
  0x83   :  { %v351_v24 = vadd.f32 %v2832_v42, %v216_v7  ;;  %v354_v43 = vadd.f32 %v2832_v42, %v219_v29  ;;  %v531_v44 = vmax.f32 %v403_v32, 0.0  ;;  %v405_v45 = vadd.f32 %v2832_v42, %v270_v33  ;;  %v144_v7 = vld [vmem:[%s3884_s0 + $0x3d0] sm:$0xff]  ;;  %v149_v32 = vld [vmem:[%s3884_s0 + $0x3f8] sm:$0xff] }
  0x84   :  { %2061 = vmatmul.mubr.f32.gmra.mrb[48].mxu0 %v469_v21  ;;  %v269_v21 = vmul.f32 %v2823_v39, %v134_v8  ;;  %2148 = vmatmul.mubr.f32.gmra.mrb[42].mxu1 %v527_v16  ;;  %v530_v34 = vmax.f32 %v402_v20, 0.0  ;;  %v406_v48 = vadd.f32 %v2832_v42, %v271_v36  ;;  %v355_v52 = vadd.f32 %v2832_v42, %v220_v41  ;;  %v145_v16 = vld [vmem:[%s3884_s0 + $0x3d8] sm:$0xff] }
  0x85   :  { %2063 = vmatprep.mubr.f32.mxu0 %v470_v25  ;;  %v218_v25 = vmul.f32 %v2823_v39, %v83_v13  ;;  %2150 = vmatprep.mubr.f32.mxu1 %v528_v19  ;;  %v479_v38 = vmax.f32 %v351_v24, 0.0  ;;  %v482_v54 = vmax.f32 %v354_v43, 0.0  ;;  %v533_v55 = vmax.f32 %v405_v45, 0.0  ;;  %v147_v24 = vld [vmem:[%s3884_s0 + $0x3e8] sm:$0xff] }
  0x86   :  { %v404_v35 = vadd.f32 %v2832_v42, %v269_v21  ;;  %v534_v58 = vmax.f32 %v406_v48, 0.0  ;;  %v483_v62 = vmax.f32 %v355_v52, 0.0  ;;  %v276_v2 = vmul.f32 %v2823_v39, %v141_v61 }
  0x87   :  { %v353_v40 = vadd.f32 %v2832_v42, %v218_v25  ;;  %v278_v11 = vmul.f32 %v2823_v39, %v143_v6  ;;  %v279_v15 = vmul.f32 %v2823_v39, %v144_v7  ;;  %v280_v20 = vmul.f32 %v2823_v39, %v145_v16  ;;  %v148_v25 = vld [vmem:[%s3884_s0 + $0x3f0] sm:$0xff] }
  0x88   :  { %2064 = vmatmul.mubr.f32.gmra.mrb[50].mxu0 %v471_v37  ;;  %v137_v37 = vld [vmem:[%s3884_s0 + $0x398] sm:$0xff]  ;;  %2151 = vmatmul.mubr.f32.gmra.mrb[44].mxu1 %v529_v31  ;;  %v532_v47 = vmax.f32 %v404_v35, 0.0  ;;  %v282_v28 = vmul.f32 %v2823_v39, %v147_v24  ;;  %v283_v31 = vmul.f32 %v2823_v39, %v148_v25  ;;  %v284_v35 = vmul.f32 %v2823_v39, %v149_v32 }
  0x89   :  { %2066 = vmatprep.mubr.f32.mxu0 %v472_v10  ;;  %v138_v10 = vld [vmem:[%s3884_s0 + $0x3a0] sm:$0xff]  ;;  %v272_v46 = vmul.f32 %v2823_v39, %v137_v37  ;;  %2153 = vmatprep.mubr.f32.mxu1 %v530_v34  ;;  %v481_v51 = vmax.f32 %v353_v40, 0.0  ;;  %v413_v19 = vadd.f32 %v2832_v42, %v278_v11  ;;  %v414_v22 = vadd.f32 %v2832_v42, %v279_v15 }
  0x8a   :  { %v273_v49 = vmul.f32 %v2823_v39, %v138_v10  ;;  %v417_v34 = vadd.f32 %v2832_v42, %v282_v28  ;;  %v418_v37 = vadd.f32 %v2832_v42, %v283_v31  ;;  %v419_v40 = vadd.f32 %v2832_v42, %v284_v35 }
  0x8b   :  { %v407_v56 = vadd.f32 %v2832_v42, %v272_v46  ;;  %v541_v26 = vmax.f32 %v413_v19, 0.0  ;;  %v542_v29 = vmax.f32 %v414_v22, 0.0 }
  0x8c   :  { %2067 = vmatmul.mubr.f32.gmra.mrb[52].mxu0 %v473_v53  ;;  %v140_v53 = vld [vmem:[%s3884_s0 + $0x3b0] sm:$0xff]  ;;  %2154 = vmatmul.mubr.f32.gmra.mrb[46].mxu1 %v531_v44  ;;  %v408_v59 = vadd.f32 %v2832_v42, %v273_v49  ;;  %v546_v41 = vmax.f32 %v418_v37, 0.0  ;;  %v547_v10 = vmax.f32 %v419_v40, 0.0 }
  0x8d   :  { %2069 = vmatprep.mubr.f32.mxu0 %v474_v57  ;;  %v274_v57 = vmul.f32 %v2823_v39, %v139_v50  ;;  %2156 = vmatprep.mubr.f32.mxu1 %v532_v47  ;;  %v275_v60 = vmul.f32 %v2823_v39, %v140_v53  ;;  %v535_v0 = vmax.f32 %v407_v56, 0.0 }
  0x8e   :  { %v536_v3 = vmax.f32 %v408_v59, 0.0 }
  0x8f   :  { %v409_v1 = vadd.f32 %v2832_v42, %v274_v57  ;;  %v410_v4 = vadd.f32 %v2832_v42, %v275_v60 }
  0x90   :  { %2070 = vmatmul.mubr.f32.gmra.mrb[54].mxu0 %v475_v5  ;;  %2157 = vmatmul.mubr.f32.gmra.mrb[48].mxu1 %v533_v55  ;;  %v277_v5 = vmul.f32 %v2823_v39, %v142_v63 }
  0x91   :  { %2072 = vmatprep.mubr.f32.mxu0 %v476_v9  ;;  %2159 = vmatprep.mubr.f32.mxu1 %v534_v58  ;;  %v537_v8 = vmax.f32 %v409_v1, 0.0  ;;  %v411_v9 = vadd.f32 %v2832_v42, %v276_v2  ;;  %v538_v12 = vmax.f32 %v410_v4, 0.0 }
  0x92   :  { %v412_v13 = vadd.f32 %v2832_v42, %v277_v5 }
  0x93   :  { %v539_v18 = vmax.f32 %v411_v9, 0.0 }
  0x94   :  { %2073 = vmatmul.mubr.f32.gmra.mrb[56].mxu0 %v477_v23  ;;  %2160 = vmatmul.mubr.f32.gmra.mrb[50].mxu1 %v535_v0  ;;  %v540_v21 = vmax.f32 %v412_v13, 0.0  ;;  %v281_v23 = vmul.f32 %v2823_v39, %v146_v17 }
  0x95   :  { %2075 = vmatprep.mubr.f32.mxu0 %v478_v27  ;;  %2162 = vmatprep.mubr.f32.mxu1 %v536_v3  ;;  %v415_v27 = vadd.f32 %v2832_v42, %v280_v20 }
  0x96   :  { %v416_v30 = vadd.f32 %v2832_v42, %v281_v23 }
  0x97   :  { %v543_v33 = vmax.f32 %v415_v27, 0.0 }
  0x98   :  { %2076 = vmatmul.mubr.f32.gmra.mrb[58].mxu0 %v479_v38  ;;  %2163 = vmatmul.mubr.f32.gmra.mrb[52].mxu1 %v537_v8  ;;  %v544_v36 = vmax.f32 %v416_v30, 0.0  ;;  %v545_v38 = vmax.f32 %v417_v34, 0.0 }
  0x99   :  { %2078 = vmatprep.mubr.f32.mxu0 %v480_v14  ;;  %2165 = vmatprep.mubr.f32.mxu1 %v538_v12  ;;  %v2977_v14 = vld [vmem:[%s3887_s4] ss:$0 sm:$0xff] }
  0x9c   :  { %2079 = vmatmul.mubr.f32.gmra.mrb[60].mxu0 %v481_v51  ;;  %2166 = vmatmul.mubr.f32.gmra.mrb[54].mxu1 %v539_v18 }
  0x9d   :  { %2081 = vmatprep.mubr.f32.mxu0 %v482_v54  ;;  %2168 = vmatprep.mubr.f32.mxu1 %v540_v21 }
  0xa0   :  { %2082 = vmatmul.mubr.f32.gmra.mrb[62].mxu0 %v483_v62  ;;  %2169 = vmatmul.mubr.f32.gmra.mrb[56].mxu1 %v541_v26 }
  0xa1   :  { %2171 = vmatprep.mubr.f32.mxu1 %v542_v29 }
  0xa4   :  { %2172 = vmatmul.mubr.f32.gmra.mrb[58].mxu1 %v543_v33 }
  0xa5   :  { %2174 = vmatprep.mubr.f32.mxu1 %v544_v36 }
  0xa8   :  { %2175 = vmatmul.mubr.f32.gmra.mrb[60].mxu1 %v545_v38 }
  0xa9   :  { %2177 = vmatprep.mubr.f32.mxu1 %v546_v41 }
  0xac   :  { %2178 = vmatmul.mubr.f32.gmra.mrb[62].mxu1 %v547_v10 }
  0xf7   :  { %v1990_v39 = vpop.f32.mrb[0].mxu0 }
  0xf8   :  { %v643_v43 = vadd.f32 %v1990_v39, %v2977_v14  ;;  %v637_v44 = vpop.f32.mrb[1].mxu0 }
  0xf9   :  { %v638_v45 = vadd.f32 %v2977_v14, %v637_v44 }
  0xfa   :  { %1277 = vst [vmem:[%s3888_s5 + $0x8] sm:$0xff] %v643_v43  ;;  %v1538_v42 = vmul.f32 %v643_v43, %v643_v43 }
  0xfb   :  { %1276 = vst [vmem:[%s3888_s5] sm:$0xff] %v638_v45  ;;  %v1404_v46 = vadd.f32 %v643_v43, %v638_v45  ;;  %v1537_v47 = vmul.f32 %v638_v45, %v638_v45  ;;  %v1993_v48 = vpop.f32.mrb[2].mxu0 }
  0xfc   :  { %v653_v49 = vadd.f32 %v1993_v48, %v2977_v14  ;;  %v647_v50 = vpop.f32.mrb[3].mxu0 }
  0xfd   :  { %v1665_v51 = vadd.f32 %v1538_v42, %v1537_v47  ;;  %v648_v52 = vadd.f32 %v2977_v14, %v647_v50 }
  0xfe   :  { %1279 = vst [vmem:[%s3888_s5 + $0x18] sm:$0xff] %v653_v49  ;;  %v1540_v58 = vmul.f32 %v653_v49, %v653_v49 }
  0xff   :  { %1278 = vst [vmem:[%s3888_s5 + $0x10] sm:$0xff] %v648_v52  ;;  %v1405_v53 = vadd.f32 %v1404_v46, %v648_v52  ;;  %v1539_v54 = vmul.f32 %v648_v52, %v648_v52  ;;  %v1996_v55 = vpop.f32.mrb[4].mxu0  ;;  %v2086_v41 = vpop.f32.mrb[0].mxu1 }
 0x100   :  { %v663_v56 = vadd.f32 %v1996_v55, %v2977_v14  ;;  %v657_v57 = vpop.f32.mrb[5].mxu0  ;;  %v3033_v10 = vadd.f32 %v2086_v41, %v2977_v14  ;;  %v957_v39 = vpop.f32.mrb[1].mxu1 }
 0x101   :  { %v1406_v59 = vadd.f32 %v1405_v53, %v653_v49  ;;  %v1666_v60 = vadd.f32 %v1665_v51, %v1539_v54  ;;  %v658_v61 = vadd.f32 %v2977_v14, %v657_v57  ;;  %v3039_v46 = vadd.f32 %v2977_v14, %v957_v39 }
 0x102   :  { %1281 = vst [vmem:[%s3888_s5 + $0x28] sm:$0xff] %v663_v56  ;;  %v1542_v4 = vmul.f32 %v663_v56, %v663_v56  ;;  %1341 = vst [vmem:[%s3888_s5 + $0x208] sm:$0xff] %v3033_v10 }
 0x103   :  { %v1667_v62 = vadd.f32 %v1666_v60, %v1540_v58  ;;  %1280 = vst [vmem:[%s3888_s5 + $0x20] sm:$0xff] %v658_v61  ;;  %v1407_v63 = vadd.f32 %v1406_v59, %v658_v61  ;;  %v1541_v0 = vmul.f32 %v658_v61, %v658_v61  ;;  %v1999_v1 = vpop.f32.mrb[6].mxu0  ;;  %1340 = vst [vmem:[%s3888_s5 + $0x200] sm:$0xff] %v3039_v46  ;;  %v2089_v53 = vpop.f32.mrb[2].mxu1 }
 0x104   :  { %v673_v2 = vadd.f32 %v1999_v1, %v2977_v14  ;;  %v667_v3 = vpop.f32.mrb[7].mxu0  ;;  %v3055_v54 = vadd.f32 %v2089_v53, %v2977_v14  ;;  %v967_v55 = vpop.f32.mrb[3].mxu1 }
 0x105   :  { %v1408_v5 = vadd.f32 %v1407_v63, %v663_v56  ;;  %v1668_v6 = vadd.f32 %v1667_v62, %v1541_v0  ;;  %v668_v7 = vadd.f32 %v2977_v14, %v667_v3  ;;  %v3061_v60 = vadd.f32 %v2977_v14, %v967_v55 }
 0x106   :  { %1283 = vst [vmem:[%s3888_s5 + $0x38] sm:$0xff] %v673_v2  ;;  %v1544_v16 = vmul.f32 %v673_v2, %v673_v2  ;;  %1343 = vst [vmem:[%s3888_s5 + $0x218] sm:$0xff] %v3055_v54 }
 0x107   :  { %v1669_v8 = vadd.f32 %v1668_v6, %v1542_v4  ;;  %1282 = vst [vmem:[%s3888_s5 + $0x30] sm:$0xff] %v668_v7  ;;  %v1409_v9 = vadd.f32 %v1408_v5, %v668_v7  ;;  %v1543_v11 = vmul.f32 %v668_v7, %v668_v7  ;;  %v2002_v12 = vpop.f32.mrb[8].mxu0  ;;  %1342 = vst [vmem:[%s3888_s5 + $0x210] sm:$0xff] %v3061_v60  ;;  %v2092_v3 = vpop.f32.mrb[4].mxu1 }
 0x108   :  { %v683_v13 = vadd.f32 %v2002_v12, %v2977_v14  ;;  %v677_v15 = vpop.f32.mrb[9].mxu0  ;;  %v3077_v4 = vadd.f32 %v2092_v3, %v2977_v14  ;;  %v977_v5 = vpop.f32.mrb[5].mxu1 }
 0x109   :  { %v1410_v17 = vadd.f32 %v1409_v9, %v673_v2  ;;  %v1670_v18 = vadd.f32 %v1669_v8, %v1543_v11  ;;  %v678_v19 = vadd.f32 %v2977_v14, %v677_v15  ;;  %v3083_v11 = vadd.f32 %v2977_v14, %v977_v5 }
 0x10a   :  { %1285 = vst [vmem:[%s3888_s5 + $0x48] sm:$0xff] %v683_v13  ;;  %v1546_v26 = vmul.f32 %v683_v13, %v683_v13  ;;  %1345 = vst [vmem:[%s3888_s5 + $0x228] sm:$0xff] %v3077_v4 }
 0x10b   :  { %v1671_v20 = vadd.f32 %v1670_v18, %v1544_v16  ;;  %1284 = vst [vmem:[%s3888_s5 + $0x40] sm:$0xff] %v678_v19  ;;  %v1411_v21 = vadd.f32 %v1410_v17, %v678_v19  ;;  %v1545_v22 = vmul.f32 %v678_v19, %v678_v19  ;;  %v2005_v23 = vpop.f32.mrb[10].mxu0  ;;  %1344 = vst [vmem:[%s3888_s5 + $0x220] sm:$0xff] %v3083_v11 }
 0x10c   :  { %v693_v24 = vadd.f32 %v2005_v23, %v2977_v14  ;;  %v687_v25 = vpop.f32.mrb[11].mxu0 }
 0x10d   :  { %v1412_v27 = vadd.f32 %v1411_v21, %v683_v13  ;;  %v1672_v28 = vadd.f32 %v1671_v20, %v1545_v22  ;;  %v688_v29 = vadd.f32 %v2977_v14, %v687_v25 }
 0x10e   :  { %1287 = vst [vmem:[%s3888_s5 + $0x58] sm:$0xff] %v693_v24  ;;  %v1548_v36 = vmul.f32 %v693_v24, %v693_v24 }
 0x10f   :  { %v1673_v30 = vadd.f32 %v1672_v28, %v1546_v26  ;;  %1286 = vst [vmem:[%s3888_s5 + $0x50] sm:$0xff] %v688_v29  ;;  %v1413_v31 = vadd.f32 %v1412_v27, %v688_v29  ;;  %v1547_v32 = vmul.f32 %v688_v29, %v688_v29  ;;  %v2008_v33 = vpop.f32.mrb[12].mxu0  ;;  %v2095_v19 = vpop.f32.mrb[6].mxu1 }
 0x110   :  { %v703_v34 = vadd.f32 %v2008_v33, %v2977_v14  ;;  %v697_v35 = vpop.f32.mrb[13].mxu0  ;;  %v3099_v20 = vadd.f32 %v2095_v19, %v2977_v14  ;;  %v987_v21 = vpop.f32.mrb[7].mxu1 }
 0x111   :  { %v1414_v37 = vadd.f32 %v1413_v31, %v693_v24  ;;  %v1674_v38 = vadd.f32 %v1673_v30, %v1547_v32  ;;  %v698_v40 = vadd.f32 %v2977_v14, %v697_v35  ;;  %v3105_v26 = vadd.f32 %v2977_v14, %v987_v21 }
 0x112   :  { %1289 = vst [vmem:[%s3888_s5 + $0x68] sm:$0xff] %v703_v34  ;;  %v1550_v49 = vmul.f32 %v703_v34, %v703_v34  ;;  %1347 = vst [vmem:[%s3888_s5 + $0x238] sm:$0xff] %v3099_v20 }
 0x113   :  { %v1675_v43 = vadd.f32 %v1674_v38, %v1548_v36  ;;  %1288 = vst [vmem:[%s3888_s5 + $0x60] sm:$0xff] %v698_v40  ;;  %v1415_v44 = vadd.f32 %v1414_v37, %v698_v40  ;;  %v1549_v45 = vmul.f32 %v698_v40, %v698_v40  ;;  %v2011_v42 = vpop.f32.mrb[14].mxu0  ;;  %1346 = vst [vmem:[%s3888_s5 + $0x230] sm:$0xff] %v3105_v26  ;;  %v2098_v33 = vpop.f32.mrb[8].mxu1 }
 0x114   :  { %v713_v47 = vadd.f32 %v2011_v42, %v2977_v14  ;;  %v707_v48 = vpop.f32.mrb[15].mxu0  ;;  %v997_v35 = vpop.f32.mrb[9].mxu1 }
 0x115   :  { %v1416_v50 = vadd.f32 %v1415_v44, %v703_v34  ;;  %v1676_v51 = vadd.f32 %v1675_v43, %v1549_v45  ;;  %v708_v52 = vadd.f32 %v2977_v14, %v707_v48  ;;  %v3121_v34 = vadd.f32 %v2098_v33, %v2977_v14 }
 0x116   :  { %1291 = vst [vmem:[%s3888_s5 + $0x78] sm:$0xff] %v713_v47  ;;  %v1552_v63 = vmul.f32 %v713_v47, %v713_v47  ;;  %v3127_v41 = vadd.f32 %v2977_v14, %v997_v35 }
 0x117   :  { %v1677_v56 = vadd.f32 %v1676_v51, %v1550_v49  ;;  %1290 = vst [vmem:[%s3888_s5 + $0x70] sm:$0xff] %v708_v52  ;;  %v1417_v57 = vadd.f32 %v1416_v50, %v708_v52  ;;  %v1551_v58 = vmul.f32 %v708_v52, %v708_v52  ;;  %v2014_v59 = vpop.f32.mrb[16].mxu0  ;;  %1349 = vst [vmem:[%s3888_s5 + $0x248] sm:$0xff] %v3121_v34  ;;  %v2101_v48 = vpop.f32.mrb[10].mxu1 }
 0x118   :  { %v723_v61 = vadd.f32 %v2014_v59, %v2977_v14  ;;  %v717_v62 = vpop.f32.mrb[17].mxu0  ;;  %1348 = vst [vmem:[%s3888_s5 + $0x240] sm:$0xff] %v3127_v41  ;;  %v3143_v49 = vadd.f32 %v2101_v48, %v2977_v14  ;;  %v1007_v50 = vpop.f32.mrb[11].mxu1 }
 0x119   :  { %v1418_v0 = vadd.f32 %v1417_v57, %v713_v47  ;;  %v1678_v1 = vadd.f32 %v1677_v56, %v1551_v58  ;;  %v718_v2 = vadd.f32 %v2977_v14, %v717_v62  ;;  %v3149_v56 = vadd.f32 %v2977_v14, %v1007_v50 }
 0x11a   :  { %1293 = vst [vmem:[%s3888_s5 + $0x88] sm:$0xff] %v723_v61  ;;  %v1554_v15 = vmul.f32 %v723_v61, %v723_v61  ;;  %1351 = vst [vmem:[%s3888_s5 + $0x258] sm:$0xff] %v3143_v49 }
 0x11b   :  { %v1679_v6 = vadd.f32 %v1678_v1, %v1552_v63  ;;  %1292 = vst [vmem:[%s3888_s5 + $0x80] sm:$0xff] %v718_v2  ;;  %v1419_v7 = vadd.f32 %v1418_v0, %v718_v2  ;;  %v1553_v8 = vmul.f32 %v718_v2, %v718_v2  ;;  %v2017_v9 = vpop.f32.mrb[18].mxu0  ;;  %1350 = vst [vmem:[%s3888_s5 + $0x250] sm:$0xff] %v3149_v56  ;;  %v2104_v0 = vpop.f32.mrb[12].mxu1 }
 0x11c   :  { %v733_v12 = vadd.f32 %v2017_v9, %v2977_v14  ;;  %v727_v13 = vpop.f32.mrb[19].mxu0  ;;  %v3165_v1 = vadd.f32 %v2104_v0, %v2977_v14  ;;  %v1017_v2 = vpop.f32.mrb[13].mxu1 }
 0x11d   :  { %v1420_v16 = vadd.f32 %v1419_v7, %v723_v61  ;;  %v1680_v17 = vadd.f32 %v1679_v6, %v1553_v8  ;;  %v728_v18 = vadd.f32 %v2977_v14, %v727_v13  ;;  %v3171_v8 = vadd.f32 %v2977_v14, %v1017_v2 }
 0x11e   :  { %1295 = vst [vmem:[%s3888_s5 + $0x98] sm:$0xff] %v733_v12  ;;  %v1556_v29 = vmul.f32 %v733_v12, %v733_v12  ;;  %1353 = vst [vmem:[%s3888_s5 + $0x268] sm:$0xff] %v3165_v1 }
 0x11f   :  { %v1681_v22 = vadd.f32 %v1680_v17, %v1554_v15  ;;  %1294 = vst [vmem:[%s3888_s5 + $0x90] sm:$0xff] %v728_v18  ;;  %v1421_v23 = vadd.f32 %v1420_v16, %v728_v18  ;;  %v1555_v24 = vmul.f32 %v728_v18, %v728_v18  ;;  %v2020_v25 = vpop.f32.mrb[20].mxu0  ;;  %1352 = vst [vmem:[%s3888_s5 + $0x260] sm:$0xff] %v3171_v8  ;;  %v2107_v18 = vpop.f32.mrb[14].mxu1 }
 0x120   :  { %v743_v27 = vadd.f32 %v2020_v25, %v2977_v14  ;;  %v737_v28 = vpop.f32.mrb[21].mxu0  ;;  %v3187_v19 = vadd.f32 %v2107_v18, %v2977_v14  ;;  %v1027_v21 = vpop.f32.mrb[15].mxu1 }
 0x121   :  { %v1422_v30 = vadd.f32 %v1421_v23, %v733_v12  ;;  %v1682_v31 = vadd.f32 %v1681_v22, %v1555_v24  ;;  %v738_v32 = vadd.f32 %v2977_v14, %v737_v28 }
 0x122   :  { %1297 = vst [vmem:[%s3888_s5 + $0xa8] sm:$0xff] %v743_v27  ;;  %v1558_v44 = vmul.f32 %v743_v27, %v743_v27  ;;  %1355 = vst [vmem:[%s3888_s5 + $0x278] sm:$0xff] %v3187_v19 }
 0x123   :  { %v1683_v36 = vadd.f32 %v1682_v31, %v1556_v29  ;;  %1296 = vst [vmem:[%s3888_s5 + $0xa0] sm:$0xff] %v738_v32  ;;  %v1423_v37 = vadd.f32 %v1422_v30, %v738_v32  ;;  %v1557_v38 = vmul.f32 %v738_v32, %v738_v32  ;;  %v2023_v40 = vpop.f32.mrb[22].mxu0  ;;  %v2110_v35 = vpop.f32.mrb[16].mxu1 }
 0x124   :  { %v753_v39 = vadd.f32 %v2023_v40, %v2977_v14  ;;  %v747_v43 = vpop.f32.mrb[23].mxu0 }
 0x125   :  { %v1424_v45 = vadd.f32 %v1423_v37, %v743_v27  ;;  %v1684_v42 = vadd.f32 %v1683_v36, %v1557_v38  ;;  %v748_v47 = vadd.f32 %v2977_v14, %v747_v43  ;;  %v3193_v27 = vadd.f32 %v2977_v14, %v1027_v21  ;;  %v1037_v37 = vpop.f32.mrb[17].mxu1 }
 0x126   :  { %1299 = vst [vmem:[%s3888_s5 + $0xb8] sm:$0xff] %v753_v39  ;;  %v1560_v59 = vmul.f32 %v753_v39, %v753_v39  ;;  %v3209_v36 = vadd.f32 %v2110_v35, %v2977_v14 }
 0x127   :  { %v1685_v51 = vadd.f32 %v1684_v42, %v1558_v44  ;;  %1298 = vst [vmem:[%s3888_s5 + $0xb0] sm:$0xff] %v748_v47  ;;  %v1425_v52 = vadd.f32 %v1424_v45, %v748_v47  ;;  %v1559_v53 = vmul.f32 %v748_v47, %v748_v47  ;;  %v2026_v55 = vpop.f32.mrb[24].mxu0  ;;  %1354 = vst [vmem:[%s3888_s5 + $0x270] sm:$0xff] %v3193_v27 }
 0x128   :  { %v763_v57 = vadd.f32 %v2026_v55, %v2977_v14  ;;  %v757_v58 = vpop.f32.mrb[25].mxu0  ;;  %v3215_v44 = vadd.f32 %v2977_v14, %v1037_v37  ;;  %1357 = vst [vmem:[%s3888_s5 + $0x288] sm:$0xff] %v3209_v36 }
 0x129   :  { %v1426_v61 = vadd.f32 %v1425_v52, %v753_v39  ;;  %v1686_v62 = vadd.f32 %v1685_v51, %v1559_v53  ;;  %v758_v63 = vadd.f32 %v2977_v14, %v757_v58  ;;  %v2113_v52 = vpop.f32.mrb[18].mxu1 }
 0x12a   :  { %1301 = vst [vmem:[%s3888_s5 + $0xc8] sm:$0xff] %v763_v57  ;;  %v1562_v13 = vmul.f32 %v763_v57, %v763_v57  ;;  %1356 = vst [vmem:[%s3888_s5 + $0x280] sm:$0xff] %v3215_v44  ;;  %v3231_v53 = vadd.f32 %v2113_v52, %v2977_v14  ;;  %v1047_v55 = vpop.f32.mrb[19].mxu1 }
 0x12b   :  { %v1687_v3 = vadd.f32 %v1686_v62, %v1560_v59  ;;  %1300 = vst [vmem:[%s3888_s5 + $0xc0] sm:$0xff] %v758_v63  ;;  %v1427_v5 = vadd.f32 %v1426_v61, %v758_v63  ;;  %v1561_v6 = vmul.f32 %v758_v63, %v758_v63  ;;  %v2029_v7 = vpop.f32.mrb[26].mxu0  ;;  %v3237_v62 = vadd.f32 %v2977_v14, %v1047_v55 }
 0x12c   :  { %v773_v9 = vadd.f32 %v2029_v7, %v2977_v14  ;;  %v767_v12 = vpop.f32.mrb[27].mxu0  ;;  %1359 = vst [vmem:[%s3888_s5 + $0x298] sm:$0xff] %v3231_v53  ;;  %v2116_v7 = vpop.f32.mrb[20].mxu1 }
 0x12d   :  { %v1428_v15 = vadd.f32 %v1427_v5, %v763_v57  ;;  %v1688_v16 = vadd.f32 %v1687_v3, %v1561_v6  ;;  %v768_v17 = vadd.f32 %v2977_v14, %v767_v12  ;;  %1358 = vst [vmem:[%s3888_s5 + $0x290] sm:$0xff] %v3237_v62  ;;  %v1057_v12 = vpop.f32.mrb[21].mxu1 }
 0x12e   :  { %1303 = vst [vmem:[%s3888_s5 + $0xd8] sm:$0xff] %v773_v9  ;;  %v1564_v30 = vmul.f32 %v773_v9, %v773_v9  ;;  %v3259_v18 = vadd.f32 %v2977_v14, %v1057_v12 }
 0x12f   :  { %v1689_v22 = vadd.f32 %v1688_v16, %v1562_v13  ;;  %1302 = vst [vmem:[%s3888_s5 + $0xd0] sm:$0xff] %v768_v17  ;;  %v1429_v23 = vadd.f32 %v1428_v15, %v768_v17  ;;  %v1563_v24 = vmul.f32 %v768_v17, %v768_v17  ;;  %v2032_v25 = vpop.f32.mrb[28].mxu0 }
 0x130   :  { %v783_v28 = vadd.f32 %v2032_v25, %v2977_v14  ;;  %v777_v29 = vpop.f32.mrb[29].mxu0  ;;  %1360 = vst [vmem:[%s3888_s5 + $0x2a0] sm:$0xff] %v3259_v18 }
 0x131   :  { %v1430_v31 = vadd.f32 %v1429_v23, %v773_v9  ;;  %v1690_v32 = vadd.f32 %v1689_v22, %v1563_v24  ;;  %v778_v33 = vadd.f32 %v2977_v14, %v777_v29  ;;  %v3253_v9 = vadd.f32 %v2116_v7, %v2977_v14  ;;  %v2119_v29 = vpop.f32.mrb[22].mxu1 }
 0x132   :  { %1305 = vst [vmem:[%s3888_s5 + $0xe8] sm:$0xff] %v783_v28  ;;  %v1566_v47 = vmul.f32 %v783_v28, %v783_v28 }
 0x133   :  { %v1691_v38 = vadd.f32 %v1690_v32, %v1564_v30  ;;  %1304 = vst [vmem:[%s3888_s5 + $0xe0] sm:$0xff] %v778_v33  ;;  %v1431_v40 = vadd.f32 %v1430_v31, %v778_v33  ;;  %v1565_v39 = vmul.f32 %v778_v33, %v778_v33  ;;  %v2035_v43 = vpop.f32.mrb[30].mxu0  ;;  %1361 = vst [vmem:[%s3888_s5 + $0x2a8] sm:$0xff] %v3253_v9  ;;  %v1067_v31 = vpop.f32.mrb[23].mxu1 }
 0x134   :  { %v793_v45 = vadd.f32 %v2035_v43, %v2977_v14  ;;  %v787_v42 = vpop.f32.mrb[31].mxu0  ;;  %v3275_v30 = vadd.f32 %v2119_v29, %v2977_v14 }
 0x135   :  { %v1432_v48 = vadd.f32 %v1431_v40, %v783_v28  ;;  %v1692_v50 = vadd.f32 %v1691_v38, %v1565_v39  ;;  %v788_v51 = vadd.f32 %v2977_v14, %v787_v42  ;;  %v3281_v38 = vadd.f32 %v2977_v14, %v1067_v31 }
 0x136   :  { %1307 = vst [vmem:[%s3888_s5 + $0xf8] sm:$0xff] %v793_v45  ;;  %v1568_v2 = vmul.f32 %v793_v45, %v793_v45  ;;  %1363 = vst [vmem:[%s3888_s5 + $0x2b8] sm:$0xff] %v3275_v30 }
 0x137   :  { %v1693_v57 = vadd.f32 %v1692_v50, %v1566_v47  ;;  %1306 = vst [vmem:[%s3888_s5 + $0xf0] sm:$0xff] %v788_v51  ;;  %v1433_v58 = vadd.f32 %v1432_v48, %v788_v51  ;;  %v1567_v59 = vmul.f32 %v788_v51, %v788_v51  ;;  %v2038_v61 = vpop.f32.mrb[32].mxu0  ;;  %1362 = vst [vmem:[%s3888_s5 + $0x2b0] sm:$0xff] %v3281_v38  ;;  %v2122_v48 = vpop.f32.mrb[24].mxu1 }
 0x138   :  { %v803_v63 = vadd.f32 %v2038_v61, %v2977_v14  ;;  %v797_v0 = vpop.f32.mrb[33].mxu0  ;;  %v3297_v50 = vadd.f32 %v2122_v48, %v2977_v14  ;;  %v1077_v51 = vpop.f32.mrb[25].mxu1 }
 0x139   :  { %v1434_v3 = vadd.f32 %v1433_v58, %v793_v45  ;;  %v1694_v5 = vadd.f32 %v1693_v57, %v1567_v59  ;;  %v798_v6 = vadd.f32 %v2977_v14, %v797_v0  ;;  %v3303_v59 = vadd.f32 %v2977_v14, %v1077_v51 }
 0x13a   :  { %1309 = vst [vmem:[%s3888_s5 + $0x108] sm:$0xff] %v803_v63  ;;  %v1570_v23 = vmul.f32 %v803_v63, %v803_v63  ;;  %1365 = vst [vmem:[%s3888_s5 + $0x2c8] sm:$0xff] %v3297_v50 }
 0x13b   :  { %v1695_v13 = vadd.f32 %v1694_v5, %v1568_v2  ;;  %1308 = vst [vmem:[%s3888_s5 + $0x100] sm:$0xff] %v798_v6  ;;  %v1435_v15 = vadd.f32 %v1434_v3, %v798_v6  ;;  %v1569_v16 = vmul.f32 %v798_v6, %v798_v6  ;;  %v2041_v17 = vpop.f32.mrb[34].mxu0  ;;  %1364 = vst [vmem:[%s3888_s5 + $0x2c0] sm:$0xff] %v3303_v59  ;;  %v2125_v6 = vpop.f32.mrb[26].mxu1 }
 0x13c   :  { %v813_v21 = vadd.f32 %v2041_v17, %v2977_v14  ;;  %v807_v22 = vpop.f32.mrb[35].mxu0  ;;  %v3319_v7 = vadd.f32 %v2125_v6, %v2977_v14  ;;  %v1087_v12 = vpop.f32.mrb[27].mxu1 }
 0x13d   :  { %v1436_v24 = vadd.f32 %v1435_v15, %v803_v63  ;;  %v1696_v25 = vadd.f32 %v1695_v13, %v1569_v16  ;;  %v808_v28 = vadd.f32 %v2977_v14, %v807_v22  ;;  %v2128_v31 = vpop.f32.mrb[28].mxu1 }
 0x13e   :  { %1311 = vst [vmem:[%s3888_s5 + $0x118] sm:$0xff] %v813_v21  ;;  %v1572_v43 = vmul.f32 %v813_v21, %v813_v21  ;;  %1367 = vst [vmem:[%s3888_s5 + $0x2d8] sm:$0xff] %v3319_v7 }
 0x13f   :  { %v1697_v32 = vadd.f32 %v1696_v25, %v1570_v23  ;;  %1310 = vst [vmem:[%s3888_s5 + $0x110] sm:$0xff] %v808_v28  ;;  %v1437_v33 = vadd.f32 %v1436_v24, %v808_v28  ;;  %v1571_v35 = vmul.f32 %v808_v28, %v808_v28  ;;  %v2044_v37 = vpop.f32.mrb[36].mxu0 }
 0x140   :  { %v823_v40 = vadd.f32 %v2044_v37, %v2977_v14  ;;  %v817_v39 = vpop.f32.mrb[37].mxu0 }
 0x141   :  { %v1438_v45 = vadd.f32 %v1437_v33, %v813_v21  ;;  %v1698_v42 = vadd.f32 %v1697_v32, %v1571_v35  ;;  %v818_v47 = vadd.f32 %v2977_v14, %v817_v39  ;;  %v3325_v21 = vadd.f32 %v2977_v14, %v1087_v12  ;;  %v1097_v33 = vpop.f32.mrb[29].mxu1 }
 0x142   :  { %1313 = vst [vmem:[%s3888_s5 + $0x128] sm:$0xff] %v823_v40  ;;  %v1574_v0 = vmul.f32 %v823_v40, %v823_v40  ;;  %v3341_v32 = vadd.f32 %v2128_v31, %v2977_v14 }
 0x143   :  { %v1699_v52 = vadd.f32 %v1698_v42, %v1572_v43  ;;  %1312 = vst [vmem:[%s3888_s5 + $0x120] sm:$0xff] %v818_v47  ;;  %v1439_v55 = vadd.f32 %v1438_v45, %v818_v47  ;;  %v1573_v57 = vmul.f32 %v818_v47, %v818_v47  ;;  %v2047_v58 = vpop.f32.mrb[38].mxu0  ;;  %1366 = vst [vmem:[%s3888_s5 + $0x2d0] sm:$0xff] %v3325_v21 }
 0x144   :  { %v833_v61 = vadd.f32 %v2047_v58, %v2977_v14  ;;  %v827_v63 = vpop.f32.mrb[39].mxu0  ;;  %v3347_v43 = vadd.f32 %v2977_v14, %v1097_v33  ;;  %1369 = vst [vmem:[%s3888_s5 + $0x2e8] sm:$0xff] %v3341_v32 }
 0x145   :  { %v1440_v2 = vadd.f32 %v1439_v55, %v823_v40  ;;  %v1700_v3 = vadd.f32 %v1699_v52, %v1573_v57  ;;  %v828_v5 = vadd.f32 %v2977_v14, %v827_v63  ;;  %v2131_v55 = vpop.f32.mrb[30].mxu1 }
 0x146   :  { %1315 = vst [vmem:[%s3888_s5 + $0x138] sm:$0xff] %v833_v61  ;;  %v1576_v24 = vmul.f32 %v833_v61, %v833_v61  ;;  %1368 = vst [vmem:[%s3888_s5 + $0x2e0] sm:$0xff] %v3347_v43  ;;  %v3363_v57 = vadd.f32 %v2131_v55, %v2977_v14  ;;  %v1107_v58 = vpop.f32.mrb[31].mxu1 }
 0x147   :  { %v1701_v13 = vadd.f32 %v1700_v3, %v1574_v0  ;;  %1314 = vst [vmem:[%s3888_s5 + $0x130] sm:$0xff] %v828_v5  ;;  %v1441_v15 = vadd.f32 %v1440_v2, %v828_v5  ;;  %v1575_v16 = vmul.f32 %v828_v5, %v828_v5  ;;  %v2050_v17 = vpop.f32.mrb[40].mxu0  ;;  %v3369_v3 = vadd.f32 %v2977_v14, %v1107_v58 }
 0x148   :  { %v843_v22 = vadd.f32 %v2050_v17, %v2977_v14  ;;  %v837_v23 = vpop.f32.mrb[41].mxu0  ;;  %1371 = vst [vmem:[%s3888_s5 + $0x2f8] sm:$0xff] %v3363_v57  ;;  %v2134_v17 = vpop.f32.mrb[32].mxu1 }
 0x149   :  { %v1442_v25 = vadd.f32 %v1441_v15, %v833_v61  ;;  %v1702_v28 = vadd.f32 %v1701_v13, %v1575_v16  ;;  %v838_v29 = vadd.f32 %v2977_v14, %v837_v23  ;;  %1370 = vst [vmem:[%s3888_s5 + $0x2f0] sm:$0xff] %v3369_v3  ;;  %v1117_v23 = vpop.f32.mrb[33].mxu1 }
 0x14a   :  { %1317 = vst [vmem:[%s3888_s5 + $0x148] sm:$0xff] %v843_v22  ;;  %v1578_v47 = vmul.f32 %v843_v22, %v843_v22  ;;  %v3391_v31 = vadd.f32 %v2977_v14, %v1117_v23 }
 0x14b   :  { %v1703_v35 = vadd.f32 %v1702_v28, %v1576_v24  ;;  %1316 = vst [vmem:[%s3888_s5 + $0x140] sm:$0xff] %v838_v29  ;;  %v1443_v37 = vadd.f32 %v1442_v25, %v838_v29  ;;  %v1577_v40 = vmul.f32 %v838_v29, %v838_v29  ;;  %v2053_v39 = vpop.f32.mrb[42].mxu0 }
 0x14c   :  { %v853_v45 = vadd.f32 %v2053_v39, %v2977_v14  ;;  %v847_v42 = vpop.f32.mrb[43].mxu0  ;;  %1372 = vst [vmem:[%s3888_s5 + $0x300] sm:$0xff] %v3391_v31 }
 0x14d   :  { %v1444_v48 = vadd.f32 %v1443_v37, %v843_v22  ;;  %v1704_v51 = vadd.f32 %v1703_v35, %v1577_v40  ;;  %v848_v52 = vadd.f32 %v2977_v14, %v847_v42  ;;  %v3385_v22 = vadd.f32 %v2134_v17, %v2977_v14  ;;  %v2137_v42 = vpop.f32.mrb[34].mxu1 }
 0x14e   :  { %1319 = vst [vmem:[%s3888_s5 + $0x158] sm:$0xff] %v853_v45  ;;  %v1580_v12 = vmul.f32 %v853_v45, %v853_v45 }
 0x14f   :  { %v1705_v61 = vadd.f32 %v1704_v51, %v1578_v47  ;;  %1318 = vst [vmem:[%s3888_s5 + $0x150] sm:$0xff] %v848_v52  ;;  %v1445_v63 = vadd.f32 %v1444_v48, %v848_v52  ;;  %v1579_v0 = vmul.f32 %v848_v52, %v848_v52  ;;  %v2056_v2 = vpop.f32.mrb[44].mxu0  ;;  %1373 = vst [vmem:[%s3888_s5 + $0x308] sm:$0xff] %v3385_v22  ;;  %v1127_v48 = vpop.f32.mrb[35].mxu1 }
 0x150   :  { %v863_v5 = vadd.f32 %v2056_v2, %v2977_v14  ;;  %v857_v6 = vpop.f32.mrb[45].mxu0  ;;  %v3407_v47 = vadd.f32 %v2137_v42, %v2977_v14 }
 0x151   :  { %v1446_v13 = vadd.f32 %v1445_v63, %v853_v45  ;;  %v1706_v15 = vadd.f32 %v1705_v61, %v1579_v0  ;;  %v858_v16 = vadd.f32 %v2977_v14, %v857_v6  ;;  %v3413_v61 = vadd.f32 %v2977_v14, %v1127_v48 }
 0x152   :  { %1321 = vst [vmem:[%s3888_s5 + $0x168] sm:$0xff] %v863_v5  ;;  %v1582_v37 = vmul.f32 %v863_v5, %v863_v5  ;;  %1375 = vst [vmem:[%s3888_s5 + $0x318] sm:$0xff] %v3407_v47 }
 0x153   :  { %v1707_v24 = vadd.f32 %v1706_v15, %v1580_v12  ;;  %1320 = vst [vmem:[%s3888_s5 + $0x160] sm:$0xff] %v858_v16  ;;  %v1447_v25 = vadd.f32 %v1446_v13, %v858_v16  ;;  %v1581_v28 = vmul.f32 %v858_v16, %v858_v16  ;;  %v2059_v29 = vpop.f32.mrb[46].mxu0  ;;  %1374 = vst [vmem:[%s3888_s5 + $0x310] sm:$0xff] %v3413_v61  ;;  %v2140_v13 = vpop.f32.mrb[36].mxu1 }
 0x154   :  { %v873_v33 = vadd.f32 %v2059_v29, %v2977_v14  ;;  %v867_v35 = vpop.f32.mrb[47].mxu0  ;;  %v3429_v15 = vadd.f32 %v2140_v13, %v2977_v14  ;;  %v1137_v16 = vpop.f32.mrb[37].mxu1 }
 0x155   :  { %v1448_v40 = vadd.f32 %v1447_v25, %v863_v5  ;;  %v1708_v39 = vadd.f32 %v1707_v24, %v1581_v28  ;;  %v868_v45 = vadd.f32 %v2977_v14, %v867_v35  ;;  %v3435_v28 = vadd.f32 %v2977_v14, %v1137_v16 }
 0x156   :  { %1323 = vst [vmem:[%s3888_s5 + $0x178] sm:$0xff] %v873_v33  ;;  %v1584_v2 = vmul.f32 %v873_v33, %v873_v33  ;;  %1377 = vst [vmem:[%s3888_s5 + $0x328] sm:$0xff] %v3429_v15 }
 0x157   :  { %v1709_v51 = vadd.f32 %v1708_v39, %v1582_v37  ;;  %1322 = vst [vmem:[%s3888_s5 + $0x170] sm:$0xff] %v868_v45  ;;  %v1449_v52 = vadd.f32 %v1448_v40, %v868_v45  ;;  %v1583_v55 = vmul.f32 %v868_v45, %v868_v45  ;;  %v2062_v58 = vpop.f32.mrb[48].mxu0  ;;  %1376 = vst [vmem:[%s3888_s5 + $0x320] sm:$0xff] %v3435_v28  ;;  %v2143_v45 = vpop.f32.mrb[38].mxu1 }
 0x158   :  { %v883_v63 = vadd.f32 %v2062_v58, %v2977_v14  ;;  %v877_v0 = vpop.f32.mrb[49].mxu0  ;;  %v3451_v42 = vadd.f32 %v2143_v45, %v2977_v14  ;;  %v1147_v48 = vpop.f32.mrb[39].mxu1 }
 0x159   :  { %v1450_v5 = vadd.f32 %v1449_v52, %v873_v33  ;;  %v1710_v6 = vadd.f32 %v1709_v51, %v1583_v55  ;;  %v878_v12 = vadd.f32 %v2977_v14, %v877_v0  ;;  %v2146_v16 = vpop.f32.mrb[40].mxu1 }
 0x15a   :  { %1325 = vst [vmem:[%s3888_s5 + $0x188] sm:$0xff] %v883_v63  ;;  %v1586_v35 = vmul.f32 %v883_v63, %v883_v63  ;;  %1379 = vst [vmem:[%s3888_s5 + $0x338] sm:$0xff] %v3451_v42 }
 0x15b   :  { %v1711_v17 = vadd.f32 %v1710_v6, %v1584_v2  ;;  %1324 = vst [vmem:[%s3888_s5 + $0x180] sm:$0xff] %v878_v12  ;;  %v1451_v23 = vadd.f32 %v1450_v5, %v878_v12  ;;  %v1585_v24 = vmul.f32 %v878_v12, %v878_v12  ;;  %v2065_v25 = vpop.f32.mrb[50].mxu0 }
 0x15c   :  { %v893_v29 = vadd.f32 %v2065_v25, %v2977_v14  ;;  %v887_v33 = vpop.f32.mrb[51].mxu0 }
 0x15d   :  { %v1452_v37 = vadd.f32 %v1451_v23, %v883_v63  ;;  %v1712_v40 = vadd.f32 %v1711_v17, %v1585_v24  ;;  %v888_v39 = vadd.f32 %v2977_v14, %v887_v33  ;;  %v3457_v63 = vadd.f32 %v2977_v14, %v1147_v48  ;;  %v1157_v23 = vpop.f32.mrb[41].mxu1 }
 0x15e   :  { %1327 = vst [vmem:[%s3888_s5 + $0x198] sm:$0xff] %v893_v29  ;;  %v1588_v5 = vmul.f32 %v893_v29, %v893_v29  ;;  %v3473_v17 = vadd.f32 %v2146_v16, %v2977_v14 }
 0x15f   :  { %v1713_v51 = vadd.f32 %v1712_v40, %v1586_v35  ;;  %1326 = vst [vmem:[%s3888_s5 + $0x190] sm:$0xff] %v888_v39  ;;  %v1453_v52 = vadd.f32 %v1452_v37, %v888_v39  ;;  %v1587_v55 = vmul.f32 %v888_v39, %v888_v39  ;;  %v2068_v58 = vpop.f32.mrb[52].mxu0  ;;  %1378 = vst [vmem:[%s3888_s5 + $0x330] sm:$0xff] %v3457_v63 }
 0x160   :  { %v903_v0 = vadd.f32 %v2068_v58, %v2977_v14  ;;  %v897_v2 = vpop.f32.mrb[53].mxu0  ;;  %v3479_v35 = vadd.f32 %v2977_v14, %v1157_v23  ;;  %1381 = vst [vmem:[%s3888_s5 + $0x348] sm:$0xff] %v3473_v17 }
 0x161   :  { %v1454_v6 = vadd.f32 %v1453_v52, %v893_v29  ;;  %v1714_v12 = vadd.f32 %v1713_v51, %v1587_v55  ;;  %v898_v13 = vadd.f32 %v2977_v14, %v897_v2  ;;  %v2149_v52 = vpop.f32.mrb[42].mxu1 }
 0x162   :  { %1329 = vst [vmem:[%s3888_s5 + $0x1a8] sm:$0xff] %v903_v0  ;;  %v1590_v39 = vmul.f32 %v903_v0, %v903_v0  ;;  %1380 = vst [vmem:[%s3888_s5 + $0x340] sm:$0xff] %v3479_v35  ;;  %v3495_v55 = vadd.f32 %v2149_v52, %v2977_v14  ;;  %v1167_v58 = vpop.f32.mrb[43].mxu1 }
 0x163   :  { %v1715_v24 = vadd.f32 %v1714_v12, %v1588_v5  ;;  %1328 = vst [vmem:[%s3888_s5 + $0x1a0] sm:$0xff] %v898_v13  ;;  %v1455_v25 = vadd.f32 %v1454_v6, %v898_v13  ;;  %v1589_v29 = vmul.f32 %v898_v13, %v898_v13  ;;  %v2071_v33 = vpop.f32.mrb[54].mxu0  ;;  %v3501_v12 = vadd.f32 %v2977_v14, %v1167_v58 }
 0x164   :  { %v913_v37 = vadd.f32 %v2071_v33, %v2977_v14  ;;  %v907_v40 = vpop.f32.mrb[55].mxu0  ;;  %1383 = vst [vmem:[%s3888_s5 + $0x358] sm:$0xff] %v3495_v55  ;;  %v2152_v33 = vpop.f32.mrb[44].mxu1 }
 0x165   :  { %v1456_v45 = vadd.f32 %v1455_v25, %v903_v0  ;;  %v1716_v48 = vadd.f32 %v1715_v24, %v1589_v29  ;;  %v908_v51 = vadd.f32 %v2977_v14, %v907_v40  ;;  %1382 = vst [vmem:[%s3888_s5 + $0x350] sm:$0xff] %v3501_v12  ;;  %v3517_v40 = vadd.f32 %v2152_v33, %v2977_v14 }
 0x166   :  { %1331 = vst [vmem:[%s3888_s5 + $0x1b8] sm:$0xff] %v913_v37  ;;  %v1592_v23 = vmul.f32 %v913_v37, %v913_v37 }
 0x167   :  { %v1717_v2 = vadd.f32 %v1716_v48, %v1590_v39  ;;  %1330 = vst [vmem:[%s3888_s5 + $0x1b0] sm:$0xff] %v908_v51  ;;  %v1457_v0 = vadd.f32 %v1456_v45, %v908_v51  ;;  %v1591_v5 = vmul.f32 %v908_v51, %v908_v51  ;;  %v2074_v6 = vpop.f32.mrb[56].mxu0  ;;  %v1177_v39 = vpop.f32.mrb[45].mxu1  ;;  %1385 = vst [vmem:[%s3888_s5 + $0x368] sm:$0xff] %v3517_v40 }
 0x168   :  { %v923_v13 = vadd.f32 %v2074_v6, %v2977_v14  ;;  %v917_v16 = vpop.f32.mrb[57].mxu0  ;;  %v3523_v52 = vadd.f32 %v2977_v14, %v1177_v39 }
 0x169   :  { %v1458_v24 = vadd.f32 %v1457_v0, %v913_v37  ;;  %v1718_v25 = vadd.f32 %v1717_v2, %v1591_v5  ;;  %v918_v29 = vadd.f32 %v2977_v14, %v917_v16 }
 0x16a   :  { %1333 = vst [vmem:[%s3888_s5 + $0x1c8] sm:$0xff] %v923_v13  ;;  %v1594_v0 = vmul.f32 %v923_v13, %v923_v13  ;;  %1384 = vst [vmem:[%s3888_s5 + $0x360] sm:$0xff] %v3523_v52 }
 0x16b   :  { %v1719_v45 = vadd.f32 %v1718_v25, %v1592_v23  ;;  %1332 = vst [vmem:[%s3888_s5 + $0x1c0] sm:$0xff] %v918_v29  ;;  %v1459_v37 = vadd.f32 %v1458_v24, %v918_v29  ;;  %v1593_v48 = vmul.f32 %v918_v29, %v918_v29  ;;  %v2077_v51 = vpop.f32.mrb[58].mxu0  ;;  %v2155_v23 = vpop.f32.mrb[46].mxu1 }
 0x16c   :  { %v933_v58 = vadd.f32 %v2077_v51, %v2977_v14  ;;  %v927_v2 = vpop.f32.mrb[59].mxu0  ;;  %v3539_v24 = vadd.f32 %v2155_v23, %v2977_v14  ;;  %v1187_v25 = vpop.f32.mrb[47].mxu1 }
 0x16d   :  { %v1460_v5 = vadd.f32 %v1459_v37, %v923_v13  ;;  %v1720_v6 = vadd.f32 %v1719_v45, %v1593_v48  ;;  %v928_v16 = vadd.f32 %v2977_v14, %v927_v2  ;;  %v3545_v45 = vadd.f32 %v2977_v14, %v1187_v25 }
 0x16e   :  { %1335 = vst [vmem:[%s3888_s5 + $0x1d8] sm:$0xff] %v933_v58  ;;  %1387 = vst [vmem:[%s3888_s5 + $0x378] sm:$0xff] %v3539_v24  ;;  %v1596_v51 = vmul.f32 %v933_v58, %v933_v58 }
 0x16f   :  { %v1721_v29 = vadd.f32 %v1720_v6, %v1594_v0  ;;  %1334 = vst [vmem:[%s3888_s5 + $0x1d0] sm:$0xff] %v928_v16  ;;  %v1461_v13 = vadd.f32 %v1460_v5, %v928_v16  ;;  %v1595_v33 = vmul.f32 %v928_v16, %v928_v16  ;;  %v2080_v39 = vpop.f32.mrb[60].mxu0  ;;  %1386 = vst [vmem:[%s3888_s5 + $0x370] sm:$0xff] %v3545_v45  ;;  %v2158_v5 = vpop.f32.mrb[48].mxu1 }
 0x170   :  { %v943_v37 = vadd.f32 %v2080_v39, %v2977_v14  ;;  %v937_v48 = vpop.f32.mrb[61].mxu0  ;;  %v3561_v16 = vadd.f32 %v2158_v5, %v2977_v14  ;;  %v1197_v23 = vpop.f32.mrb[49].mxu1 }
 0x171   :  { %v1462_v2 = vadd.f32 %v1461_v13, %v933_v58  ;;  %v1722_v0 = vadd.f32 %v1721_v29, %v1595_v33  ;;  %v938_v6 = vadd.f32 %v2977_v14, %v937_v48  ;;  %v3569_v33 = vld [vmem:[%s3887_s4] ss:$0 sm:$0xff]  ;;  %v2161_v5 = vpop.f32.mrb[50].mxu1 }
 0x172   :  { %1337 = vst [vmem:[%s3888_s5 + $0x1e8] sm:$0xff] %v943_v37  ;;  %3896 = vst [vmem:[#allocation2_spill] sm:$0xff] %v3561_v16  ;;  %v3572_v39 = vadd.f32 %v3569_v33, %v1197_v23  ;;  %v3588_v23 = vadd.f32 %v3569_v33, %v2161_v5 }
 0x173   :  { %v1723_v25 = vadd.f32 %v1722_v0, %v1596_v51  ;;  %1336 = vst [vmem:[%s3888_s5 + $0x1e0] sm:$0xff] %v938_v6  ;;  %v1463_v58 = vadd.f32 %v1462_v2, %v938_v6  ;;  %v1597_v29 = vmul.f32 %v938_v6, %v938_v6  ;;  %v2083_v13 = vpop.f32.mrb[62].mxu0  ;;  %1389 = vst [vmem:[%s3888_s5 + $0x388] sm:$0xff] %v3561_v16 }
 0x174   :  { %3897 = vst [vmem:[#allocation3_spill] sm:$0xff] %v3572_v39  ;;  %v953_v14 = vadd.f32 %v3569_v33, %v2083_v13  ;;  %v947_v48 = vpop.f32.mrb[63].mxu0  ;;  %v1598_v51 = vmul.f32 %v943_v37, %v943_v37  ;;  %1388 = vst [vmem:[%s3888_s5 + $0x380] sm:$0xff] %v3572_v39  ;;  %v1207_v13 = vpop.f32.mrb[51].mxu1 }
 0x175   :  { %v1464_v2 = vadd.f32 %v1463_v58, %v943_v37  ;;  %v1724_v0 = vadd.f32 %v1723_v25, %v1597_v29  ;;  %v948_v6 = vadd.f32 %v3569_v33, %v947_v48  ;;  %3898 = vst [vmem:[#allocation4_spill] sm:$0xff] %v3588_v23  ;;  %v3594_v58 = vadd.f32 %v3569_v33, %v1207_v13 }
 0x176   :  { %1339 = vst [vmem:[%s3888_s5 + $0x1f8] sm:$0xff] %v953_v14  ;;  %1391 = vst [vmem:[%s3888_s5 + $0x398] sm:$0xff] %v3588_v23  ;;  %v1600_v29 = vmul.f32 %v953_v14, %v953_v14 }
 0x177   :  { %v1725_v16 = vadd.f32 %v1724_v0, %v1598_v51  ;;  %1338 = vst [vmem:[%s3888_s5 + $0x1f0] sm:$0xff] %v948_v6  ;;  %v1465_v37 = vadd.f32 %v1464_v2, %v948_v6  ;;  %v1599_v25 = vmul.f32 %v948_v6, %v948_v6  ;;  %v1601_v51 = vmul.f32 %v3039_v46, %v3039_v46  ;;  %v2164_v2 = vpop.f32.mrb[52].mxu1 }
 0x178   :  { %1390 = vst [vmem:[%s3888_s5 + $0x390] sm:$0xff] %v3594_v58  ;;  %v3607_v0 = vadd.f32 %v3569_v33, %v2164_v2  ;;  %v1217_v6 = vpop.f32.mrb[53].mxu1 }
 0x179   :  { %v1466_v48 = vadd.f32 %v1465_v37, %v953_v14  ;;  %v1726_v5 = vadd.f32 %v1725_v16, %v1599_v25  ;;  %v3611_v23 = vadd.f32 %v3569_v33, %v1217_v6  ;;  %v1602_v16 = vmul.f32 %v3033_v10, %v3033_v10 }
 0x17a   :  { %1393 = vst [vmem:[%s3888_s5 + $0x3a8] sm:$0xff] %v3607_v0  ;;  %v1603_v25 = vmul.f32 %v3061_v60, %v3061_v60 }
 0x17b   :  { %v1727_v13 = vadd.f32 %v1726_v5, %v1600_v29  ;;  %v1467_v39 = vadd.f32 %v1466_v48, %v3039_v46  ;;  %1392 = vst [vmem:[%s3888_s5 + $0x3a0] sm:$0xff] %v3611_v23  ;;  %v2167_v46 = vpop.f32.mrb[54].mxu1 }
 0x17c   :  { %v3627_v29 = vadd.f32 %v3569_v33, %v2167_v46  ;;  %v1227_v48 = vpop.f32.mrb[55].mxu1 }
 0x17d   :  { %v1468_v14 = vadd.f32 %v1467_v39, %v3033_v10  ;;  %v1728_v37 = vadd.f32 %v1727_v13, %v1601_v51  ;;  %v3631_v6 = vadd.f32 %v3569_v33, %v1227_v48  ;;  %v1604_v10 = vmul.f32 %v3055_v54, %v3055_v54 }
 0x17e   :  { %1395 = vst [vmem:[%s3888_s5 + $0x3b8] sm:$0xff] %v3627_v29  ;;  %v1605_v13 = vmul.f32 %v3083_v11, %v3083_v11 }
 0x17f   :  { %v1729_v5 = vadd.f32 %v1728_v37, %v1602_v16  ;;  %v1469_v2 = vadd.f32 %v1468_v14, %v3061_v60  ;;  %1394 = vst [vmem:[%s3888_s5 + $0x3b0] sm:$0xff] %v3631_v6  ;;  %v2170_v60 = vpop.f32.mrb[56].mxu1 }
 0x180   :  { %v3647_v16 = vadd.f32 %v3569_v33, %v2170_v60  ;;  %v1237_v14 = vpop.f32.mrb[57].mxu1 }
 0x181   :  { %v1730_v39 = vadd.f32 %v1729_v5, %v1603_v25  ;;  %v1470_v51 = vadd.f32 %v1469_v2, %v3055_v54  ;;  %v3651_v25 = vadd.f32 %v3569_v33, %v1237_v14  ;;  %v1606_v54 = vmul.f32 %v3077_v4, %v3077_v4 }
 0x182   :  { %1397 = vst [vmem:[%s3888_s5 + $0x3c8] sm:$0xff] %v3647_v16  ;;  %v1607_v2 = vmul.f32 %v3105_v26, %v3105_v26 }
 0x183   :  { %v1471_v37 = vadd.f32 %v1470_v51, %v3083_v11  ;;  %v1731_v46 = vadd.f32 %v1730_v39, %v1604_v10  ;;  %1396 = vst [vmem:[%s3888_s5 + $0x3c0] sm:$0xff] %v3651_v25  ;;  %v2173_v11 = vpop.f32.mrb[58].mxu1 }
 0x184   :  { %v3667_v10 = vadd.f32 %v3569_v33, %v2173_v11  ;;  %v1247_v39 = vpop.f32.mrb[59].mxu1 }
 0x185   :  { %v1732_v48 = vadd.f32 %v1731_v46, %v1605_v13  ;;  %v1472_v5 = vadd.f32 %v1471_v37, %v3077_v4  ;;  %v3671_v13 = vadd.f32 %v3569_v33, %v1247_v39  ;;  %v1608_v4 = vmul.f32 %v3099_v20, %v3099_v20 }
 0x186   :  { %1399 = vst [vmem:[%s3888_s5 + $0x3d8] sm:$0xff] %v3667_v10  ;;  %v1609_v46 = vmul.f32 %v3127_v41, %v3127_v41 }
 0x187   :  { %v1473_v51 = vadd.f32 %v1472_v5, %v3105_v26  ;;  %v1733_v60 = vadd.f32 %v1732_v48, %v1606_v54  ;;  %1398 = vst [vmem:[%s3888_s5 + $0x3d0] sm:$0xff] %v3671_v13  ;;  %v2176_v26 = vpop.f32.mrb[60].mxu1 }
 0x188   :  { %v3687_v54 = vadd.f32 %v3569_v33, %v2176_v26  ;;  %v1257_v48 = vpop.f32.mrb[61].mxu1 }
 0x189   :  { %v1734_v14 = vadd.f32 %v1733_v60, %v1607_v2  ;;  %v1474_v37 = vadd.f32 %v1473_v51, %v3099_v20  ;;  %v3691_v2 = vadd.f32 %v3569_v33, %v1257_v48  ;;  %v1610_v20 = vmul.f32 %v3121_v34, %v3121_v34 }
 0x18a   :  { %1401 = vst [vmem:[%s3888_s5 + $0x3e8] sm:$0xff] %v3687_v54  ;;  %v1611_v60 = vmul.f32 %v3149_v56, %v3149_v56 }
 0x18b   :  { %v1475_v5 = vadd.f32 %v1474_v37, %v3127_v41  ;;  %v1735_v11 = vadd.f32 %v1734_v14, %v1608_v4  ;;  %1400 = vst [vmem:[%s3888_s5 + $0x3e0] sm:$0xff] %v3691_v2  ;;  %v2179_v41 = vpop.f32.mrb[62].mxu1 }
 0x18c   :  { %v3707_v4 = vadd.f32 %v3569_v33, %v2179_v41  ;;  %v1267_v14 = vpop.f32.mrb[63].mxu1 }
 0x18d   :  { %v1736_v39 = vadd.f32 %v1735_v11, %v1609_v46  ;;  %v1476_v51 = vadd.f32 %v1475_v5, %v3121_v34  ;;  %v3711_v46 = vadd.f32 %v3569_v33, %v1267_v14  ;;  %v1612_v34 = vmul.f32 %v3143_v49, %v3143_v49 }
 0x18e   :  { %1403 = vst [vmem:[%s3888_s5 + $0x3f8] sm:$0xff] %v3707_v4  ;;  %v1613_v11 = vmul.f32 %v3171_v8, %v3171_v8  ;;  %v1616_v14 = vmul.f32 %v3187_v19, %v3187_v19 }
 0x18f   :  { %v1477_v37 = vadd.f32 %v1476_v51, %v3149_v56  ;;  %v1737_v26 = vadd.f32 %v1736_v39, %v1610_v20  ;;  %1402 = vst [vmem:[%s3888_s5 + $0x3f0] sm:$0xff] %v3711_v46  ;;  %v1614_v20 = vmul.f32 %v3165_v1, %v3165_v1 }
 0x191   :  { %v1738_v48 = vadd.f32 %v1737_v26, %v1611_v60  ;;  %v1478_v5 = vadd.f32 %v1477_v37, %v3143_v49  ;;  %v1615_v49 = vmul.f32 %v3193_v27, %v3193_v27 }
 0x193   :  { %v1479_v56 = vadd.f32 %v1478_v5, %v3171_v8  ;;  %v1739_v33 = vadd.f32 %v1738_v48, %v1612_v34  ;;  %v1617_v8 = vmul.f32 %v3215_v44, %v3215_v44 }
 0x195   :  { %v1740_v39 = vadd.f32 %v1739_v33, %v1613_v11  ;;  %v1480_v51 = vadd.f32 %v1479_v56, %v3165_v1  ;;  %v1618_v1 = vmul.f32 %v3209_v36, %v3209_v36 }
 0x197   :  { %v1481_v60 = vadd.f32 %v1480_v51, %v3193_v27  ;;  %v1741_v41 = vadd.f32 %v1740_v39, %v1614_v20  ;;  %v1619_v27 = vmul.f32 %v3237_v62, %v3237_v62 }
 0x199   :  { %v1742_v37 = vadd.f32 %v1741_v41, %v1615_v49  ;;  %v1482_v26 = vadd.f32 %v1481_v60, %v3187_v19  ;;  %v1620_v19 = vmul.f32 %v3231_v53, %v3231_v53 }
 0x19b   :  { %v1483_v34 = vadd.f32 %v1482_v26, %v3215_v44  ;;  %v1743_v48 = vadd.f32 %v1742_v37, %v1616_v14  ;;  %v1621_v44 = vmul.f32 %v3259_v18, %v3259_v18 }
 0x19d   :  { %v1744_v5 = vadd.f32 %v1743_v48, %v1617_v8  ;;  %v1484_v11 = vadd.f32 %v1483_v34, %v3209_v36  ;;  %v1622_v36 = vmul.f32 %v3253_v9, %v3253_v9 }
 0x19f   :  { %v1485_v56 = vadd.f32 %v1484_v11, %v3237_v62  ;;  %v1745_v33 = vadd.f32 %v1744_v5, %v1618_v1  ;;  %v1623_v62 = vmul.f32 %v3281_v38, %v3281_v38 }
 0x1a1   :  { %v1746_v20 = vadd.f32 %v1745_v33, %v1619_v27  ;;  %v1486_v39 = vadd.f32 %v1485_v56, %v3231_v53  ;;  %v1624_v53 = vmul.f32 %v3275_v30, %v3275_v30 }
 0x1a3   :  { %v1487_v51 = vadd.f32 %v1486_v39, %v3259_v18  ;;  %v1747_v49 = vadd.f32 %v1746_v20, %v1620_v19  ;;  %v1625_v18 = vmul.f32 %v3303_v59, %v3303_v59 }
 0x1a5   :  { %v1748_v60 = vadd.f32 %v1747_v49, %v1621_v44  ;;  %v1488_v41 = vadd.f32 %v1487_v51, %v3253_v9  ;;  %v1626_v9 = vmul.f32 %v3297_v50, %v3297_v50 }
 0x1a7   :  { %v1489_v14 = vadd.f32 %v1488_v41, %v3281_v38  ;;  %v1749_v37 = vadd.f32 %v1748_v60, %v1622_v36  ;;  %v1627_v38 = vmul.f32 %v3325_v21, %v3325_v21 }
 0x1a9   :  { %v1750_v26 = vadd.f32 %v1749_v37, %v1623_v62  ;;  %v1490_v8 = vadd.f32 %v1489_v14, %v3275_v30  ;;  %v1628_v30 = vmul.f32 %v3319_v7, %v3319_v7 }
 0x1ab   :  { %v1491_v34 = vadd.f32 %v1490_v8, %v3303_v59  ;;  %v1751_v48 = vadd.f32 %v1750_v26, %v1624_v53  ;;  %v1629_v59 = vmul.f32 %v3347_v43, %v3347_v43 }
 0x1ad   :  { %v1752_v1 = vadd.f32 %v1751_v48, %v1625_v18  ;;  %v1492_v5 = vadd.f32 %v1491_v34, %v3297_v50  ;;  %v1630_v50 = vmul.f32 %v3341_v32, %v3341_v32 }
 0x1af   :  { %v1493_v11 = vadd.f32 %v1492_v5, %v3325_v21  ;;  %v1753_v27 = vadd.f32 %v1752_v1, %v1626_v9  ;;  %v1631_v21 = vmul.f32 %v3369_v3, %v3369_v3 }
 0x1b1   :  { %v1754_v56 = vadd.f32 %v1753_v27, %v1627_v38  ;;  %v1494_v33 = vadd.f32 %v1493_v11, %v3319_v7  ;;  %v1632_v7 = vmul.f32 %v3363_v57, %v3363_v57 }
 0x1b3   :  { %v1495_v19 = vadd.f32 %v1494_v33, %v3347_v43  ;;  %v1755_v20 = vadd.f32 %v1754_v56, %v1628_v30  ;;  %v1633_v43 = vmul.f32 %v3391_v31, %v3391_v31 }
 0x1b5   :  { %v1756_v39 = vadd.f32 %v1755_v20, %v1629_v59  ;;  %v1496_v44 = vadd.f32 %v1495_v19, %v3341_v32  ;;  %v1634_v32 = vmul.f32 %v3385_v22, %v3385_v22 }
 0x1b7   :  { %v1497_v51 = vadd.f32 %v1496_v44, %v3369_v3  ;;  %v1757_v49 = vadd.f32 %v1756_v39, %v1630_v50  ;;  %v1635_v3 = vmul.f32 %v3413_v61, %v3413_v61 }
 0x1b9   :  { %v1758_v36 = vadd.f32 %v1757_v49, %v1631_v21  ;;  %v1498_v60 = vadd.f32 %v1497_v51, %v3363_v57  ;;  %v1636_v57 = vmul.f32 %v3407_v47, %v3407_v47 }
 0x1bb   :  { %v1499_v41 = vadd.f32 %v1498_v60, %v3391_v31  ;;  %v1759_v62 = vadd.f32 %v1758_v36, %v1632_v7  ;;  %v1637_v31 = vmul.f32 %v3435_v28, %v3435_v28 }
 0x1bd   :  { %v1760_v14 = vadd.f32 %v1759_v62, %v1633_v43  ;;  %v1500_v37 = vadd.f32 %v1499_v41, %v3385_v22  ;;  %v1638_v22 = vmul.f32 %v3429_v15, %v3429_v15 }
 0x1bf   :  { %v1501_v53 = vadd.f32 %v1500_v37, %v3413_v61  ;;  %v1761_v26 = vadd.f32 %v1760_v14, %v1634_v32  ;;  %v1639_v61 = vmul.f32 %v3457_v63, %v3457_v63  ;;  %v3900_v14 = vld [vmem:[#allocation2_spill] sm:$0xff] }
 0x1c1   :  { %v1762_v8 = vadd.f32 %v1761_v26, %v1635_v3  ;;  %v1502_v18 = vadd.f32 %v1501_v53, %v3407_v47  ;;  %v1640_v47 = vmul.f32 %v3451_v42, %v3451_v42 }
 0x1c3   :  { %v1503_v34 = vadd.f32 %v1502_v18, %v3435_v28  ;;  %v1763_v48 = vadd.f32 %v1762_v8, %v1636_v57  ;;  %v1641_v28 = vmul.f32 %v3479_v35, %v3479_v35  ;;  %v3901_v57 = vld [vmem:[#allocation4_spill] sm:$0xff] }
 0x1c5   :  { %v1764_v9 = vadd.f32 %v1763_v48, %v1637_v31  ;;  %v1504_v1 = vadd.f32 %v1503_v34, %v3429_v15  ;;  %v1642_v15 = vmul.f32 %v3473_v17, %v3473_v17  ;;  %v1653_v31 = vmul.f32 %v3611_v23, %v3611_v23 }
 0x1c7   :  { %v1505_v5 = vadd.f32 %v1504_v1, %v3457_v63  ;;  %v1765_v38 = vadd.f32 %v1764_v9, %v1638_v22  ;;  %v1643_v63 = vmul.f32 %v3501_v12, %v3501_v12  ;;  %v1654_v22 = vmul.f32 %v3607_v0, %v3607_v0 }
 0x1c9   :  { %v1766_v11 = vadd.f32 %v1765_v38, %v1639_v61  ;;  %v1506_v27 = vadd.f32 %v1505_v5, %v3451_v42  ;;  %v1644_v42 = vmul.f32 %v3495_v55, %v3495_v55  ;;  %v1656_v38 = vmul.f32 %v3627_v29, %v3627_v29 }
 0x1cb   :  { %v1507_v30 = vadd.f32 %v1506_v27, %v3479_v35  ;;  %v1767_v56 = vadd.f32 %v1766_v11, %v1640_v47  ;;  %v1645_v35 = vmul.f32 %v3523_v52, %v3523_v52 }
 0x1cd   :  { %v1768_v33 = vadd.f32 %v1767_v56, %v1641_v28  ;;  %v1508_v59 = vadd.f32 %v1507_v30, %v3473_v17  ;;  %v1646_v17 = vmul.f32 %v3517_v40, %v3517_v40 }
 0x1cf   :  { %v1509_v19 = vadd.f32 %v1508_v59, %v3501_v12  ;;  %v1769_v20 = vadd.f32 %v1768_v33, %v1642_v15  ;;  %v1647_v12 = vmul.f32 %v3545_v45, %v3545_v45 }
 0x1d1   :  { %v1770_v50 = vadd.f32 %v1769_v20, %v1643_v63  ;;  %v1510_v39 = vadd.f32 %v1509_v19, %v3495_v55  ;;  %v1648_v55 = vmul.f32 %v3539_v24, %v3539_v24 }
 0x1d3   :  { %v1511_v44 = vadd.f32 %v1510_v39, %v3523_v52  ;;  %v1771_v21 = vadd.f32 %v1770_v50, %v1644_v42  ;;  %v3899_v52 = vld [vmem:[#allocation3_spill] sm:$0xff] }
 0x1d4   :  { %v1649_v41 = vmul.f32 %v3899_v52, %v3899_v52 }
 0x1d5   :  { %v1772_v51 = vadd.f32 %v1771_v21, %v1645_v35  ;;  %v1512_v49 = vadd.f32 %v1511_v44, %v3517_v40  ;;  %v1650_v40 = vmul.f32 %v3900_v14, %v3900_v14 }
 0x1d7   :  { %v1513_v7 = vadd.f32 %v1512_v49, %v3545_v45  ;;  %v1773_v36 = vadd.f32 %v1772_v51, %v1646_v17  ;;  %v1651_v45 = vmul.f32 %v3594_v58, %v3594_v58 }
 0x1d9   :  { %v1774_v60 = vadd.f32 %v1773_v36, %v1647_v12  ;;  %v1514_v43 = vadd.f32 %v1513_v7, %v3539_v24  ;;  %v1652_v24 = vmul.f32 %v3901_v57, %v3901_v57 }
 0x1db   :  { %v1515_v62 = vadd.f32 %v1514_v43, %v3899_v52  ;;  %v1775_v32 = vadd.f32 %v1774_v60, %v1648_v55 }
 0x1dd   :  { %v1776_v37 = vadd.f32 %v1775_v32, %v1649_v41  ;;  %v1516_v3 = vadd.f32 %v1515_v62, %v3900_v14 }
 0x1df   :  { %v1517_v53 = vadd.f32 %v1516_v3, %v3594_v58  ;;  %v1777_v26 = vadd.f32 %v1776_v37, %v1650_v40  ;;  %v1655_v58 = vmul.f32 %v3631_v6, %v3631_v6 }
 0x1e1   :  { %v1778_v8 = vadd.f32 %v1777_v26, %v1651_v45  ;;  %v1518_v18 = vadd.f32 %v1517_v53, %v3901_v57 }
 0x1e3   :  { %v1519_v34 = vadd.f32 %v1518_v18, %v3611_v23  ;;  %v1779_v48 = vadd.f32 %v1778_v8, %v1652_v24  ;;  %v1657_v23 = vmul.f32 %v3651_v25, %v3651_v25 }
 0x1e5   :  { %v1780_v9 = vadd.f32 %v1779_v48, %v1653_v31  ;;  %v1520_v1 = vadd.f32 %v1519_v34, %v3607_v0  ;;  %v1658_v0 = vmul.f32 %v3647_v16, %v3647_v16 }
 0x1e7   :  { %v1521_v61 = vadd.f32 %v1520_v1, %v3631_v6  ;;  %v1781_v5 = vadd.f32 %v1780_v9, %v1654_v22  ;;  %v1659_v6 = vmul.f32 %v3671_v13, %v3671_v13 }
 0x1e9   :  { %v1782_v47 = vadd.f32 %v1781_v5, %v1655_v58  ;;  %v1522_v11 = vadd.f32 %v1521_v61, %v3627_v29  ;;  %v1660_v29 = vmul.f32 %v3667_v10, %v3667_v10 }
 0x1eb   :  { %v1523_v27 = vadd.f32 %v1522_v11, %v3651_v25  ;;  %v1783_v28 = vadd.f32 %v1782_v47, %v1656_v38  ;;  %v1661_v25 = vmul.f32 %v3691_v2, %v3691_v2 }
 0x1ed   :  { %v1784_v30 = vadd.f32 %v1783_v28, %v1657_v23  ;;  %v1524_v56 = vadd.f32 %v1523_v27, %v3647_v16  ;;  %v1662_v16 = vmul.f32 %v3687_v54, %v3687_v54 }
 0x1ef   :  { %v1525_v15 = vadd.f32 %v1524_v56, %v3671_v13  ;;  %v1785_v33 = vadd.f32 %v1784_v30, %v1658_v0  ;;  %v1663_v13 = vmul.f32 %v3711_v46, %v3711_v46 }
 0x1f1   :  { %v1786_v59 = vadd.f32 %v1785_v33, %v1659_v6  ;;  %v1526_v63 = vadd.f32 %v1525_v15, %v3667_v10  ;;  %v1664_v10 = vmul.f32 %v3707_v4, %v3707_v4 }
 0x1f3   :  { %v1527_v19 = vadd.f32 %v1526_v63, %v3691_v2  ;;  %v1787_v20 = vadd.f32 %v1786_v59, %v1660_v29 }
 0x1f5   :  { %v1788_v42 = vadd.f32 %v1787_v20, %v1661_v25  ;;  %v1528_v50 = vadd.f32 %v1527_v19, %v3687_v54 }
 0x1f7   :  { %v1529_v39 = vadd.f32 %v1528_v50, %v3711_v46  ;;  %v1789_v35 = vadd.f32 %v1788_v42, %v1662_v16 }
 0x1f9   :  { %v1530_v44 = vadd.f32 %v1529_v39, %v3707_v4  ;;  %v1790_v21 = vadd.f32 %v1789_v35, %v1663_v13 }
 0x1fb   :  { %v1531_v2 = vrot.slane %v1530_v44, 4  ;;  %v1791_v17 = vadd.f32 %v1790_v21, %v1664_v10 }
 0x1fd   :  { %v1532_v51 = vadd.f32 %v1531_v2, %v1530_v44  ;;  %v1792_v49 = vrot.slane %v1791_v17, 4 }
 0x1ff   :  { %v1533_v12 = vrot.slane %v1532_v51, 2  ;;  %v1793_v7 = vadd.f32 %v1792_v49, %v1791_v17 }
 0x201   :  { %v1534_v36 = vadd.f32 %v1533_v12, %v1532_v51  ;;  %v1794_v54 = vrot.slane %v1793_v7, 2 }
 0x203   :  { %v1535_v55 = vrot.slane %v1534_v36, 1  ;;  %v1795_v60 = vadd.f32 %v1794_v54, %v1793_v7 }
 0x205   :  { %v1796_v43 = vrot.slane %v1795_v60, 1  ;;  %v1536_v46 = vadd.f32 %v1535_v55, %v1534_v36 }
 0x207   :  { %v1797_v52 = vadd.f32 %v1796_v43, %v1795_v60 }
 0x209   :  { %v1799_v41 = vsel %vm1798_vm0, %v1536_v46, %v1797_v52 }
 0x20a   :  { %1800 = vst [vmem:[%s3889_s6] sm:$0x3] %v1799_v41 }

// kernel: next_block.7
= control target key start
LH: loop header
LB: loop body
LE: loop exit
PB: predicated region body
PF: predicated region fallthrough
CT: control target
= control target key end

     0   :  { %s2388_s0 = inlined_call_operand.vmem [shape: f32[1024,128], index: 0, kind: input, shape index: {}]   ;;  %s2389_s1 = inlined_call_operand.vmem [shape: f32[1,128], index: 1, kind: input, shape index: {}]   ;;  %s2390_s2 = inlined_call_operand.vmem [shape: f32[1,128], index: 2, kind: input, shape index: {}]   ;;  %s2391_s3 = inlined_call_operand.vmem [shape: f32[1024,128], index: 3, kind: input, shape index: {}]   ;;  %s2392_s4 = inlined_call_operand.vmem [shape: f32[1024,128], index: 4, kind: output, shape index: {}]  }
   0x1   :  { %v17_v0 = vld [vmem:[%s2388_s0] sm:$0xff]  ;;  %v18_v4 = vld [vmem:[%s2388_s0 + $0x8] sm:$0xff]  ;;  %v19_v7 = vld [vmem:[%s2388_s0 + $0x10] sm:$0xff] }
   0x2   :  { %v966_v1 = vld [vmem:[%s2389_s1] ss:$0 sm:$0xff]  ;;  %v20_v8 = vld [vmem:[%s2388_s0 + $0x18] sm:$0xff]  ;;  %v416_v10 = vld [vmem:[%s2391_s3 + $0x8] sm:$0xff] }
   0x3   :  { %v971_v2 = vld [vmem:[%s2390_s2] ss:$0 sm:$0xff]  ;;  %v152_v3 = vmul.f32 %v966_v1, %v17_v0  ;;  %v153_v6 = vmul.f32 %v966_v1, %v18_v4  ;;  %v154_v11 = vmul.f32 %v966_v1, %v19_v7  ;;  %v417_v12 = vld [vmem:[%s2391_s3 + $0x10] sm:$0xff]  ;;  %v155_v13 = vmul.f32 %v966_v1, %v20_v8  ;;  %v418_v16 = vld [vmem:[%s2391_s3 + $0x18] sm:$0xff] }
   0x4   :  { %v415_v5 = vld [vmem:[%s2391_s3] sm:$0xff]  ;;  %v22_v18 = vld [vmem:[%s2388_s0 + $0x28] sm:$0xff]  ;;  %v23_v19 = vld [vmem:[%s2388_s0 + $0x30] sm:$0xff] }
   0x5   :  { %v287_v9 = vadd.f32 %v971_v2, %v152_v3  ;;  %v21_v14 = vld [vmem:[%s2388_s0 + $0x20] sm:$0xff]  ;;  %v288_v15 = vadd.f32 %v971_v2, %v153_v6  ;;  %v289_v21 = vadd.f32 %v971_v2, %v154_v11  ;;  %v290_v22 = vadd.f32 %v971_v2, %v155_v13  ;;  %v24_v25 = vld [vmem:[%s2388_s0 + $0x38] sm:$0xff]  ;;  %v420_v28 = vld [vmem:[%s2391_s3 + $0x28] sm:$0xff] }
   0x6   :  { %v156_v17 = vmul.f32 %v966_v1, %v21_v14  ;;  %v419_v23 = vld [vmem:[%s2391_s3 + $0x20] sm:$0xff]  ;;  %v157_v24 = vmul.f32 %v966_v1, %v22_v18  ;;  %v158_v29 = vmul.f32 %v966_v1, %v23_v19  ;;  %v159_v30 = vmul.f32 %v966_v1, %v24_v25  ;;  %v421_v36 = vld [vmem:[%s2391_s3 + $0x30] sm:$0xff]  ;;  %v422_v37 = vld [vmem:[%s2391_s3 + $0x38] sm:$0xff] }
   0x7   :  { %v543_v20 = vadd.f32 %v415_v5, %v287_v9  ;;  %v544_v26 = vadd.f32 %v416_v10, %v288_v15  ;;  %v25_v31 = vld [vmem:[%s2388_s0 + $0x40] sm:$0xff]  ;;  %v545_v33 = vadd.f32 %v417_v12, %v289_v21  ;;  %v546_v34 = vadd.f32 %v418_v16, %v290_v22  ;;  %v26_v38 = vld [vmem:[%s2388_s0 + $0x48] sm:$0xff]  ;;  %v27_v43 = vld [vmem:[%s2388_s0 + $0x50] sm:$0xff] }
   0x8   :  { %v291_v27 = vadd.f32 %v971_v2, %v156_v17  ;;  %v292_v35 = vadd.f32 %v971_v2, %v157_v24  ;;  %v293_v41 = vadd.f32 %v971_v2, %v158_v29  ;;  %v294_v42 = vadd.f32 %v971_v2, %v159_v30  ;;  %v28_v44 = vld [vmem:[%s2388_s0 + $0x58] sm:$0xff]  ;;  %v29_v49 = vld [vmem:[%s2388_s0 + $0x60] sm:$0xff]  ;;  %v30_v55 = vld [vmem:[%s2388_s0 + $0x68] sm:$0xff] }
   0x9   :  { %v671_v32 = vmax.f32 %v543_v20, 0.0  ;;  %v672_v39 = vmax.f32 %v544_v26, 0.0  ;;  %v673_v45 = vmax.f32 %v545_v33, 0.0  ;;  %v674_v46 = vmax.f32 %v546_v34, 0.0  ;;  %v423_v53 = vld [vmem:[%s2391_s3 + $0x40] sm:$0xff]  ;;  %v424_v58 = vld [vmem:[%s2391_s3 + $0x48] sm:$0xff] }
   0xa   :  { %v547_v40 = vadd.f32 %v419_v23, %v291_v27  ;;  %v548_v47 = vadd.f32 %v420_v28, %v292_v35  ;;  %v160_v48 = vmul.f32 %v966_v1, %v25_v31  ;;  %v549_v51 = vadd.f32 %v421_v36, %v293_v41  ;;  %v31_v61 = vld [vmem:[%s2388_s0 + $0x70] sm:$0xff]  ;;  %v32_v62 = vld [vmem:[%s2388_s0 + $0x78] sm:$0xff]  ;;  %v427_v10 = vld [vmem:[%s2391_s3 + $0x60] sm:$0xff] }
   0xb   :  { %799 = vst [vmem:[%s2392_s4] sm:$0xff] %v671_v32  ;;  %800 = vst [vmem:[%s2392_s4 + $0x8] sm:$0xff] %v672_v39  ;;  %v550_v52 = vadd.f32 %v422_v37, %v294_v42  ;;  %v161_v54 = vmul.f32 %v966_v1, %v26_v38  ;;  %v162_v59 = vmul.f32 %v966_v1, %v27_v43  ;;  %v425_v4 = vld [vmem:[%s2391_s3 + $0x50] sm:$0xff]  ;;  %v426_v5 = vld [vmem:[%s2391_s3 + $0x58] sm:$0xff] }
   0xc   :  { %v675_v50 = vmax.f32 %v547_v40, 0.0  ;;  %801 = vst [vmem:[%s2392_s4 + $0x10] sm:$0xff] %v673_v45  ;;  %802 = vst [vmem:[%s2392_s4 + $0x18] sm:$0xff] %v674_v46  ;;  %v676_v56 = vmax.f32 %v548_v47, 0.0  ;;  %v295_v57 = vadd.f32 %v971_v2, %v160_v48  ;;  %v163_v60 = vmul.f32 %v966_v1, %v28_v44  ;;  %v428_v14 = vld [vmem:[%s2391_s3 + $0x68] sm:$0xff]  ;;  %v33_v17 = vld [vmem:[%s2388_s0 + $0x80] sm:$0xff] }
   0xd   :  { %v677_v63 = vmax.f32 %v549_v51, 0.0  ;;  %v678_v0 = vmax.f32 %v550_v52, 0.0  ;;  %v296_v3 = vadd.f32 %v971_v2, %v161_v54  ;;  %v164_v6 = vmul.f32 %v966_v1, %v29_v49  ;;  %v429_v22 = vld [vmem:[%s2391_s3 + $0x70] sm:$0xff]  ;;  %v430_v23 = vld [vmem:[%s2391_s3 + $0x78] sm:$0xff]  ;;  %v34_v24 = vld [vmem:[%s2388_s0 + $0x88] sm:$0xff] }
   0xe   :  { %803 = vst [vmem:[%s2392_s4 + $0x20] sm:$0xff] %v675_v50  ;;  %804 = vst [vmem:[%s2392_s4 + $0x28] sm:$0xff] %v676_v56  ;;  %v551_v7 = vadd.f32 %v423_v53, %v295_v57  ;;  %v297_v8 = vadd.f32 %v971_v2, %v162_v59  ;;  %v298_v9 = vadd.f32 %v971_v2, %v163_v60  ;;  %v35_v29 = vld [vmem:[%s2388_s0 + $0x90] sm:$0xff]  ;;  %v36_v30 = vld [vmem:[%s2388_s0 + $0x98] sm:$0xff] }
   0xf   :  { %v165_v11 = vmul.f32 %v966_v1, %v30_v55  ;;  %805 = vst [vmem:[%s2392_s4 + $0x30] sm:$0xff] %v677_v63  ;;  %806 = vst [vmem:[%s2392_s4 + $0x38] sm:$0xff] %v678_v0  ;;  %v552_v12 = vadd.f32 %v424_v58, %v296_v3  ;;  %v299_v13 = vadd.f32 %v971_v2, %v164_v6  ;;  %v37_v35 = vld [vmem:[%s2388_s0 + $0xa0] sm:$0xff]  ;;  %v38_v41 = vld [vmem:[%s2388_s0 + $0xa8] sm:$0xff] }
  0x10   :  { %v166_v15 = vmul.f32 %v966_v1, %v31_v61  ;;  %v167_v16 = vmul.f32 %v966_v1, %v32_v62  ;;  %v679_v18 = vmax.f32 %v551_v7, 0.0  ;;  %v553_v19 = vadd.f32 %v425_v4, %v297_v8  ;;  %v431_v39 = vld [vmem:[%s2391_s3 + $0x80] sm:$0xff]  ;;  %v432_v44 = vld [vmem:[%s2391_s3 + $0x88] sm:$0xff]  ;;  %v39_v47 = vld [vmem:[%s2388_s0 + $0xb0] sm:$0xff] }
  0x11   :  { %v554_v20 = vadd.f32 %v426_v5, %v298_v9  ;;  %v300_v21 = vadd.f32 %v971_v2, %v165_v11  ;;  %v680_v25 = vmax.f32 %v552_v12, 0.0  ;;  %v555_v26 = vadd.f32 %v427_v10, %v299_v13  ;;  %v40_v48 = vld [vmem:[%s2388_s0 + $0xb8] sm:$0xff]  ;;  %v433_v52 = vld [vmem:[%s2391_s3 + $0x90] sm:$0xff]  ;;  %v435_v58 = vld [vmem:[%s2391_s3 + $0xa0] sm:$0xff] }
  0x12   :  { %v301_v27 = vadd.f32 %v971_v2, %v166_v15  ;;  %v302_v28 = vadd.f32 %v971_v2, %v167_v16  ;;  %807 = vst [vmem:[%s2392_s4 + $0x40] sm:$0xff] %v679_v18  ;;  %v681_v31 = vmax.f32 %v553_v19, 0.0  ;;  %v168_v34 = vmul.f32 %v966_v1, %v33_v17  ;;  %v434_v53 = vld [vmem:[%s2391_s3 + $0x98] sm:$0xff]  ;;  %v436_v62 = vld [vmem:[%s2391_s3 + $0xa8] sm:$0xff]  ;;  %v41_v3 = vld [vmem:[%s2388_s0 + $0xc0] sm:$0xff] }
  0x13   :  { %v682_v32 = vmax.f32 %v554_v20, 0.0  ;;  %v556_v33 = vadd.f32 %v428_v14, %v300_v21  ;;  %808 = vst [vmem:[%s2392_s4 + $0x48] sm:$0xff] %v680_v25  ;;  %v683_v36 = vmax.f32 %v555_v26, 0.0  ;;  %v169_v40 = vmul.f32 %v966_v1, %v34_v24  ;;  %v437_v8 = vld [vmem:[%s2391_s3 + $0xb0] sm:$0xff]  ;;  %v438_v9 = vld [vmem:[%s2391_s3 + $0xb8] sm:$0xff]  ;;  %v42_v10 = vld [vmem:[%s2388_s0 + $0xc8] sm:$0xff] }
  0x14   :  { %v557_v37 = vadd.f32 %v429_v22, %v301_v27  ;;  %v558_v38 = vadd.f32 %v430_v23, %v302_v28  ;;  %809 = vst [vmem:[%s2392_s4 + $0x50] sm:$0xff] %v681_v31  ;;  %v303_v43 = vadd.f32 %v971_v2, %v168_v34  ;;  %v170_v45 = vmul.f32 %v966_v1, %v35_v29  ;;  %v43_v15 = vld [vmem:[%s2388_s0 + $0xd0] sm:$0xff]  ;;  %v44_v16 = vld [vmem:[%s2388_s0 + $0xd8] sm:$0xff]  ;;  %v45_v21 = vld [vmem:[%s2388_s0 + $0xe0] sm:$0xff] }
  0x15   :  { %810 = vst [vmem:[%s2392_s4 + $0x58] sm:$0xff] %v682_v32  ;;  %v684_v42 = vmax.f32 %v556_v33, 0.0  ;;  %v171_v46 = vmul.f32 %v966_v1, %v36_v30  ;;  %811 = vst [vmem:[%s2392_s4 + $0x60] sm:$0xff] %v683_v36  ;;  %v304_v51 = vadd.f32 %v971_v2, %v169_v40  ;;  %v172_v54 = vmul.f32 %v966_v1, %v37_v35  ;;  %v439_v25 = vld [vmem:[%s2391_s3 + $0xc0] sm:$0xff]  ;;  %v46_v27 = vld [vmem:[%s2388_s0 + $0xe8] sm:$0xff] }
  0x16   :  { %v685_v49 = vmax.f32 %v557_v37, 0.0  ;;  %v686_v50 = vmax.f32 %v558_v38, 0.0  ;;  %v559_v55 = vadd.f32 %v431_v39, %v303_v43  ;;  %v305_v56 = vadd.f32 %v971_v2, %v170_v45  ;;  %v440_v30 = vld [vmem:[%s2391_s3 + $0xc8] sm:$0xff]  ;;  %v47_v33 = vld [vmem:[%s2388_s0 + $0xf0] sm:$0xff]  ;;  %v48_v34 = vld [vmem:[%s2388_s0 + $0xf8] sm:$0xff] }
  0x17   :  { %812 = vst [vmem:[%s2392_s4 + $0x68] sm:$0xff] %v684_v42  ;;  %v306_v57 = vadd.f32 %v971_v2, %v171_v46  ;;  %v173_v59 = vmul.f32 %v966_v1, %v38_v41  ;;  %v560_v60 = vadd.f32 %v432_v44, %v304_v51  ;;  %v307_v61 = vadd.f32 %v971_v2, %v172_v54  ;;  %v441_v38 = vld [vmem:[%s2391_s3 + $0xd0] sm:$0xff]  ;;  %v442_v39 = vld [vmem:[%s2391_s3 + $0xd8] sm:$0xff]  ;;  %v443_v44 = vld [vmem:[%s2391_s3 + $0xe0] sm:$0xff] }
  0x18   :  { %813 = vst [vmem:[%s2392_s4 + $0x70] sm:$0xff] %v685_v49  ;;  %814 = vst [vmem:[%s2392_s4 + $0x78] sm:$0xff] %v686_v50  ;;  %v174_v63 = vmul.f32 %v966_v1, %v39_v47  ;;  %v175_v0 = vmul.f32 %v966_v1, %v40_v48  ;;  %v687_v4 = vmax.f32 %v559_v55, 0.0  ;;  %v561_v5 = vadd.f32 %v433_v52, %v305_v56  ;;  %v444_v48 = vld [vmem:[%s2391_s3 + $0xe8] sm:$0xff]  ;;  %v49_v51 = vld [vmem:[%s2388_s0 + $0x100] sm:$0xff] }
  0x19   :  { %v562_v6 = vadd.f32 %v434_v53, %v306_v57  ;;  %v308_v7 = vadd.f32 %v971_v2, %v173_v59  ;;  %v688_v11 = vmax.f32 %v560_v60, 0.0  ;;  %v563_v12 = vadd.f32 %v435_v58, %v307_v61  ;;  %v445_v56 = vld [vmem:[%s2391_s3 + $0xf0] sm:$0xff]  ;;  %v446_v57 = vld [vmem:[%s2391_s3 + $0xf8] sm:$0xff]  ;;  %v50_v58 = vld [vmem:[%s2388_s0 + $0x108] sm:$0xff] }
  0x1a   :  { %v309_v13 = vadd.f32 %v971_v2, %v174_v63  ;;  %v310_v14 = vadd.f32 %v971_v2, %v175_v0  ;;  %815 = vst [vmem:[%s2392_s4 + $0x80] sm:$0xff] %v687_v4  ;;  %v689_v17 = vmax.f32 %v561_v5, 0.0  ;;  %v176_v20 = vmul.f32 %v966_v1, %v41_v3  ;;  %v51_v63 = vld [vmem:[%s2388_s0 + $0x110] sm:$0xff]  ;;  %v52_v0 = vld [vmem:[%s2388_s0 + $0x118] sm:$0xff] }
  0x1b   :  { %v690_v18 = vmax.f32 %v562_v6, 0.0  ;;  %v564_v19 = vadd.f32 %v436_v62, %v308_v7  ;;  %816 = vst [vmem:[%s2392_s4 + $0x88] sm:$0xff] %v688_v11  ;;  %v691_v22 = vmax.f32 %v563_v12, 0.0  ;;  %v177_v26 = vmul.f32 %v966_v1, %v42_v10  ;;  %v53_v7 = vld [vmem:[%s2388_s0 + $0x120] sm:$0xff] }
  0x1c   :  { %v565_v23 = vadd.f32 %v437_v8, %v309_v13  ;;  %v566_v24 = vadd.f32 %v438_v9, %v310_v14  ;;  %817 = vst [vmem:[%s2392_s4 + $0x90] sm:$0xff] %v689_v17  ;;  %v311_v29 = vadd.f32 %v971_v2, %v176_v20  ;;  %v178_v31 = vmul.f32 %v966_v1, %v43_v15  ;;  %v447_v11 = vld [vmem:[%s2391_s3 + $0x100] sm:$0xff]  ;;  %v54_v13 = vld [vmem:[%s2388_s0 + $0x128] sm:$0xff]  ;;  %v56_v20 = vld [vmem:[%s2388_s0 + $0x138] sm:$0xff] }
  0x1d   :  { %818 = vst [vmem:[%s2392_s4 + $0x98] sm:$0xff] %v690_v18  ;;  %v692_v28 = vmax.f32 %v564_v19, 0.0  ;;  %v179_v32 = vmul.f32 %v966_v1, %v44_v16  ;;  %819 = vst [vmem:[%s2392_s4 + $0xa0] sm:$0xff] %v691_v22  ;;  %v312_v37 = vadd.f32 %v971_v2, %v177_v26  ;;  %v180_v40 = vmul.f32 %v966_v1, %v45_v21  ;;  %v448_v16 = vld [vmem:[%s2391_s3 + $0x108] sm:$0xff]  ;;  %v55_v19 = vld [vmem:[%s2388_s0 + $0x130] sm:$0xff] }
  0x1e   :  { %v693_v35 = vmax.f32 %v565_v23, 0.0  ;;  %v694_v36 = vmax.f32 %v566_v24, 0.0  ;;  %v567_v41 = vadd.f32 %v439_v25, %v311_v29  ;;  %v313_v42 = vadd.f32 %v971_v2, %v178_v31  ;;  %v449_v24 = vld [vmem:[%s2391_s3 + $0x110] sm:$0xff]  ;;  %v450_v25 = vld [vmem:[%s2391_s3 + $0x118] sm:$0xff] }
  0x1f   :  { %820 = vst [vmem:[%s2392_s4 + $0xa8] sm:$0xff] %v692_v28  ;;  %v314_v43 = vadd.f32 %v971_v2, %v179_v32  ;;  %v181_v45 = vmul.f32 %v966_v1, %v46_v27  ;;  %v568_v46 = vadd.f32 %v440_v30, %v312_v37  ;;  %v315_v47 = vadd.f32 %v971_v2, %v180_v40  ;;  %v451_v30 = vld [vmem:[%s2391_s3 + $0x120] sm:$0xff] }
  0x20   :  { %821 = vst [vmem:[%s2392_s4 + $0xb0] sm:$0xff] %v693_v35  ;;  %822 = vst [vmem:[%s2392_s4 + $0xb8] sm:$0xff] %v694_v36  ;;  %v182_v49 = vmul.f32 %v966_v1, %v47_v33  ;;  %v183_v50 = vmul.f32 %v966_v1, %v48_v34  ;;  %v695_v52 = vmax.f32 %v567_v41, 0.0  ;;  %v569_v53 = vadd.f32 %v441_v38, %v313_v42  ;;  %v452_v34 = vld [vmem:[%s2391_s3 + $0x128] sm:$0xff]  ;;  %v57_v37 = vld [vmem:[%s2388_s0 + $0x140] sm:$0xff] }
  0x21   :  { %v570_v54 = vadd.f32 %v442_v39, %v314_v43  ;;  %v316_v55 = vadd.f32 %v971_v2, %v181_v45  ;;  %v696_v59 = vmax.f32 %v568_v46, 0.0  ;;  %v571_v60 = vadd.f32 %v443_v44, %v315_v47  ;;  %v453_v42 = vld [vmem:[%s2391_s3 + $0x130] sm:$0xff]  ;;  %v454_v43 = vld [vmem:[%s2391_s3 + $0x138] sm:$0xff]  ;;  %v58_v44 = vld [vmem:[%s2388_s0 + $0x148] sm:$0xff] }
  0x22   :  { %v317_v61 = vadd.f32 %v971_v2, %v182_v49  ;;  %v318_v62 = vadd.f32 %v971_v2, %v183_v50  ;;  %823 = vst [vmem:[%s2392_s4 + $0xc0] sm:$0xff] %v695_v52  ;;  %v697_v3 = vmax.f32 %v569_v53, 0.0  ;;  %v184_v6 = vmul.f32 %v966_v1, %v49_v51  ;;  %v59_v49 = vld [vmem:[%s2388_s0 + $0x150] sm:$0xff]  ;;  %v60_v50 = vld [vmem:[%s2388_s0 + $0x158] sm:$0xff] }
  0x23   :  { %v698_v4 = vmax.f32 %v570_v54, 0.0  ;;  %v572_v5 = vadd.f32 %v444_v48, %v316_v55  ;;  %824 = vst [vmem:[%s2392_s4 + $0xc8] sm:$0xff] %v696_v59  ;;  %v699_v8 = vmax.f32 %v571_v60, 0.0  ;;  %v185_v12 = vmul.f32 %v966_v1, %v50_v58  ;;  %v61_v55 = vld [vmem:[%s2388_s0 + $0x160] sm:$0xff] }
  0x24   :  { %v573_v9 = vadd.f32 %v445_v56, %v317_v61  ;;  %v574_v10 = vadd.f32 %v446_v57, %v318_v62  ;;  %825 = vst [vmem:[%s2392_s4 + $0xd0] sm:$0xff] %v697_v3  ;;  %v319_v15 = vadd.f32 %v971_v2, %v184_v6  ;;  %v186_v17 = vmul.f32 %v966_v1, %v51_v63  ;;  %v455_v59 = vld [vmem:[%s2391_s3 + $0x140] sm:$0xff]  ;;  %v62_v61 = vld [vmem:[%s2388_s0 + $0x168] sm:$0xff]  ;;  %v64_v6 = vld [vmem:[%s2388_s0 + $0x178] sm:$0xff] }
  0x25   :  { %826 = vst [vmem:[%s2392_s4 + $0xd8] sm:$0xff] %v698_v4  ;;  %v700_v14 = vmax.f32 %v572_v5, 0.0  ;;  %v187_v18 = vmul.f32 %v966_v1, %v52_v0  ;;  %827 = vst [vmem:[%s2392_s4 + $0xe0] sm:$0xff] %v699_v8  ;;  %v320_v23 = vadd.f32 %v971_v2, %v185_v12  ;;  %v188_v26 = vmul.f32 %v966_v1, %v53_v7  ;;  %v456_v0 = vld [vmem:[%s2391_s3 + $0x148] sm:$0xff]  ;;  %v63_v5 = vld [vmem:[%s2388_s0 + $0x170] sm:$0xff] }
  0x26   :  { %v701_v21 = vmax.f32 %v573_v9, 0.0  ;;  %v702_v22 = vmax.f32 %v574_v10, 0.0  ;;  %v575_v27 = vadd.f32 %v447_v11, %v319_v15  ;;  %v321_v28 = vadd.f32 %v971_v2, %v186_v17  ;;  %v457_v10 = vld [vmem:[%s2391_s3 + $0x150] sm:$0xff]  ;;  %v458_v11 = vld [vmem:[%s2391_s3 + $0x158] sm:$0xff] }
  0x27   :  { %828 = vst [vmem:[%s2392_s4 + $0xe8] sm:$0xff] %v700_v14  ;;  %v322_v29 = vadd.f32 %v971_v2, %v187_v18  ;;  %v189_v31 = vmul.f32 %v966_v1, %v54_v13  ;;  %v576_v32 = vadd.f32 %v448_v16, %v320_v23  ;;  %v323_v33 = vadd.f32 %v971_v2, %v188_v26  ;;  %v459_v16 = vld [vmem:[%s2391_s3 + $0x160] sm:$0xff] }
  0x28   :  { %829 = vst [vmem:[%s2392_s4 + $0xf0] sm:$0xff] %v701_v21  ;;  %830 = vst [vmem:[%s2392_s4 + $0xf8] sm:$0xff] %v702_v22  ;;  %v190_v35 = vmul.f32 %v966_v1, %v55_v19  ;;  %v191_v36 = vmul.f32 %v966_v1, %v56_v20  ;;  %v703_v38 = vmax.f32 %v575_v27, 0.0  ;;  %v577_v39 = vadd.f32 %v449_v24, %v321_v28  ;;  %v460_v20 = vld [vmem:[%s2391_s3 + $0x168] sm:$0xff]  ;;  %v65_v23 = vld [vmem:[%s2388_s0 + $0x180] sm:$0xff] }
  0x29   :  { %v578_v40 = vadd.f32 %v450_v25, %v322_v29  ;;  %v324_v41 = vadd.f32 %v971_v2, %v189_v31  ;;  %v704_v45 = vmax.f32 %v576_v32, 0.0  ;;  %v579_v46 = vadd.f32 %v451_v30, %v323_v33  ;;  %v461_v28 = vld [vmem:[%s2391_s3 + $0x170] sm:$0xff]  ;;  %v462_v29 = vld [vmem:[%s2391_s3 + $0x178] sm:$0xff]  ;;  %v66_v30 = vld [vmem:[%s2388_s0 + $0x188] sm:$0xff] }
  0x2a   :  { %v325_v47 = vadd.f32 %v971_v2, %v190_v35  ;;  %v326_v48 = vadd.f32 %v971_v2, %v191_v36  ;;  %831 = vst [vmem:[%s2392_s4 + $0x100] sm:$0xff] %v703_v38  ;;  %v705_v51 = vmax.f32 %v577_v39, 0.0  ;;  %v192_v54 = vmul.f32 %v966_v1, %v57_v37  ;;  %v67_v35 = vld [vmem:[%s2388_s0 + $0x190] sm:$0xff]  ;;  %v68_v36 = vld [vmem:[%s2388_s0 + $0x198] sm:$0xff] }
  0x2b   :  { %v706_v52 = vmax.f32 %v578_v40, 0.0  ;;  %v580_v53 = vadd.f32 %v452_v34, %v324_v41  ;;  %832 = vst [vmem:[%s2392_s4 + $0x108] sm:$0xff] %v704_v45  ;;  %v707_v56 = vmax.f32 %v579_v46, 0.0  ;;  %v193_v60 = vmul.f32 %v966_v1, %v58_v44  ;;  %v69_v41 = vld [vmem:[%s2388_s0 + $0x1a0] sm:$0xff] }
  0x2c   :  { %v581_v57 = vadd.f32 %v453_v42, %v325_v47  ;;  %v582_v58 = vadd.f32 %v454_v43, %v326_v48  ;;  %833 = vst [vmem:[%s2392_s4 + $0x110] sm:$0xff] %v705_v51  ;;  %v327_v63 = vadd.f32 %v971_v2, %v192_v54  ;;  %v194_v3 = vmul.f32 %v966_v1, %v59_v49  ;;  %v463_v45 = vld [vmem:[%s2391_s3 + $0x180] sm:$0xff]  ;;  %v70_v47 = vld [vmem:[%s2388_s0 + $0x1a8] sm:$0xff]  ;;  %v72_v54 = vld [vmem:[%s2388_s0 + $0x1b8] sm:$0xff] }
  0x2d   :  { %834 = vst [vmem:[%s2392_s4 + $0x118] sm:$0xff] %v706_v52  ;;  %v708_v62 = vmax.f32 %v580_v53, 0.0  ;;  %v195_v4 = vmul.f32 %v966_v1, %v60_v50  ;;  %835 = vst [vmem:[%s2392_s4 + $0x120] sm:$0xff] %v707_v56  ;;  %v328_v9 = vadd.f32 %v971_v2, %v193_v60  ;;  %v196_v12 = vmul.f32 %v966_v1, %v61_v55  ;;  %v464_v50 = vld [vmem:[%s2391_s3 + $0x188] sm:$0xff]  ;;  %v71_v53 = vld [vmem:[%s2388_s0 + $0x1b0] sm:$0xff] }
  0x2e   :  { %v709_v7 = vmax.f32 %v581_v57, 0.0  ;;  %v710_v8 = vmax.f32 %v582_v58, 0.0  ;;  %v583_v13 = vadd.f32 %v455_v59, %v327_v63  ;;  %v329_v14 = vadd.f32 %v971_v2, %v194_v3  ;;  %v465_v58 = vld [vmem:[%s2391_s3 + $0x190] sm:$0xff]  ;;  %v466_v59 = vld [vmem:[%s2391_s3 + $0x198] sm:$0xff] }
  0x2f   :  { %836 = vst [vmem:[%s2392_s4 + $0x128] sm:$0xff] %v708_v62  ;;  %v330_v15 = vadd.f32 %v971_v2, %v195_v4  ;;  %v197_v17 = vmul.f32 %v966_v1, %v62_v61  ;;  %v584_v18 = vadd.f32 %v456_v0, %v328_v9  ;;  %v331_v19 = vadd.f32 %v971_v2, %v196_v12  ;;  %v467_v0 = vld [vmem:[%s2391_s3 + $0x1a0] sm:$0xff] }
  0x30   :  { %837 = vst [vmem:[%s2392_s4 + $0x130] sm:$0xff] %v709_v7  ;;  %838 = vst [vmem:[%s2392_s4 + $0x138] sm:$0xff] %v710_v8  ;;  %v198_v21 = vmul.f32 %v966_v1, %v63_v5  ;;  %v199_v22 = vmul.f32 %v966_v1, %v64_v6  ;;  %v711_v24 = vmax.f32 %v583_v13, 0.0  ;;  %v585_v25 = vadd.f32 %v457_v10, %v329_v14  ;;  %v468_v6 = vld [vmem:[%s2391_s3 + $0x1a8] sm:$0xff]  ;;  %v73_v9 = vld [vmem:[%s2388_s0 + $0x1c0] sm:$0xff] }
  0x31   :  { %v586_v26 = vadd.f32 %v458_v11, %v330_v15  ;;  %v332_v27 = vadd.f32 %v971_v2, %v197_v17  ;;  %v712_v31 = vmax.f32 %v584_v18, 0.0  ;;  %v587_v32 = vadd.f32 %v459_v16, %v331_v19  ;;  %v469_v14 = vld [vmem:[%s2391_s3 + $0x1b0] sm:$0xff]  ;;  %v470_v15 = vld [vmem:[%s2391_s3 + $0x1b8] sm:$0xff]  ;;  %v74_v16 = vld [vmem:[%s2388_s0 + $0x1c8] sm:$0xff] }
  0x32   :  { %v333_v33 = vadd.f32 %v971_v2, %v198_v21  ;;  %v334_v34 = vadd.f32 %v971_v2, %v199_v22  ;;  %839 = vst [vmem:[%s2392_s4 + $0x140] sm:$0xff] %v711_v24  ;;  %v713_v37 = vmax.f32 %v585_v25, 0.0  ;;  %v200_v40 = vmul.f32 %v966_v1, %v65_v23  ;;  %v75_v21 = vld [vmem:[%s2388_s0 + $0x1d0] sm:$0xff]  ;;  %v76_v22 = vld [vmem:[%s2388_s0 + $0x1d8] sm:$0xff] }
  0x33   :  { %v714_v38 = vmax.f32 %v586_v26, 0.0  ;;  %v588_v39 = vadd.f32 %v460_v20, %v332_v27  ;;  %840 = vst [vmem:[%s2392_s4 + $0x148] sm:$0xff] %v712_v31  ;;  %v715_v42 = vmax.f32 %v587_v32, 0.0  ;;  %v201_v46 = vmul.f32 %v966_v1, %v66_v30  ;;  %v77_v27 = vld [vmem:[%s2388_s0 + $0x1e0] sm:$0xff] }
  0x34   :  { %v589_v43 = vadd.f32 %v461_v28, %v333_v33  ;;  %v590_v44 = vadd.f32 %v462_v29, %v334_v34  ;;  %841 = vst [vmem:[%s2392_s4 + $0x150] sm:$0xff] %v713_v37  ;;  %v335_v49 = vadd.f32 %v971_v2, %v200_v40  ;;  %v202_v51 = vmul.f32 %v966_v1, %v67_v35  ;;  %v471_v31 = vld [vmem:[%s2391_s3 + $0x1c0] sm:$0xff]  ;;  %v78_v33 = vld [vmem:[%s2388_s0 + $0x1e8] sm:$0xff]  ;;  %v80_v40 = vld [vmem:[%s2388_s0 + $0x1f8] sm:$0xff] }
  0x35   :  { %842 = vst [vmem:[%s2392_s4 + $0x158] sm:$0xff] %v714_v38  ;;  %v716_v48 = vmax.f32 %v588_v39, 0.0  ;;  %v203_v52 = vmul.f32 %v966_v1, %v68_v36  ;;  %843 = vst [vmem:[%s2392_s4 + $0x160] sm:$0xff] %v715_v42  ;;  %v336_v57 = vadd.f32 %v971_v2, %v201_v46  ;;  %v204_v60 = vmul.f32 %v966_v1, %v69_v41  ;;  %v472_v36 = vld [vmem:[%s2391_s3 + $0x1c8] sm:$0xff]  ;;  %v79_v39 = vld [vmem:[%s2388_s0 + $0x1f0] sm:$0xff] }
  0x36   :  { %v717_v55 = vmax.f32 %v589_v43, 0.0  ;;  %v718_v56 = vmax.f32 %v590_v44, 0.0  ;;  %v591_v61 = vadd.f32 %v463_v45, %v335_v49  ;;  %v337_v62 = vadd.f32 %v971_v2, %v202_v51  ;;  %v473_v44 = vld [vmem:[%s2391_s3 + $0x1d0] sm:$0xff]  ;;  %v474_v45 = vld [vmem:[%s2391_s3 + $0x1d8] sm:$0xff] }
  0x37   :  { %844 = vst [vmem:[%s2392_s4 + $0x168] sm:$0xff] %v716_v48  ;;  %v338_v63 = vadd.f32 %v971_v2, %v203_v52  ;;  %v205_v3 = vmul.f32 %v966_v1, %v70_v47  ;;  %v592_v4 = vadd.f32 %v464_v50, %v336_v57  ;;  %v339_v5 = vadd.f32 %v971_v2, %v204_v60  ;;  %v475_v50 = vld [vmem:[%s2391_s3 + $0x1e0] sm:$0xff] }
  0x38   :  { %845 = vst [vmem:[%s2392_s4 + $0x170] sm:$0xff] %v717_v55  ;;  %846 = vst [vmem:[%s2392_s4 + $0x178] sm:$0xff] %v718_v56  ;;  %v206_v7 = vmul.f32 %v966_v1, %v71_v53  ;;  %v207_v8 = vmul.f32 %v966_v1, %v72_v54  ;;  %v719_v10 = vmax.f32 %v591_v61, 0.0  ;;  %v593_v11 = vadd.f32 %v465_v58, %v337_v62  ;;  %v476_v54 = vld [vmem:[%s2391_s3 + $0x1e8] sm:$0xff]  ;;  %v81_v57 = vld [vmem:[%s2388_s0 + $0x200] sm:$0xff] }
  0x39   :  { %v594_v12 = vadd.f32 %v466_v59, %v338_v63  ;;  %v340_v13 = vadd.f32 %v971_v2, %v205_v3  ;;  %v720_v17 = vmax.f32 %v592_v4, 0.0  ;;  %v595_v18 = vadd.f32 %v467_v0, %v339_v5  ;;  %v477_v62 = vld [vmem:[%s2391_s3 + $0x1f0] sm:$0xff]  ;;  %v478_v63 = vld [vmem:[%s2391_s3 + $0x1f8] sm:$0xff]  ;;  %v82_v0 = vld [vmem:[%s2388_s0 + $0x208] sm:$0xff] }
  0x3a   :  { %v341_v19 = vadd.f32 %v971_v2, %v206_v7  ;;  %v342_v20 = vadd.f32 %v971_v2, %v207_v8  ;;  %847 = vst [vmem:[%s2392_s4 + $0x180] sm:$0xff] %v719_v10  ;;  %v721_v23 = vmax.f32 %v593_v11, 0.0  ;;  %v208_v26 = vmul.f32 %v966_v1, %v73_v9  ;;  %v83_v7 = vld [vmem:[%s2388_s0 + $0x210] sm:$0xff]  ;;  %v84_v8 = vld [vmem:[%s2388_s0 + $0x218] sm:$0xff] }
  0x3b   :  { %v722_v24 = vmax.f32 %v594_v12, 0.0  ;;  %v596_v25 = vadd.f32 %v468_v6, %v340_v13  ;;  %848 = vst [vmem:[%s2392_s4 + $0x188] sm:$0xff] %v720_v17  ;;  %v723_v28 = vmax.f32 %v595_v18, 0.0  ;;  %v209_v32 = vmul.f32 %v966_v1, %v74_v16  ;;  %v85_v13 = vld [vmem:[%s2388_s0 + $0x220] sm:$0xff] }
  0x3c   :  { %v597_v29 = vadd.f32 %v469_v14, %v341_v19  ;;  %v598_v30 = vadd.f32 %v470_v15, %v342_v20  ;;  %849 = vst [vmem:[%s2392_s4 + $0x190] sm:$0xff] %v721_v23  ;;  %v343_v35 = vadd.f32 %v971_v2, %v208_v26  ;;  %v210_v37 = vmul.f32 %v966_v1, %v75_v21  ;;  %v479_v17 = vld [vmem:[%s2391_s3 + $0x200] sm:$0xff]  ;;  %v86_v19 = vld [vmem:[%s2388_s0 + $0x228] sm:$0xff]  ;;  %v88_v26 = vld [vmem:[%s2388_s0 + $0x238] sm:$0xff] }
  0x3d   :  { %850 = vst [vmem:[%s2392_s4 + $0x198] sm:$0xff] %v722_v24  ;;  %v724_v34 = vmax.f32 %v596_v25, 0.0  ;;  %v211_v38 = vmul.f32 %v966_v1, %v76_v22  ;;  %851 = vst [vmem:[%s2392_s4 + $0x1a0] sm:$0xff] %v723_v28  ;;  %v344_v43 = vadd.f32 %v971_v2, %v209_v32  ;;  %v212_v46 = vmul.f32 %v966_v1, %v77_v27  ;;  %v480_v22 = vld [vmem:[%s2391_s3 + $0x208] sm:$0xff]  ;;  %v87_v25 = vld [vmem:[%s2388_s0 + $0x230] sm:$0xff] }
  0x3e   :  { %v725_v41 = vmax.f32 %v597_v29, 0.0  ;;  %v726_v42 = vmax.f32 %v598_v30, 0.0  ;;  %v599_v47 = vadd.f32 %v471_v31, %v343_v35  ;;  %v345_v48 = vadd.f32 %v971_v2, %v210_v37  ;;  %v481_v30 = vld [vmem:[%s2391_s3 + $0x210] sm:$0xff]  ;;  %v482_v31 = vld [vmem:[%s2391_s3 + $0x218] sm:$0xff] }
  0x3f   :  { %852 = vst [vmem:[%s2392_s4 + $0x1a8] sm:$0xff] %v724_v34  ;;  %v346_v49 = vadd.f32 %v971_v2, %v211_v38  ;;  %v213_v51 = vmul.f32 %v966_v1, %v78_v33  ;;  %v600_v52 = vadd.f32 %v472_v36, %v344_v43  ;;  %v347_v53 = vadd.f32 %v971_v2, %v212_v46  ;;  %v483_v36 = vld [vmem:[%s2391_s3 + $0x220] sm:$0xff] }
  0x40   :  { %853 = vst [vmem:[%s2392_s4 + $0x1b0] sm:$0xff] %v725_v41  ;;  %854 = vst [vmem:[%s2392_s4 + $0x1b8] sm:$0xff] %v726_v42  ;;  %v214_v55 = vmul.f32 %v966_v1, %v79_v39  ;;  %v215_v56 = vmul.f32 %v966_v1, %v80_v40  ;;  %v727_v58 = vmax.f32 %v599_v47, 0.0  ;;  %v601_v59 = vadd.f32 %v473_v44, %v345_v48  ;;  %v484_v40 = vld [vmem:[%s2391_s3 + $0x228] sm:$0xff]  ;;  %v89_v43 = vld [vmem:[%s2388_s0 + $0x240] sm:$0xff] }
  0x41   :  { %v602_v60 = vadd.f32 %v474_v45, %v346_v49  ;;  %v348_v61 = vadd.f32 %v971_v2, %v213_v51  ;;  %v728_v3 = vmax.f32 %v600_v52, 0.0  ;;  %v603_v4 = vadd.f32 %v475_v50, %v347_v53  ;;  %v485_v48 = vld [vmem:[%s2391_s3 + $0x230] sm:$0xff]  ;;  %v486_v49 = vld [vmem:[%s2391_s3 + $0x238] sm:$0xff]  ;;  %v90_v50 = vld [vmem:[%s2388_s0 + $0x248] sm:$0xff] }
  0x42   :  { %v349_v5 = vadd.f32 %v971_v2, %v214_v55  ;;  %v350_v6 = vadd.f32 %v971_v2, %v215_v56  ;;  %855 = vst [vmem:[%s2392_s4 + $0x1c0] sm:$0xff] %v727_v58  ;;  %v729_v9 = vmax.f32 %v601_v59, 0.0  ;;  %v216_v12 = vmul.f32 %v966_v1, %v81_v57  ;;  %v91_v55 = vld [vmem:[%s2388_s0 + $0x250] sm:$0xff]  ;;  %v92_v56 = vld [vmem:[%s2388_s0 + $0x258] sm:$0xff] }
  0x43   :  { %v730_v10 = vmax.f32 %v602_v60, 0.0  ;;  %v604_v11 = vadd.f32 %v476_v54, %v348_v61  ;;  %856 = vst [vmem:[%s2392_s4 + $0x1c8] sm:$0xff] %v728_v3  ;;  %v731_v14 = vmax.f32 %v603_v4, 0.0  ;;  %v217_v18 = vmul.f32 %v966_v1, %v82_v0  ;;  %v93_v61 = vld [vmem:[%s2388_s0 + $0x260] sm:$0xff] }
  0x44   :  { %v605_v15 = vadd.f32 %v477_v62, %v349_v5  ;;  %v606_v16 = vadd.f32 %v478_v63, %v350_v6  ;;  %857 = vst [vmem:[%s2392_s4 + $0x1d0] sm:$0xff] %v729_v9  ;;  %v351_v21 = vadd.f32 %v971_v2, %v216_v12  ;;  %v218_v23 = vmul.f32 %v966_v1, %v83_v7  ;;  %v487_v3 = vld [vmem:[%s2391_s3 + $0x240] sm:$0xff]  ;;  %v94_v5 = vld [vmem:[%s2388_s0 + $0x268] sm:$0xff]  ;;  %v95_v12 = vld [vmem:[%s2388_s0 + $0x270] sm:$0xff] }
  0x45   :  { %858 = vst [vmem:[%s2392_s4 + $0x1d8] sm:$0xff] %v730_v10  ;;  %v732_v20 = vmax.f32 %v604_v11, 0.0  ;;  %v219_v24 = vmul.f32 %v966_v1, %v84_v8  ;;  %859 = vst [vmem:[%s2392_s4 + $0x1e0] sm:$0xff] %v731_v14  ;;  %v352_v29 = vadd.f32 %v971_v2, %v217_v18  ;;  %v220_v32 = vmul.f32 %v966_v1, %v85_v13  ;;  %v488_v8 = vld [vmem:[%s2391_s3 + $0x248] sm:$0xff]  ;;  %v1781_v10 = vld [vmem:[%s2389_s1] ss:$0 sm:$0xff] }
  0x46   :  { %v733_v27 = vmax.f32 %v605_v15, 0.0  ;;  %v734_v28 = vmax.f32 %v606_v16, 0.0  ;;  %v607_v33 = vadd.f32 %v479_v17, %v351_v21  ;;  %v353_v34 = vadd.f32 %v971_v2, %v218_v23  ;;  %v1796_v14 = vld [vmem:[%s2390_s2] ss:$0 sm:$0xff]  ;;  %v489_v16 = vld [vmem:[%s2391_s3 + $0x250] sm:$0xff]  ;;  %v490_v17 = vld [vmem:[%s2391_s3 + $0x258] sm:$0xff] }
  0x47   :  { %860 = vst [vmem:[%s2392_s4 + $0x1e8] sm:$0xff] %v732_v20  ;;  %v354_v35 = vadd.f32 %v971_v2, %v219_v24  ;;  %v221_v37 = vmul.f32 %v966_v1, %v86_v19  ;;  %v608_v38 = vadd.f32 %v480_v22, %v352_v29  ;;  %v355_v39 = vadd.f32 %v971_v2, %v220_v32  ;;  %v491_v22 = vld [vmem:[%s2391_s3 + $0x260] sm:$0xff] }
  0x48   :  { %861 = vst [vmem:[%s2392_s4 + $0x1f0] sm:$0xff] %v733_v27  ;;  %862 = vst [vmem:[%s2392_s4 + $0x1f8] sm:$0xff] %v734_v28  ;;  %v222_v41 = vmul.f32 %v966_v1, %v87_v25  ;;  %v223_v42 = vmul.f32 %v966_v1, %v88_v26  ;;  %v735_v44 = vmax.f32 %v607_v33, 0.0  ;;  %v609_v45 = vadd.f32 %v481_v30, %v353_v34  ;;  %v492_v26 = vld [vmem:[%s2391_s3 + $0x268] sm:$0xff]  ;;  %v97_v29 = vld [vmem:[%s2388_s0 + $0x280] sm:$0xff] }
  0x49   :  { %v610_v46 = vadd.f32 %v482_v31, %v354_v35  ;;  %v356_v47 = vadd.f32 %v971_v2, %v221_v37  ;;  %v736_v51 = vmax.f32 %v608_v38, 0.0  ;;  %v611_v52 = vadd.f32 %v483_v36, %v355_v39  ;;  %v493_v34 = vld [vmem:[%s2391_s3 + $0x270] sm:$0xff]  ;;  %v494_v35 = vld [vmem:[%s2391_s3 + $0x278] sm:$0xff]  ;;  %v98_v36 = vld [vmem:[%s2388_s0 + $0x288] sm:$0xff] }
  0x4a   :  { %v357_v53 = vadd.f32 %v971_v2, %v222_v41  ;;  %v358_v54 = vadd.f32 %v971_v2, %v223_v42  ;;  %863 = vst [vmem:[%s2392_s4 + $0x200] sm:$0xff] %v735_v44  ;;  %v737_v57 = vmax.f32 %v609_v45, 0.0  ;;  %v224_v60 = vmul.f32 %v966_v1, %v89_v43  ;;  %v99_v41 = vld [vmem:[%s2388_s0 + $0x290] sm:$0xff]  ;;  %v100_v42 = vld [vmem:[%s2388_s0 + $0x298] sm:$0xff] }
  0x4b   :  { %v738_v58 = vmax.f32 %v610_v46, 0.0  ;;  %v612_v59 = vadd.f32 %v484_v40, %v356_v47  ;;  %864 = vst [vmem:[%s2392_s4 + $0x208] sm:$0xff] %v736_v51  ;;  %v739_v62 = vmax.f32 %v611_v52, 0.0  ;;  %v225_v4 = vmul.f32 %v966_v1, %v90_v50  ;;  %v101_v47 = vld [vmem:[%s2388_s0 + $0x2a0] sm:$0xff] }
  0x4c   :  { %v613_v63 = vadd.f32 %v485_v48, %v357_v53  ;;  %v614_v0 = vadd.f32 %v486_v49, %v358_v54  ;;  %865 = vst [vmem:[%s2392_s4 + $0x210] sm:$0xff] %v737_v57  ;;  %v359_v7 = vadd.f32 %v971_v2, %v224_v60  ;;  %v226_v9 = vmul.f32 %v966_v1, %v91_v55  ;;  %v96_v2 = vld [vmem:[%s2388_s0 + $0x278] sm:$0xff]  ;;  %v495_v51 = vld [vmem:[%s2391_s3 + $0x280] sm:$0xff]  ;;  %v102_v53 = vld [vmem:[%s2388_s0 + $0x2a8] sm:$0xff] }
  0x4d   :  { %866 = vst [vmem:[%s2392_s4 + $0x218] sm:$0xff] %v738_v58  ;;  %v740_v6 = vmax.f32 %v612_v59, 0.0  ;;  %v227_v11 = vmul.f32 %v1781_v10, %v92_v56  ;;  %867 = vst [vmem:[%s2392_s4 + $0x220] sm:$0xff] %v739_v62  ;;  %v360_v15 = vadd.f32 %v1796_v14, %v225_v4  ;;  %v228_v18 = vmul.f32 %v1781_v10, %v93_v61  ;;  %v496_v56 = vld [vmem:[%s2391_s3 + $0x288] sm:$0xff]  ;;  %v103_v59 = vld [vmem:[%s2388_s0 + $0x2b0] sm:$0xff] }
  0x4e   :  { %v741_v1 = vmax.f32 %v613_v63, 0.0  ;;  %v742_v13 = vmax.f32 %v614_v0, 0.0  ;;  %v615_v19 = vadd.f32 %v487_v3, %v359_v7  ;;  %v361_v20 = vadd.f32 %v1796_v14, %v226_v9  ;;  %v104_v60 = vld [vmem:[%s2388_s0 + $0x2b8] sm:$0xff]  ;;  %v497_v0 = vld [vmem:[%s2391_s3 + $0x290] sm:$0xff] }
  0x4f   :  { %868 = vst [vmem:[%s2392_s4 + $0x228] sm:$0xff] %v740_v6  ;;  %v362_v21 = vadd.f32 %v1796_v14, %v227_v11  ;;  %v229_v23 = vmul.f32 %v1781_v10, %v94_v5  ;;  %v616_v24 = vadd.f32 %v488_v8, %v360_v15  ;;  %v363_v25 = vadd.f32 %v1796_v14, %v228_v18  ;;  %v498_v3 = vld [vmem:[%s2391_s3 + $0x298] sm:$0xff]  ;;  %v499_v8 = vld [vmem:[%s2391_s3 + $0x2a0] sm:$0xff] }
  0x50   :  { %869 = vst [vmem:[%s2392_s4 + $0x230] sm:$0xff] %v741_v1  ;;  %870 = vst [vmem:[%s2392_s4 + $0x238] sm:$0xff] %v742_v13  ;;  %v230_v27 = vmul.f32 %v1781_v10, %v95_v12  ;;  %v231_v28 = vmul.f32 %v1781_v10, %v96_v2  ;;  %v743_v30 = vmax.f32 %v615_v19, 0.0  ;;  %v617_v31 = vadd.f32 %v489_v16, %v361_v20  ;;  %v500_v2 = vld [vmem:[%s2391_s3 + $0x2a8] sm:$0xff]  ;;  %v105_v15 = vld [vmem:[%s2388_s0 + $0x2c0] sm:$0xff] }
  0x51   :  { %v618_v32 = vadd.f32 %v490_v17, %v362_v21  ;;  %v364_v33 = vadd.f32 %v1796_v14, %v229_v23  ;;  %v744_v37 = vmax.f32 %v616_v24, 0.0  ;;  %v619_v38 = vadd.f32 %v491_v22, %v363_v25  ;;  %v501_v20 = vld [vmem:[%s2391_s3 + $0x2b0] sm:$0xff]  ;;  %v502_v21 = vld [vmem:[%s2391_s3 + $0x2b8] sm:$0xff]  ;;  %v106_v22 = vld [vmem:[%s2388_s0 + $0x2c8] sm:$0xff] }
  0x52   :  { %v365_v39 = vadd.f32 %v1796_v14, %v230_v27  ;;  %v366_v40 = vadd.f32 %v1796_v14, %v231_v28  ;;  %871 = vst [vmem:[%s2392_s4 + $0x240] sm:$0xff] %v743_v30  ;;  %v745_v43 = vmax.f32 %v617_v31, 0.0  ;;  %v232_v46 = vmul.f32 %v1781_v10, %v97_v29  ;;  %v107_v27 = vld [vmem:[%s2388_s0 + $0x2d0] sm:$0xff]  ;;  %v108_v28 = vld [vmem:[%s2388_s0 + $0x2d8] sm:$0xff] }
  0x53   :  { %v746_v44 = vmax.f32 %v618_v32, 0.0  ;;  %v620_v45 = vadd.f32 %v492_v26, %v364_v33  ;;  %872 = vst [vmem:[%s2392_s4 + $0x248] sm:$0xff] %v744_v37  ;;  %v747_v48 = vmax.f32 %v619_v38, 0.0  ;;  %v233_v52 = vmul.f32 %v1781_v10, %v98_v36  ;;  %v109_v33 = vld [vmem:[%s2388_s0 + $0x2e0] sm:$0xff] }
  0x54   :  { %v621_v49 = vadd.f32 %v493_v34, %v365_v39  ;;  %v622_v50 = vadd.f32 %v494_v35, %v366_v40  ;;  %873 = vst [vmem:[%s2392_s4 + $0x250] sm:$0xff] %v745_v43  ;;  %v367_v55 = vadd.f32 %v1796_v14, %v232_v46  ;;  %v234_v57 = vmul.f32 %v1781_v10, %v99_v41  ;;  %v503_v37 = vld [vmem:[%s2391_s3 + $0x2c0] sm:$0xff]  ;;  %v110_v39 = vld [vmem:[%s2388_s0 + $0x2e8] sm:$0xff]  ;;  %v112_v46 = vld [vmem:[%s2388_s0 + $0x2f8] sm:$0xff] }
  0x55   :  { %874 = vst [vmem:[%s2392_s4 + $0x258] sm:$0xff] %v746_v44  ;;  %v748_v54 = vmax.f32 %v620_v45, 0.0  ;;  %v235_v58 = vmul.f32 %v1781_v10, %v100_v42  ;;  %875 = vst [vmem:[%s2392_s4 + $0x260] sm:$0xff] %v747_v48  ;;  %v368_v63 = vadd.f32 %v1796_v14, %v233_v52  ;;  %v236_v4 = vmul.f32 %v1781_v10, %v101_v47  ;;  %v504_v42 = vld [vmem:[%s2391_s3 + $0x2c8] sm:$0xff]  ;;  %v111_v45 = vld [vmem:[%s2388_s0 + $0x2f0] sm:$0xff] }
  0x56   :  { %v749_v61 = vmax.f32 %v621_v49, 0.0  ;;  %v750_v62 = vmax.f32 %v622_v50, 0.0  ;;  %v623_v5 = vadd.f32 %v495_v51, %v367_v55  ;;  %v369_v6 = vadd.f32 %v1796_v14, %v234_v57  ;;  %v505_v50 = vld [vmem:[%s2391_s3 + $0x2d0] sm:$0xff]  ;;  %v506_v51 = vld [vmem:[%s2391_s3 + $0x2d8] sm:$0xff] }
  0x57   :  { %876 = vst [vmem:[%s2392_s4 + $0x268] sm:$0xff] %v748_v54  ;;  %v370_v7 = vadd.f32 %v1796_v14, %v235_v58  ;;  %v237_v9 = vmul.f32 %v1781_v10, %v102_v53  ;;  %v624_v11 = vadd.f32 %v496_v56, %v368_v63  ;;  %v371_v12 = vadd.f32 %v1796_v14, %v236_v4  ;;  %v507_v56 = vld [vmem:[%s2391_s3 + $0x2e0] sm:$0xff] }
  0x58   :  { %877 = vst [vmem:[%s2392_s4 + $0x270] sm:$0xff] %v749_v61  ;;  %878 = vst [vmem:[%s2392_s4 + $0x278] sm:$0xff] %v750_v62  ;;  %v238_v1 = vmul.f32 %v1781_v10, %v103_v59  ;;  %v239_v13 = vmul.f32 %v1781_v10, %v104_v60  ;;  %v751_v16 = vmax.f32 %v623_v5, 0.0  ;;  %v625_v17 = vadd.f32 %v497_v0, %v369_v6  ;;  %v508_v60 = vld [vmem:[%s2391_s3 + $0x2e8] sm:$0xff]  ;;  %v113_v63 = vld [vmem:[%s2388_s0 + $0x300] sm:$0xff] }
  0x59   :  { %v626_v18 = vadd.f32 %v498_v3, %v370_v7  ;;  %v372_v19 = vadd.f32 %v1796_v14, %v237_v9  ;;  %v752_v23 = vmax.f32 %v624_v11, 0.0  ;;  %v627_v24 = vadd.f32 %v499_v8, %v371_v12  ;;  %v509_v6 = vld [vmem:[%s2391_s3 + $0x2f0] sm:$0xff]  ;;  %v510_v7 = vld [vmem:[%s2391_s3 + $0x2f8] sm:$0xff]  ;;  %v114_v8 = vld [vmem:[%s2388_s0 + $0x308] sm:$0xff] }
  0x5a   :  { %v373_v25 = vadd.f32 %v1796_v14, %v238_v1  ;;  %v374_v26 = vadd.f32 %v1796_v14, %v239_v13  ;;  %879 = vst [vmem:[%s2392_s4 + $0x280] sm:$0xff] %v751_v16  ;;  %v753_v29 = vmax.f32 %v625_v17, 0.0  ;;  %v240_v32 = vmul.f32 %v1781_v10, %v105_v15  ;;  %v115_v1 = vld [vmem:[%s2388_s0 + $0x310] sm:$0xff]  ;;  %v116_v13 = vld [vmem:[%s2388_s0 + $0x318] sm:$0xff] }
  0x5b   :  { %v754_v30 = vmax.f32 %v626_v18, 0.0  ;;  %v628_v31 = vadd.f32 %v500_v2, %v372_v19  ;;  %880 = vst [vmem:[%s2392_s4 + $0x288] sm:$0xff] %v752_v23  ;;  %v755_v34 = vmax.f32 %v627_v24, 0.0  ;;  %v241_v38 = vmul.f32 %v1781_v10, %v106_v22  ;;  %v117_v19 = vld [vmem:[%s2388_s0 + $0x320] sm:$0xff] }
  0x5c   :  { %v629_v35 = vadd.f32 %v501_v20, %v373_v25  ;;  %v630_v36 = vadd.f32 %v502_v21, %v374_v26  ;;  %881 = vst [vmem:[%s2392_s4 + $0x290] sm:$0xff] %v753_v29  ;;  %v375_v41 = vadd.f32 %v1796_v14, %v240_v32  ;;  %v242_v43 = vmul.f32 %v1781_v10, %v107_v27  ;;  %v511_v23 = vld [vmem:[%s2391_s3 + $0x300] sm:$0xff]  ;;  %v118_v25 = vld [vmem:[%s2388_s0 + $0x328] sm:$0xff]  ;;  %v120_v32 = vld [vmem:[%s2388_s0 + $0x338] sm:$0xff] }
  0x5d   :  { %882 = vst [vmem:[%s2392_s4 + $0x298] sm:$0xff] %v754_v30  ;;  %v756_v40 = vmax.f32 %v628_v31, 0.0  ;;  %v243_v44 = vmul.f32 %v1781_v10, %v108_v28  ;;  %883 = vst [vmem:[%s2392_s4 + $0x2a0] sm:$0xff] %v755_v34  ;;  %v376_v49 = vadd.f32 %v1796_v14, %v241_v38  ;;  %v244_v52 = vmul.f32 %v1781_v10, %v109_v33  ;;  %v512_v28 = vld [vmem:[%s2391_s3 + $0x308] sm:$0xff]  ;;  %v119_v31 = vld [vmem:[%s2388_s0 + $0x330] sm:$0xff] }
  0x5e   :  { %v757_v47 = vmax.f32 %v629_v35, 0.0  ;;  %v758_v48 = vmax.f32 %v630_v36, 0.0  ;;  %v631_v53 = vadd.f32 %v503_v37, %v375_v41  ;;  %v377_v54 = vadd.f32 %v1796_v14, %v242_v43  ;;  %v513_v36 = vld [vmem:[%s2391_s3 + $0x310] sm:$0xff]  ;;  %v514_v37 = vld [vmem:[%s2391_s3 + $0x318] sm:$0xff] }
  0x5f   :  { %884 = vst [vmem:[%s2392_s4 + $0x2a8] sm:$0xff] %v756_v40  ;;  %v378_v55 = vadd.f32 %v1796_v14, %v243_v44  ;;  %v245_v57 = vmul.f32 %v1781_v10, %v110_v39  ;;  %v632_v58 = vadd.f32 %v504_v42, %v376_v49  ;;  %v379_v59 = vadd.f32 %v1796_v14, %v244_v52  ;;  %v515_v42 = vld [vmem:[%s2391_s3 + $0x320] sm:$0xff] }
  0x60   :  { %885 = vst [vmem:[%s2392_s4 + $0x2b0] sm:$0xff] %v757_v47  ;;  %886 = vst [vmem:[%s2392_s4 + $0x2b8] sm:$0xff] %v758_v48  ;;  %v246_v61 = vmul.f32 %v1781_v10, %v111_v45  ;;  %v247_v62 = vmul.f32 %v1781_v10, %v112_v46  ;;  %v759_v0 = vmax.f32 %v631_v53, 0.0  ;;  %v633_v3 = vadd.f32 %v505_v50, %v377_v54  ;;  %v516_v46 = vld [vmem:[%s2391_s3 + $0x328] sm:$0xff]  ;;  %v121_v49 = vld [vmem:[%s2388_s0 + $0x340] sm:$0xff] }
  0x61   :  { %v634_v4 = vadd.f32 %v506_v51, %v378_v55  ;;  %v380_v5 = vadd.f32 %v1796_v14, %v245_v57  ;;  %v760_v9 = vmax.f32 %v632_v58, 0.0  ;;  %v635_v11 = vadd.f32 %v507_v56, %v379_v59  ;;  %v517_v54 = vld [vmem:[%s2391_s3 + $0x330] sm:$0xff]  ;;  %v518_v55 = vld [vmem:[%s2391_s3 + $0x338] sm:$0xff]  ;;  %v122_v56 = vld [vmem:[%s2388_s0 + $0x348] sm:$0xff] }
  0x62   :  { %v381_v12 = vadd.f32 %v1796_v14, %v246_v61  ;;  %v382_v2 = vadd.f32 %v1796_v14, %v247_v62  ;;  %887 = vst [vmem:[%s2392_s4 + $0x2c0] sm:$0xff] %v759_v0  ;;  %v761_v15 = vmax.f32 %v633_v3, 0.0  ;;  %v248_v18 = vmul.f32 %v1781_v10, %v113_v63  ;;  %v123_v61 = vld [vmem:[%s2388_s0 + $0x350] sm:$0xff]  ;;  %v124_v62 = vld [vmem:[%s2388_s0 + $0x358] sm:$0xff] }
  0x63   :  { %v762_v16 = vmax.f32 %v634_v4, 0.0  ;;  %v636_v17 = vadd.f32 %v508_v60, %v380_v5  ;;  %888 = vst [vmem:[%s2392_s4 + $0x2c8] sm:$0xff] %v760_v9  ;;  %v763_v20 = vmax.f32 %v635_v11, 0.0  ;;  %v249_v24 = vmul.f32 %v1781_v10, %v114_v8  ;;  %v125_v5 = vld [vmem:[%s2388_s0 + $0x360] sm:$0xff] }
  0x64   :  { %v637_v21 = vadd.f32 %v509_v6, %v381_v12  ;;  %v638_v22 = vadd.f32 %v510_v7, %v382_v2  ;;  %889 = vst [vmem:[%s2392_s4 + $0x2d0] sm:$0xff] %v761_v15  ;;  %v383_v27 = vadd.f32 %v1796_v14, %v248_v18  ;;  %v250_v29 = vmul.f32 %v1781_v10, %v115_v1  ;;  %v519_v9 = vld [vmem:[%s2391_s3 + $0x340] sm:$0xff]  ;;  %v126_v12 = vld [vmem:[%s2388_s0 + $0x368] sm:$0xff]  ;;  %v128_v18 = vld [vmem:[%s2388_s0 + $0x378] sm:$0xff] }
  0x65   :  { %890 = vst [vmem:[%s2392_s4 + $0x2d8] sm:$0xff] %v762_v16  ;;  %v764_v26 = vmax.f32 %v636_v17, 0.0  ;;  %v251_v30 = vmul.f32 %v1781_v10, %v116_v13  ;;  %891 = vst [vmem:[%s2392_s4 + $0x2e0] sm:$0xff] %v763_v20  ;;  %v384_v35 = vadd.f32 %v1796_v14, %v249_v24  ;;  %v252_v38 = vmul.f32 %v1781_v10, %v117_v19  ;;  %v520_v13 = vld [vmem:[%s2391_s3 + $0x348] sm:$0xff]  ;;  %v127_v17 = vld [vmem:[%s2388_s0 + $0x370] sm:$0xff] }
  0x66   :  { %v765_v33 = vmax.f32 %v637_v21, 0.0  ;;  %v766_v34 = vmax.f32 %v638_v22, 0.0  ;;  %v639_v39 = vadd.f32 %v511_v23, %v383_v27  ;;  %v385_v40 = vadd.f32 %v1796_v14, %v250_v29  ;;  %v521_v22 = vld [vmem:[%s2391_s3 + $0x350] sm:$0xff]  ;;  %v522_v23 = vld [vmem:[%s2391_s3 + $0x358] sm:$0xff] }
  0x67   :  { %892 = vst [vmem:[%s2392_s4 + $0x2e8] sm:$0xff] %v764_v26  ;;  %v386_v41 = vadd.f32 %v1796_v14, %v251_v30  ;;  %v253_v43 = vmul.f32 %v1781_v10, %v118_v25  ;;  %v640_v44 = vadd.f32 %v512_v28, %v384_v35  ;;  %v387_v45 = vadd.f32 %v1796_v14, %v252_v38  ;;  %v523_v28 = vld [vmem:[%s2391_s3 + $0x360] sm:$0xff] }
  0x68   :  { %893 = vst [vmem:[%s2392_s4 + $0x2f0] sm:$0xff] %v765_v33  ;;  %894 = vst [vmem:[%s2392_s4 + $0x2f8] sm:$0xff] %v766_v34  ;;  %v254_v47 = vmul.f32 %v1781_v10, %v119_v31  ;;  %v255_v48 = vmul.f32 %v1781_v10, %v120_v32  ;;  %v767_v50 = vmax.f32 %v639_v39, 0.0  ;;  %v641_v51 = vadd.f32 %v513_v36, %v385_v40  ;;  %v524_v32 = vld [vmem:[%s2391_s3 + $0x368] sm:$0xff]  ;;  %v129_v35 = vld [vmem:[%s2388_s0 + $0x380] sm:$0xff] }
  0x69   :  { %v642_v52 = vadd.f32 %v514_v37, %v386_v41  ;;  %v388_v53 = vadd.f32 %v1796_v14, %v253_v43  ;;  %v768_v57 = vmax.f32 %v640_v44, 0.0  ;;  %v643_v58 = vadd.f32 %v515_v42, %v387_v45  ;;  %v525_v40 = vld [vmem:[%s2391_s3 + $0x370] sm:$0xff]  ;;  %v526_v41 = vld [vmem:[%s2391_s3 + $0x378] sm:$0xff]  ;;  %v130_v42 = vld [vmem:[%s2388_s0 + $0x388] sm:$0xff] }
  0x6a   :  { %v389_v59 = vadd.f32 %v1796_v14, %v254_v47  ;;  %v390_v60 = vadd.f32 %v1796_v14, %v255_v48  ;;  %895 = vst [vmem:[%s2392_s4 + $0x300] sm:$0xff] %v767_v50  ;;  %v769_v63 = vmax.f32 %v641_v51, 0.0  ;;  %v256_v4 = vmul.f32 %v1781_v10, %v121_v49  ;;  %v131_v47 = vld [vmem:[%s2388_s0 + $0x390] sm:$0xff]  ;;  %v132_v48 = vld [vmem:[%s2388_s0 + $0x398] sm:$0xff] }
  0x6b   :  { %v770_v0 = vmax.f32 %v642_v52, 0.0  ;;  %v644_v3 = vadd.f32 %v516_v46, %v388_v53  ;;  %896 = vst [vmem:[%s2392_s4 + $0x308] sm:$0xff] %v768_v57  ;;  %v771_v6 = vmax.f32 %v643_v58, 0.0  ;;  %v257_v11 = vmul.f32 %v1781_v10, %v122_v56  ;;  %v133_v53 = vld [vmem:[%s2388_s0 + $0x3a0] sm:$0xff] }
  0x6c   :  { %v645_v7 = vadd.f32 %v517_v54, %v389_v59  ;;  %v646_v8 = vadd.f32 %v518_v55, %v390_v60  ;;  %897 = vst [vmem:[%s2392_s4 + $0x310] sm:$0xff] %v769_v63  ;;  %v391_v1 = vadd.f32 %v1796_v14, %v256_v4  ;;  %v258_v15 = vmul.f32 %v1781_v10, %v123_v61  ;;  %v527_v57 = vld [vmem:[%s2391_s3 + $0x380] sm:$0xff]  ;;  %v134_v59 = vld [vmem:[%s2388_s0 + $0x3a8] sm:$0xff]  ;;  %v136_v4 = vld [vmem:[%s2388_s0 + $0x3b8] sm:$0xff] }
  0x6d   :  { %898 = vst [vmem:[%s2392_s4 + $0x318] sm:$0xff] %v770_v0  ;;  %v772_v2 = vmax.f32 %v644_v3, 0.0  ;;  %v259_v16 = vmul.f32 %v1781_v10, %v124_v62  ;;  %899 = vst [vmem:[%s2392_s4 + $0x320] sm:$0xff] %v771_v6  ;;  %v392_v21 = vadd.f32 %v1796_v14, %v257_v11  ;;  %v260_v24 = vmul.f32 %v1781_v10, %v125_v5  ;;  %v528_v62 = vld [vmem:[%s2391_s3 + $0x388] sm:$0xff]  ;;  %v135_v3 = vld [vmem:[%s2388_s0 + $0x3b0] sm:$0xff] }
  0x6e   :  { %v773_v19 = vmax.f32 %v645_v7, 0.0  ;;  %v774_v20 = vmax.f32 %v646_v8, 0.0  ;;  %v647_v25 = vadd.f32 %v519_v9, %v391_v1  ;;  %v393_v26 = vadd.f32 %v1796_v14, %v258_v15  ;;  %v529_v8 = vld [vmem:[%s2391_s3 + $0x390] sm:$0xff]  ;;  %v530_v9 = vld [vmem:[%s2391_s3 + $0x398] sm:$0xff] }
  0x6f   :  { %900 = vst [vmem:[%s2392_s4 + $0x328] sm:$0xff] %v772_v2  ;;  %v394_v27 = vadd.f32 %v1796_v14, %v259_v16  ;;  %v261_v29 = vmul.f32 %v1781_v10, %v126_v12  ;;  %v648_v30 = vadd.f32 %v520_v13, %v392_v21  ;;  %v395_v31 = vadd.f32 %v1796_v14, %v260_v24  ;;  %v531_v13 = vld [vmem:[%s2391_s3 + $0x3a0] sm:$0xff] }
  0x70   :  { %901 = vst [vmem:[%s2392_s4 + $0x330] sm:$0xff] %v773_v19  ;;  %902 = vst [vmem:[%s2392_s4 + $0x338] sm:$0xff] %v774_v20  ;;  %v262_v33 = vmul.f32 %v1781_v10, %v127_v17  ;;  %v263_v34 = vmul.f32 %v1781_v10, %v128_v18  ;;  %v775_v36 = vmax.f32 %v647_v25, 0.0  ;;  %v649_v37 = vadd.f32 %v521_v22, %v393_v26  ;;  %v532_v18 = vld [vmem:[%s2391_s3 + $0x3a8] sm:$0xff]  ;;  %v137_v21 = vld [vmem:[%s2388_s0 + $0x3c0] sm:$0xff] }
  0x71   :  { %v650_v38 = vadd.f32 %v522_v23, %v394_v27  ;;  %v396_v39 = vadd.f32 %v1796_v14, %v261_v29  ;;  %v776_v43 = vmax.f32 %v648_v30, 0.0  ;;  %v651_v44 = vadd.f32 %v523_v28, %v395_v31  ;;  %v533_v26 = vld [vmem:[%s2391_s3 + $0x3b0] sm:$0xff]  ;;  %v534_v27 = vld [vmem:[%s2391_s3 + $0x3b8] sm:$0xff]  ;;  %v138_v28 = vld [vmem:[%s2388_s0 + $0x3c8] sm:$0xff] }
  0x72   :  { %v397_v45 = vadd.f32 %v1796_v14, %v262_v33  ;;  %v398_v46 = vadd.f32 %v1796_v14, %v263_v34  ;;  %903 = vst [vmem:[%s2392_s4 + $0x340] sm:$0xff] %v775_v36  ;;  %v777_v49 = vmax.f32 %v649_v37, 0.0  ;;  %v264_v52 = vmul.f32 %v1781_v10, %v129_v35  ;;  %v139_v33 = vld [vmem:[%s2388_s0 + $0x3d0] sm:$0xff]  ;;  %v140_v34 = vld [vmem:[%s2388_s0 + $0x3d8] sm:$0xff] }
  0x73   :  { %v778_v50 = vmax.f32 %v650_v38, 0.0  ;;  %v652_v51 = vadd.f32 %v524_v32, %v396_v39  ;;  %904 = vst [vmem:[%s2392_s4 + $0x348] sm:$0xff] %v776_v43  ;;  %v779_v54 = vmax.f32 %v651_v44, 0.0  ;;  %v265_v58 = vmul.f32 %v1781_v10, %v130_v42  ;;  %v141_v39 = vld [vmem:[%s2388_s0 + $0x3e0] sm:$0xff] }
  0x74   :  { %v653_v55 = vadd.f32 %v525_v40, %v397_v45  ;;  %v654_v56 = vadd.f32 %v526_v41, %v398_v46  ;;  %905 = vst [vmem:[%s2392_s4 + $0x350] sm:$0xff] %v777_v49  ;;  %v399_v61 = vadd.f32 %v1796_v14, %v264_v52  ;;  %v266_v63 = vmul.f32 %v1781_v10, %v131_v47  ;;  %v535_v43 = vld [vmem:[%s2391_s3 + $0x3c0] sm:$0xff]  ;;  %v142_v45 = vld [vmem:[%s2388_s0 + $0x3e8] sm:$0xff]  ;;  %v144_v52 = vld [vmem:[%s2388_s0 + $0x3f8] sm:$0xff] }
  0x75   :  { %906 = vst [vmem:[%s2392_s4 + $0x358] sm:$0xff] %v778_v50  ;;  %v780_v60 = vmax.f32 %v652_v51, 0.0  ;;  %v267_v0 = vmul.f32 %v1781_v10, %v132_v48  ;;  %907 = vst [vmem:[%s2392_s4 + $0x360] sm:$0xff] %v779_v54  ;;  %v400_v7 = vadd.f32 %v1796_v14, %v265_v58  ;;  %v268_v11 = vmul.f32 %v1781_v10, %v133_v53  ;;  %v536_v48 = vld [vmem:[%s2391_s3 + $0x3c8] sm:$0xff]  ;;  %v143_v51 = vld [vmem:[%s2388_s0 + $0x3f0] sm:$0xff] }
  0x76   :  { %v781_v5 = vmax.f32 %v653_v55, 0.0  ;;  %v782_v6 = vmax.f32 %v654_v56, 0.0  ;;  %v655_v12 = vadd.f32 %v527_v57, %v399_v61  ;;  %v401_v2 = vadd.f32 %v1796_v14, %v266_v63  ;;  %v537_v56 = vld [vmem:[%s2391_s3 + $0x3d0] sm:$0xff]  ;;  %v538_v57 = vld [vmem:[%s2391_s3 + $0x3d8] sm:$0xff] }
  0x77   :  { %908 = vst [vmem:[%s2392_s4 + $0x368] sm:$0xff] %v780_v60  ;;  %v402_v1 = vadd.f32 %v1796_v14, %v267_v0  ;;  %v269_v15 = vmul.f32 %v1781_v10, %v134_v59  ;;  %v656_v16 = vadd.f32 %v528_v62, %v400_v7  ;;  %v403_v17 = vadd.f32 %v1796_v14, %v268_v11  ;;  %v539_v62 = vld [vmem:[%s2391_s3 + $0x3e0] sm:$0xff] }
  0x78   :  { %909 = vst [vmem:[%s2392_s4 + $0x370] sm:$0xff] %v781_v5  ;;  %910 = vst [vmem:[%s2392_s4 + $0x378] sm:$0xff] %v782_v6  ;;  %v270_v19 = vmul.f32 %v1781_v10, %v135_v3  ;;  %v271_v20 = vmul.f32 %v1781_v10, %v136_v4  ;;  %v783_v22 = vmax.f32 %v655_v12, 0.0  ;;  %v657_v23 = vadd.f32 %v529_v8, %v401_v2  ;;  %v540_v4 = vld [vmem:[%s2391_s3 + $0x3e8] sm:$0xff]  ;;  %v541_v12 = vld [vmem:[%s2391_s3 + $0x3f0] sm:$0xff] }
  0x79   :  { %v658_v24 = vadd.f32 %v530_v9, %v402_v1  ;;  %v404_v25 = vadd.f32 %v1796_v14, %v269_v15  ;;  %v784_v29 = vmax.f32 %v656_v16, 0.0  ;;  %v659_v30 = vadd.f32 %v531_v13, %v403_v17  ;;  %v542_v2 = vld [vmem:[%s2391_s3 + $0x3f8] sm:$0xff] }
  0x7a   :  { %v405_v31 = vadd.f32 %v1796_v14, %v270_v19  ;;  %v406_v32 = vadd.f32 %v1796_v14, %v271_v20  ;;  %911 = vst [vmem:[%s2392_s4 + $0x380] sm:$0xff] %v783_v22  ;;  %v785_v35 = vmax.f32 %v657_v23, 0.0  ;;  %v272_v38 = vmul.f32 %v1781_v10, %v137_v21 }
  0x7b   :  { %v786_v36 = vmax.f32 %v658_v24, 0.0  ;;  %v660_v37 = vadd.f32 %v532_v18, %v404_v25  ;;  %912 = vst [vmem:[%s2392_s4 + $0x388] sm:$0xff] %v784_v29  ;;  %v787_v40 = vmax.f32 %v659_v30, 0.0  ;;  %v273_v44 = vmul.f32 %v1781_v10, %v138_v28 }
  0x7c   :  { %v661_v41 = vadd.f32 %v533_v26, %v405_v31  ;;  %v662_v42 = vadd.f32 %v534_v27, %v406_v32  ;;  %913 = vst [vmem:[%s2392_s4 + $0x390] sm:$0xff] %v785_v35  ;;  %v407_v47 = vadd.f32 %v1796_v14, %v272_v38  ;;  %v274_v49 = vmul.f32 %v1781_v10, %v139_v33 }
  0x7d   :  { %914 = vst [vmem:[%s2392_s4 + $0x398] sm:$0xff] %v786_v36  ;;  %v788_v46 = vmax.f32 %v660_v37, 0.0  ;;  %v275_v50 = vmul.f32 %v1781_v10, %v140_v34  ;;  %915 = vst [vmem:[%s2392_s4 + $0x3a0] sm:$0xff] %v787_v40  ;;  %v408_v55 = vadd.f32 %v1796_v14, %v273_v44  ;;  %v276_v58 = vmul.f32 %v1781_v10, %v141_v39 }
  0x7e   :  { %v789_v53 = vmax.f32 %v661_v41, 0.0  ;;  %v790_v54 = vmax.f32 %v662_v42, 0.0  ;;  %v663_v59 = vadd.f32 %v535_v43, %v407_v47  ;;  %v409_v60 = vadd.f32 %v1796_v14, %v274_v49 }
  0x7f   :  { %916 = vst [vmem:[%s2392_s4 + $0x3a8] sm:$0xff] %v788_v46  ;;  %v410_v61 = vadd.f32 %v1796_v14, %v275_v50  ;;  %v277_v63 = vmul.f32 %v1781_v10, %v142_v45  ;;  %v664_v0 = vadd.f32 %v536_v48, %v408_v55  ;;  %v411_v3 = vadd.f32 %v1796_v14, %v276_v58 }
  0x80   :  { %917 = vst [vmem:[%s2392_s4 + $0x3b0] sm:$0xff] %v789_v53  ;;  %918 = vst [vmem:[%s2392_s4 + $0x3b8] sm:$0xff] %v790_v54  ;;  %v278_v5 = vmul.f32 %v1781_v10, %v143_v51  ;;  %v279_v6 = vmul.f32 %v1781_v10, %v144_v52  ;;  %v791_v7 = vmax.f32 %v663_v59, 0.0  ;;  %v665_v8 = vadd.f32 %v537_v56, %v409_v60 }
  0x81   :  { %v666_v9 = vadd.f32 %v538_v57, %v410_v61  ;;  %v412_v11 = vadd.f32 %v1796_v14, %v277_v63  ;;  %v792_v1 = vmax.f32 %v664_v0, 0.0  ;;  %v667_v13 = vadd.f32 %v539_v62, %v411_v3 }
  0x82   :  { %v413_v15 = vadd.f32 %v1796_v14, %v278_v5  ;;  %v414_v16 = vadd.f32 %v1796_v14, %v279_v6  ;;  %919 = vst [vmem:[%s2392_s4 + $0x3c0] sm:$0xff] %v791_v7  ;;  %v793_v10 = vmax.f32 %v665_v8, 0.0 }
  0x83   :  { %v794_v17 = vmax.f32 %v666_v9, 0.0  ;;  %v668_v18 = vadd.f32 %v540_v4, %v412_v11  ;;  %920 = vst [vmem:[%s2392_s4 + $0x3c8] sm:$0xff] %v792_v1  ;;  %v795_v19 = vmax.f32 %v667_v13, 0.0 }
  0x84   :  { %v669_v20 = vadd.f32 %v541_v12, %v413_v15  ;;  %v670_v21 = vadd.f32 %v542_v2, %v414_v16  ;;  %921 = vst [vmem:[%s2392_s4 + $0x3d0] sm:$0xff] %v793_v10 }
  0x85   :  { %922 = vst [vmem:[%s2392_s4 + $0x3d8] sm:$0xff] %v794_v17  ;;  %v796_v14 = vmax.f32 %v668_v18, 0.0  ;;  %923 = vst [vmem:[%s2392_s4 + $0x3e0] sm:$0xff] %v795_v19 }
  0x86   :  { %v797_v22 = vmax.f32 %v669_v20, 0.0  ;;  %v798_v23 = vmax.f32 %v670_v21, 0.0 }
  0x87   :  { %924 = vst [vmem:[%s2392_s4 + $0x3e8] sm:$0xff] %v796_v14 }
  0x88   :  { %925 = vst [vmem:[%s2392_s4 + $0x3f0] sm:$0xff] %v797_v22  ;;  %926 = vst [vmem:[%s2392_s4 + $0x3f8] sm:$0xff] %v798_v23 }

</bundles_post_ra>
